<compile_context>
chip_gen: v6e
topology: v6e:2x2x1
jax: 0.10.0
libtpu: 0.0.40
codegen_flags: <defaults>
</compile_context>

<pallas_src>
import functools
import math

import jax
import jax.numpy as jnp
from jax.experimental import pallas as pl
from jax.experimental.pallas import tpu as pltpu

# --- constants from src/linear_mp.py ---
K = 5
HIDDEN_DIMS = [1024, 512, 256, 128]
IMG_SIZE = 28
IN_CHANNELS = 1
INPUT_DIM = IN_CHANNELS * IMG_SIZE * IMG_SIZE   # 784
OUTPUT_DIM = 10
SCALE = 1.0

LANE = 128
SUBLANE = 8
MAX_TM = 1024          # rows per grid step (upper bound)


def _round_up(v, m):
    return ((v + m - 1) // m) * m


def _cdiv(a, b):
    return -(-a // b)


def _inv_norm(h, k):
    # per-row scalar k / (||h||_2 + 1e-8); divide on the EUP (approx reciprocal)
    nrm = jnp.sqrt(jnp.sum(h * h, axis=1, keepdims=True))
    return k * pl.reciprocal(nrm + 1e-8, approx=True)


def _network_kernel(x_ref, w0_ref, w1_ref, w2_ref, w3_ref, w4_ref, o_ref, *, k, scale):
    # One batch tile per grid step; all five (bf16) weights stay VMEM-resident.
    x = x_ref[...].astype(jnp.float32)                       # (tm, Dp)

    # layer 0: input (896) is narrower than the output (1024), so the normalize
    # scalar is cheapest applied to the matmul *input* here.
    x0 = x * _inv_norm(x, k)
    h = jnp.dot(x0.astype(jnp.bfloat16), w0_ref[...],
                preferred_element_type=jnp.float32)
    if scale != 1.0:
        h = h * scale
    h = jnp.maximum(h, 0.0)                                  # un-normalized ReLU output

    # layers 1..3: ReLU positive-homogeneity -> matmul the un-normalized h and
    # apply s = k/(||h||+eps) to the (narrower) output:  relu(s*(h@W)) == relu((s*h)@W)
    for w_ref in (w1_ref, w2_ref, w3_ref):
        s = _inv_norm(h, k)                                  # (tm, 1)
        m = jnp.dot(h.astype(jnp.bfloat16), w_ref[...],
                    preferred_element_type=jnp.float32)
        if scale != 1.0:
            m = m * scale
        h = jnp.maximum(m * s, 0.0)

    # final layer (output padded to 128 lanes; extra columns are exact zeros)
    s = _inv_norm(h, k)
    out = jnp.dot(h.astype(jnp.bfloat16), w4_ref[...],
                  preferred_element_type=jnp.float32)
    if scale != 1.0:
        out = out * scale
    o_ref[...] = out * s


def network_forward(x_img, weights, *, k=K, scale=SCALE, tm=None):
    """x_img: (B, C, H, W) float32. weights: list of (out_features, in_features) arrays."""
    B = x_img.shape[0]
    x2d = x_img.reshape(B, -1).astype(jnp.float32)           # glue: flatten (x.view)

    # pad features to a lane multiple (784 -> 896); padded columns are exact zeros
    D = x2d.shape[1]
    Dp = _round_up(D, LANE)
    if Dp != D:
        x2d = jnp.pad(x2d, ((0, 0), (0, Dp - D)))
    x2d = x2d.astype(jnp.bfloat16)                           # halve input HBM traffic

    # weights -> (in, out) bf16; first layer's in-dim padded to Dp, last layer's
    # out-dim padded to a full lane tile (10 -> 128) for lane-dense stores.
    wts = []
    n_layers = len(weights)
    for li, w in enumerate(weights):
        wt = w.T.astype(jnp.float32)
        if li == 0 and wt.shape[0] != Dp:
            wt = jnp.pad(wt, ((0, Dp - wt.shape[0]), (0, 0)))
        if li == n_layers - 1 and wt.shape[1] % LANE != 0:
            wt = jnp.pad(wt, ((0, 0), (0, _round_up(wt.shape[1], LANE) - wt.shape[1])))
        wts.append(wt.astype(jnp.bfloat16))
    Np = wts[-1].shape[1]                                    # padded output width (128)

    # batch tiling: tm multiple of 128 and <= 1024 rows, with >= 2 grid steps so the
    # "parallel" batch axis shards across both v7x TensorCores. Padded rows are
    # zero end-to-end (zero * approx-recip stays exactly zero) and sliced off.
    if tm is None:
        Bg = _round_up(max(B, 1), LANE)
        n_steps = max(2, _cdiv(Bg, MAX_TM))
        tm = _round_up(_cdiv(Bg, n_steps), LANE)
        Bp = n_steps * tm
    else:
        Bp = _round_up(B, tm)
    if Bp != B:
        x2d = jnp.pad(x2d, ((0, Bp - B), (0, 0)))
    grid = (Bp // tm,)

    x_spec = pl.BlockSpec((tm, Dp), lambda i: (i, 0))
    w_specs = [pl.BlockSpec(tuple(w.shape), lambda i: (0, 0)) for w in wts]  # VMEM-resident
    out_spec = pl.BlockSpec((tm, Np), lambda i: (i, 0))

    dims = [Dp] + HIDDEN_DIMS + [Np]
    flops = 2 * Bp * sum(dims[i] * dims[i + 1] for i in range(len(dims) - 1))
    weight_bytes = sum(int(w.size) * 2 for w in wts)
    bytes_accessed = weight_bytes + Bp * Dp * 2 + Bp * Np * 4
    cost = pl.CostEstimate(flops=flops,
                           transcendentals=2 * 5 * Bp,       # sqrt + recip per normalize
                           bytes_accessed=bytes_accessed)

    kernel = functools.partial(_network_kernel, k=float(k), scale=float(scale))
    out = pl.pallas_call(
        kernel,
        out_shape=jax.ShapeDtypeStruct((Bp, Np), jnp.float32),
        grid=grid,
        in_specs=[x_spec] + w_specs,
        out_specs=out_spec,
        compiler_params=pltpu.CompilerParams(
            dimension_semantics=("parallel",),
            vmem_limit_bytes=48 << 20,
        ),
        cost_estimate=cost,
    )(x2d, *wts)
    return out[:B, :OUTPUT_DIM]


def init_weights(key):
    """Deterministic init matching nn.Linear's default U(-1/sqrt(fan_in), 1/sqrt(fan_in))."""
    dims = [INPUT_DIM] + HIDDEN_DIMS + [OUTPUT_DIM]
    weights = []
    for i in range(len(dims) - 1):
        key, sub = jax.random.split(key)
        bound = 1.0 / math.sqrt(dims[i])
        w = jax.random.uniform(sub, (dims[i + 1], dims[i]),
                               minval=-bound, maxval=bound, dtype=jnp.float32)
        weights.append(w)
    return weights


def reference_forward(x_img, weights, *, k=K, scale=SCALE):
    # exact f32 semantics of the PyTorch module
    def norm(x):
        return k * x / (jnp.sqrt(jnp.sum(x * x, axis=1, keepdims=True)) + 1e-8)
    x = x_img.reshape(x_img.shape[0], -1).astype(jnp.float32)
    x = norm(x)
    for w in weights[:-1]:
        x = scale * (x @ w.T)
        x = jnp.maximum(x, 0.0)
        x = norm(x)
    return scale * (x @ weights[-1].T)


if __name__ == "__main__":
    key = jax.random.PRNGKey(0)
    kx, kw = jax.random.split(key)
    B = 8
    x = jax.random.normal(kx, (B, IN_CHANNELS, IMG_SIZE, IMG_SIZE), dtype=jnp.float32)
    weights = init_weights(kw)

    out = jax.block_until_ready(network_forward(x, weights))

    ref = reference_forward(x, weights)
    assert out.shape == (B, OUTPUT_DIM), out.shape
    # bf16 inputs/weights + approx EUP reciprocal -> relaxed tolerance vs exact-f32 reference
    assert jnp.allclose(out, ref, atol=5e-2, rtol=5e-2), "Pallas output mismatch vs JAX reference"
    print("KERNEL_OK")
</pallas_src>

<mosaic_0001>
module attributes {stable_mosaic.version = 11 : i64} {
  func.func @_network_kernel(%arg0: i32, %arg1: memref<128x896xbf16, #tpu.memory_space<vmem>>, %arg2: memref<896x1024xbf16, #tpu.memory_space<vmem>>, %arg3: memref<1024x512xbf16, #tpu.memory_space<vmem>>, %arg4: memref<512x256xbf16, #tpu.memory_space<vmem>>, %arg5: memref<256x128xbf16, #tpu.memory_space<vmem>>, %arg6: memref<128x128xbf16, #tpu.memory_space<vmem>>, %arg7: memref<128x128xf32, #tpu.memory_space<vmem>>) attributes {dimension_semantics = [#tpu.dimension_semantics<parallel>], iteration_bounds = array<i64: 2>, scalar_prefetch = 0 : i64, scratch_operands = 0 : i64, tpu.core_type = #tpu.core_type<tc>, window_params = [{transform_indices = @transform_0, window_bounds = array<i64: 128, 896>}, {pipeline_mode = #tpu.pipeline_mode<synchronous>, transform_indices = @transform_1, window_bounds = array<i64: 896, 1024>}, {pipeline_mode = #tpu.pipeline_mode<synchronous>, transform_indices = @transform_2, window_bounds = array<i64: 1024, 512>}, {pipeline_mode = #tpu.pipeline_mode<synchronous>, transform_indices = @transform_3, window_bounds = array<i64: 512, 256>}, {pipeline_mode = #tpu.pipeline_mode<synchronous>, transform_indices = @transform_4, window_bounds = array<i64: 256, 128>}, {pipeline_mode = #tpu.pipeline_mode<synchronous>, transform_indices = @transform_5, window_bounds = array<i64: 128, 128>}, {transform_indices = @transform_6, window_bounds = array<i64: 128, 128>}]} {
    %c0 = arith.constant 0 : index
    %c0_0 = arith.constant 0 : index
    %0 = vector.load %arg1[%c0, %c0_0] : memref<128x896xbf16, #tpu.memory_space<vmem>>, vector<128x896xbf16>
    %1 = arith.extf %0 : vector<128x896xbf16> to vector<128x896xf32>
    %2 = arith.mulf %1, %1 : vector<128x896xf32>
    %cst = arith.constant dense<0.000000e+00> : vector<128xf32>
    %3 = vector.multi_reduction <add>, %2, %cst [1] : vector<128x896xf32> to vector<128xf32>
    %4 = vector.shape_cast %3 : vector<128xf32> to vector<128x1xf32>
    %5 = math.sqrt %4 : vector<128x1xf32>
    %cst_1 = arith.constant 9.99999993E-9 : f32
    %6 = vector.broadcast %cst_1 : f32 to vector<128x1xf32>
    %7 = arith.addf %5, %6 : vector<128x1xf32>
    %8 = tpu.reciprocal %7 {approx = true} : vector<128x1xf32> -> vector<128x1xf32>
    %cst_2 = arith.constant 5.000000e+00 : f32
    %9 = vector.broadcast %cst_2 : f32 to vector<128x1xf32>
    %10 = arith.mulf %9, %8 : vector<128x1xf32>
    %11 = vector.broadcast %10 : vector<128x1xf32> to vector<128x896xf32>
    %12 = arith.mulf %1, %11 : vector<128x896xf32>
    %13 = arith.truncf %12 : vector<128x896xf32> to vector<128x896xbf16>
    %c0_3 = arith.constant 0 : index
    %c0_4 = arith.constant 0 : index
    %14 = vector.load %arg2[%c0_3, %c0_4] : memref<896x1024xbf16, #tpu.memory_space<vmem>>, vector<896x1024xbf16>
    %cst_5 = arith.constant dense<0.000000e+00> : vector<128x1024xf32>
    %15 = tpu.matmul %13, %14, %cst_5 {dimension_numbers = #tpu.dot_dimension_numbers<[1], [0], [0], [1], [0, 0, 1, 1], [], []>} : vector<128x896xbf16>, vector<896x1024xbf16>, vector<128x1024xf32> -> vector<128x1024xf32>
    %cst_6 = arith.constant 0.000000e+00 : f32
    %16 = vector.broadcast %cst_6 : f32 to vector<128x1024xf32>
    %17 = arith.maximumf %15, %16 : vector<128x1024xf32>
    %18 = arith.mulf %17, %17 : vector<128x1024xf32>
    %cst_7 = arith.constant dense<0.000000e+00> : vector<128xf32>
    %19 = vector.multi_reduction <add>, %18, %cst_7 [1] : vector<128x1024xf32> to vector<128xf32>
    %20 = vector.shape_cast %19 : vector<128xf32> to vector<128x1xf32>
    %21 = math.sqrt %20 : vector<128x1xf32>
    %cst_8 = arith.constant 9.99999993E-9 : f32
    %22 = vector.broadcast %cst_8 : f32 to vector<128x1xf32>
    %23 = arith.addf %21, %22 : vector<128x1xf32>
    %24 = tpu.reciprocal %23 {approx = true} : vector<128x1xf32> -> vector<128x1xf32>
    %cst_9 = arith.constant 5.000000e+00 : f32
    %25 = vector.broadcast %cst_9 : f32 to vector<128x1xf32>
    %26 = arith.mulf %25, %24 : vector<128x1xf32>
    %27 = arith.truncf %17 : vector<128x1024xf32> to vector<128x1024xbf16>
    %c0_10 = arith.constant 0 : index
    %c0_11 = arith.constant 0 : index
    %28 = vector.load %arg3[%c0_10, %c0_11] : memref<1024x512xbf16, #tpu.memory_space<vmem>>, vector<1024x512xbf16>
    %cst_12 = arith.constant dense<0.000000e+00> : vector<128x512xf32>
    %29 = tpu.matmul %27, %28, %cst_12 {dimension_numbers = #tpu.dot_dimension_numbers<[1], [0], [0], [1], [0, 0, 1, 1], [], []>} : vector<128x1024xbf16>, vector<1024x512xbf16>, vector<128x512xf32> -> vector<128x512xf32>
    %30 = vector.broadcast %26 : vector<128x1xf32> to vector<128x512xf32>
    %31 = arith.mulf %29, %30 : vector<128x512xf32>
    %cst_13 = arith.constant 0.000000e+00 : f32
    %32 = vector.broadcast %cst_13 : f32 to vector<128x512xf32>
    %33 = arith.maximumf %31, %32 : vector<128x512xf32>
    %34 = arith.mulf %33, %33 : vector<128x512xf32>
    %cst_14 = arith.constant dense<0.000000e+00> : vector<128xf32>
    %35 = vector.multi_reduction <add>, %34, %cst_14 [1] : vector<128x512xf32> to vector<128xf32>
    %36 = vector.shape_cast %35 : vector<128xf32> to vector<128x1xf32>
    %37 = math.sqrt %36 : vector<128x1xf32>
    %cst_15 = arith.constant 9.99999993E-9 : f32
    %38 = vector.broadcast %cst_15 : f32 to vector<128x1xf32>
    %39 = arith.addf %37, %38 : vector<128x1xf32>
    %40 = tpu.reciprocal %39 {approx = true} : vector<128x1xf32> -> vector<128x1xf32>
    %cst_16 = arith.constant 5.000000e+00 : f32
    %41 = vector.broadcast %cst_16 : f32 to vector<128x1xf32>
    %42 = arith.mulf %41, %40 : vector<128x1xf32>
    %43 = arith.truncf %33 : vector<128x512xf32> to vector<128x512xbf16>
    %c0_17 = arith.constant 0 : index
    %c0_18 = arith.constant 0 : index
    %44 = vector.load %arg4[%c0_17, %c0_18] : memref<512x256xbf16, #tpu.memory_space<vmem>>, vector<512x256xbf16>
    %cst_19 = arith.constant dense<0.000000e+00> : vector<128x256xf32>
    %45 = tpu.matmul %43, %44, %cst_19 {dimension_numbers = #tpu.dot_dimension_numbers<[1], [0], [0], [1], [0, 0, 1, 1], [], []>} : vector<128x512xbf16>, vector<512x256xbf16>, vector<128x256xf32> -> vector<128x256xf32>
    %46 = vector.broadcast %42 : vector<128x1xf32> to vector<128x256xf32>
    %47 = arith.mulf %45, %46 : vector<128x256xf32>
    %cst_20 = arith.constant 0.000000e+00 : f32
    %48 = vector.broadcast %cst_20 : f32 to vector<128x256xf32>
    %49 = arith.maximumf %47, %48 : vector<128x256xf32>
    %50 = arith.mulf %49, %49 : vector<128x256xf32>
    %cst_21 = arith.constant dense<0.000000e+00> : vector<128xf32>
    %51 = vector.multi_reduction <add>, %50, %cst_21 [1] : vector<128x256xf32> to vector<128xf32>
    %52 = vector.shape_cast %51 : vector<128xf32> to vector<128x1xf32>
    %53 = math.sqrt %52 : vector<128x1xf32>
    %cst_22 = arith.constant 9.99999993E-9 : f32
    %54 = vector.broadcast %cst_22 : f32 to vector<128x1xf32>
    %55 = arith.addf %53, %54 : vector<128x1xf32>
    %56 = tpu.reciprocal %55 {approx = true} : vector<128x1xf32> -> vector<128x1xf32>
    %cst_23 = arith.constant 5.000000e+00 : f32
    %57 = vector.broadcast %cst_23 : f32 to vector<128x1xf32>
    %58 = arith.mulf %57, %56 : vector<128x1xf32>
    %59 = arith.truncf %49 : vector<128x256xf32> to vector<128x256xbf16>
    %c0_24 = arith.constant 0 : index
    %c0_25 = arith.constant 0 : index
    %60 = vector.load %arg5[%c0_24, %c0_25] : memref<256x128xbf16, #tpu.memory_space<vmem>>, vector<256x128xbf16>
    %cst_26 = arith.constant dense<0.000000e+00> : vector<128x128xf32>
    %61 = tpu.matmul %59, %60, %cst_26 {dimension_numbers = #tpu.dot_dimension_numbers<[1], [0], [0], [1], [0, 0, 1, 1], [], []>} : vector<128x256xbf16>, vector<256x128xbf16>, vector<128x128xf32> -> vector<128x128xf32>
    %62 = vector.broadcast %58 : vector<128x1xf32> to vector<128x128xf32>
    %63 = arith.mulf %61, %62 : vector<128x128xf32>
    %cst_27 = arith.constant 0.000000e+00 : f32
    %64 = vector.broadcast %cst_27 : f32 to vector<128x128xf32>
    %65 = arith.maximumf %63, %64 : vector<128x128xf32>
    %66 = arith.mulf %65, %65 : vector<128x128xf32>
    %cst_28 = arith.constant dense<0.000000e+00> : vector<128xf32>
    %67 = vector.multi_reduction <add>, %66, %cst_28 [1] : vector<128x128xf32> to vector<128xf32>
    %68 = vector.shape_cast %67 : vector<128xf32> to vector<128x1xf32>
    %69 = math.sqrt %68 : vector<128x1xf32>
    %cst_29 = arith.constant 9.99999993E-9 : f32
    %70 = vector.broadcast %cst_29 : f32 to vector<128x1xf32>
    %71 = arith.addf %69, %70 : vector<128x1xf32>
    %72 = tpu.reciprocal %71 {approx = true} : vector<128x1xf32> -> vector<128x1xf32>
    %cst_30 = arith.constant 5.000000e+00 : f32
    %73 = vector.broadcast %cst_30 : f32 to vector<128x1xf32>
    %74 = arith.mulf %73, %72 : vector<128x1xf32>
    %75 = arith.truncf %65 : vector<128x128xf32> to vector<128x128xbf16>
    %c0_31 = arith.constant 0 : index
    %c0_32 = arith.constant 0 : index
    %76 = vector.load %arg6[%c0_31, %c0_32] : memref<128x128xbf16, #tpu.memory_space<vmem>>, vector<128x128xbf16>
    %cst_33 = arith.constant dense<0.000000e+00> : vector<128x128xf32>
    %77 = tpu.matmul %75, %76, %cst_33 {dimension_numbers = #tpu.dot_dimension_numbers<[1], [0], [0], [1], [0, 0, 1, 1], [], []>} : vector<128x128xbf16>, vector<128x128xbf16>, vector<128x128xf32> -> vector<128x128xf32>
    %78 = vector.broadcast %74 : vector<128x1xf32> to vector<128x128xf32>
    %79 = arith.mulf %77, %78 : vector<128x128xf32>
    %c0_34 = arith.constant 0 : index
    %c0_35 = arith.constant 0 : index
    %80 = vector.load %arg7[%c0_34, %c0_35] : memref<128x128xf32, #tpu.memory_space<vmem>>, vector<128x128xf32>
    tpu.vector_store %arg7[%c0_34, %c0_35], %79 {strides = array<i32>} : memref<128x128xf32, #tpu.memory_space<vmem>>, vector<128x128xf32>,
    return
  }
  func.func @transform_0(%arg0: i32) -> (i32, i32) {
    %c0_i32 = arith.constant 0 : i32
    %c0_i32_0 = arith.constant 0 : i32
    return %arg0, %c0_i32 : i32, i32
  }
  func.func @transform_1(%arg0: i32) -> (i32, i32) {
    %c0_i32 = arith.constant 0 : i32
    %c0_i32_0 = arith.constant 0 : i32
    %c0_i32_1 = arith.constant 0 : i32
    return %c0_i32, %c0_i32_0 : i32, i32
  }
  func.func @transform_2(%arg0: i32) -> (i32, i32) {
    %c0_i32 = arith.constant 0 : i32
    %c0_i32_0 = arith.constant 0 : i32
    %c0_i32_1 = arith.constant 0 : i32
    return %c0_i32, %c0_i32_0 : i32, i32
  }
  func.func @transform_3(%arg0: i32) -> (i32, i32) {
    %c0_i32 = arith.constant 0 : i32
    %c0_i32_0 = arith.constant 0 : i32
    %c0_i32_1 = arith.constant 0 : i32
    return %c0_i32, %c0_i32_0 : i32, i32
  }
  func.func @transform_4(%arg0: i32) -> (i32, i32) {
    %c0_i32 = arith.constant 0 : i32
    %c0_i32_0 = arith.constant 0 : i32
    %c0_i32_1 = arith.constant 0 : i32
    return %c0_i32, %c0_i32_0 : i32, i32
  }
  func.func @transform_5(%arg0: i32) -> (i32, i32) {
    %c0_i32 = arith.constant 0 : i32
    %c0_i32_0 = arith.constant 0 : i32
    %c0_i32_1 = arith.constant 0 : i32
    return %c0_i32, %c0_i32_0 : i32, i32
  }
  func.func @transform_6(%arg0: i32) -> (i32, i32) {
    %c0_i32 = arith.constant 0 : i32
    %c0_i32_0 = arith.constant 0 : i32
    return %arg0, %c0_i32 : i32, i32
  }
}

</mosaic_0001>

<bundles_post_ra>
// kernel: tpu_custom_call.1
= control target key start
LH: loop header
LB: loop body
LE: loop exit
PB: predicated region body
PF: predicated region fallthrough
CT: control target
= control target key end

     0   :  { %11 = vsyncpa [#allocation3], 0  ;;  %s17125_s0 = inlined_call_operand.hbm [shape: bf16[256,896], index: 0, kind: input, shape index: {}]   ;;  %s17126_s1 = inlined_call_operand.hbm [shape: bf16[896,1024], index: 1, kind: input, shape index: {}]   ;;  %s17127_s2 = inlined_call_operand.hbm [shape: bf16[1024,512], index: 2, kind: input, shape index: {}]   ;;  %s17128_s3 = inlined_call_operand.hbm [shape: bf16[512,256], index: 3, kind: input, shape index: {}]   ;;  %s17129_s4 = inlined_call_operand.hbm [shape: bf16[256,128], index: 4, kind: input, shape index: {}]   ;;  %s17130_s5 = inlined_call_operand.hbm [shape: bf16[128,128], index: 5, kind: input, shape index: {}]   ;;  %s17131_s6 = inlined_call_operand.hbm [shape: f32[256,128], index: 6, kind: output, shape index: {}]  }
   0x1   :  { %13 = vsyncpa [#allocation3 + $0x1], 0 }
   0x2   :  { %14 = vsyncpa [#allocation6], 0 }
   0x3   :  { %15 = vsyncpa [#allocation9], 0 }
   0x4   :  { %16 = vsyncpa [#allocation12], 0 }
   0x5   :  { %17 = vsyncpa [#allocation4], 0 }
   0x6   :  { %19 = vsyncpa [#allocation4 + $0x1], 0  ;;  %s13002_s21 = smov 0   ;;  %s13004_s22 = smov 0  }
   0x7   :  { %s13006_s23 = smov 0   ;;  %s13008_s24 = smov 0  }
   0x8 LB: > { %s12947_s25 = smov [#allocation5]   ;;  %s13023_s27 = sadd.s32 4294967295, %s12945_s24   ;;  %s12945_s24 = sphi %s13008_s24, %s18324_s24   ;;  %s12941_s23 = sphi %s13006_s23, %s18323_s23   ;;  %s12937_s22 = sphi %s13004_s22, %s18322_s22   ;;  %s12933_s21 = sphi %s13002_s21, %s18321_s21  }
   0x9   : > { %s199_s26 = sshll.u32 %s12947_s25, 4  ;;  %p10847_p0 = scmp.ge.s32.totalorder %s12945_s24, 1  ;;  %s200_s26 = int_to_ptr.vmem [resolvable:$true] %s199_s26 }
   0xa   : > { %p17132_p1 = scmp.eq.s32.totalorder %s13023_s27, 0  ;;  %p187_p2 = scmp.lt.s32.totalorder %s12945_s24, 3 }
   0xb   : > { %s12948_s29 = smov [#allocation8]   ;;  %s12949_s8 = smov [#allocation7]  }
   0xc   : > { %p13028_p3 = pnand %p10847_p0, %p187_p2  ;;  %s225_s30 = sshll.u32 %s12948_s29, 4  ;;  %s13041_s30 = int_to_ptr.vmem [resolvable:$true] %s225_s30 }
   0xd   : > { %s13043_s9 = sshll.u32 %s12949_s8, 4  ;;  %s12722_s11 = scalar_lea.vmem %s200_s26, 57344  ;;  %s213_s9 = int_to_ptr.vmem [resolvable:$true] %s13043_s9 }
   0xe   : > { %s17434_s28 = scalar_select %p13028_p3, 1, 0 }
   0xf   : > { %p11801_p5 = pneg %p13028_p3  ;;  %p12723_p8 = scmp.ne.s32.totalorder %s200_s26, %s12722_s11 }
  0x10   : > { %p12730_p11 = scmp.lt.s32.totalorder %s200_s26, %s200_s26  ;;  %p12731_p12 = scmp.lt.s32.totalorder %s12722_s11, %s12722_s11 }
  0x11   : > { %p13037_p6 = pnand %p11801_p5, %p17132_p1 }
  0x12   : > { %p12732_p13 = por %p12731_p12, %p12730_p11 }
  0x13   : > { %p13047_p7 = pneg %p13037_p6 }
  0x15   : > { %p12725_p9 = pnand %p12723_p8, %p13047_p7 }
  0x17   : > { %p12726_p10 = pneg %p12725_p9 }
  0x19   : > { %p12733_p0 = pnand %p12732_p13, %p12726_p10 }
  0x1b   : > { %12736 = shalt.err (!%p12733_p0)
}
  0x1c   : > { %s12950_s12 = smov 512   ;;  %s12951_s13 = smov 32  }
  0x1d   : > { %11804 = dma.hbm_to_vmem [thread:$0]  (!%p13037_p6), %s17126_s1, 57344, %s200_s26, [#allocation6], %s12950_s12, %s12950_s12, %s12951_s13  }
  0x1e   : > { %s12748_s16 = scalar_lea.vmem %s13041_s30, 8192  ;;  %p12756_p9 = scmp.lt.s32.totalorder %s13041_s30, %s13041_s30 }
  0x1f   : > { %p12749_p2 = scmp.ne.s32.totalorder %s13041_s30, %s12748_s16  ;;  %p12757_p10 = scmp.lt.s32.totalorder %s12748_s16, %s12748_s16 }
  0x21   : > { %p12751_p5 = pnand %p12749_p2, %p13047_p7  ;;  %p12758_p11 = por %p12757_p10, %p12756_p9 }
  0x23   : > { %p12752_p8 = pneg %p12751_p5 }
  0x25   : > { %p12759_p12 = pnand %p12758_p11, %p12752_p8 }
  0x27   : > { %12762 = shalt.err (!%p12759_p12)
}
  0x28   : > { %s12952_s17 = smov 128   ;;  %s12953_s18 = smov 8  }
  0x29   : > { %11810 = dma.hbm_to_vmem [thread:$0]  (!%p13037_p6), %s17128_s3, 8192, %s13041_s30, [#allocation9], %s12952_s17, %s12952_s17, %s12953_s18  }
  0x2a   : > { %s12774_s25 = scalar_lea.vmem %s213_s9, 32768  ;;  %p12782_p5 = scmp.lt.s32.totalorder %s213_s9, %s213_s9 }
  0x2b   : > { %p12775_p13 = scmp.ne.s32.totalorder %s213_s9, %s12774_s25  ;;  %p12783_p8 = scmp.lt.s32.totalorder %s12774_s25, %s12774_s25 }
  0x2d   : > { %p12777_p0 = pnand %p12775_p13, %p13047_p7  ;;  %p12784_p9 = por %p12783_p8, %p12782_p5 }
  0x2f   : > { %p12778_p2 = pneg %p12777_p0 }
  0x31   : > { %p12785_p10 = pnand %p12784_p9, %p12778_p2 }
  0x33   : > { %12788 = shalt.err (!%p12785_p10)
}
  0x34   : > { %s12954_s26 = smov 256   ;;  %s12955_s29 = smov 16  }
  0x35   : > { %11807 = dma.hbm_to_vmem [thread:$0]  (!%p13037_p6), %s17127_s2, 32768, %s213_s9, [#allocation6], %s12954_s26, %s12954_s26, %s12955_s29  }
  0x36   : > { %s12956_s30 = smov [#allocation10]  }
  0x37   : > { %s238_s12 = sshll.u32 %s12956_s30, 4  ;;  %s239_s12 = int_to_ptr.vmem [resolvable:$true] %s238_s12 }
  0x38   : > { %s12800_s13 = scalar_lea.vmem %s239_s12, 2048  ;;  %p12808_p0 = scmp.lt.s32.totalorder %s239_s12, %s239_s12 }
  0x39   : > { %p12801_p11 = scmp.ne.s32.totalorder %s239_s12, %s12800_s13  ;;  %p12809_p2 = scmp.lt.s32.totalorder %s12800_s13, %s12800_s13 }
  0x3b   : > { %p12803_p12 = pnand %p12801_p11, %p13047_p7  ;;  %p12810_p5 = por %p12809_p2, %p12808_p0 }
  0x3d   : > { %p12804_p13 = pneg %p12803_p12 }
  0x3f   : > { %p12811_p8 = pnand %p12810_p5, %p12804_p13 }
  0x41   : > { %12814 = shalt.err (!%p12811_p8)
}
  0x42   : > { %s12957_s14 = smov 64   ;;  %s12958_s15 = smov 4  }
  0x43   : > { %11813 = dma.hbm_to_vmem [thread:$0]  (!%p13037_p6), %s17129_s4, 2048, %s239_s12, [#allocation9], %s12957_s14, %s12957_s14, %s12958_s15  }
  0x44   : > { %s12959_s17 = smov [#allocation11]  }
  0x45   : > { %s251_s18 = sshll.u32 %s12959_s17, 4  ;;  %s252_s18 = int_to_ptr.vmem [resolvable:$true] %s251_s18 }
  0x46   : > { %s12826_s19 = scalar_lea.vmem %s252_s18, 1024  ;;  %p12834_p12 = scmp.lt.s32.totalorder %s252_s18, %s252_s18 }
  0x47   : > { %p12827_p9 = scmp.ne.s32.totalorder %s252_s18, %s12826_s19  ;;  %p12835_p13 = scmp.lt.s32.totalorder %s12826_s19, %s12826_s19 }
  0x49   : > { %p12829_p10 = pnand %p12827_p9, %p13047_p7  ;;  %p12836_p0 = por %p12835_p13, %p12834_p12 }
  0x4b   : > { %p12830_p11 = pneg %p12829_p10 }
  0x4d   : > { %p12837_p2 = pnand %p12836_p0, %p12830_p11 }
  0x4f   : > { %12840 = shalt.err (!%p12837_p2)
}
  0x50   : > { %11816 = dma.hbm_to_vmem [thread:$0]  (!%p13037_p6), %s17130_s5, 1024, %s252_s18, [#allocation12], %s12957_s14, %s12957_s14, %s12958_s15  }
  0x51   : > { %s10846_s10 = sadd.s32 4294967294, %s12945_s24   ;;  %s13094_s7 = sadd.s32 1, %s12945_s24  }
  0x52   : > { %s32_s26 = sadd.s32 1, %s12941_s23  ;;  %s29_s29 = ssub.s32 %s12945_s24, %s13094_s7 }
  0x53   : > { %p39_p7 = scmp.ne.s32.totalorder %s12941_s23, %s12937_s22  ;;  %p30_p5 = scmp.eq.s32.totalorder %s29_s29, 0 }
  0x54   : > { %p40_p8 = scmp.eq.s32.totalorder %s12945_s24, 0  ;;  %p45_p9 = scmp.ne.s32.totalorder %s12937_s22, %s12933_s21 }
  0x55   : > { %p174_p10 = scmp.eq.s32.totalorder %s13023_s27, 1  ;;  %p180_p13 = scmp.eq.s32.totalorder %s10846_s10, 1 }
  0x56   : > { %s13106_s8 = scalar_select %p30_p5, %s12941_s23, %s32_s26  }
  0x57   : > { %p41_p11 = por %p40_p8, %p39_p7  ;;  %p13110_p12 = por %p17132_p1, %p45_p9 }
  0x58   : > { %p13114_p6 = por %p174_p10, %p39_p7  ;;  %p11830_p0 = scmp.lt.s32.totalorder %s12945_s24, 2 }
  0x59   : > { %s17437_s11 = scalar_select %p13110_p12, 1, 0 }
  0x5a   : > { %s17438_s30 = scalar_select %p13114_p6, 1, 0 }
  0x5b   : > { %s265_s12 = sand.u32 1, %s12941_s23   ;;  %p13120_p2 = por %p180_p13, %p45_p9 }
  0x5c   : > { %s11774_s14 = smul.u32 448, %s265_s12  ;;  %p13124_p5 = pnand %p11830_p0, %p41_p11 }
  0x5d   : > { %s17439_s13 = scalar_select %p13120_p2, 1, 0 }
  0x5e   : > { %s11775_s16 = smul.u32 7168, %s12945_s24  ;;  %s269_s19 = scalar_lea.vmem [#allocation2], %s11774_s14 }
  0x5f   : > { %s277_s20 = sshll.u32 %s269_s19, 4  ;;  %s13136_s25 = scalar_lea.sflag [#allocation3], %s265_s12  ;;  %s13134_s20 = int_to_ptr.vmem [resolvable:$true] %s277_s20 }
  0x60   : > { %s13132_s18 = scalar_lea.hbm %s17125_s0, %s11775_s16  ;;  %p12843_p8 = pneg %p13124_p5 }
  0x61   : > { %s12841_s10 = scalar_lea.hbm %s13132_s18, 7168  ;;  %s12846_s16 = scalar_lea.hbm %s17125_s0, 14336 }
  0x62   : > { %p12842_p7 = scmp.ne.s32.totalorder %s13132_s18, %s12841_s10  ;;  %p12847_p11 = scmp.lt.s32.totalorder %s13132_s18, %s17125_s0 }
  0x63   : > { %p12848_p13 = scmp.lt.s32.totalorder %s12846_s16, %s12841_s10 }
  0x64   : > { %p12844_p9 = pnand %p12843_p8, %p12842_p7 }
  0x65   : > { %p12849_p0 = por %p12848_p13, %p12847_p11 }
  0x66   : > { %p12845_p10 = pneg %p12844_p9 }
  0x68   : > { %p12850_p4 = pnand %p12849_p0, %p12845_p10 }
  0x6a   : > { %12853 = shalt.err (!%p12850_p4)
}
  0x6b   : > { %s12854_s12 = scalar_lea.vmem %s13134_s20, 7168  ;;  %s12960_s14 = smov [#allocation2]  }
  0x6c   : > { %p12855_p1 = scmp.ne.s32.totalorder %s13134_s20, %s12854_s12  ;;  %s12859_s19 = sshll.u32 %s12960_s14, 4  ;;  %s12860_s19 = int_to_ptr.vmem [resolvable:$false] %s12859_s19 }
  0x6d   : > { %s12861_s26 = scalar_lea.vmem %s12860_s19, 14336  ;;  %p12862_p9 = scmp.lt.s32.totalorder %s13134_s20, %s12860_s19 }
  0x6e   : > { %p12857_p2 = pnand %p12855_p1, %p12843_p8  ;;  %p12863_p6 = scmp.lt.s32.totalorder %s12861_s26, %s12854_s12 }
  0x70   : > { %p12858_p7 = pneg %p12857_p2  ;;  %p12864_p12 = por %p12863_p6, %p12862_p9 }
  0x72   : > { %p12865_p3 = pnand %p12864_p12, %p12858_p7 }
  0x74   : > { %12868 = shalt.err (!%p12865_p3)
}
  0x75   : > { %s12961_s10 = smov 448   ;;  %s12962_s29 = smov 28  }
  0x76   : > { %11820 = dma.hbm_to_vmem [thread:$0]  (!%p13124_p5), %s13132_s18, 7168, %s13134_s20, %s13136_s25, %s12961_s10, %s12961_s10, %s12962_s29  }
  0x77   : > { %p17441_p1 = scmp.ne.s32.totalorder %s17434_s28, 0 }
  0x79   : > { %289 = sbr.rel (%p17441_p1) target bundleno = 2044 (0x7fc), region = 44 }
  0x7e   : > { %s13160_s16 = sand.u32 1, %s12937_s22   ;;  %p17442_p3 = scmp.ne.s32.totalorder %s17437_s11, 0 }
  0x7f   : > { %s11776_s9 = smul.u32 448, %s13160_s16  ;;  %s292_s17 = scalar_lea.sflag [#allocation3], %s13160_s16 }
  0x81   : > { %s13164_s12 = scalar_lea.vmem [#allocation2], %s11776_s9 }
  0x82   : > { %12912 = dma.done.wait (%p17442_p3), %s292_s17, 7168  }
  0x83   : > { %12914 = vsyncadd (%p17442_p3), %s292_s17, 4294960128  ;;  %p17443_p4 = scmp.eq.s32.totalorder %s13023_s27, 0 }
  0x85   : > { %12916 = dma.done.wait (%p17443_p4), [#allocation6], 90112   ;;  %p17444_p12 = pmov %p17443_p4 }
  0x86   : > { %p17445_p6 = pmov %p17443_p4 }
  0x87   : > { %12918 = vsyncadd (%p17444_p12), [#allocation6], 4294877184 }
  0x88   : > { %12920 = dma.done.wait (%p17445_p6), [#allocation9], 10240   ;;  %p17446_p2 = pmov %p17443_p4 }
  0x8a   : > { %12922 = vsyncadd (%p17446_p2), [#allocation9], 4294957056  ;;  %p17447_p5 = pmov %p17446_p2 }
  0x8b   : > { %p17448_p8 = pmov %p17446_p2 }
  0x8c   : > { %12924 = dma.done.wait (%p17447_p5), [#allocation12], 1024  }
  0x8d   : > { %12926 = vsyncadd (%p17448_p8), [#allocation12], 4294966272  ;;  %v355_v0 = vld [vmem:[%s13164_s12 + $0x38] sm:$0xff]  ;;  %v356_v1 = vld [vmem:[%s13164_s12 + $0x40] sm:$0xff]  ;;  %s10863_s28 = sshll.u32 %s13160_s16, 7  ;;  %s11661_s15 = sshll.u32 %s13023_s27, 11 }
  0x8e   : > { %v357_v2 = vld [vmem:[%s13164_s12 + $0x48] sm:$0xff]  ;;  %v358_v3 = vld [vmem:[%s13164_s12 + $0x18] ss:$56 sps:$4 sm:$0xff]   ;;  %v13186_v4 = vunpack.c.l.bf16 %v355_v0  ;;  %v13188_v5 = vunpack.c.h.bf16 %v355_v0  ;;  %v13190_v6 = vunpack.c.l.bf16 %v356_v1  ;;  %v13192_v7 = vunpack.c.h.bf16 %v356_v1  ;;  %v347_v8 = vld [vmem:[%s13164_s12] sm:$0xff]  ;;  %s17017_s11 = scalar_lea.vmem [#allocation13], %s10863_s28  ;;  %s17078_s14 = scalar_lea.hbm %s17131_s6, %s11661_s15 }
  0x8f   : > { %v13195_v9 = vunpack.c.l.bf16 %v357_v2  ;;  %v13197_v10 = vunpack.c.h.bf16 %v357_v2  ;;  %v348_v11 = vld [vmem:[%s13164_s12 + $0x8] sm:$0xff]  ;;  %v13200_v12 = vunpack.c.l.bf16 %v347_v8  ;;  %v13202_v13 = vunpack.c.h.bf16 %v358_v3  ;;  %v349_v17 = vld [vmem:[%s13164_s12 + $0x10] sm:$0xff]  ;;  %v360_v29 = vld [vmem:[%s13164_s12 + $0x5c] sm:$0xff]  ;;  %s10725_s18 = sshll.u32 %s17017_s11, 4  ;;  %s10712_s27 = scalar_lea.sflag [#allocation4], %s13160_s16  ;;  %s17080_s18 = int_to_ptr.vmem [resolvable:$true] %s10725_s18 }
  0x90   : > { %v537_v14 = vmul.f32 %v13186_v4, %v13186_v4  ;;  %v538_v15 = vmul.f32 %v13188_v5, %v13188_v5  ;;  %v539_v16 = vmul.f32 %v13190_v6, %v13190_v6  ;;  %v540_v18 = vmul.f32 %v13192_v7, %v13192_v7  ;;  %v359_v24 = vld [vmem:[%s13164_s12 + $0x54] sm:$0xff]  ;;  %v361_v34 = vld [vmem:[%s13164_s12 + $0x64] sm:$0xff]  ;;  %v351_v48 = vld [vmem:[%s13164_s12 + $0x1c] sm:$0xff]  ;;  %s12869_s19 = scalar_lea.vmem %s17080_s18, 2048  ;;  %p18318_p11 = scmp.ne.s32.totalorder %s17438_s30, 0 }
  0x91   : > { %17449 = vst [vmem:[#allocation19_spill] sm:$0xff] %v13202_v13  ;;  %v13213_v19 = vunpack.c.h.bf16 %v347_v8  ;;  %v541_v20 = vmul.f32 %v13195_v9, %v13195_v9  ;;  %v13217_v22 = vunpack.c.l.bf16 %v348_v11  ;;  %v13219_v23 = vunpack.c.h.bf16 %v348_v11  ;;  %v362_v40 = vld [vmem:[%s13164_s12 + $0x34] ss:$56 sps:$4 sm:$0xff]   ;;  %v352_v53 = vld [vmem:[%s13164_s12 + $0x24] sm:$0xff]  ;;  %p12870_p10 = scmp.ne.s32.totalorder %s17080_s18, %s12869_s19  ;;  %s12964_s26 = smov [#allocation13]  }
  0x92   : > { %v651_v21 = vadd.f32 %v538_v15, %v537_v14  ;;  %v542_v25 = vmul.f32 %v13197_v10, %v13197_v10  ;;  %v13224_v26 = vunpack.c.l.bf16 %v349_v17  ;;  %v523_v27 = vmul.f32 %v13200_v12, %v13200_v12  ;;  %v353_v61 = vld [vmem:[%s13164_s12 + $0x2c] sm:$0xff]  ;;  %s12873_s10 = sshll.u32 %s12964_s26, 4  ;;  %s12874_s10 = int_to_ptr.vmem [resolvable:$false] %s12873_s10 }
  0x93   : > { %v524_v28 = vmul.f32 %v13213_v19, %v13213_v19  ;;  %v543_v30 = vmul.f32 %v13202_v13, %v13202_v13  ;;  %v13233_v32 = vunpack.c.h.bf16 %v349_v17  ;;  %v525_v33 = vmul.f32 %v13217_v22, %v13217_v22  ;;  %v1267_v13 = vld [vmem:[#allocation5 + $0x580] sm:$0xff]  ;;  %p12871_p13 = pnand %p12870_p10, %p18318_p11  ;;  %s12875_s29 = scalar_lea.vmem %s12874_s10, 4096 }
  0x94   : > { %v652_v31 = vadd.f32 %v651_v21, %v539_v16  ;;  %v13238_v35 = vunpack.c.l.bf16 %v358_v3  ;;  %v526_v36 = vmul.f32 %v13219_v23, %v13219_v23  ;;  %v13242_v38 = vunpack.c.l.bf16 %v359_v24  ;;  %v368_v21 = vld [vmem:[%s13164_s12 + $0x94] sm:$0xff]  ;;  %p12876_p7 = scmp.lt.s32.totalorder %s17080_s18, %s12874_s10  ;;  %p12877_p9 = scmp.lt.s32.totalorder %s12875_s29, %s12869_s19 }
  0x95   : > { %v635_v37 = vadd.f32 %v524_v28, %v523_v27  ;;  %v13245_v41 = vunpack.c.h.bf16 %v359_v24  ;;  %v13247_v42 = vunpack.c.l.bf16 %v360_v29  ;;  %v13249_v43 = vunpack.c.h.bf16 %v360_v29  ;;  %v369_v29 = vld [vmem:[%s13164_s12 + $0x9c] sm:$0xff]  ;;  %p12872_p0 = pneg %p12871_p13 }
  0x96   : > { %v653_v39 = vadd.f32 %v652_v31, %v540_v18  ;;  %v527_v44 = vmul.f32 %v13224_v26, %v13224_v26  ;;  %v13253_v46 = vunpack.c.l.bf16 %v361_v34  ;;  %v13255_v47 = vunpack.c.h.bf16 %v361_v34  ;;  %p12878_p1 = por %p12877_p9, %p12876_p7 }
  0x97   : > { %v636_v45 = vadd.f32 %v635_v37, %v525_v33  ;;  %v544_v50 = vmul.f32 %v13242_v38, %v13242_v38  ;;  %v545_v51 = vmul.f32 %v13245_v41, %v13245_v41  ;;  %v546_v52 = vmul.f32 %v13247_v42, %v13247_v42 }
  0x98   : > { %v654_v49 = vadd.f32 %v653_v39, %v541_v20  ;;  %v528_v54 = vmul.f32 %v13233_v32, %v13233_v32  ;;  %v529_v55 = vmul.f32 %v13238_v35, %v13238_v35  ;;  %v13269_v57 = vunpack.c.h.bf16 %v362_v40  ;;  %v367_v20 = vld [vmem:[%s13164_s12 + $0x8c] sm:$0xff]  ;;  %p12879_p3 = pnand %p12878_p1, %p12872_p0 }
  0x99   : > { %v637_v56 = vadd.f32 %v636_v45, %v526_v36  ;;  %v547_v59 = vmul.f32 %v13249_v43, %v13249_v43  ;;  %v659_v60 = vadd.f32 %v545_v51, %v544_v50  ;;  %v13274_v62 = vunpack.c.l.bf16 %v351_v48 }
  0x9a   : > { %17450 = vst [vmem:[#allocation20_spill] sm:$0xff] %v13269_v57  ;;  %v655_v58 = vadd.f32 %v654_v49, %v542_v25  ;;  %v13276_v0 = vunpack.c.h.bf16 %v351_v48  ;;  %v13278_v1 = vunpack.c.l.bf16 %v352_v53  ;;  %v13280_v2 = vunpack.c.h.bf16 %v352_v53 }
  0x9b   : > { %v638_v63 = vadd.f32 %v637_v56, %v527_v44  ;;  %v548_v8 = vmul.f32 %v13253_v46, %v13253_v46  ;;  %v549_v11 = vmul.f32 %v13255_v47, %v13255_v47  ;;  %v660_v14 = vadd.f32 %v659_v60, %v546_v52  ;;  %v364_v56 = vld [vmem:[%s13164_s12 + $0x78] sm:$0xff] }
  0x9c   : > { %v656_v3 = vadd.f32 %v655_v58, %v543_v30  ;;  %v13286_v16 = vunpack.c.l.bf16 %v353_v61  ;;  %v530_v17 = vmul.f32 %v13274_v62, %v13274_v62  ;;  %v531_v18 = vmul.f32 %v13276_v0, %v13276_v0 }
  0x9d   : > { %v639_v15 = vadd.f32 %v638_v63, %v528_v54  ;;  %v550_v24 = vmul.f32 %v13269_v57, %v13269_v57  ;;  %v661_v25 = vadd.f32 %v660_v14, %v547_v59  ;;  %v13296_v27 = vunpack.c.h.bf16 %v353_v61  ;;  %v365_v14 = vld [vmem:[%s13164_s12 + $0x80] sm:$0xff] }
  0x9e   : > { %657 = vadd.xlane.f32.xlu1 %v656_v3  ;;  %v532_v28 = vmul.f32 %v13278_v1, %v13278_v1  ;;  %v13301_v31 = vunpack.c.l.bf16 %v362_v40  ;;  %v533_v33 = vmul.f32 %v13280_v2, %v13280_v2  ;;  %v643_v34 = vadd.f32 %v531_v18, %v530_v17  ;;  %v370_v40 = vld [vmem:[%s13164_s12 + $0x88] ss:$28 sps:$4 sm:$0xff]  }
  0x9f   : > { %v640_v30 = vadd.f32 %v639_v15, %v529_v55  ;;  %v662_v36 = vadd.f32 %v661_v25, %v548_v8  ;;  %v13305_v37 = vunpack.c.l.bf16 %v367_v20  ;;  %v13307_v39 = vunpack.c.h.bf16 %v367_v20  ;;  %v363_v55 = vld [vmem:[%s13164_s12 + $0x70] sm:$0xff] }
  0xa0   : > { %v13309_v44 = vunpack.c.l.bf16 %v368_v21  ;;  %v534_v45 = vmul.f32 %v13286_v16, %v13286_v16  ;;  %v644_v48 = vadd.f32 %v643_v34, %v532_v28  ;;  %v13314_v49 = vunpack.c.h.bf16 %v368_v21  ;;  %v375_v21 = vld [vmem:[%s13164_s12 + $0xc4] sm:$0xff]  ;;  %v376_v25 = vld [vmem:[%s13164_s12 + $0xcc] sm:$0xff] }
  0xa1   : > { %17451 = vst [vmem:[#allocation21_spill] sm:$0xff] %v13305_v37  ;;  %641 = vadd.xlane.f32.xlu0 %v640_v30  ;;  %v13316_v50 = vunpack.c.l.bf16 %v369_v29  ;;  %v663_v51 = vadd.f32 %v662_v36, %v549_v11  ;;  %v13318_v52 = vunpack.c.h.bf16 %v369_v29  ;;  %v558_v53 = vmul.f32 %v13305_v37, %v13305_v37 }
  0xa2   : > { %17452 = vst [vmem:[#allocation22_spill] sm:$0xff] %v13309_v44  ;;  %v559_v54 = vmul.f32 %v13307_v39, %v13307_v39  ;;  %v535_v58 = vmul.f32 %v13296_v27, %v13296_v27  ;;  %v536_v59 = vmul.f32 %v13301_v31, %v13301_v31  ;;  %v645_v60 = vadd.f32 %v644_v48, %v533_v33  ;;  %v377_v33 = vld [vmem:[%s13164_s12 + $0xd4] sm:$0xff] }
  0xa3   : > { %17453 = vst [vmem:[#allocation23_spill] sm:$0xff] %v13316_v50  ;;  %17454 = vst [vmem:[#allocation24_spill] sm:$0xff] %v13318_v52  ;;  %v560_v61 = vmul.f32 %v13309_v44, %v13309_v44  ;;  %v664_v63 = vadd.f32 %v663_v51, %v550_v24  ;;  %v13332_v3 = vunpack.c.h.bf16 %v370_v40  ;;  %v561_v8 = vmul.f32 %v13314_v49, %v13314_v49 }
  0xa4   : > { %v675_v11 = vadd.f32 %v559_v54, %v558_v53  ;;  %v646_v15 = vadd.f32 %v645_v60, %v534_v45  ;;  %v13337_v17 = vunpack.c.l.bf16 %v363_v55  ;;  %v13339_v18 = vunpack.c.h.bf16 %v363_v55 }
  0xa5   : > { %17455 = vst [vmem:[#allocation25_spill] sm:$0xff] %v13332_v3  ;;  %v13341_v20 = vunpack.c.l.bf16 %v364_v56  ;;  %665 = vadd.xlane.f32.xlu1 %v664_v63  ;;  %v562_v24 = vmul.f32 %v13316_v50, %v13316_v50  ;;  %v563_v28 = vmul.f32 %v13318_v52, %v13318_v52  ;;  %v13349_v30 = vunpack.c.h.bf16 %v364_v56  ;;  %v378_v63 = vld [vmem:[%s13164_s12 + $0xc0] ss:$28 sps:$4 sm:$0xff]  }
  0xa6   : > { %17456 = vst [vmem:[#allocation26_spill] sm:$0xff] %v13337_v17  ;;  %17457 = vst [vmem:[#allocation27_spill] sm:$0xff] %v13339_v18  ;;  %v676_v29 = vadd.f32 %v675_v11, %v560_v61  ;;  %v647_v34 = vadd.f32 %v646_v15, %v535_v58  ;;  %v13352_v36 = vunpack.c.l.bf16 %v365_v14  ;;  %v551_v45 = vmul.f32 %v13337_v17, %v13337_v17  ;;  %v1131_v17 = vld [vmem:[#allocation5 + $0x140] sm:$0xff] }
  0xa7   : > { %17458 = vst [vmem:[#allocation28_spill] sm:$0xff] %v13341_v20  ;;  %17459 = vst [vmem:[#allocation29_spill] sm:$0xff] %v13349_v30  ;;  %v552_v48 = vmul.f32 %v13339_v18, %v13339_v18  ;;  %v564_v51 = vmul.f32 %v13332_v3, %v13332_v3  ;;  %v13360_v54 = vunpack.c.h.bf16 %v365_v14  ;;  %v553_v55 = vmul.f32 %v13341_v20, %v13341_v20  ;;  %v371_v14 = vld [vmem:[%s13164_s12 + $0xa8] sm:$0xff]  ;;  %v1271_v20 = vld [vmem:[#allocation5 + $0x5a0] sm:$0xff] }
  0xa8   : > { %17460 = vst [vmem:[#allocation30_spill] sm:$0xff] %v13352_v36  ;;  %v677_v53 = vadd.f32 %v676_v29, %v561_v8  ;;  %v648_v56 = vadd.f32 %v647_v34, %v536_v59  ;;  %v13364_v58 = vunpack.c.l.bf16 %v370_v40  ;;  %v554_v60 = vmul.f32 %v13349_v30, %v13349_v30  ;;  %v372_v29 = vld [vmem:[%s13164_s12 + $0xb0] sm:$0xff]  ;;  %v1259_v30 = vld [vmem:[#allocation5 + $0x540] sm:$0xff] }
  0xa9   : > { %17461 = vst [vmem:[#allocation31_spill] sm:$0xff] %v13360_v54  ;;  %v667_v61 = vadd.f32 %v552_v48, %v551_v45  ;;  %v13369_v15 = vunpack.c.l.bf16 %v375_v21  ;;  %v13371_v50 = vunpack.c.h.bf16 %v375_v21  ;;  %v13373_v8 = vunpack.c.l.bf16 %v376_v25 }
  0xaa   : > { %17462 = vst [vmem:[#allocation32_spill] sm:$0xff] %v13364_v58  ;;  %v678_v11 = vadd.f32 %v677_v53, %v562_v24  ;;  %649 = vadd.xlane.f32.xlu0 %v648_v56  ;;  %v555_v40 = vmul.f32 %v13352_v36, %v13352_v36  ;;  %v13379_v34 = vunpack.c.h.bf16 %v376_v25  ;;  %v13381_v3 = vunpack.c.l.bf16 %v377_v33  ;;  %v373_v53 = vld [vmem:[%s13164_s12 + $0xb8] sm:$0xff] }
  0xab   : > { %17463 = vst [vmem:[#allocation33_spill] sm:$0xff] %v13369_v15  ;;  %17464 = vst [vmem:[#allocation34_spill] sm:$0xff] %v13371_v50  ;;  %v668_v59 = vadd.f32 %v667_v61, %v553_v55  ;;  %v13383_v48 = vunpack.c.h.bf16 %v377_v33  ;;  %v572_v21 = vmul.f32 %v13369_v15, %v13369_v15  ;;  %v573_v24 = vmul.f32 %v13371_v50, %v13371_v50 }
  0xac   : > { %17465 = vst [vmem:[#allocation35_spill] sm:$0xff] %v13373_v8  ;;  %17466 = vst [vmem:[#allocation36_spill] sm:$0xff] %v13379_v34  ;;  %v679_v45 = vadd.f32 %v678_v11, %v563_v28  ;;  %v556_v56 = vmul.f32 %v13360_v54, %v13360_v54  ;;  %v557_v25 = vmul.f32 %v13364_v58, %v13364_v58  ;;  %v13396_v61 = vunpack.c.h.bf16 %v378_v63  ;;  %v383_v58 = vld [vmem:[%s13164_s12 + $0xfc] sm:$0xff] }
  0xad   : > { %17467 = vst [vmem:[#allocation37_spill] sm:$0xff] %v13381_v3  ;;  %17468 = vst [vmem:[#allocation38_spill] sm:$0xff] %v13383_v48  ;;  %v669_v55 = vadd.f32 %v668_v59, %v554_v60  ;;  %v574_v28 = vmul.f32 %v13373_v8, %v13373_v8  ;;  %v575_v11 = vmul.f32 %v13379_v34, %v13379_v34  ;;  %v13400_v52 = vunpack.c.l.bf16 %v371_v14  ;;  %v384_v60 = vld [vmem:[%s13164_s12 + $0x104] sm:$0xff] }
  0xae   : > { %v680_v33 = vadd.f32 %v679_v45, %v564_v51  ;;  %17469 = vst [vmem:[#allocation39_spill] sm:$0xff] %v13396_v61  ;;  %v691_v36 = vadd.f32 %v573_v24, %v572_v21  ;;  %v13402_v57 = vunpack.c.h.bf16 %v371_v14  ;;  %v13404_v54 = vunpack.c.l.bf16 %v372_v29 }
  0xaf   : > { %v670_v15 = vadd.f32 %v669_v55, %v555_v40  ;;  %17470 = vst [vmem:[#allocation40_spill] sm:$0xff] %v13400_v52  ;;  %v576_v59 = vmul.f32 %v13381_v3, %v13381_v3  ;;  %v577_v51 = vmul.f32 %v13383_v48, %v13383_v48  ;;  %v13412_v8 = vunpack.c.h.bf16 %v372_v29  ;;  %v385_v40 = vld [vmem:[%s13164_s12 + $0x10c] sm:$0xff] }
  0xb0   : > { %17471 = vst [vmem:[#allocation41_spill] sm:$0xff] %v13402_v57  ;;  %17472 = vst [vmem:[#allocation42_spill] sm:$0xff] %v13404_v54  ;;  %681 = vadd.xlane.f32.xlu1 %v680_v33  ;;  %v692_v45 = vadd.f32 %v691_v36, %v574_v28  ;;  %v13415_v24 = vunpack.c.l.bf16 %v373_v53  ;;  %v565_v14 = vmul.f32 %v13400_v52, %v13400_v52  ;;  %v13423_v48 = vunpack.c.h.bf16 %v373_v53  ;;  %v386_v52 = vld [vmem:[%s13164_s12 + $0xf8] ss:$28 sps:$4 sm:$0xff]   ;;  %v379_v53 = vld [vmem:[%s13164_s12 + $0xe0] sm:$0xff] }
  0xb1   : > { %17473 = vst [vmem:[#allocation43_spill] sm:$0xff] %v13412_v8  ;;  %v671_v21 = vadd.f32 %v670_v15, %v556_v56  ;;  %v566_v55 = vmul.f32 %v13402_v57, %v13402_v57  ;;  %v578_v33 = vmul.f32 %v13396_v61, %v13396_v61  ;;  %v567_v36 = vmul.f32 %v13404_v54, %v13404_v54 }
  0xb2   : > { %17474 = vst [vmem:[#allocation44_spill] sm:$0xff] %v13415_v24  ;;  %v693_v3 = vadd.f32 %v692_v45, %v575_v11  ;;  %17475 = vst [vmem:[#allocation45_spill] sm:$0xff] %v13423_v48  ;;  %v13427_v29 = vunpack.c.l.bf16 %v378_v63  ;;  %v568_v56 = vmul.f32 %v13412_v8, %v13412_v8  ;;  %v13432_v57 = vunpack.c.l.bf16 %v383_v58  ;;  %v380_v45 = vld [vmem:[%s13164_s12 + $0xe8] sm:$0xff] }
  0xb3   : > { %v672_v15 = vadd.f32 %v671_v21, %v557_v25  ;;  %v683_v28 = vadd.f32 %v566_v55, %v565_v14  ;;  %v13434_v50 = vunpack.c.h.bf16 %v383_v58  ;;  %v13436_v11 = vunpack.c.l.bf16 %v384_v60 }
  0xb4   : > { %17476 = vst [vmem:[#allocation46_spill] sm:$0xff] %v13427_v29  ;;  %v694_v34 = vadd.f32 %v693_v3, %v576_v59  ;;  %17477 = vst [vmem:[#allocation47_spill] sm:$0xff] %v13432_v57  ;;  %v569_v63 = vmul.f32 %v13415_v24, %v13415_v24  ;;  %v13442_v21 = vunpack.c.h.bf16 %v384_v60  ;;  %v13444_v61 = vunpack.c.l.bf16 %v385_v40  ;;  %v381_v59 = vld [vmem:[%s13164_s12 + $0xf0] sm:$0xff] }
  0xb5   : > { %17478 = vst [vmem:[#allocation48_spill] sm:$0xff] %v13434_v50  ;;  %17479 = vst [vmem:[#allocation49_spill] sm:$0xff] %v13436_v11  ;;  %673 = vadd.xlane.f32.xlu0 %v672_v15  ;;  %v684_v25 = vadd.f32 %v683_v28, %v567_v36  ;;  %v13446_v55 = vunpack.c.h.bf16 %v385_v40  ;;  %v586_v3 = vmul.f32 %v13432_v57, %v13432_v57  ;;  %v13459_v40 = vunpack.c.h.bf16 %v386_v52 }
  0xb6   : > { %17480 = vst [vmem:[#allocation50_spill] sm:$0xff] %v13442_v21  ;;  %17481 = vst [vmem:[#allocation51_spill] sm:$0xff] %v13444_v61  ;;  %v695_v14 = vadd.f32 %v694_v34, %v577_v51  ;;  %v587_v58 = vmul.f32 %v13434_v50, %v13434_v50  ;;  %v570_v15 = vmul.f32 %v13423_v48, %v13423_v48  ;;  %v13463_v50 = vunpack.c.l.bf16 %v379_v53 }
  0xb7   : > { %17482 = vst [vmem:[#allocation52_spill] sm:$0xff] %v13446_v55  ;;  %v571_v60 = vmul.f32 %v13427_v29, %v13427_v29  ;;  %v685_v36 = vadd.f32 %v684_v25, %v568_v56  ;;  %v588_v34 = vmul.f32 %v13436_v11, %v13436_v11  ;;  %17483 = vst [vmem:[#allocation53_spill] sm:$0xff] %v13459_v40  ;;  %v13465_v54 = vunpack.c.h.bf16 %v379_v53  ;;  %v391_v29 = vld [vmem:[%s13164_s12 + $0x134] sm:$0xff]  ;;  %v392_v56 = vld [vmem:[%s13164_s12 + $0x13c] sm:$0xff] }
  0xb8   : > { %v696_v51 = vadd.f32 %v695_v14, %v578_v33  ;;  %v589_v28 = vmul.f32 %v13442_v21, %v13442_v21  ;;  %v707_v24 = vadd.f32 %v587_v58, %v586_v3  ;;  %17484 = vst [vmem:[#allocation54_spill] sm:$0xff] %v13463_v50  ;;  %v13467_v48 = vunpack.c.l.bf16 %v380_v45 }
  0xb9   : > { %v686_v57 = vadd.f32 %v685_v36, %v569_v63  ;;  %17485 = vst [vmem:[#allocation55_spill] sm:$0xff] %v13465_v54  ;;  %v590_v25 = vmul.f32 %v13444_v61, %v13444_v61  ;;  %v591_v33 = vmul.f32 %v13446_v55, %v13446_v55  ;;  %v13475_v11 = vunpack.c.h.bf16 %v380_v45  ;;  %v393_v63 = vld [vmem:[%s13164_s12 + $0x144] sm:$0xff] }
  0xba   : > { %17486 = vst [vmem:[#allocation56_spill] sm:$0xff] %v13467_v48  ;;  %697 = vadd.xlane.f32.xlu1 %v696_v51  ;;  %v708_v14 = vadd.f32 %v707_v24, %v588_v34  ;;  %v13478_v58 = vunpack.c.l.bf16 %v381_v59  ;;  %v579_v53 = vmul.f32 %v13463_v50, %v13463_v50  ;;  %v580_v36 = vmul.f32 %v13465_v54, %v13465_v54  ;;  %v394_v50 = vld [vmem:[%s13164_s12 + $0x130] ss:$28 sps:$4 sm:$0xff]  }
  0xbb   : > { %17487 = vst [vmem:[#allocation57_spill] sm:$0xff] %v13475_v11  ;;  %v687_v3 = vadd.f32 %v686_v57, %v570_v15  ;;  %v592_v51 = vmul.f32 %v13459_v40, %v13459_v40  ;;  %v13486_v55 = vunpack.c.h.bf16 %v381_v59  ;;  %v581_v24 = vmul.f32 %v13467_v48, %v13467_v48  ;;  %v387_v59 = vld [vmem:[%s13164_s12 + $0x118] sm:$0xff] }
  0xbc   : > { %17488 = vst [vmem:[#allocation58_spill] sm:$0xff] %v13478_v58  ;;  %v709_v61 = vadd.f32 %v708_v14, %v589_v28  ;;  %v13490_v45 = vunpack.c.l.bf16 %v386_v52  ;;  %v582_v15 = vmul.f32 %v13475_v11, %v13475_v11  ;;  %v699_v34 = vadd.f32 %v580_v36, %v579_v53  ;;  %v388_v14 = vld [vmem:[%s13164_s12 + $0x120] sm:$0xff] }
  0xbd   : > { %17489 = vst [vmem:[#allocation59_spill] sm:$0xff] %v13486_v55  ;;  %v688_v57 = vadd.f32 %v687_v3, %v571_v60  ;;  %v13495_v54 = vunpack.c.l.bf16 %v391_v29  ;;  %v13497_v8 = vunpack.c.h.bf16 %v391_v29  ;;  %v13499_v28 = vunpack.c.l.bf16 %v392_v56 }
  0xbe   : > { %17490 = vst [vmem:[#allocation60_spill] sm:$0xff] %v13490_v45  ;;  %v710_v21 = vadd.f32 %v709_v61, %v590_v25  ;;  %v583_v52 = vmul.f32 %v13478_v58, %v13478_v58  ;;  %v700_v60 = vadd.f32 %v699_v34, %v581_v24  ;;  %v13505_v3 = vunpack.c.h.bf16 %v392_v56  ;;  %v389_v25 = vld [vmem:[%s13164_s12 + $0x128] sm:$0xff] }
  0xbf   : > { %17491 = vst [vmem:[#allocation61_spill] sm:$0xff] %v13495_v54  ;;  %17492 = vst [vmem:[#allocation62_spill] sm:$0xff] %v13497_v8  ;;  %689 = vadd.xlane.f32.xlu0 %v688_v57  ;;  %v13507_v40 = vunpack.c.l.bf16 %v393_v63  ;;  %v13509_v36 = vunpack.c.h.bf16 %v393_v63  ;;  %v600_v61 = vmul.f32 %v13495_v54, %v13495_v54  ;;  %v601_v29 = vmul.f32 %v13497_v8, %v13497_v8 }
  0xc0   : > { %17493 = vst [vmem:[#allocation63_spill] sm:$0xff] %v13499_v28  ;;  %17494 = vst [vmem:[#allocation64_spill] sm:$0xff] %v13505_v3  ;;  %v711_v53 = vadd.f32 %v710_v21, %v591_v33  ;;  %v584_v57 = vmul.f32 %v13486_v55, %v13486_v55  ;;  %v585_v56 = vmul.f32 %v13490_v45, %v13490_v45  ;;  %v13522_v63 = vunpack.c.h.bf16 %v394_v50  ;;  %v399_v45 = vld [vmem:[%s13164_s12 + $0x16c] sm:$0xff] }
  0xc1   : > { %17495 = vst [vmem:[#allocation65_spill] sm:$0xff] %v13507_v40  ;;  %17496 = vst [vmem:[#allocation66_spill] sm:$0xff] %v13509_v36  ;;  %v701_v24 = vadd.f32 %v700_v60, %v582_v15  ;;  %v602_v21 = vmul.f32 %v13499_v28, %v13499_v28  ;;  %v603_v34 = vmul.f32 %v13505_v3, %v13505_v3  ;;  %v13526_v8 = vunpack.c.l.bf16 %v387_v59  ;;  %v400_v15 = vld [vmem:[%s13164_s12 + $0x174] sm:$0xff] }
  0xc2   : > { %v712_v33 = vadd.f32 %v711_v53, %v592_v51  ;;  %17497 = vst [vmem:[#allocation67_spill] sm:$0xff] %v13522_v63  ;;  %v723_v58 = vadd.f32 %v601_v29, %v600_v61  ;;  %v13528_v48 = vunpack.c.h.bf16 %v387_v59  ;;  %v13530_v55 = vunpack.c.l.bf16 %v388_v14 }
  0xc3   : > { %v702_v54 = vadd.f32 %v701_v24, %v583_v52  ;;  %17498 = vst [vmem:[#allocation68_spill] sm:$0xff] %v13526_v8  ;;  %v604_v60 = vmul.f32 %v13507_v40, %v13507_v40  ;;  %v605_v51 = vmul.f32 %v13509_v36, %v13509_v36  ;;  %v13538_v28 = vunpack.c.h.bf16 %v388_v14  ;;  %v401_v52 = vld [vmem:[%s13164_s12 + $0x17c] sm:$0xff] }
  0xc4   : > { %17499 = vst [vmem:[#allocation69_spill] sm:$0xff] %v13528_v48  ;;  %17500 = vst [vmem:[#allocation70_spill] sm:$0xff] %v13530_v55  ;;  %713 = vadd.xlane.f32.xlu1 %v712_v33  ;;  %v724_v53 = vadd.f32 %v723_v58, %v602_v21  ;;  %v13541_v29 = vunpack.c.l.bf16 %v389_v25  ;;  %v593_v59 = vmul.f32 %v13526_v8, %v13526_v8  ;;  %v13549_v36 = vunpack.c.h.bf16 %v389_v25  ;;  %v402_v8 = vld [vmem:[%s13164_s12 + $0x168] ss:$28 sps:$4 sm:$0xff]   ;;  %v395_v25 = vld [vmem:[%s13164_s12 + $0x150] sm:$0xff] }
  0xc5   : > { %17501 = vst [vmem:[#allocation71_spill] sm:$0xff] %v13538_v28  ;;  %v703_v61 = vadd.f32 %v702_v54, %v584_v57  ;;  %v594_v24 = vmul.f32 %v13528_v48, %v13528_v48  ;;  %v606_v33 = vmul.f32 %v13522_v63, %v13522_v63  ;;  %v595_v58 = vmul.f32 %v13530_v55, %v13530_v55 }
  0xc6   : > { %17502 = vst [vmem:[#allocation72_spill] sm:$0xff] %v13541_v29  ;;  %v725_v40 = vadd.f32 %v724_v53, %v603_v34  ;;  %17503 = vst [vmem:[#allocation73_spill] sm:$0xff] %v13549_v36  ;;  %v13553_v14 = vunpack.c.l.bf16 %v394_v50  ;;  %v596_v57 = vmul.f32 %v13538_v28, %v13538_v28  ;;  %v13558_v11 = vunpack.c.l.bf16 %v399_v45  ;;  %v396_v34 = vld [vmem:[%s13164_s12 + $0x158] sm:$0xff]  ;;  %v1147_v28 = vld [vmem:[#allocation5 + $0x1c0] sm:$0xff] }
  0xc7   : > { %v704_v54 = vadd.f32 %v703_v61, %v585_v56  ;;  %v715_v21 = vadd.f32 %v594_v24, %v593_v59  ;;  %v13560_v48 = vunpack.c.h.bf16 %v399_v45  ;;  %v13562_v63 = vunpack.c.l.bf16 %v400_v15 }
  0xc8   : > { %17504 = vst [vmem:[#allocation74_spill] sm:$0xff] %v13553_v14  ;;  %v726_v3 = vadd.f32 %v725_v40, %v604_v60  ;;  %17505 = vst [vmem:[#allocation75_spill] sm:$0xff] %v13558_v11  ;;  %v597_v56 = vmul.f32 %v13541_v29, %v13541_v29  ;;  %v13568_v53 = vunpack.c.h.bf16 %v400_v15  ;;  %v13570_v61 = vunpack.c.l.bf16 %v401_v52 }
  0xc9   : > { %17506 = vst [vmem:[#allocation76_spill] sm:$0xff] %v13560_v48  ;;  %17507 = vst [vmem:[#allocation77_spill] sm:$0xff] %v13562_v63  ;;  %705 = vadd.xlane.f32.xlu0 %v704_v54  ;;  %v716_v50 = vadd.f32 %v715_v21, %v595_v58  ;;  %v13572_v40 = vunpack.c.h.bf16 %v401_v52  ;;  %v614_v45 = vmul.f32 %v13558_v11, %v13558_v11  ;;  %v397_v11 = vld [vmem:[%s13164_s12 + $0x160] sm:$0xff]  ;;  %v13589_v29 = vunpack.c.l.bf16 %v395_v25 }
  0xca   : > { %17508 = vst [vmem:[#allocation78_spill] sm:$0xff] %v13568_v53  ;;  %17509 = vst [vmem:[#allocation79_spill] sm:$0xff] %v13570_v61  ;;  %v727_v59 = vadd.f32 %v726_v3, %v605_v51  ;;  %v615_v60 = vmul.f32 %v13560_v48, %v13560_v48  ;;  %v598_v24 = vmul.f32 %v13549_v36, %v13549_v36  ;;  %v13584_v3 = vunpack.c.h.bf16 %v402_v8 }
  0xcb   : > { %17510 = vst [vmem:[#allocation80_spill] sm:$0xff] %v13572_v40  ;;  %v599_v54 = vmul.f32 %v13553_v14, %v13553_v14  ;;  %v717_v58 = vadd.f32 %v716_v50, %v596_v57  ;;  %v616_v15 = vmul.f32 %v13562_v63, %v13562_v63  ;;  %v617_v51 = vmul.f32 %v13568_v53, %v13568_v53 }
  0xcc   : > { %v728_v21 = vadd.f32 %v727_v59, %v606_v33  ;;  %17511 = vst [vmem:[#allocation81_spill] sm:$0xff] %v13584_v3  ;;  %v739_v52 = vadd.f32 %v615_v60, %v614_v45  ;;  %17512 = vst [vmem:[#allocation82_spill] sm:$0xff] %v13589_v29  ;;  %v13591_v36 = vunpack.c.h.bf16 %v395_v25  ;;  %v13593_v14 = vunpack.c.l.bf16 %v396_v34 }
  0xcd   : > { %v718_v48 = vadd.f32 %v717_v58, %v597_v56  ;;  %v618_v33 = vmul.f32 %v13570_v61, %v13570_v61  ;;  %v619_v57 = vmul.f32 %v13572_v40, %v13572_v40  ;;  %v13599_v59 = vunpack.c.h.bf16 %v396_v34  ;;  %v407_v58 = vld [vmem:[%s13164_s12 + $0x1a4] sm:$0xff]  ;;  %v409_v34 = vld [vmem:[%s13164_s12 + $0x1b4] sm:$0xff] }
  0xce   : > { %17513 = vst [vmem:[#allocation83_spill] sm:$0xff] %v13591_v36  ;;  %17514 = vst [vmem:[#allocation84_spill] sm:$0xff] %v13593_v14  ;;  %729 = vadd.xlane.f32.xlu1 %v728_v21  ;;  %v740_v50 = vadd.f32 %v739_v52, %v616_v15  ;;  %v13601_v60 = vunpack.c.l.bf16 %v397_v11  ;;  %v607_v25 = vmul.f32 %v13589_v29, %v13589_v29  ;;  %v408_v21 = vld [vmem:[%s13164_s12 + $0x1ac] sm:$0xff]  ;;  %v13611_v40 = vunpack.c.h.bf16 %v397_v11 }
  0xcf   : > { %17515 = vst [vmem:[#allocation85_spill] sm:$0xff] %v13599_v59  ;;  %v719_v45 = vadd.f32 %v718_v48, %v598_v24  ;;  %v608_v56 = vmul.f32 %v13591_v36, %v13591_v36  ;;  %v620_v61 = vmul.f32 %v13584_v3, %v13584_v3  ;;  %v609_v48 = vmul.f32 %v13593_v14, %v13593_v14 }
  0xd0   : > { %17516 = vst [vmem:[#allocation86_spill] sm:$0xff] %v13601_v60  ;;  %v741_v63 = vadd.f32 %v740_v50, %v617_v51  ;;  %17517 = vst [vmem:[#allocation87_spill] sm:$0xff] %v13611_v40  ;;  %v13616_v15 = vunpack.c.l.bf16 %v402_v8  ;;  %v610_v52 = vmul.f32 %v13599_v59, %v13599_v59  ;;  %v13620_v3 = vunpack.c.l.bf16 %v407_v58  ;;  %v403_v59 = vld [vmem:[%s13164_s12 + $0x188] sm:$0xff] }
  0xd1   : > { %v720_v24 = vadd.f32 %v719_v45, %v599_v54  ;;  %v731_v29 = vadd.f32 %v608_v56, %v607_v25  ;;  %v13622_v51 = vunpack.c.h.bf16 %v407_v58  ;;  %v13624_v11 = vunpack.c.l.bf16 %v408_v21  ;;  %v410_v54 = vld [vmem:[%s13164_s12 + $0x1a0] ss:$28 sps:$4 sm:$0xff]   ;;  %v404_v25 = vld [vmem:[%s13164_s12 + $0x190] sm:$0xff] }
  0xd2   : > { %17518 = vst [vmem:[#allocation88_spill] sm:$0xff] %v13616_v15  ;;  %v742_v36 = vadd.f32 %v741_v63, %v618_v33  ;;  %17519 = vst [vmem:[#allocation89_spill] sm:$0xff] %v13620_v3  ;;  %v611_v50 = vmul.f32 %v13601_v60, %v13601_v60  ;;  %v13629_v8 = vunpack.c.h.bf16 %v408_v21  ;;  %v13631_v45 = vunpack.c.l.bf16 %v409_v34 }
  0xd3   : > { %17520 = vst [vmem:[#allocation90_spill] sm:$0xff] %v13622_v51  ;;  %17521 = vst [vmem:[#allocation91_spill] sm:$0xff] %v13624_v11  ;;  %721 = vadd.xlane.f32.xlu0 %v720_v24  ;;  %v732_v14 = vadd.f32 %v731_v29, %v609_v48  ;;  %v13635_v33 = vunpack.c.h.bf16 %v409_v34  ;;  %v628_v56 = vmul.f32 %v13620_v3, %v13620_v3  ;;  %v405_v24 = vld [vmem:[%s13164_s12 + $0x198] sm:$0xff]  ;;  %v13654_v55 = vunpack.c.h.bf16 %v403_v59 }
  0xd4   : > { %17522 = vst [vmem:[#allocation92_spill] sm:$0xff] %v13629_v8  ;;  %17523 = vst [vmem:[#allocation93_spill] sm:$0xff] %v13631_v45  ;;  %v743_v63 = vadd.f32 %v742_v36, %v619_v57  ;;  %v629_v58 = vmul.f32 %v13622_v51, %v13622_v51  ;;  %v612_v29 = vmul.f32 %v13611_v40, %v13611_v40  ;;  %v13648_v57 = vunpack.c.h.bf16 %v410_v54 }
  0xd5   : > { %17524 = vst [vmem:[#allocation94_spill] sm:$0xff] %v13635_v33  ;;  %v613_v21 = vmul.f32 %v13616_v15, %v13616_v15  ;;  %v733_v48 = vadd.f32 %v732_v14, %v610_v52  ;;  %v630_v60 = vmul.f32 %v13624_v11, %v13624_v11  ;;  %v631_v34 = vmul.f32 %v13629_v8, %v13629_v8  ;;  %v1151_v15 = vld [vmem:[#allocation5 + $0x1e0] sm:$0xff] }
  0xd6   : > { %v744_v36 = vadd.f32 %v743_v63, %v620_v61  ;;  %17525 = vst [vmem:[#allocation95_spill] sm:$0xff] %v13648_v57  ;;  %v755_v3 = vadd.f32 %v629_v58, %v628_v56  ;;  %v13652_v51 = vunpack.c.l.bf16 %v403_v59  ;;  %17527 = vst [vmem:[#allocation97_spill] sm:$0xff] %v13654_v55  ;;  %v13656_v40 = vunpack.c.l.bf16 %v404_v25  ;;  %v1275_v14 = vld [vmem:[#allocation5 + $0x5c0] sm:$0xff] }
  0xd7   : > { %v734_v53 = vadd.f32 %v733_v48, %v611_v50  ;;  %v1279_v52 = vld [vmem:[#allocation5 + $0x5e0] sm:$0xff]  ;;  %v632_v61 = vmul.f32 %v13631_v45, %v13631_v45  ;;  %v633_v63 = vmul.f32 %v13635_v33, %v13635_v33  ;;  %v13662_v56 = vunpack.c.h.bf16 %v404_v25 }
  0xd8   : > { %17526 = vst [vmem:[#allocation96_spill] sm:$0xff] %v13652_v51  ;;  %17528 = vst [vmem:[#allocation98_spill] sm:$0xff] %v13656_v40  ;;  %745 = vadd.xlane.f32.xlu1 %v744_v36  ;;  %v756_v11 = vadd.f32 %v755_v3, %v630_v60  ;;  %v1139_v50 = vld [vmem:[#allocation5 + $0x180] sm:$0xff]  ;;  %v13664_v48 = vunpack.c.l.bf16 %v405_v24  ;;  %v621_v8 = vmul.f32 %v13652_v51, %v13652_v51  ;;  %v13672_v3 = vunpack.c.h.bf16 %v405_v24 }
  0xd9   : > { %17529 = vst [vmem:[#allocation99_spill] sm:$0xff] %v13662_v56  ;;  %v1143_v58 = vld [vmem:[#allocation5 + $0x1a0] sm:$0xff]  ;;  %v735_v59 = vadd.f32 %v734_v53, %v612_v29  ;;  %v622_v36 = vmul.f32 %v13654_v55, %v13654_v55  ;;  %v634_v45 = vmul.f32 %v13648_v57, %v13648_v57  ;;  %v623_v60 = vmul.f32 %v13656_v40, %v13656_v40 }
  0xda   : > { %17530 = vst [vmem:[#allocation100_spill] sm:$0xff] %v13664_v48  ;;  %v757_v33 = vadd.f32 %v756_v11, %v631_v34  ;;  %17531 = vst [vmem:[#allocation101_spill] sm:$0xff] %v13672_v3  ;;  %v13676_v25 = vunpack.c.l.bf16 %v410_v54  ;;  %v624_v29 = vmul.f32 %v13662_v56, %v13662_v56  ;;  %v1135_v55 = vld [vmem:[#allocation5 + $0x160] sm:$0xff]  ;;  %v10921_v44 = vcombine.high %v1147_v28, %v1151_v15 }
  0xdb   : > { %v736_v53 = vadd.f32 %v735_v59, %v613_v21  ;;  %v747_v51 = vadd.f32 %v622_v36, %v621_v8  ;;  %v10920_v37 = vcombine.low %v1147_v28, %v1151_v15  ;;  %v11049_v57 = vcombine.high %v1275_v14, %v1279_v52  ;;  %v1263_v11 = vld [vmem:[#allocation5 + $0x560] sm:$0xff] }
  0xdc   : > { %17532 = vst [vmem:[#allocation102_spill] sm:$0xff] %v13676_v25  ;;  %v758_v18 = vadd.f32 %v757_v33, %v632_v61  ;;  %v625_v24 = vmul.f32 %v13664_v48, %v13664_v48  ;;  %v11048_v21 = vcombine.low %v1275_v14, %v1279_v52  ;;  %v10913_v54 = vcombine.high %v1139_v50, %v1143_v58  ;;  %v1123_v33 = vld [vmem:[#allocation5 + $0x100] sm:$0xff] }
  0xdd   : > { %737 = vadd.xlane.f32.xlu0 %v736_v53  ;;  %v748_v34 = vadd.f32 %v747_v51, %v623_v60  ;;  %v626_v40 = vmul.f32 %v13672_v3, %v13672_v3  ;;  %3779 = vmatprep.subr.bf16.mxu0 %v10921_v44  ;;  %v11041_v8 = vcombine.high %v1267_v13, %v1271_v20  ;;  %v1127_v61 = vld [vmem:[#allocation5 + $0x120] sm:$0xff] }
  0xde   : > { %v759_v59 = vadd.f32 %v758_v18, %v633_v63  ;;  %3892 = vmatprep.subr.bf16.mxu1 %v11049_v57  ;;  %3780 = vmatpush1.bf16.msra.mxu0 %v10920_v37  ;;  %v10912_v28 = vcombine.low %v1139_v50, %v1143_v58  ;;  %v11040_v15 = vcombine.low %v1267_v13, %v1271_v20  ;;  %v1251_v52 = vld [vmem:[#allocation5 + $0x500] sm:$0xff] }
  0xdf   : > { %v749_v36 = vadd.f32 %v748_v34, %v624_v29  ;;  %3893 = vmatpush1.bf16.msra.mxu1 %v11048_v21  ;;  %3781 = vmatprep.subr.bf16.mxu0 %v10913_v54  ;;  %v10905_v51 = vcombine.high %v1131_v17, %v1135_v55  ;;  %v11033_v14 = vcombine.high %v1259_v30, %v1263_v11  ;;  %v1255_v18 = vld [vmem:[#allocation5 + $0x520] sm:$0xff] }
  0xe0   : > { %v760_v53 = vadd.f32 %v759_v59, %v634_v45  ;;  %3894 = vmatprep.subr.bf16.mxu1 %v11041_v8  ;;  %v627_v63 = vmul.f32 %v13676_v25, %v13676_v25  ;;  %v10904_v37 = vcombine.low %v1131_v17, %v1135_v55  ;;  %v1115_v50 = vld [vmem:[#allocation5 + $0xc0] sm:$0xff]  ;;  %v11032_v20 = vcombine.low %v1259_v30, %v1263_v11 }
  0xe1   : > { %v750_v44 = vadd.f32 %v749_v36, %v625_v24  ;;  %v1119_v13 = vld [vmem:[#allocation5 + $0xe0] sm:$0xff]  ;;  %v10897_v45 = vcombine.high %v1123_v33, %v1127_v61  ;;  %v11025_v34 = vcombine.high %v1251_v52, %v1255_v18  ;;  %v10896_v21 = vcombine.low %v1123_v33, %v1127_v61 }
  0xe2   : > { %761 = vadd.xlane.f32.xlu1 %v760_v53  ;;  %3782 = vmatpush1.bf16.msra.mxu0 %v10912_v28  ;;  %v1243_v58 = vld [vmem:[#allocation5 + $0x4c0] sm:$0xff]  ;;  %v10889_v59 = vcombine.high %v1115_v50, %v1119_v13  ;;  %v10888_v30 = vcombine.low %v1115_v50, %v1119_v13 }
  0xe3   : > { %v751_v57 = vadd.f32 %v750_v44, %v626_v40  ;;  %3895 = vmatpush1.bf16.msra.mxu1 %v11040_v15  ;;  %3783 = vmatprep.subr.bf16.mxu0 %v10905_v51  ;;  %v1247_v60 = vld [vmem:[#allocation5 + $0x4e0] sm:$0xff]  ;;  %v11024_v40 = vcombine.low %v1251_v52, %v1255_v18 }
  0xe4   : > { %3896 = vmatprep.subr.bf16.mxu1 %v11033_v14  ;;  %v1107_v54 = vld [vmem:[#allocation5 + $0x80] sm:$0xff]  ;;  %v11017_v8 = vcombine.high %v1243_v58, %v1247_v60  ;;  %v11016_v28 = vcombine.low %v1243_v58, %v1247_v60 }
  0xe5   : > { %v752_v29 = vadd.f32 %v751_v57, %v627_v63  ;;  %v1111_v24 = vld [vmem:[#allocation5 + $0xa0] sm:$0xff] }
  0xe6   : > { %3784 = vmatpush1.bf16.msra.mxu0 %v10904_v37  ;;  %v1235_v17 = vld [vmem:[#allocation5 + $0x480] sm:$0xff]  ;;  %v10881_v15 = vcombine.high %v1107_v54, %v1111_v24  ;;  %v10880_v51 = vcombine.low %v1107_v54, %v1111_v24 }
  0xe7   : > { %753 = vadd.xlane.f32.xlu0 %v752_v29  ;;  %3897 = vmatpush1.bf16.msra.mxu1 %v11032_v20  ;;  %v1239_v55 = vld [vmem:[#allocation5 + $0x4a0] sm:$0xff] }
  0xe8   : > { %3785 = vmatprep.subr.bf16.mxu0 %v10897_v45  ;;  %3898 = vmatprep.subr.bf16.mxu1 %v11025_v34  ;;  %v1099_v11 = vld [vmem:[#allocation5 + $0x40] sm:$0xff]  ;;  %v11009_v61 = vcombine.high %v1235_v17, %v1239_v55  ;;  %v11008_v18 = vcombine.low %v1235_v17, %v1239_v55 }
  0xe9   : > { %v1103_v36 = vld [vmem:[#allocation5 + $0x60] sm:$0xff] }
  0xea   : > { %3786 = vmatpush1.bf16.msra.mxu0 %v10896_v21  ;;  %v1227_v53 = vld [vmem:[#allocation5 + $0x440] sm:$0xff]  ;;  %v10873_v63 = vcombine.high %v1099_v11, %v1103_v36  ;;  %v10872_v45 = vcombine.low %v1099_v11, %v1103_v36 }
  0xeb   : > { %3899 = vmatpush1.bf16.msra.mxu1 %v11024_v40  ;;  %3787 = vmatprep.subr.bf16.mxu0 %v10889_v59  ;;  %v1231_v33 = vld [vmem:[#allocation5 + $0x460] sm:$0xff] }
  0xec   : > { %3900 = vmatprep.subr.bf16.mxu1 %v11017_v8  ;;  %v1091_v14 = vld [vmem:[#allocation5] sm:$0xff]  ;;  %v11001_v13 = vcombine.high %v1227_v53, %v1231_v33  ;;  %v11000_v29 = vcombine.low %v1227_v53, %v1231_v33 }
  0xed   : > { %v1095_v52 = vld [vmem:[#allocation5 + $0x20] sm:$0xff] }
  0xee   : > { %3788 = vmatpush1.bf16.msra.mxu0 %v10888_v30  ;;  %v1219_v44 = vld [vmem:[#allocation5 + $0x400] sm:$0xff]  ;;  %v10865_v34 = vcombine.high %v1091_v14, %v1095_v52  ;;  %v10864_v40 = vcombine.low %v1091_v14, %v1095_v52 }
  0xef   : > { %3901 = vmatpush1.bf16.msra.mxu1 %v11016_v28  ;;  %3789 = vmatprep.subr.bf16.mxu0 %v10881_v15  ;;  %v1223_v57 = vld [vmem:[#allocation5 + $0x420] sm:$0xff] }
  0xf0   : > { %v13686_v37 = vld [vmem:[#allocation5 + $0x9c0] sm:$0xff]  ;;  %3902 = vmatprep.subr.bf16.mxu1 %v11009_v61  ;;  %v10993_v24 = vcombine.high %v1219_v44, %v1223_v57  ;;  %v10992_v55 = vcombine.low %v1219_v44, %v1223_v57 }
  0xf1   : > { %v13688_v50 = vld [vmem:[#allocation5 + $0x9e0] sm:$0xff] }
  0xf2   : > { %3790 = vmatpush1.bf16.msra.mxu0 %v10880_v51  ;;  %v1211_v58 = vld [vmem:[#allocation5 + $0x3c0] sm:$0xff] }
  0xf3   : > { %v1215_v60 = vld [vmem:[#allocation5 + $0x3e0] sm:$0xff]  ;;  %3903 = vmatpush1.bf16.msra.mxu1 %v11008_v18  ;;  %3791 = vmatprep.subr.bf16.mxu0 %v10873_v63 }
  0xf4   : > { %v1339_v21 = vld [vmem:[#allocation5 + $0x7c0] sm:$0xff]  ;;  %3904 = vmatprep.subr.bf16.mxu1 %v11001_v13  ;;  %v10985_v8 = vcombine.high %v1211_v58, %v1215_v60  ;;  %v10984_v28 = vcombine.low %v1211_v58, %v1215_v60 }
  0xf5   : > { %v1343_v54 = vld [vmem:[#allocation5 + $0x7e0] sm:$0xff] }
  0xf6   : > { %3792 = vmatpush1.bf16.msra.mxu0 %v10872_v45  ;;  %v1203_v59 = vld [vmem:[#allocation5 + $0x380] sm:$0xff]  ;;  %v11113_v36 = vcombine.high %v1339_v21, %v1343_v54  ;;  %v11112_v33 = vcombine.low %v1339_v21, %v1343_v54 }
  0xf7   : > { %v1207_v17 = vld [vmem:[#allocation5 + $0x3a0] sm:$0xff]  ;;  %3905 = vmatpush1.bf16.msra.mxu1 %v11000_v29  ;;  %3793 = vmatprep.subr.bf16.mxu0 %v10865_v34 }
  0xf8   : > { %v1331_v30 = vld [vmem:[#allocation5 + $0x780] sm:$0xff]  ;;  %3906 = vmatprep.subr.bf16.mxu1 %v10993_v24  ;;  %v10977_v61 = vcombine.high %v1203_v59, %v1207_v17  ;;  %v10976_v18 = vcombine.low %v1203_v59, %v1207_v17 }
  0xf9   : > { %v1335_v11 = vld [vmem:[#allocation5 + $0x7a0] sm:$0xff] }
  0xfa   : > { %3794 = vmatpush1.bf16.msra.mxu0 %v10864_v40  ;;  %v1195_v15 = vld [vmem:[#allocation5 + $0x340] sm:$0xff]  ;;  %v11105_v52 = vcombine.high %v1331_v30, %v1335_v11  ;;  %v11104_v57 = vcombine.low %v1331_v30, %v1335_v11 }
  0xfb   : > { %v1199_v53 = vld [vmem:[#allocation5 + $0x360] sm:$0xff]  ;;  %3907 = vmatpush1.bf16.msra.mxu1 %v10992_v55  ;;  %3795 = vmatprep.subr.bf16.mxu0 %v10985_v8 }
  0xfc   : > { %v1323_v51 = vld [vmem:[#allocation5 + $0x740] sm:$0xff]  ;;  %3908 = vmatprep.subr.bf16.mxu1 %v11113_v36  ;;  %v10969_v13 = vcombine.high %v1195_v15, %v1199_v53  ;;  %v10968_v29 = vcombine.low %v1195_v15, %v1199_v53 }
  0xfd   : > { %v1327_v14 = vld [vmem:[#allocation5 + $0x760] sm:$0xff] }
  0xfe   : > { %3796 = vmatpush2.bf16.msra.mxu0 %v10984_v28  ;;  %v1187_v63 = vld [vmem:[#allocation5 + $0x300] sm:$0xff]  ;;  %v11097_v60 = vcombine.high %v1323_v51, %v1327_v14  ;;  %v11096_v54 = vcombine.low %v1323_v51, %v1327_v14 }
  0xff   : > { %v1191_v44 = vld [vmem:[#allocation5 + $0x320] sm:$0xff]  ;;  %3909 = vmatpush2.bf16.msra.mxu1 %v11112_v33  ;;  %3797 = vmatprep.subr.bf16.mxu0 %v10977_v61 }
 0x100   : > { %v1315_v45 = vld [vmem:[#allocation5 + $0x700] sm:$0xff]  ;;  %3910 = vmatprep.subr.bf16.mxu1 %v11105_v52  ;;  %v10961_v24 = vcombine.high %v1187_v63, %v1191_v44  ;;  %v10960_v55 = vcombine.low %v1187_v63, %v1191_v44 }
 0x101   : > { %v1319_v58 = vld [vmem:[#allocation5 + $0x720] sm:$0xff] }
 0x102   : > { %3798 = vmatpush2.bf16.msra.mxu0 %v10976_v18  ;;  %v1179_v34 = vld [vmem:[#allocation5 + $0x2c0] sm:$0xff]  ;;  %v11089_v17 = vcombine.high %v1315_v45, %v1319_v58  ;;  %v11088_v11 = vcombine.low %v1315_v45, %v1319_v58 }
 0x103   : > { %v1183_v21 = vld [vmem:[#allocation5 + $0x2e0] sm:$0xff]  ;;  %3911 = vmatpush2.bf16.msra.mxu1 %v11104_v57  ;;  %3799 = vmatprep.subr.bf16.mxu0 %v10969_v13 }
 0x104   : > { %v1307_v40 = vld [vmem:[#allocation5 + $0x6c0] sm:$0xff]  ;;  %3912 = vmatprep.subr.bf16.mxu1 %v11097_v60  ;;  %v10953_v36 = vcombine.high %v1179_v34, %v1183_v21  ;;  %v10952_v33 = vcombine.low %v1179_v34, %v1183_v21 }
 0x105   : > { %v1311_v59 = vld [vmem:[#allocation5 + $0x6e0] sm:$0xff] }
 0x106   : > { %3800 = vmatpush2.bf16.msra.mxu0 %v10968_v29  ;;  %v1171_v8 = vld [vmem:[#allocation5 + $0x280] sm:$0xff]  ;;  %v11081_v53 = vcombine.high %v1307_v40, %v1311_v59  ;;  %v11080_v14 = vcombine.low %v1307_v40, %v1311_v59 }
 0x107   : > { %v1175_v30 = vld [vmem:[#allocation5 + $0x2a0] sm:$0xff]  ;;  %3913 = vmatpush2.bf16.msra.mxu1 %v11096_v54  ;;  %3801 = vmatprep.subr.bf16.mxu0 %v10961_v24 }
 0x108   : > { %v1299_v28 = vld [vmem:[#allocation5 + $0x680] sm:$0xff]  ;;  %3914 = vmatprep.subr.bf16.mxu1 %v11089_v17  ;;  %v10945_v52 = vcombine.high %v1171_v8, %v1175_v30  ;;  %v10944_v57 = vcombine.low %v1171_v8, %v1175_v30 }
 0x109   : > { %v1303_v15 = vld [vmem:[#allocation5 + $0x6a0] sm:$0xff] }
 0x10a   : > { %3802 = vmatpush2.bf16.msra.mxu0 %v10960_v55  ;;  %v1163_v61 = vld [vmem:[#allocation5 + $0x240] sm:$0xff]  ;;  %v11073_v44 = vcombine.high %v1299_v28, %v1303_v15  ;;  %v11072_v58 = vcombine.low %v1299_v28, %v1303_v15 }
 0x10b   : > { %v1167_v51 = vld [vmem:[#allocation5 + $0x260] sm:$0xff]  ;;  %3915 = vmatpush2.bf16.msra.mxu1 %v11088_v11  ;;  %3803 = vmatprep.subr.bf16.mxu0 %v10953_v36  ;;  %v11177_v36 = vcombine.high %v13686_v37, %v13688_v50 }
 0x10c   : > { %v1291_v18 = vld [vmem:[#allocation5 + $0x640] sm:$0xff]  ;;  %3916 = vmatprep.subr.bf16.mxu1 %v11081_v53  ;;  %v10937_v60 = vcombine.high %v1163_v61, %v1167_v51  ;;  %v10936_v59 = vcombine.low %v1163_v61, %v1167_v51 }
 0x10d   : > { %v1295_v63 = vld [vmem:[#allocation5 + $0x660] sm:$0xff] }
 0x10e   : > { %3804 = vmatpush2.bf16.msra.mxu0 %v10952_v33  ;;  %v1155_v13 = vld [vmem:[#allocation5 + $0x200] sm:$0xff]  ;;  %v11065_v54 = vcombine.high %v1291_v18, %v1295_v63  ;;  %v11064_v17 = vcombine.low %v1291_v18, %v1295_v63 }
 0x10f   : > { %v1159_v45 = vld [vmem:[#allocation5 + $0x220] sm:$0xff]  ;;  %3917 = vmatpush2.bf16.msra.mxu1 %v11080_v14  ;;  %3805 = vmatprep.subr.bf16.mxu0 %v10945_v52 }
 0x110   : > { %v1283_v29 = vld [vmem:[#allocation5 + $0x600] sm:$0xff]  ;;  %3918 = vmatprep.subr.bf16.mxu1 %v11073_v44  ;;  %v10929_v55 = vcombine.high %v1155_v13, %v1159_v45  ;;  %v10928_v30 = vcombine.low %v1155_v13, %v1159_v45 }
 0x111   : > { %v13692_v34 = vld [vmem:[#allocation5 + $0xdc0] sm:$0xff] }
 0x112   : > { %v13694_v21 = vld [vmem:[#allocation5 + $0xde0] sm:$0xff]  ;;  %3806 = vmatpush2.bf16.msra.mxu0 %v10944_v57 }
 0x113   : > { %v1287_v24 = vld [vmem:[#allocation5 + $0x620] sm:$0xff]  ;;  %3919 = vmatpush2.bf16.msra.mxu1 %v11072_v58  ;;  %3807 = vmatprep.subr.bf16.mxu0 %v10937_v60  ;;  %v11305_v28 = vcombine.high %v13692_v34, %v13694_v21 }
 0x114   : > { %3920 = vmatprep.subr.bf16.mxu1 %v11065_v54  ;;  %v11057_v8 = vcombine.high %v1283_v29, %v1287_v24  ;;  %v11056_v11 = vcombine.low %v1283_v29, %v1287_v24  ;;  %v13707_v45 = vld [vmem:[#allocation5 + $0x980] sm:$0xff] }
 0x115   : > { %v13709_v58 = vld [vmem:[#allocation5 + $0x9a0] sm:$0xff] }
 0x116   : > { %3808 = vmatpush2.bf16.msra.mxu0 %v10936_v59  ;;  %v13712_v54 = vld [vmem:[#allocation5 + $0x940] sm:$0xff] }
 0x117   : > { %3921 = vmatpush2.bf16.msra.mxu1 %v11064_v17  ;;  %3809 = vmatprep.subr.bf16.mxu0 %v10929_v55  ;;  %v13714_v59 = vld [vmem:[#allocation5 + $0x960] sm:$0xff] }
 0x118   : > { %3922 = vmatprep.subr.bf16.mxu1 %v11057_v8  ;;  %v13716_v55 = vld [vmem:[#allocation5 + $0x900] sm:$0xff] }
 0x119   : > { %17533 = vst [vmem:[#allocation103_spill] sm:$0xff] %v13716_v55  ;;  %v13718_v8 = vld [vmem:[#allocation5 + $0x920] sm:$0xff] }
 0x11a   : > { %3810 = vmatpush2.bf16.msra.mxu0 %v10928_v30  ;;  %17534 = vst [vmem:[#allocation104_spill] sm:$0xff] %v13718_v8  ;;  %v13757_v20 = vld [vmem:[#allocation5 + $0xbe0] sm:$0xff] }
 0x11b   : > { %3923 = vmatpush2.bf16.msra.mxu1 %v11056_v11  ;;  %4005 = vmatprep.subr.bf16.mxu0 %v11177_v36  ;;  %v13720_v36 = vld [vmem:[#allocation5 + $0x8c0] sm:$0xff]  ;;  %17544 = vst [vmem:[#allocation114_spill] sm:$0xff] %v13757_v20 }
 0x11c   : > { %4118 = vmatprep.subr.bf16.mxu1 %v11305_v28  ;;  %17535 = vst [vmem:[#allocation105_spill] sm:$0xff] %v13720_v36  ;;  %v13722_v28 = vld [vmem:[#allocation5 + $0x8e0] sm:$0xff] }
 0x11d   : > { %17536 = vst [vmem:[#allocation106_spill] sm:$0xff] %v13722_v28  ;;  %v13765_v25 = vld [vmem:[#allocation5 + $0xd60] sm:$0xff] }
 0x11e   : > { %v13778_v56 = vld [vmem:[#allocation5 + $0xd00] sm:$0xff] }
 0x11f   : > { %17545 = vst [vmem:[#allocation115_spill] sm:$0xff] %v13778_v56  ;;  %v13782_v28 = vld [vmem:[#allocation5 + $0xd20] sm:$0xff] }
 0x120   : > { %17546 = vst [vmem:[#allocation116_spill] sm:$0xff] %v13782_v28  ;;  %v13786_v36 = vld [vmem:[#allocation5 + $0xcc0] sm:$0xff] }
 0x121   : > { %17547 = vst [vmem:[#allocation117_spill] sm:$0xff] %v13786_v36  ;;  %v13836_v20 = vld [vmem:[#allocation5 + $0xc00] sm:$0xff] }
 0x122   : > { %17555 = vst [vmem:[#allocation125_spill] sm:$0xff] %v13836_v20  ;;  %v13843_v28 = vld [vmem:[#allocation5 + $0xc20] sm:$0xff] }
 0x123   : > { %17556 = vst [vmem:[#allocation126_spill] sm:$0xff] %v13843_v28 }
 0x127   : > { %v658_v15 = vpop.xlane.xlu1 %657 }
 0x128   : > { %12391 = vrsqrt.f32 %v658_v15  ;;  %vm779_vm0 = vcmp.eq.f32.partialorder %v658_v15, inf  ;;  %v782_v52 = vand.u32 2147483648, %v658_v15  ;;  %vm781_vm1 = vcmp.eq.f32.partialorder %v658_v15, 0.0 }
 0x12a   : > { %v642_v53 = vpop.xlane.xlu0 %641 }
 0x12b   : > { %12393 = vrsqrt.f32 %v642_v53  ;;  %vm765_vm2 = vcmp.eq.f32.partialorder %v642_v53, inf  ;;  %v768_v29 = vand.u32 2147483648, %v642_v53  ;;  %vm767_vm3 = vcmp.eq.f32.partialorder %v642_v53, 0.0 }
 0x12e   : > { %v666_v33 = vpop.xlane.xlu1 %665 }
 0x12f   : > { %12395 = vrsqrt.f32 %v666_v33  ;;  %vm786_vm4 = vcmp.eq.f32.partialorder %v666_v33, inf  ;;  %vm788_vm5 = vcmp.eq.f32.partialorder %v666_v33, 0.0 }
 0x133   : > { %v13702_v61 = vpop.xlane.xlu0 %649 }
 0x134   : > { %12397 = vrsqrt.f32 %v13702_v61  ;;  %vm772_vm6 = vcmp.eq.f32.partialorder %v13702_v61, inf  ;;  %v775_v40 = vand.u32 2147483648, %v13702_v61  ;;  %vm774_vm7 = vcmp.eq.f32.partialorder %v13702_v61, 0.0 }
 0x135   : > { %v12392_v51 = vpop.eup %12391 }
 0x136   : > { %v778_v14 = vmul.f32 %v12392_v51, %v658_v15  ;;  %v13726_v51 = vld [vmem:[#allocation5 + $0x8a0] sm:$0xff] }
 0x137   : > { %17538 = vst [vmem:[#allocation108_spill] sm:$0xff] %v13726_v51 }
 0x138   : > { %v12394_v18 = vpop.eup %12393  ;;  %v780_v63 = vsel %vm779_vm0, %v658_v15, %v778_v14  ;;  %v13724_v15 = vld [vmem:[#allocation5 + $0x880] sm:$0xff] }
 0x139   : > { %v783_v44 = vsel %vm781_vm1, %v782_v52, %v780_v63  ;;  %v764_v57 = vmul.f32 %v12394_v18, %v642_v53  ;;  %v13705_v13 = vpop.xlane.xlu1 %681  ;;  %17537 = vst [vmem:[#allocation107_spill] sm:$0xff] %v13724_v15  ;;  %v789_v18 = vand.u32 2147483648, %v666_v33  ;;  %v13747_v52 = vld [vmem:[#allocation5 + $0xd80] sm:$0xff] }
 0x13a   : > { %v877_v60 = vadd.f32 1e-08, %v783_v44  ;;  %12399 = vrsqrt.f32 %v13705_v13  ;;  %v13749_v44 = vld [vmem:[#allocation5 + $0xda0] sm:$0xff]  ;;  %vm800_vm8 = vcmp.eq.f32.partialorder %v13705_v13, inf  ;;  %vm802_vm9 = vcmp.eq.f32.partialorder %v13705_v13, 0.0 }
 0x13b   : > { %v766_v24 = vsel %vm765_vm2, %v642_v53, %v764_v57  ;;  %v13736_v57 = vld [vmem:[#allocation5 + $0x840] sm:$0xff] }
 0x13c   : > { %v769_v17 = vsel %vm767_vm3, %v768_v29, %v766_v24  ;;  %v12396_v30 = vpop.eup %12395  ;;  %12401 = vrcp.f32 %v877_v60  ;;  %17539 = vst [vmem:[#allocation109_spill] sm:$0xff] %v13736_v57  ;;  %v13738_v60 = vld [vmem:[#allocation5 + $0x860] sm:$0xff] }
 0x13d   : > { %v875_v11 = vadd.f32 1e-08, %v769_v17  ;;  %v785_v14 = vmul.f32 %v12396_v30, %v666_v33  ;;  %17540 = vst [vmem:[#allocation110_spill] sm:$0xff] %v13738_v60  ;;  %v13743_v17 = vld [vmem:[#allocation5 + $0x800] sm:$0xff] }
 0x13e   : > { %v13728_v53 = vpop.xlane.xlu0 %673  ;;  %17541 = vst [vmem:[#allocation111_spill] sm:$0xff] %v13743_v17  ;;  %v13745_v30 = vld [vmem:[#allocation5 + $0x820] sm:$0xff] }
 0x13f   : > { %v787_v29 = vsel %vm786_vm4, %v666_v33, %v785_v14  ;;  %12403 = vrsqrt.f32 %v13728_v53  ;;  %17542 = vst [vmem:[#allocation112_spill] sm:$0xff] %v13745_v30  ;;  %v13755_v14 = vld [vmem:[#allocation5 + $0xbc0] sm:$0xff]  ;;  %vm793_vm10 = vcmp.eq.f32.partialorder %v13728_v53, inf  ;;  %vm795_vm11 = vcmp.eq.f32.partialorder %v13728_v53, 0.0 }
 0x140   : > { %12405 = vrcp.f32 %v875_v11  ;;  %v790_v63 = vsel %vm788_vm5, %v789_v18, %v787_v29  ;;  %17543 = vst [vmem:[#allocation113_spill] sm:$0xff] %v13755_v14  ;;  %v13763_v29 = vld [vmem:[#allocation5 + $0xd40] sm:$0xff] }
 0x141   : > { %v12398_v24 = vpop.eup %12397  ;;  %v878_v3 = vadd.f32 1e-08, %v790_v63  ;;  %v13788_v63 = vld [vmem:[#allocation5 + $0xce0] sm:$0xff] }
 0x142   : > { %v771_v33 = vmul.f32 %v12398_v24, %v13702_v61  ;;  %17548 = vst [vmem:[#allocation118_spill] sm:$0xff] %v13788_v63  ;;  %v13795_v18 = vld [vmem:[#allocation5 + $0xb80] sm:$0xff] }
 0x143   : > { %v13770_v48 = vpop.xlane.xlu1 %697  ;;  %12407 = vrcp.f32 %v878_v3  ;;  %17549 = vst [vmem:[#allocation119_spill] sm:$0xff] %v13795_v18  ;;  %v13797_v60 = vld [vmem:[#allocation5 + $0xba0] sm:$0xff] }
 0x144   : > { %v773_v11 = vsel %vm772_vm6, %v13702_v61, %v771_v33  ;;  %12409 = vrsqrt.f32 %v13770_v48  ;;  %17550 = vst [vmem:[#allocation120_spill] sm:$0xff] %v13797_v60  ;;  %v13805_v61 = vld [vmem:[#allocation5 + $0xb40] sm:$0xff]  ;;  %vm814_vm12 = vcmp.eq.f32.partialorder %v13770_v48, inf  ;;  %vm816_vm13 = vcmp.eq.f32.partialorder %v13770_v48, 0.0 }
 0x145   : > { %v776_v57 = vsel %vm774_vm7, %v775_v40, %v773_v11  ;;  %17551 = vst [vmem:[#allocation121_spill] sm:$0xff] %v13805_v61  ;;  %v13807_v15 = vld [vmem:[#allocation5 + $0xb60] sm:$0xff] }
 0x146   : > { %17552 = vst [vmem:[#allocation122_spill] sm:$0xff] %v13807_v15  ;;  %v876_v3 = vadd.f32 1e-08, %v776_v57  ;;  %v13824_v30 = vld [vmem:[#allocation5 + $0xc80] sm:$0xff] }
 0x147   : > { %v12400_v8 = vpop.eup %12399  ;;  %v13826_v14 = vld [vmem:[#allocation5 + $0xca0] sm:$0xff] }
 0x148   : > { %v799_v51 = vmul.f32 %v12400_v8, %v13705_v13  ;;  %v13816_v24 = vpop.xlane.xlu0 %689  ;;  %12411 = vrcp.f32 %v876_v3  ;;  %v803_v8 = vand.u32 2147483648, %v13705_v13  ;;  %v13832_v11 = vld [vmem:[#allocation5 + $0xc40] sm:$0xff]  ;;  %v796_v3 = vand.u32 2147483648, %v13728_v53 }
 0x149   : > { %17553 = vst [vmem:[#allocation123_spill] sm:$0xff] %v13832_v11  ;;  %v13834_v33 = vld [vmem:[#allocation5 + $0xc60] sm:$0xff]  ;;  %v12402_v17 = vpop.eup %12401  ;;  %12413 = vrsqrt.f32 %v13816_v24  ;;  %vm807_vm14 = vcmp.eq.f32.partialorder %v13816_v24, inf  ;;  %vm809_vm15 = vcmp.eq.f32.partialorder %v13816_v24, 0.0  ;;  %v810_v15 = vand.u32 2147483648, %v13816_v24 }
 0x14a   : > { %17554 = vst [vmem:[#allocation124_spill] sm:$0xff] %v13834_v33  ;;  %v801_v57 = vsel %vm800_vm8, %v13705_v13, %v799_v51 }
 0x14b   : > { %v804_v56 = vsel %vm802_vm9, %v803_v8, %v801_v57  ;;  %v13857_v8 = vmul.f32 5.0, %v12402_v17 }
 0x14c   : > { %v880_v51 = vadd.f32 1e-08, %v804_v56  ;;  %v12404_v57 = vpop.eup %12403  ;;  %v817_v56 = vand.u32 2147483648, %v13770_v48 }
 0x14d   : > { %v13860_v40 = vpop.xlane.xlu1 %713  ;;  %v12406_v36 = vpop.eup %12405  ;;  %v792_v13 = vmul.f32 %v12404_v57, %v13728_v53  ;;  %v938_v61 = vmul.f32 %v13857_v8, %v13188_v5  ;;  %v13889_v17 = vmul.f32 %v13857_v8, %v13190_v6  ;;  %v13897_v5 = vmul.f32 %v13857_v8, %v13197_v10 }
 0x14e   : > { %12415 = vrcp.f32 %v880_v51  ;;  %v907_v57 = vmul.f32 5.0, %v12406_v36  ;;  %vm828_vm0 = vcmp.eq.f32.partialorder %v13860_v40, inf  ;;  %vm830_vm1 = vcmp.eq.f32.partialorder %v13860_v40, 0.0 }
 0x14f   : > { %12417 = vrsqrt.f32 %v13860_v40  ;;  %v794_v63 = vsel %vm793_vm10, %v13728_v53, %v792_v13  ;;  %v940_v53 = vmul.f32 %v13857_v8, %v13192_v7  ;;  %v937_v13 = vmul.f32 %v13857_v8, %v13186_v4 }
 0x150   : > { %v12408_v51 = vpop.eup %12407  ;;  %v797_v55 = vsel %vm795_vm11, %v796_v3, %v794_v63  ;;  %v13903_v4 = vmul.f32 %v13857_v8, %v13195_v9  ;;  %v926_v10 = vmul.f32 %v907_v57, %v13219_v23  ;;  %v928_v9 = vmul.f32 %v907_v57, %v13233_v32 }
 0x151   : > { %v12410_v60 = vpop.eup %12409  ;;  %v879_v18 = vadd.f32 1e-08, %v797_v55  ;;  %v13891_v36 = vmul.f32 5.0, %v12408_v51  ;;  %v924_v55 = vmul.f32 %v907_v57, %v13213_v19  ;;  %v925_v51 = vmul.f32 %v907_v57, %v13217_v22 }
 0x152   : > { %v13881_v33 = vpop.xlane.xlu0 %705  ;;  %v813_v63 = vmul.f32 %v12410_v60, %v13770_v48  ;;  %v923_v60 = vmul.f32 %v907_v57, %v13200_v12  ;;  %v927_v7 = vmul.f32 %v907_v57, %v13224_v26  ;;  %v13922_v12 = vmul.f32 %v907_v57, %v13238_v35 }
 0x153   : > { %12419 = vrsqrt.f32 %v13881_v33  ;;  %v945_v19 = vmul.f32 %v13891_v36, %v13245_v41  ;;  %vm821_vm2 = vcmp.eq.f32.partialorder %v13881_v33, inf  ;;  %v947_v22 = vmul.f32 %v13891_v36, %v13249_v43 }
 0x154   : > { %12421 = vrcp.f32 %v879_v18  ;;  %v815_v6 = vsel %vm814_vm12, %v13770_v48, %v813_v63  ;;  %v944_v26 = vmul.f32 %v13891_v36, %v13242_v38  ;;  %vm823_vm3 = vcmp.eq.f32.partialorder %v13881_v33, 0.0 }
 0x155   : > { %v12412_v18 = vpop.eup %12411  ;;  %v818_v3 = vsel %vm816_vm13, %v817_v56, %v815_v6  ;;  %v946_v41 = vmul.f32 %v13891_v36, %v13247_v42 }
 0x156   : > { %v12414_v28 = vpop.eup %12413  ;;  %v908_v63 = vmul.f32 5.0, %v12412_v18  ;;  %v882_v20 = vadd.f32 1e-08, %v818_v3 }
 0x157   : > { %v13917_v11 = vpop.xlane.xlu1 %729  ;;  %v806_v23 = vmul.f32 %v12414_v28, %v13816_v24 }
 0x158   : > { %12423 = vrsqrt.f32 %v13917_v11  ;;  %v931_v32 = vmul.f32 %v908_v63, %v13276_v0  ;;  %v933_v35 = vmul.f32 %v908_v63, %v13280_v2  ;;  %v930_v28 = vmul.f32 %v908_v63, %v13274_v62 }
 0x159   : > { %12425 = vrcp.f32 %v882_v20  ;;  %v808_v48 = vsel %vm807_vm14, %v13816_v24, %v806_v23  ;;  %v932_v43 = vmul.f32 %v908_v63, %v13278_v1  ;;  %v935_v38 = vmul.f32 %v908_v63, %v13296_v27 }
 0x15a   : > { %v811_v56 = vsel %vm809_vm15, %v810_v15, %v808_v48  ;;  %v13944_v0 = vpack.c.bf16 %v931_v32, %v924_v55  ;;  %v13946_v2 = vpack.c.bf16 %v933_v35, %v926_v10  ;;  %v934_v42 = vmul.f32 %v908_v63, %v13286_v16  ;;  %v17571_v35 = vld [vmem:[#allocation21_spill] sm:$0xff] }
 0x15b   : > { %v12416_v20 = vpop.eup %12415  ;;  %v881_v18 = vadd.f32 1e-08, %v811_v56  ;;  %v13953_v62 = vpack.c.bf16 %v930_v28, %v923_v60  ;;  %v13955_v1 = vpack.c.bf16 %v932_v43, %v925_v51  ;;  %v13961_v15 = vpack.c.bf16 %v945_v19, %v938_v61 }
 0x15c   : > { %17557 = vst [vmem:[#allocation127_spill] sm:$0xff] %v13944_v0  ;;  %17558 = vst [vmem:[#allocation128_spill] sm:$0xff] %v13946_v2  ;;  %v12418_v57 = vpop.eup %12417  ;;  %v13949_v6 = vmul.f32 5.0, %v12416_v20  ;;  %v13951_v3 = vpop.xlane.xlu0 %721  ;;  %3811 = vmatprep.mubr.bf16.mxu0 %v13944_v0  ;;  %3924 = vmatprep.mubr.bf16.mxu1 %v13946_v2  ;;  %v949_v16 = vmul.f32 %v13891_v36, %v13255_v47  ;;  %v13967_v24 = vpack.c.bf16 %v947_v22, %v940_v53  ;;  %v17576_v20 = vld [vmem:[#allocation27_spill] sm:$0xff] }
 0x15d   : > { %17559 = vst [vmem:[#allocation129_spill] sm:$0xff] %v13953_v62  ;;  %17560 = vst [vmem:[#allocation130_spill] sm:$0xff] %v13955_v1  ;;  %v827_v27 = vmul.f32 %v12418_v57, %v13860_v40  ;;  %12427 = vrsqrt.f32 %v13951_v3  ;;  %3812 = vmatmul.mubr.bf16.vlgmr.msra.gmra.mxu0 %v13953_v62  ;;  %3925 = vmatmul.mubr.bf16.vlgmr.msra.gmra.mxu1 %v13955_v1  ;;  %v13969_v55 = vpack.c.bf16 %v944_v26, %v937_v13 }
 0x15e   : > { %17561 = vst [vmem:[#allocation131_spill] sm:$0xff] %v13961_v15  ;;  %12429 = vrcp.f32 %v881_v18  ;;  %17562 = vst [vmem:[#allocation132_spill] sm:$0xff] %v13967_v24  ;;  %v948_v10 = vmul.f32 %v13891_v36, %v13253_v46  ;;  %v824_v60 = vand.u32 2147483648, %v13881_v33  ;;  %v17563_v47 = vcombine.low %v13686_v37, %v13688_v50  ;;  %3821 = vmatprep.mubr.bf16.mxu0 %v13961_v15 }
 0x15f   : > { %v829_v61 = vsel %vm828_vm0, %v13860_v40, %v827_v27  ;;  %v13982_v53 = vpack.c.bf16 %v946_v41, %v13889_v17  ;;  %v959_v13 = vmul.f32 %v13949_v6, %v13307_v39  ;;  %v17564_v46 = vand.u32 2147483648, %v13860_v40  ;;  %3934 = vmatprep.mubr.bf16.mxu1 %v13967_v24  ;;  %v17579_v27 = vld [vmem:[#allocation26_spill] sm:$0xff] }
 0x160   : > { %4006 = vmatpush1.bf16.msra.mxu0 %v17563_v47  ;;  %v12420_v51 = vpop.eup %12419  ;;  %vm842_vm4 = vcmp.eq.f32.partialorder %v13917_v11, inf  ;;  %v17565_v37 = vcombine.low %v13692_v34, %v13694_v21  ;;  %v13995_v50 = vpack.c.bf16 %v935_v38, %v928_v9  ;;  %v13997_v17 = vpack.c.bf16 %v934_v42, %v927_v7 }
 0x161   : > { %v832_v19 = vsel %vm830_vm1, %v17564_v46, %v829_v61  ;;  %v12422_v23 = vpop.eup %12421  ;;  %v820_v22 = vmul.f32 %v12420_v51, %v13881_v33  ;;  %v14000_v26 = vpop.xlane.xlu1 %745  ;;  %v17568_v40 = vcombine.high %v13707_v45, %v13709_v58  ;;  %v17569_v32 = vcombine.high %v13747_v52, %v13749_v44  ;;  %v17580_v61 = vld [vmem:[#allocation28_spill] sm:$0xff] }
 0x162   : > { %4119 = vmatpush1.bf16.msra.mxu1 %v17565_v37  ;;  %17566 = vst [vmem:[#allocation133_spill] sm:$0xff] %v13995_v50  ;;  %17567 = vst [vmem:[#allocation134_spill] sm:$0xff] %v13997_v17  ;;  %v884_v39 = vadd.f32 1e-08, %v832_v19  ;;  %v936_v34 = vmul.f32 %v908_v63, %v13301_v31  ;;  %v14010_v21 = vpack.c.bf16 %v949_v16, %v13897_v5  ;;  %v14012_v7 = vmul.f32 5.0, %v12422_v23  ;;  %v17573_v5 = vld [vmem:[#allocation22_spill] sm:$0xff] }
 0x163   : > { %4007 = vmatprep.subr.bf16.mxu0 %v17568_v40  ;;  %4120 = vmatprep.subr.bf16.mxu1 %v17569_v32  ;;  %12431 = vrsqrt.f32 %v14000_v26  ;;  %v961_v9 = vmul.f32 %v13949_v6, %v13314_v49  ;;  %v958_v41 = vmul.f32 %v13949_v6, %v17571_v35  ;;  %v822_v48 = vsel %vm821_vm2, %v13881_v33, %v820_v22  ;;  %v14045_v33 = vld [vmem:[#allocation5 + $0x5e8] sm:$0xff] }
 0x164   : > { %17570 = vst [vmem:[#allocation135_spill] sm:$0xff] %v14010_v21  ;;  %12433 = vrcp.f32 %v884_v39  ;;  %v17572_v31 = vcombine.low %v13707_v45, %v13709_v58  ;;  %v960_v63 = vmul.f32 %v13949_v6, %v17573_v5  ;;  %v14028_v28 = vpack.c.bf16 %v936_v34, %v13922_v12  ;;  %v17577_v45 = vld [vmem:[#allocation29_spill] sm:$0xff]  ;;  %v14043_v12 = vld [vmem:[#allocation5 + $0x5c8] sm:$0xff]  ;;  %v17584_v39 = vld [vmem:[#allocation19_spill] sm:$0xff] }
 0x165   : > { %v825_v49 = vsel %vm823_vm3, %v824_v60, %v822_v48  ;;  %v845_v43 = vand.u32 2147483648, %v13917_v11  ;;  %v17575_v38 = vcombine.high %v13712_v54, %v13714_v59  ;;  %v952_v56 = vmul.f32 %v14012_v7, %v17576_v20  ;;  %v12424_v57 = vpop.eup %12423  ;;  %3822 = vmatmul.mubr.bf16.gmra.mxu0 %v13969_v55  ;;  %3935 = vmatmul.mubr.bf16.gmra.mxu1 %v13982_v53  ;;  %v17586_v40 = vld [vmem:[#allocation104_spill] sm:$0xff] }
 0x166   : > { %4008 = vmatpush1.bf16.msra.mxu0 %v17572_v31  ;;  %17574 = vst [vmem:[#allocation21_spill] sm:$0xff] %v14028_v28  ;;  %v954_v58 = vmul.f32 %v14012_v7, %v17577_v45  ;;  %v17578_v42 = vcombine.low %v13747_v52, %v13749_v44  ;;  %v883_v18 = vadd.f32 1e-08, %v825_v49  ;;  %v951_v16 = vmul.f32 %v14012_v7, %v17579_v27  ;;  %v12426_v52 = vpop.eup %12425  ;;  %v14059_v46 = vpop.xlane.xlu0 %737  ;;  %v17589_v31 = vld [vmem:[#allocation34_spill] sm:$0xff]  ;;  %v17591_v49 = vld [vmem:[#allocation20_spill] sm:$0xff] }
 0x167   : > { %4009 = vmatprep.subr.bf16.mxu0 %v17575_v38  ;;  %v953_v60 = vmul.f32 %v14012_v7, %v17580_v61  ;;  %v17581_v47 = vcombine.high %v13763_v29, %v13765_v25  ;;  %v14055_v51 = vpack.c.bf16 %v948_v10, %v13903_v4  ;;  %v841_v44 = vmul.f32 %v12424_v57, %v13917_v11  ;;  %v17594_v45 = vld [vmem:[#allocation116_spill] sm:$0xff]  ;;  %v17599_v27 = vld [vmem:[#allocation106_spill] sm:$0xff] }
 0x168   : > { %4121 = vmatpush1.bf16.msra.mxu1 %v17578_v42  ;;  %vm844_vm5 = vcmp.eq.f32.partialorder %v13917_v11, 0.0  ;;  %v14063_v19 = vpack.c.bf16 %v959_v13, %v952_v56  ;;  %v14065_v37 = vpack.c.bf16 %v961_v9, %v954_v58  ;;  %v14067_v23 = vmul.f32 5.0, %v12426_v52  ;;  %v17593_v56 = vld [vmem:[#allocation115_spill] sm:$0xff]  ;;  %v17597_v42 = vld [vmem:[#allocation24_spill] sm:$0xff] }
 0x169   : > { %4122 = vmatprep.subr.bf16.mxu1 %v17581_v47  ;;  %17582 = vst [vmem:[#allocation22_spill] sm:$0xff] %v14055_v51  ;;  %12435 = vrcp.f32 %v883_v18  ;;  %v17583_v4 = vcombine.low %v13712_v54, %v13714_v59  ;;  %v943_v22 = vmul.f32 %v13857_v8, %v17584_v39  ;;  %v843_v13 = vsel %vm842_vm4, %v13917_v11, %v841_v44  ;;  %v17585_v8 = vld [vmem:[#allocation103_spill] sm:$0xff]  ;;  %v17598_v18 = vld [vmem:[#allocation105_spill] sm:$0xff]  ;;  %v17601_v61 = vld [vmem:[#allocation36_spill] sm:$0xff] }
 0x16a   : > { %vm835_vm6 = vcmp.eq.f32.partialorder %v13951_v3, inf  ;;  %vm837_vm7 = vcmp.eq.f32.partialorder %v13951_v3, 0.0  ;;  %12437 = vrsqrt.f32 %v14059_v46  ;;  %3831 = vmatprep.mubr.bf16.mxu0 %v14063_v19  ;;  %3944 = vmatprep.mubr.bf16.mxu1 %v14065_v37  ;;  %v846_v54 = vsel %vm844_vm5, %v845_v43, %v843_v13  ;;  %v12428_v9 = vpop.eup %12427  ;;  %v17602_v47 = vld [vmem:[#allocation33_spill] sm:$0xff] }
 0x16b   : > { %4010 = vmatpush1.bf16.msra.mxu0 %v17583_v4  ;;  %v838_v59 = vand.u32 2147483648, %v13951_v3  ;;  %vm856_vm8 = vcmp.eq.f32.partialorder %v14000_v26, inf  ;;  %v17587_v32 = vcombine.high %v17585_v8, %v17586_v40  ;;  %v14091_v34 = vpack.c.bf16 %v958_v41, %v951_v16  ;;  %v12430_v38 = vpop.eup %12429  ;;  %v14104_v41 = vpop.xlane.xlu1 %761  ;;  %v17603_v4 = vld [vmem:[#allocation35_spill] sm:$0xff] }
 0x16c   : > { %v886_v35 = vadd.f32 1e-08, %v846_v54  ;;  %v14093_v48 = vpack.c.bf16 %v960_v63, %v953_v60  ;;  %v973_v5 = vmul.f32 %v14067_v23, %v17589_v31  ;;  %v17590_v11 = vcombine.low %v13763_v29, %v13765_v25  ;;  %v17596_v25 = vld [vmem:[#allocation31_spill] sm:$0xff] }
 0x16d   : > { %4011 = vmatprep.subr.bf16.mxu0 %v17587_v32  ;;  %v950_v43 = vmul.f32 %v13891_v36, %v17591_v49  ;;  %v834_v20 = vmul.f32 %v12428_v9, %v13951_v3  ;;  %vm858_vm9 = vcmp.eq.f32.partialorder %v14000_v26, 0.0  ;;  %v17592_v63 = vcombine.low %v17585_v8, %v17586_v40  ;;  %3832 = vmatmul.mubr.bf16.gmra.mxu0 %v14091_v34  ;;  %v17605_v40 = vld [vmem:[#allocation41_spill] sm:$0xff]  ;;  %v17606_v9 = vld [vmem:[#allocation43_spill] sm:$0xff]  ;;  %v17609_v49 = vld [vmem:[#allocation42_spill] sm:$0xff] }
 0x16e   : > { %17588 = vst [vmem:[#allocation27_spill] sm:$0xff] %v14093_v48  ;;  %4123 = vmatpush1.bf16.msra.mxu1 %v17590_v11  ;;  %v17595_v58 = vcombine.high %v17593_v56, %v17594_v45  ;;  %v956_v29 = vmul.f32 %v14012_v7, %v17596_v25  ;;  %v963_v36 = vmul.f32 %v13949_v6, %v17597_v42  ;;  %v14116_v57 = vmul.f32 5.0, %v12430_v38 }
 0x16f   : > { %4012 = vmatpush1.bf16.msra.mxu0 %v17592_v63  ;;  %12439 = vrcp.f32 %v886_v35  ;;  %v17600_v16 = vcombine.high %v17598_v18, %v17599_v27  ;;  %v975_v60 = vmul.f32 %v14067_v23, %v17601_v61  ;;  %v972_v52 = vmul.f32 %v14067_v23, %v17602_v47  ;;  %3945 = vmatmul.mubr.bf16.gmra.mxu1 %v14093_v48  ;;  %v17617_v47 = vld [vmem:[#allocation117_spill] sm:$0xff] }
 0x170   : > { %4124 = vmatprep.subr.bf16.mxu1 %v17595_v58  ;;  %v836_v44 = vsel %vm835_vm6, %v13951_v3, %v834_v20  ;;  %12441 = vrsqrt.f32 %v14104_v41  ;;  %v974_v39 = vmul.f32 %v14067_v23, %v17603_v4  ;;  %v14131_v13 = vpack.c.bf16 %v950_v43, %v943_v22  ;;  %v12432_v31 = vpop.eup %12431  ;;  %v17608_v3 = vld [vmem:[#allocation40_spill] sm:$0xff]  ;;  %v14156_v25 = vpop.xlane.xlu0 %753 }
 0x171   : > { %4013 = vmatprep.subr.bf16.mxu0 %v17600_v16  ;;  %v839_v54 = vsel %vm837_vm7, %v838_v59, %v836_v44  ;;  %v859_v8 = vand.u32 2147483648, %v14000_v26  ;;  %v966_v32 = vmul.f32 %v14116_v57, %v17605_v40  ;;  %v968_v35 = vmul.f32 %v14116_v57, %v17606_v9  ;;  %v12434_v63 = vpop.eup %12433  ;;  %v17615_v16 = vld [vmem:[#allocation108_spill] sm:$0xff]  ;;  %v17624_v9 = vld [vmem:[#allocation50_spill] sm:$0xff] }
 0x172   : > { %17604 = vst [vmem:[#allocation29_spill] sm:$0xff] %v14131_v13  ;;  %v885_v11 = vadd.f32 1e-08, %v839_v54  ;;  %v17607_v22 = vcombine.low %v17598_v18, %v17599_v27  ;;  %v965_v59 = vmul.f32 %v14116_v57, %v17608_v3  ;;  %v967_v43 = vmul.f32 %v14116_v57, %v17609_v49  ;;  %v17614_v27 = vld [vmem:[#allocation107_spill] sm:$0xff]  ;;  %v17623_v40 = vld [vmem:[#allocation48_spill] sm:$0xff] }
 0x173   : > { %v17610_v38 = vcombine.low %v17593_v56, %v17594_v45  ;;  %v14152_v20 = vpack.c.bf16 %v963_v36, %v956_v29  ;;  %v855_v58 = vmul.f32 %v12432_v31, %v14000_v26  ;;  %vm849_vm10 = vcmp.eq.f32.partialorder %v14059_v46, inf  ;;  %v17618_v56 = vld [vmem:[#allocation118_spill] sm:$0xff] }
 0x174   : > { %4014 = vmatpush1.bf16.msra.mxu0 %v17607_v22  ;;  %v14158_v42 = vpack.c.bf16 %v973_v5, %v966_v32  ;;  %v14160_v18 = vpack.c.bf16 %v975_v60, %v968_v35  ;;  %v17616_v61 = vcombine.high %v17614_v27, %v17615_v16  ;;  %v17619_v45 = vcombine.high %v17617_v47, %v17618_v56  ;;  %v17625_v22 = vld [vmem:[#allocation109_spill] sm:$0xff] }
 0x175   : > { %4125 = vmatpush1.bf16.msra.mxu1 %v17610_v38  ;;  %17611 = vst [vmem:[#allocation26_spill] sm:$0xff] %v14152_v20  ;;  %v14168_v29 = vmul.f32 5.0, %v12434_v63  ;;  %12443 = vrcp.f32 %v885_v11  ;;  %vm851_vm11 = vcmp.eq.f32.partialorder %v14059_v46, 0.0  ;;  %v852_v36 = vand.u32 2147483648, %v14059_v46 }
 0x176   : > { %17612 = vst [vmem:[#allocation28_spill] sm:$0xff] %v14158_v42  ;;  %17613 = vst [vmem:[#allocation19_spill] sm:$0xff] %v14160_v18  ;;  %4015 = vmatprep.subr.bf16.mxu0 %v17616_v61  ;;  %4126 = vmatprep.subr.bf16.mxu1 %v17619_v45  ;;  %v857_v5 = vsel %vm856_vm8, %v14000_v26, %v855_v58  ;;  %vm870_vm12 = vcmp.eq.f32.partialorder %v14104_v41, inf  ;;  %12445 = vrsqrt.f32 %v14156_v25  ;;  %v12436_v31 = vpop.eup %12435  ;;  %v17628_v26 = vld [vmem:[#allocation47_spill] sm:$0xff]  ;;  %v17634_v45 = vld [vmem:[#allocation32_spill] sm:$0xff]  ;;  %vm872_vm13 = vcmp.eq.f32.partialorder %v14104_v41, 0.0 }
 0x177   : > { %3841 = vmatprep.mubr.bf16.mxu0 %v14158_v42  ;;  %3954 = vmatprep.mubr.bf16.mxu1 %v14160_v18  ;;  %v14179_v60 = vpack.c.bf16 %v972_v52, %v965_v59  ;;  %v860_v44 = vsel %vm858_vm9, %v859_v8, %v857_v5  ;;  %v17621_v4 = vcombine.low %v17614_v27, %v17615_v16  ;;  %v17626_v52 = vld [vmem:[#allocation110_spill] sm:$0xff]  ;;  %v17629_v59 = vld [vmem:[#allocation49_spill] sm:$0xff]  ;;  %v12438_v63 = vpop.eup %12437  ;;  %v14204_v58 = vmul.f32 5.0, %v12436_v31  ;;  %v17633_v16 = vld [vmem:[#allocation23_spill] sm:$0xff] }
 0x178   : > { %v14186_v54 = vpack.c.bf16 %v974_v39, %v967_v43  ;;  %v987_v32 = vmul.f32 %v14168_v29, %v17623_v40  ;;  %v989_v35 = vmul.f32 %v14168_v29, %v17624_v9  ;;  %v888_v11 = vadd.f32 1e-08, %v860_v44  ;;  %v17631_v43 = vld [vmem:[#allocation30_spill] sm:$0xff]  ;;  %v17635_v44 = vld [vmem:[#allocation25_spill] sm:$0xff] }
 0x179   : > { %17620 = vst [vmem:[#allocation103_spill] sm:$0xff] %v14179_v60  ;;  %4016 = vmatpush1.bf16.msra.mxu0 %v17621_v4  ;;  %v17627_v3 = vcombine.high %v17625_v22, %v17626_v52  ;;  %v986_v8 = vmul.f32 %v14168_v29, %v17628_v26  ;;  %v988_v49 = vmul.f32 %v14168_v29, %v17629_v59  ;;  %v17636_v4 = vld [vmem:[#allocation45_spill] sm:$0xff]  ;;  %v17637_v9 = vld [vmem:[#allocation38_spill] sm:$0xff]  ;;  %vm863_vm14 = vcmp.eq.f32.partialorder %v14156_v25, inf }
 0x17a   : > { %17622 = vst [vmem:[#allocation104_spill] sm:$0xff] %v14186_v54  ;;  %v17630_v39 = vcombine.low %v17617_v47, %v17618_v56  ;;  %v955_v38 = vmul.f32 %v14012_v7, %v17631_v43  ;;  %v17632_v27 = vcombine.high %v13824_v30, %v13826_v14  ;;  %v962_v61 = vmul.f32 %v13949_v6, %v17633_v16  ;;  %v17641_v59 = vld [vmem:[#allocation54_spill] sm:$0xff]  ;;  %v17642_v43 = vld [vmem:[#allocation56_spill] sm:$0xff] }
 0x17b   : > { %4017 = vmatprep.subr.bf16.mxu0 %v17627_v3  ;;  %v957_v5 = vmul.f32 %v14012_v7, %v17634_v45  ;;  %v964_v47 = vmul.f32 %v13949_v6, %v17635_v44  ;;  %12447 = vrcp.f32 %v888_v11  ;;  %v848_v56 = vmul.f32 %v12438_v63, %v14059_v46  ;;  %3842 = vmatmul.mubr.bf16.gmra.mxu0 %v14179_v60  ;;  %v17639_v7 = vld [vmem:[#allocation55_spill] sm:$0xff]  ;;  %v17640_v11 = vld [vmem:[#allocation57_spill] sm:$0xff] }
 0x17c   : > { %4127 = vmatpush1.bf16.msra.mxu1 %v17630_v39  ;;  %v970_v40 = vmul.f32 %v14116_v57, %v17636_v4  ;;  %v977_v31 = vmul.f32 %v14067_v23, %v17637_v9  ;;  %v17638_v3 = vcombine.low %v17625_v22, %v17626_v52  ;;  %v980_v6 = vmul.f32 %v14204_v58, %v17639_v7  ;;  %v17643_v22 = vld [vmem:[#allocation111_spill] sm:$0xff]  ;;  %v17644_v52 = vld [vmem:[#allocation112_spill] sm:$0xff] }
 0x17d   : > { %4128 = vmatprep.subr.bf16.mxu1 %v17632_v27  ;;  %3955 = vmatmul.mubr.bf16.gmra.mxu1 %v14186_v54  ;;  %v982_v26 = vmul.f32 %v14204_v58, %v17640_v11  ;;  %v979_v39 = vmul.f32 %v14204_v58, %v17641_v59  ;;  %v981_v63 = vmul.f32 %v14204_v58, %v17642_v43  ;;  %v873_v16 = vand.u32 2147483648, %v14104_v41  ;;  %v17652_v43 = vld [vmem:[#allocation123_spill] sm:$0xff] }
 0x17e   : > { %4018 = vmatpush1.bf16.msra.mxu0 %v17638_v3  ;;  %v850_v27 = vsel %vm849_vm10, %v14059_v46, %v848_v56  ;;  %v17645_v45 = vcombine.high %v17643_v22, %v17644_v52  ;;  %v17646_v44 = vcombine.low %v13824_v30, %v13826_v14  ;;  %v14243_v4 = vpack.c.bf16 %v962_v61, %v955_v38  ;;  %v12440_v3 = vpop.eup %12439 }
 0x17f   : > { %v14245_v9 = vpack.c.bf16 %v964_v47, %v957_v5  ;;  %v853_v7 = vsel %vm851_vm11, %v852_v36, %v850_v27  ;;  %v14249_v11 = vpack.c.bf16 %v987_v32, %v980_v6  ;;  %v14251_v56 = vpack.c.bf16 %v989_v35, %v982_v26  ;;  %v12442_v30 = vpop.eup %12441  ;;  %v17657_v36 = vld [vmem:[#allocation44_spill] sm:$0xff]  ;;  %v17662_v6 = vld [vmem:[#allocation61_spill] sm:$0xff] }
 0x180   : > { %4019 = vmatprep.subr.bf16.mxu0 %v17645_v45  ;;  %4129 = vmatpush1.bf16.msra.mxu1 %v17646_v44  ;;  %17647 = vst [vmem:[#allocation34_spill] sm:$0xff] %v14243_v4  ;;  %v14253_v59 = vpack.c.bf16 %v986_v8, %v979_v39  ;;  %v17653_v45 = vld [vmem:[#allocation124_spill] sm:$0xff]  ;;  %v14258_v14 = vmul.f32 5.0, %v12440_v3  ;;  %v887_v38 = vadd.f32 1e-08, %v853_v7  ;;  %v14260_v61 = vpack.c.bf16 %v988_v49, %v981_v63  ;;  %v17660_v49 = vld [vmem:[#allocation62_spill] sm:$0xff] }
 0x181   : > { %17648 = vst [vmem:[#allocation20_spill] sm:$0xff] %v14245_v9  ;;  %17649 = vst [vmem:[#allocation115_spill] sm:$0xff] %v14249_v11  ;;  %v17654_v10 = vcombine.high %v17652_v43, %v17653_v45  ;;  %v14262_v5 = vpack.c.bf16 %v977_v31, %v970_v40  ;;  %v869_v46 = vmul.f32 %v12442_v30, %v14104_v41  ;;  %3851 = vmatprep.mubr.bf16.mxu0 %v14249_v11  ;;  %v17661_v40 = vld [vmem:[#allocation64_spill] sm:$0xff]  ;;  %v17664_v27 = vld [vmem:[#allocation113_spill] sm:$0xff] }
 0x182   : > { %17650 = vst [vmem:[#allocation116_spill] sm:$0xff] %v14251_v56  ;;  %17651 = vst [vmem:[#allocation31_spill] sm:$0xff] %v14253_v59  ;;  %3964 = vmatprep.mubr.bf16.mxu1 %v14251_v56  ;;  %v969_v32 = vmul.f32 %v14116_v57, %v17657_v36  ;;  %12449 = vrcp.f32 %v887_v38  ;;  %v17659_v8 = vcombine.low %v17643_v22, %v17644_v52  ;;  %v17665_v22 = vld [vmem:[#allocation114_spill] sm:$0xff]  ;;  %v17667_v44 = vld [vmem:[#allocation63_spill] sm:$0xff]  ;;  %vm865_vm15 = vcmp.eq.f32.partialorder %v14156_v25, 0.0 }
 0x183   : > { %4130 = vmatprep.subr.bf16.mxu1 %v17654_v10  ;;  %17655 = vst [vmem:[#allocation24_spill] sm:$0xff] %v14260_v61  ;;  %17656 = vst [vmem:[#allocation105_spill] sm:$0xff] %v14262_v5  ;;  %v17658_v10 = vld [vmem:[#allocation37_spill] sm:$0xff]  ;;  %v1001_v47 = vmul.f32 %v14258_v14, %v17660_v49  ;;  %v1003_v31 = vmul.f32 %v14258_v14, %v17661_v40  ;;  %v1000_v26 = vmul.f32 %v14258_v14, %v17662_v6  ;;  %v17669_v30 = vld [vmem:[#allocation126_spill] sm:$0xff] }
 0x184   : > { %v976_v35 = vmul.f32 %v14067_v23, %v17658_v10  ;;  %4020 = vmatpush1.bf16.msra.mxu0 %v17659_v8  ;;  %v17663_v39 = vcombine.low %v17652_v43, %v17653_v45  ;;  %v871_v63 = vsel %vm870_vm12, %v14104_v41, %v869_v46  ;;  %v17666_v52 = vcombine.high %v17664_v27, %v17665_v22  ;;  %v17668_v7 = vld [vmem:[#allocation125_spill] sm:$0xff]  ;;  %v12444_v43 = vpop.eup %12443  ;;  %v17672_v10 = vld [vmem:[#allocation46_spill] sm:$0xff]  ;;  %v17673_v49 = vld [vmem:[#allocation39_spill] sm:$0xff] }
 0x185   : > { %v1002_v3 = vmul.f32 %v14258_v14, %v17667_v44  ;;  %v17670_v38 = vcombine.high %v17668_v7, %v17669_v30  ;;  %v874_v45 = vsel %vm872_vm13, %v873_v16, %v871_v63  ;;  %v866_v46 = vand.u32 2147483648, %v14156_v25  ;;  %3852 = vmatmul.mubr.bf16.gmra.mxu0 %v14253_v59  ;;  %3965 = vmatmul.mubr.bf16.gmra.mxu1 %v14260_v61  ;;  %v12446_v6 = vpop.eup %12445  ;;  %v17675_v41 = vld [vmem:[#allocation52_spill] sm:$0xff]  ;;  %v17682_v61 = vld [vmem:[#allocation119_spill] sm:$0xff] }
 0x186   : > { %4131 = vmatpush1.bf16.msra.mxu1 %v17663_v39  ;;  %4021 = vmatprep.subr.bf16.mxu0 %v17666_v52  ;;  %v14296_v36 = vpack.c.bf16 %v976_v35, %v969_v32  ;;  %v971_v8 = vmul.f32 %v14116_v57, %v17672_v10  ;;  %v978_v40 = vmul.f32 %v14067_v23, %v17673_v49  ;;  %v917_v39 = vmul.f32 5.0, %v12444_v43  ;;  %v17674_v35 = vld [vmem:[#allocation59_spill] sm:$0xff]  ;;  %v17680_v49 = vld [vmem:[#allocation69_spill] sm:$0xff]  ;;  %v17683_v59 = vld [vmem:[#allocation120_spill] sm:$0xff] }
 0x187   : > { %4132 = vmatprep.subr.bf16.mxu1 %v17670_v38  ;;  %v890_v32 = vadd.f32 1e-08, %v874_v45  ;;  %v984_v52 = vmul.f32 %v14204_v58, %v17674_v35  ;;  %v991_v16 = vmul.f32 %v14168_v29, %v17675_v41  ;;  %v862_v63 = vmul.f32 %v12446_v6, %v14156_v25  ;;  %v1443_v57 = vld [vmem:[#allocation5 + $0xb00] sm:$0xff]  ;;  %v17679_v45 = vld [vmem:[#allocation58_spill] sm:$0xff] }
 0x188   : > { %17671 = vst [vmem:[#allocation106_spill] sm:$0xff] %v14296_v36  ;;  %v17676_v44 = vcombine.low %v17664_v27, %v17665_v22  ;;  %v1447_v38 = vld [vmem:[#allocation5 + $0xb20] sm:$0xff]  ;;  %v17677_v23 = vcombine.low %v17668_v7, %v17669_v30  ;;  %v14319_v43 = vpack.c.bf16 %v978_v40, %v971_v8  ;;  %v983_v10 = vmul.f32 %v14204_v58, %v17679_v45  ;;  %v17685_v22 = vld [vmem:[#allocation68_spill] sm:$0xff]  ;;  %v17687_v8 = vld [vmem:[#allocation70_spill] sm:$0xff] }
 0x189   : > { %12451 = vrcp.f32 %v890_v32  ;;  %v994_v6 = vmul.f32 %v917_v39, %v17680_v49  ;;  %v17681_v35 = vld [vmem:[#allocation71_spill] sm:$0xff]  ;;  %v17684_v27 = vcombine.high %v17682_v61, %v17683_v59  ;;  %v17686_v7 = vcombine.high %v14043_v12, %v14045_v33  ;;  %v12448_v49 = vpop.eup %12447 }
 0x18a   : > { %4022 = vmatpush2.bf16.msra.mxu0 %v17676_v44  ;;  %4133 = vmatpush1.bf16.msra.mxu1 %v17677_v23  ;;  %17678 = vst [vmem:[#allocation36_spill] sm:$0xff] %v14319_v43  ;;  %v996_v41 = vmul.f32 %v917_v39, %v17681_v35  ;;  %v993_v44 = vmul.f32 %v917_v39, %v17685_v22  ;;  %v17689_v23 = vld [vmem:[#allocation51_spill] sm:$0xff] }
 0x18b   : > { %4023 = vmatprep.subr.bf16.mxu0 %v17684_v27  ;;  %4344 = vmatprep.subr.bf16.mxu1 %v17686_v7  ;;  %v864_v30 = vsel %vm863_vm14, %v14156_v25, %v862_v63  ;;  %v995_v40 = vmul.f32 %v917_v39, %v17687_v8  ;;  %v14336_v32 = vpack.c.bf16 %v991_v16, %v984_v52  ;;  %v17696_v25 = vld [vmem:[#allocation60_spill] sm:$0xff] }
 0x18c   : > { %v990_v45 = vmul.f32 %v14168_v29, %v17689_v23  ;;  %v867_v35 = vsel %vm865_vm15, %v866_v46, %v864_v30  ;;  %v14342_v27 = vpack.c.bf16 %v1001_v47, %v994_v6  ;;  %v14344_v22 = vpack.c.bf16 %v1003_v31, %v996_v41  ;;  %v17697_v31 = vld [vmem:[#allocation53_spill] sm:$0xff]  ;;  %v1439_v41 = vld [vmem:[#allocation5 + $0xae0] sm:$0xff]  ;;  %v17703_v30 = vld [vmem:[#allocation66_spill] sm:$0xff] }
 0x18d   : > { %17688 = vst [vmem:[#allocation33_spill] sm:$0xff] %v14336_v32  ;;  %v11217_v7 = vcombine.high %v1443_v57, %v1447_v38  ;;  %v889_v56 = vadd.f32 1e-08, %v867_v35  ;;  %v17692_v63 = vcombine.low %v17682_v61, %v17683_v59  ;;  %v14349_v8 = vpack.c.bf16 %v1000_v26, %v993_v44  ;;  %v17698_v59 = vld [vmem:[#allocation73_spill] sm:$0xff] }
 0x18e   : > { %17690 = vst [vmem:[#allocation35_spill] sm:$0xff] %v14342_v27  ;;  %17691 = vst [vmem:[#allocation41_spill] sm:$0xff] %v14344_v22  ;;  %v14351_v52 = vpack.c.bf16 %v1002_v3, %v995_v40  ;;  %v14353_v16 = vpack.c.bf16 %v990_v45, %v983_v10  ;;  %v14355_v23 = vmul.f32 5.0, %v12448_v49  ;;  %3861 = vmatprep.mubr.bf16.mxu0 %v14342_v27  ;;  %3974 = vmatprep.mubr.bf16.mxu1 %v14344_v22  ;;  %v17699_v26 = vld [vmem:[#allocation121_spill] sm:$0xff]  ;;  %v17700_v3 = vld [vmem:[#allocation122_spill] sm:$0xff] }
 0x18f   : > { %4024 = vmatpush2.bf16.msra.mxu0 %v17692_v63  ;;  %17693 = vst [vmem:[#allocation43_spill] sm:$0xff] %v14349_v8  ;;  %v985_v47 = vmul.f32 %v14204_v58, %v17696_v25  ;;  %v992_v46 = vmul.f32 %v14168_v29, %v17697_v31  ;;  %v998_v61 = vmul.f32 %v917_v39, %v17698_v59  ;;  %12453 = vrcp.f32 %v889_v56  ;;  %v1435_v10 = vld [vmem:[#allocation5 + $0xac0] sm:$0xff]  ;;  %v17704_v40 = vld [vmem:[#allocation72_spill] sm:$0xff]  ;;  %v17706_v49 = vld [vmem:[#allocation65_spill] sm:$0xff] }
 0x190   : > { %17694 = vst [vmem:[#allocation40_spill] sm:$0xff] %v14351_v52  ;;  %17695 = vst [vmem:[#allocation42_spill] sm:$0xff] %v14353_v16  ;;  %v17701_v6 = vcombine.high %v17699_v26, %v17700_v3  ;;  %3862 = vmatmul.mubr.bf16.gmra.mxu0 %v14349_v8  ;;  %3975 = vmatmul.mubr.bf16.gmra.mxu1 %v14351_v52  ;;  %v1005_v58 = vmul.f32 %v14258_v14, %v17703_v30  ;;  %v17707_v63 = vld [vmem:[#allocation74_spill] sm:$0xff]  ;;  %v17708_v31 = vld [vmem:[#allocation67_spill] sm:$0xff] }
 0x191   : > { %v14369_v44 = vpack.c.bf16 %v992_v46, %v985_v47  ;;  %v997_v29 = vmul.f32 %v917_v39, %v17704_v40  ;;  %v17705_v56 = vcombine.low %v17699_v26, %v17700_v3  ;;  %v11216_v45 = vcombine.low %v1443_v57, %v1447_v38  ;;  %v12450_v47 = vpop.eup %12449  ;;  %v17709_v46 = vld [vmem:[#allocation76_spill] sm:$0xff]  ;;  %v17711_v26 = vld [vmem:[#allocation78_spill] sm:$0xff] }
 0x192   : > { %4025 = vmatprep.subr.bf16.mxu0 %v17701_v6  ;;  %v1004_v35 = vmul.f32 %v14258_v14, %v17706_v49  ;;  %v999_v25 = vmul.f32 %v917_v39, %v17707_v63  ;;  %v1006_v59 = vmul.f32 %v14258_v14, %v17708_v31  ;;  %v1015_v6 = vmul.f32 %v14355_v23, %v17709_v46  ;;  %v17714_v39 = vld [vmem:[#allocation75_spill] sm:$0xff]  ;;  %v17722_v8 = vld [vmem:[#allocation86_spill] sm:$0xff]  ;;  %v17723_v22 = vld [vmem:[#allocation88_spill] sm:$0xff] }
 0x193   : > { %17702 = vst [vmem:[#allocation107_spill] sm:$0xff] %v14369_v44  ;;  %4026 = vmatpush2.bf16.msra.mxu0 %v17705_v56  ;;  %v11209_v30 = vcombine.high %v1435_v10, %v1439_v41  ;;  %v14384_v40 = vpack.c.bf16 %v1005_v58, %v998_v61  ;;  %v14386_v52 = vmul.f32 5.0, %v12450_v47  ;;  %v1017_v57 = vmul.f32 %v14355_v23, %v17711_v26  ;;  %v17715_v56 = vld [vmem:[#allocation77_spill] sm:$0xff]  ;;  %v1427_v63 = vld [vmem:[#allocation5 + $0xa80] sm:$0xff] }
 0x194   : > { %4027 = vmatprep.subr.bf16.mxu0 %v11217_v7  ;;  %v14390_v38 = vpack.c.bf16 %v1004_v35, %v997_v29  ;;  %v14392_v3 = vpack.c.bf16 %v1006_v59, %v999_v25  ;;  %v1014_v14 = vmul.f32 %v14355_v23, %v17714_v39  ;;  %v1016_v49 = vmul.f32 %v14355_v23, %v17715_v56  ;;  %v1431_v7 = vld [vmem:[#allocation5 + $0xaa0] sm:$0xff]  ;;  %v17717_v58 = vld [vmem:[#allocation81_spill] sm:$0xff]  ;;  %v17720_v59 = vld [vmem:[#allocation82_spill] sm:$0xff] }
 0x195   : > { %17710 = vst [vmem:[#allocation108_spill] sm:$0xff] %v14384_v40  ;;  %v17716_v31 = vld [vmem:[#allocation79_spill] sm:$0xff]  ;;  %v1020_v47 = vmul.f32 %v14355_v23, %v17717_v58  ;;  %v17719_v35 = vld [vmem:[#allocation85_spill] sm:$0xff]  ;;  %v1007_v26 = vmul.f32 %v14386_v52, %v17720_v59  ;;  %v17721_v39 = vld [vmem:[#allocation84_spill] sm:$0xff]  ;;  %v1013_v58 = vmul.f32 %v14386_v52, %v17723_v22 }
 0x196   : > { %17712 = vst [vmem:[#allocation117_spill] sm:$0xff] %v14390_v38  ;;  %17713 = vst [vmem:[#allocation118_spill] sm:$0xff] %v14392_v3  ;;  %v1018_v61 = vmul.f32 %v14355_v23, %v17716_v31  ;;  %v17718_v46 = vld [vmem:[#allocation83_spill] sm:$0xff]  ;;  %v1010_v25 = vmul.f32 %v14386_v52, %v17719_v35  ;;  %v1009_v56 = vmul.f32 %v14386_v52, %v17721_v39  ;;  %v12452_v27 = vpop.eup %12451 }
 0x197   : > { %v1008_v29 = vmul.f32 %v14386_v52, %v17718_v46  ;;  %4028 = vmatpush2.bf16.msra.mxu0 %v11216_v45  ;;  %v1011_v31 = vmul.f32 %v14386_v52, %v17722_v8  ;;  %v11208_v35 = vcombine.low %v1435_v10, %v1439_v41  ;;  %v11201_v45 = vcombine.high %v1427_v63, %v1431_v7  ;;  %v1419_v22 = vld [vmem:[#allocation5 + $0xa40] sm:$0xff] }
 0x198   : > { %4029 = vmatprep.subr.bf16.mxu0 %v11209_v30  ;;  %v14416_v46 = vpack.c.bf16 %v1017_v57, %v1010_v25  ;;  %v14418_v54 = vpack.c.bf16 %v1014_v14, %v1007_v26  ;;  %v14420_v59 = vpack.c.bf16 %v1016_v49, %v1009_v56  ;;  %v14424_v30 = vpack.c.bf16 %v1020_v47, %v1013_v58  ;;  %v1423_v8 = vld [vmem:[#allocation5 + $0xa60] sm:$0xff]  ;;  %v17730_v14 = vld [vmem:[#allocation90_spill] sm:$0xff]  ;;  %v17731_v49 = vld [vmem:[#allocation92_spill] sm:$0xff] }
 0x199   : > { %v14414_v11 = vpack.c.bf16 %v1015_v6, %v1008_v29  ;;  %v14422_v60 = vpack.c.bf16 %v1018_v61, %v1011_v31  ;;  %v14426_v39 = vmul.f32 5.0, %v12452_v27  ;;  %v11200_v10 = vcombine.low %v1427_v63, %v1431_v7  ;;  %v17732_v47 = vld [vmem:[#allocation89_spill] sm:$0xff]  ;;  %v17733_v25 = vld [vmem:[#allocation91_spill] sm:$0xff] }
 0x19a   : > { %17725 = vst [vmem:[#allocation50_spill] sm:$0xff] %v14416_v46  ;;  %17726 = vst [vmem:[#allocation109_spill] sm:$0xff] %v14418_v54  ;;  %3984 = vmatprep.mubr.bf16.mxu1 %v14416_v46  ;;  %v11193_v6 = vcombine.high %v1419_v22, %v1423_v8  ;;  %v1411_v56 = vld [vmem:[#allocation5 + $0xa00] sm:$0xff]  ;;  %v17734_v63 = vld [vmem:[#allocation93_spill] sm:$0xff]  ;;  %v11192_v42 = vcombine.low %v1419_v22, %v1423_v8  ;;  %v17304_v8 = vmov 0  }
 0x19b   : > { %17724 = vst [vmem:[#allocation48_spill] sm:$0xff] %v14414_v11  ;;  %17727 = vst [vmem:[#allocation110_spill] sm:$0xff] %v14420_v59  ;;  %3871 = vmatprep.mubr.bf16.mxu0 %v14414_v11  ;;  %3985 = vmatmul.mubr.bf16.gmra.mxu1 %v14420_v59  ;;  %v1029_v27 = vmul.f32 %v14426_v39, %v17730_v14  ;;  %v1031_v61 = vmul.f32 %v14426_v39, %v17731_v49  ;;  %v1415_v31 = vld [vmem:[#allocation5 + $0xa20] sm:$0xff]  ;;  %v17738_v59 = vld [vmem:[#allocation96_spill] sm:$0xff] }
 0x19c   : > { %17728 = vst [vmem:[#allocation47_spill] sm:$0xff] %v14422_v60  ;;  %17729 = vst [vmem:[#allocation49_spill] sm:$0xff] %v14424_v30  ;;  %3872 = vmatmul.mubr.bf16.gmra.mxu0 %v14418_v54  ;;  %v12454_v41 = vpop.eup %12453  ;;  %v1028_v29 = vmul.f32 %v14426_v39, %v17732_v47  ;;  %v1030_v26 = vmul.f32 %v14426_v39, %v17733_v25  ;;  %v1032_v7 = vmul.f32 %v14426_v39, %v17734_v63  ;;  %v17735_v58 = vld [vmem:[#allocation95_spill] sm:$0xff]  ;;  %v17739_v54 = vld [vmem:[#allocation98_spill] sm:$0xff] }
 0x19d   : > { %4030 = vmatpush2.bf16.msra.mxu0 %v11208_v35  ;;  %v14432_v57 = vmul.f32 5.0, %v12454_v41  ;;  %v1034_v35 = vmul.f32 %v14426_v39, %v17735_v58  ;;  %v17737_v14 = vld [vmem:[#allocation99_spill] sm:$0xff]  ;;  %v17740_v46 = vld [vmem:[#allocation100_spill] sm:$0xff]  ;;  %v17741_v11 = vld [vmem:[#allocation102_spill] sm:$0xff]  ;;  %v11184_v22 = vcombine.low %v1411_v56, %v1415_v31 }
 0x19e   : > { %4031 = vmatprep.subr.bf16.mxu0 %v11201_v45  ;;  %v17736_v45 = vld [vmem:[#allocation97_spill] sm:$0xff] }
 0x19f   : > { %v1022_v41 = vmul.f32 %v14432_v57, %v17736_v45  ;;  %v1024_v49 = vmul.f32 %v14432_v57, %v17737_v14  ;;  %v1021_v47 = vmul.f32 %v14432_v57, %v17738_v59  ;;  %v1023_v25 = vmul.f32 %v14432_v57, %v17739_v54 }
 0x1a0   : > { %v1025_v63 = vmul.f32 %v14432_v57, %v17740_v46  ;;  %v1027_v58 = vmul.f32 %v14432_v57, %v17741_v11  ;;  %v11185_v14 = vcombine.high %v1411_v56, %v1415_v31  ;;  %v1148_v46 = vld [vmem:[#allocation5 + $0x1c8] sm:$0xff] }
 0x1a1   : > { %4032 = vmatpush2.bf16.msra.mxu0 %v11200_v10  ;;  %v14458_v18 = vpack.c.bf16 %v1029_v27, %v1022_v41  ;;  %v14460_v45 = vpack.c.bf16 %v1031_v61, %v1024_v49  ;;  %v14462_v10 = vpack.c.bf16 %v1028_v29, %v1021_v47  ;;  %v14464_v48 = vpack.c.bf16 %v1030_v26, %v1023_v25  ;;  %v1152_v11 = vld [vmem:[#allocation5 + $0x1e8] sm:$0xff] }
 0x1a2   : > { %4033 = vmatprep.subr.bf16.mxu0 %v11193_v6  ;;  %v14466_v59 = vpack.c.bf16 %v1032_v7, %v1025_v63  ;;  %v14468_v54 = vpack.c.bf16 %v1034_v35, %v1027_v58  ;;  %v10923_v6 = vcombine.high %v1148_v46, %v1152_v11  ;;  %v1140_v27 = vld [vmem:[#allocation5 + $0x188] sm:$0xff]  ;;  %v10922_v7 = vcombine.low %v1148_v46, %v1152_v11 }
 0x1a3   : > { %17742 = vst [vmem:[#allocation30_spill] sm:$0xff] %v14458_v18  ;;  %17743 = vst [vmem:[#allocation23_spill] sm:$0xff] %v14460_v45  ;;  %3881 = vmatprep.mubr.bf16.mxu0 %v14458_v18  ;;  %3994 = vmatprep.mubr.bf16.mxu1 %v14460_v45  ;;  %v1144_v61 = vld [vmem:[#allocation5 + $0x1a8] sm:$0xff]  ;;  %v11050_v35 = vcombine.low %v14043_v12, %v14045_v33 }
 0x1a4   : > { %17744 = vst [vmem:[#allocation32_spill] sm:$0xff] %v14462_v10  ;;  %17745 = vst [vmem:[#allocation25_spill] sm:$0xff] %v14464_v48  ;;  %3882 = vmatmul.mubr.bf16.gmra.mxu0 %v14462_v10  ;;  %3995 = vmatmul.mubr.bf16.gmra.mxu1 %v14464_v48  ;;  %v1268_v29 = vld [vmem:[#allocation5 + $0x588] sm:$0xff]  ;;  %v10915_v41 = vcombine.high %v1140_v27, %v1144_v61  ;;  %v10914_v25 = vcombine.low %v1140_v27, %v1144_v61 }
 0x1a5   : > { %17746 = vst [vmem:[#allocation45_spill] sm:$0xff] %v14466_v59  ;;  %17747 = vst [vmem:[#allocation38_spill] sm:$0xff] %v14468_v54  ;;  %4034 = vmatpush2.bf16.msra.mxu0 %v11192_v42  ;;  %4037 = vmatprep.mubr.bf16.mxu0 %v13995_v50  ;;  %v1272_v26 = vld [vmem:[#allocation5 + $0x5a8] sm:$0xff] }
 0x1a6   : > { %4035 = vmatprep.subr.bf16.mxu0 %v11185_v14  ;;  %4150 = vmatprep.mubr.bf16.mxu1 %v17304_v8  ;;  %v11043_v42 = vcombine.high %v1268_v29, %v1272_v26  ;;  %v1132_v49 = vld [vmem:[#allocation5 + $0x148] sm:$0xff]  ;;  %v11042_v63 = vcombine.low %v1268_v29, %v1272_v26 }
 0x1a7   : > { %v1136_v47 = vld [vmem:[#allocation5 + $0x168] sm:$0xff] }
 0x1a8   : > { %v1260_v56 = vld [vmem:[#allocation5 + $0x548] sm:$0xff]  ;;  %v10907_v58 = vcombine.high %v1132_v49, %v1136_v47 }
 0x1a9   : > { %4036 = vmatpush2.bf16.msra.mxu0 %v11184_v22  ;;  %v1264_v31 = vld [vmem:[#allocation5 + $0x568] sm:$0xff]  ;;  %v10906_v22 = vcombine.low %v1132_v49, %v1136_v47 }
 0x1aa   : > { %4231 = vmatprep.subr.bf16.mxu0 %v10923_v6  ;;  %v11035_v12 = vcombine.high %v1260_v56, %v1264_v31  ;;  %v1124_v33 = vld [vmem:[#allocation5 + $0x108] sm:$0xff]  ;;  %v11034_v6 = vcombine.low %v1260_v56, %v1264_v31 }
 0x1ab   : > { %v1128_v14 = vld [vmem:[#allocation5 + $0x128] sm:$0xff] }
 0x1ac   : > { %4038 = vmatmul.mubr.bf16.vlgmr.msra.gmra.mxu0 %v13997_v17  ;;  %4151 = vmatmul.mubr.bf16.vlgmr.msra.gmra.mxu1 %v14028_v28  ;;  %v1252_v46 = vld [vmem:[#allocation5 + $0x508] sm:$0xff] }
 0x1ad   : > { %4232 = vmatpush1.bf16.msra.mxu0 %v10922_v7  ;;  %4047 = vmatprep.mubr.bf16.mxu0 %v14010_v21  ;;  %v1256_v11 = vld [vmem:[#allocation5 + $0x528] sm:$0xff]  ;;  %v10899_v7 = vcombine.high %v1124_v33, %v1128_v14 }
 0x1ae   : > { %4345 = vmatpush1.bf16.msra.mxu1 %v11050_v35  ;;  %4233 = vmatprep.subr.bf16.mxu0 %v10915_v41  ;;  %v11027_v27 = vcombine.high %v1252_v46, %v1256_v11  ;;  %v1116_v61 = vld [vmem:[#allocation5 + $0xc8] sm:$0xff]  ;;  %v10898_v41 = vcombine.low %v1124_v33, %v1128_v14 }
 0x1af   : > { %4346 = vmatprep.subr.bf16.mxu1 %v11043_v42  ;;  %4160 = vmatprep.mubr.bf16.mxu1 %v17304_v8  ;;  %v1120_v35 = vld [vmem:[#allocation5 + $0xe8] sm:$0xff]  ;;  %v11026_v42 = vcombine.low %v1252_v46, %v1256_v11 }
 0x1b0   : > { %v1244_v29 = vld [vmem:[#allocation5 + $0x4c8] sm:$0xff]  ;;  %v10891_v49 = vcombine.high %v1116_v61, %v1120_v35 }
 0x1b1   : > { %4234 = vmatpush1.bf16.msra.mxu0 %v10914_v25  ;;  %v1248_v26 = vld [vmem:[#allocation5 + $0x4e8] sm:$0xff] }
 0x1b2   : > { %4347 = vmatpush1.bf16.msra.mxu1 %v11042_v63  ;;  %4235 = vmatprep.subr.bf16.mxu0 %v10907_v58  ;;  %v11019_v47 = vcombine.high %v1244_v29, %v1248_v26  ;;  %v1108_v56 = vld [vmem:[#allocation5 + $0x88] sm:$0xff]  ;;  %v10890_v58 = vcombine.low %v1116_v61, %v1120_v35 }
 0x1b3   : > { %4348 = vmatprep.subr.bf16.mxu1 %v11035_v12  ;;  %v1112_v31 = vld [vmem:[#allocation5 + $0xa8] sm:$0xff]  ;;  %v11018_v12 = vcombine.low %v1244_v29, %v1248_v26 }
 0x1b4   : > { %4048 = vmatmul.mubr.bf16.gmra.mxu0 %v14055_v51  ;;  %4161 = vmatmul.mubr.bf16.gmra.mxu1 %v14131_v13  ;;  %v1236_v25 = vld [vmem:[#allocation5 + $0x488] sm:$0xff] }
 0x1b5   : > { %4236 = vmatpush1.bf16.msra.mxu0 %v10906_v22  ;;  %4057 = vmatprep.mubr.bf16.mxu0 %v14152_v20  ;;  %v1240_v63 = vld [vmem:[#allocation5 + $0x4a8] sm:$0xff]  ;;  %v10883_v22 = vcombine.high %v1108_v56, %v1112_v31 }
 0x1b6   : > { %4349 = vmatpush1.bf16.msra.mxu1 %v11034_v6  ;;  %4237 = vmatprep.subr.bf16.mxu0 %v10899_v7  ;;  %v11011_v33 = vcombine.high %v1236_v25, %v1240_v63  ;;  %v1100_v14 = vld [vmem:[#allocation5 + $0x48] sm:$0xff]  ;;  %v10882_v7 = vcombine.low %v1108_v56, %v1112_v31 }
 0x1b7   : > { %4350 = vmatprep.subr.bf16.mxu1 %v11027_v27  ;;  %4170 = vmatprep.mubr.bf16.mxu1 %v17304_v8  ;;  %v1104_v6 = vld [vmem:[#allocation5 + $0x68] sm:$0xff]  ;;  %v11010_v27 = vcombine.low %v1236_v25, %v1240_v63 }
 0x1b8   : > { %v1228_v46 = vld [vmem:[#allocation5 + $0x448] sm:$0xff]  ;;  %v10875_v61 = vcombine.high %v1100_v14, %v1104_v6 }
 0x1b9   : > { %4238 = vmatpush1.bf16.msra.mxu0 %v10898_v41  ;;  %v1232_v11 = vld [vmem:[#allocation5 + $0x468] sm:$0xff] }
 0x1ba   : > { %4351 = vmatpush1.bf16.msra.mxu1 %v11026_v42  ;;  %4239 = vmatprep.subr.bf16.mxu0 %v10891_v49  ;;  %v11003_v35 = vcombine.high %v1228_v46, %v1232_v11  ;;  %v1092_v29 = vld [vmem:[#allocation5 + $0x8] sm:$0xff]  ;;  %v10874_v49 = vcombine.low %v1100_v14, %v1104_v6 }
 0x1bb   : > { %4352 = vmatprep.subr.bf16.mxu1 %v11019_v47  ;;  %v1096_v26 = vld [vmem:[#allocation5 + $0x28] sm:$0xff]  ;;  %v11002_v47 = vcombine.low %v1228_v46, %v1232_v11 }
 0x1bc   : > { %4058 = vmatmul.mubr.bf16.gmra.mxu0 %v14243_v4  ;;  %4171 = vmatmul.mubr.bf16.gmra.mxu1 %v14245_v9  ;;  %v1220_v41 = vld [vmem:[#allocation5 + $0x408] sm:$0xff] }
 0x1bd   : > { %4240 = vmatpush1.bf16.msra.mxu0 %v10890_v58  ;;  %4067 = vmatprep.mubr.bf16.mxu0 %v14262_v5  ;;  %v1224_v42 = vld [vmem:[#allocation5 + $0x428] sm:$0xff]  ;;  %v10867_v58 = vcombine.high %v1092_v29, %v1096_v26 }
 0x1be   : > { %4353 = vmatpush1.bf16.msra.mxu1 %v11018_v12  ;;  %4241 = vmatprep.subr.bf16.mxu0 %v10883_v22  ;;  %v10995_v56 = vcombine.high %v1220_v41, %v1224_v42  ;;  %v1212_v31 = vld [vmem:[#allocation5 + $0x3c8] sm:$0xff]  ;;  %v10866_v22 = vcombine.low %v1092_v29, %v1096_v26 }
 0x1bf   : > { %4354 = vmatprep.subr.bf16.mxu1 %v11011_v33  ;;  %4180 = vmatprep.mubr.bf16.mxu1 %v17304_v8  ;;  %v1216_v12 = vld [vmem:[#allocation5 + $0x3e8] sm:$0xff]  ;;  %v10994_v33 = vcombine.low %v1220_v41, %v1224_v42 }
 0x1c0   : > { %v1340_v25 = vld [vmem:[#allocation5 + $0x7c8] sm:$0xff]  ;;  %v10987_v14 = vcombine.high %v1212_v31, %v1216_v12 }
 0x1c1   : > { %4242 = vmatpush1.bf16.msra.mxu0 %v10882_v7  ;;  %v1344_v63 = vld [vmem:[#allocation5 + $0x7e8] sm:$0xff] }
 0x1c2   : > { %4355 = vmatpush1.bf16.msra.mxu1 %v11010_v27  ;;  %4243 = vmatprep.subr.bf16.mxu0 %v10875_v61  ;;  %v11115_v6 = vcombine.high %v1340_v25, %v1344_v63  ;;  %v1204_v46 = vld [vmem:[#allocation5 + $0x388] sm:$0xff]  ;;  %v10986_v61 = vcombine.low %v1212_v31, %v1216_v12 }
 0x1c3   : > { %4356 = vmatprep.subr.bf16.mxu1 %v11003_v35  ;;  %v1208_v11 = vld [vmem:[#allocation5 + $0x3a8] sm:$0xff]  ;;  %v11114_v35 = vcombine.low %v1340_v25, %v1344_v63  ;;  %v17748_v25 = vld [vmem:[#allocation87_spill] sm:$0xff] }
 0x1c4   : > { %4068 = vmatmul.mubr.bf16.gmra.mxu0 %v14296_v36  ;;  %4181 = vmatmul.mubr.bf16.gmra.mxu1 %v14319_v43  ;;  %v1332_v7 = vld [vmem:[#allocation5 + $0x788] sm:$0xff]  ;;  %v1012_v63 = vmul.f32 %v14386_v52, %v17748_v25 }
 0x1c5   : > { %4244 = vmatpush1.bf16.msra.mxu0 %v10874_v49  ;;  %4077 = vmatprep.mubr.bf16.mxu0 %v14336_v32  ;;  %v1336_v27 = vld [vmem:[#allocation5 + $0x7a8] sm:$0xff]  ;;  %v10979_v49 = vcombine.high %v1204_v46, %v1208_v11 }
 0x1c6   : > { %4357 = vmatpush1.bf16.msra.mxu1 %v11002_v47  ;;  %4245 = vmatprep.subr.bf16.mxu0 %v10867_v58  ;;  %v11107_v29 = vcombine.high %v1332_v7, %v1336_v27  ;;  %v1196_v26 = vld [vmem:[#allocation5 + $0x348] sm:$0xff]  ;;  %v10978_v58 = vcombine.low %v1204_v46, %v1208_v11 }
 0x1c7   : > { %4358 = vmatprep.subr.bf16.mxu1 %v10995_v56  ;;  %4190 = vmatprep.mubr.bf16.mxu1 %v17304_v8  ;;  %v1200_v47 = vld [vmem:[#allocation5 + $0x368] sm:$0xff]  ;;  %v11106_v56 = vcombine.low %v1332_v7, %v1336_v27 }
 0x1c8   : > { %v1324_v41 = vld [vmem:[#allocation5 + $0x748] sm:$0xff]  ;;  %v10971_v31 = vcombine.high %v1196_v26, %v1200_v47  ;;  %v10970_v46 = vcombine.low %v1196_v26, %v1200_v47 }
 0x1c9   : > { %4246 = vmatpush1.bf16.msra.mxu0 %v10866_v22  ;;  %v1328_v42 = vld [vmem:[#allocation5 + $0x768] sm:$0xff] }
 0x1ca   : > { %4359 = vmatpush1.bf16.msra.mxu1 %v10994_v33  ;;  %4247 = vmatprep.subr.bf16.mxu0 %v10987_v14  ;;  %v11099_v12 = vcombine.high %v1324_v41, %v1328_v42  ;;  %v17749_v22 = vld [vmem:[#allocation80_spill] sm:$0xff]  ;;  %v11098_v11 = vcombine.low %v1324_v41, %v1328_v42 }
 0x1cb   : > { %4360 = vmatprep.subr.bf16.mxu1 %v11115_v6  ;;  %v1019_v33 = vmul.f32 %v14355_v23, %v17749_v22  ;;  %v1188_v14 = vld [vmem:[#allocation5 + $0x308] sm:$0xff] }
 0x1cc   : > { %4078 = vmatmul.mubr.bf16.gmra.mxu0 %v14353_v16  ;;  %4191 = vmatmul.mubr.bf16.gmra.mxu1 %v14369_v44  ;;  %v1192_v6 = vld [vmem:[#allocation5 + $0x328] sm:$0xff] }
 0x1cd   : > { %4248 = vmatpush2.bf16.msra.mxu0 %v10986_v61  ;;  %4087 = vmatprep.mubr.bf16.mxu0 %v14384_v40  ;;  %v1316_v61 = vld [vmem:[#allocation5 + $0x708] sm:$0xff]  ;;  %v10963_v7 = vcombine.high %v1188_v14, %v1192_v6  ;;  %v14502_v27 = vpack.c.bf16 %v1019_v33, %v1012_v63  ;;  %v10962_v26 = vcombine.low %v1188_v14, %v1192_v6 }
 0x1ce   : > { %4361 = vmatpush2.bf16.msra.mxu1 %v11114_v35  ;;  %4249 = vmatprep.subr.bf16.mxu0 %v10979_v49  ;;  %v1320_v44 = vld [vmem:[#allocation5 + $0x728] sm:$0xff] }
 0x1cf   : > { %4362 = vmatprep.subr.bf16.mxu1 %v11107_v29  ;;  %4200 = vmatprep.mubr.bf16.mxu1 %v17304_v8  ;;  %17750 = vst [vmem:[#allocation55_spill] sm:$0xff] %v14502_v27  ;;  %v11091_v35 = vcombine.high %v1316_v61, %v1320_v44  ;;  %v1180_v49 = vld [vmem:[#allocation5 + $0x2c8] sm:$0xff]  ;;  %v11090_v47 = vcombine.low %v1316_v61, %v1320_v44 }
 0x1d0   : > { %v1184_v29 = vld [vmem:[#allocation5 + $0x2e8] sm:$0xff] }
 0x1d1   : > { %4250 = vmatpush2.bf16.msra.mxu0 %v10978_v58  ;;  %v1308_v52 = vld [vmem:[#allocation5 + $0x6c8] sm:$0xff]  ;;  %v10955_v41 = vcombine.high %v1180_v49, %v1184_v29  ;;  %v17751_v58 = vld [vmem:[#allocation101_spill] sm:$0xff]  ;;  %v10954_v14 = vcombine.low %v1180_v49, %v1184_v29 }
 0x1d2   : > { %4363 = vmatpush2.bf16.msra.mxu1 %v11106_v56  ;;  %4251 = vmatprep.subr.bf16.mxu0 %v10971_v31  ;;  %v1312_v23 = vld [vmem:[#allocation5 + $0x6e8] sm:$0xff]  ;;  %v1026_v56 = vmul.f32 %v14432_v57, %v17751_v58  ;;  %v17752_v31 = vld [vmem:[#allocation94_spill] sm:$0xff] }
 0x1d3   : > { %4364 = vmatprep.subr.bf16.mxu1 %v11099_v12  ;;  %v11083_v42 = vcombine.high %v1308_v52, %v1312_v23  ;;  %v1033_v12 = vmul.f32 %v14426_v39, %v17752_v31  ;;  %v1172_v25 = vld [vmem:[#allocation5 + $0x288] sm:$0xff]  ;;  %v11082_v44 = vcombine.low %v1308_v52, %v1312_v23 }
 0x1d4   : > { %4088 = vmatmul.mubr.bf16.gmra.mxu0 %v14390_v38  ;;  %4201 = vmatmul.mubr.bf16.gmra.mxu1 %v14392_v3  ;;  %v1176_v63 = vld [vmem:[#allocation5 + $0x2a8] sm:$0xff] }
 0x1d5   : > { %4252 = vmatpush2.bf16.msra.mxu0 %v10970_v46  ;;  %4097 = vmatprep.mubr.bf16.mxu0 %v14502_v27  ;;  %v1300_v22 = vld [vmem:[#allocation5 + $0x688] sm:$0xff]  ;;  %v10947_v6 = vcombine.high %v1172_v25, %v1176_v63  ;;  %v14512_v61 = vpack.c.bf16 %v1033_v12, %v1026_v56 }
 0x1d6   : > { %4365 = vmatpush2.bf16.msra.mxu1 %v11098_v11  ;;  %4253 = vmatprep.subr.bf16.mxu0 %v10963_v7  ;;  %v1304_v33 = vld [vmem:[#allocation5 + $0x6a8] sm:$0xff] }
 0x1d7   : > { %4366 = vmatprep.subr.bf16.mxu1 %v11091_v35  ;;  %4210 = vmatprep.mubr.bf16.mxu1 %v17304_v8  ;;  %17753 = vst [vmem:[#allocation57_spill] sm:$0xff] %v14512_v61  ;;  %v11075_v46 = vcombine.high %v1300_v22, %v1304_v33  ;;  %v1164_v11 = vld [vmem:[#allocation5 + $0x248] sm:$0xff]  ;;  %v10946_v35 = vcombine.low %v1172_v25, %v1176_v63 }
 0x1d8   : > { %v1168_v7 = vld [vmem:[#allocation5 + $0x268] sm:$0xff]  ;;  %v11074_v49 = vcombine.low %v1300_v22, %v1304_v33 }
 0x1d9   : > { %4254 = vmatpush2.bf16.msra.mxu0 %v10962_v26  ;;  %v1292_v39 = vld [vmem:[#allocation5 + $0x648] sm:$0xff]  ;;  %v10939_v29 = vcombine.high %v1164_v11, %v1168_v7 }
 0x1da   : > { %4367 = vmatpush2.bf16.msra.mxu1 %v11090_v47  ;;  %4255 = vmatprep.subr.bf16.mxu0 %v10955_v41  ;;  %v1296_v57 = vld [vmem:[#allocation5 + $0x668] sm:$0xff] }
 0x1db   : > { %4368 = vmatprep.subr.bf16.mxu1 %v11083_v42  ;;  %v11067_v52 = vcombine.high %v1292_v39, %v1296_v57  ;;  %v1156_v23 = vld [vmem:[#allocation5 + $0x208] sm:$0xff]  ;;  %v10938_v42 = vcombine.low %v1164_v11, %v1168_v7  ;;  %v11066_v58 = vcombine.low %v1292_v39, %v1296_v57 }
 0x1dc   : > { %4098 = vmatmul.mubr.bf16.gmra.mxu0 %v14422_v60  ;;  %4211 = vmatmul.mubr.bf16.gmra.mxu1 %v14424_v30  ;;  %v1160_v26 = vld [vmem:[#allocation5 + $0x228] sm:$0xff] }
 0x1dd   : > { %4256 = vmatpush2.bf16.msra.mxu0 %v10954_v14  ;;  %4107 = vmatprep.mubr.bf16.mxu0 %v14512_v61  ;;  %v1284_v47 = vld [vmem:[#allocation5 + $0x608] sm:$0xff]  ;;  %v10931_v56 = vcombine.high %v1156_v23, %v1160_v26  ;;  %v10930_v33 = vcombine.low %v1156_v23, %v1160_v26 }
 0x1de   : > { %4369 = vmatpush2.bf16.msra.mxu1 %v11082_v44  ;;  %4257 = vmatprep.subr.bf16.mxu0 %v10947_v6  ;;  %v1288_v41 = vld [vmem:[#allocation5 + $0x628] sm:$0xff] }
 0x1df   : > { %4370 = vmatprep.subr.bf16.mxu1 %v11075_v46  ;;  %4220 = vmatprep.mubr.bf16.mxu1 %v17304_v8  ;;  %v11059_v31 = vcombine.high %v1284_v47, %v1288_v41  ;;  %v1404_v12 = vld [vmem:[#allocation5 + $0x9c8] sm:$0xff]  ;;  %v11058_v14 = vcombine.low %v1284_v47, %v1288_v41  ;;  %v17757_v8 = vld [vmem:[#allocation103_spill] sm:$0xff] }
 0x1e0   : > { %v1408_v25 = vld [vmem:[#allocation5 + $0x9e8] sm:$0xff] }
 0x1e1   : > { %4258 = vmatpush2.bf16.msra.mxu0 %v10946_v35  ;;  %v1532_v63 = vld [vmem:[#allocation5 + $0xdc8] sm:$0xff]  ;;  %v11179_v44 = vcombine.high %v1404_v12, %v1408_v25  ;;  %v11178_v7 = vcombine.low %v1404_v12, %v1408_v25 }
 0x1e2   : > { %4371 = vmatpush2.bf16.msra.mxu1 %v11074_v49  ;;  %4259 = vmatprep.subr.bf16.mxu0 %v10939_v29  ;;  %v1536_v22 = vld [vmem:[#allocation5 + $0xde8] sm:$0xff] }
 0x1e3   : > { %4372 = vmatprep.subr.bf16.mxu1 %v11067_v52  ;;  %v11307_v6 = vcombine.high %v1532_v63, %v1536_v22  ;;  %v1396_v46 = vld [vmem:[#allocation5 + $0x988] sm:$0xff]  ;;  %v11306_v35 = vcombine.low %v1532_v63, %v1536_v22 }
 0x1e4   : > { %4108 = vmatmul.mubr.bf16.gmra.mxu0 %v14466_v59  ;;  %4221 = vmatmul.mubr.bf16.gmra.mxu1 %v14468_v54  ;;  %v1400_v11 = vld [vmem:[#allocation5 + $0x9a8] sm:$0xff] }
 0x1e5   : > { %4260 = vmatpush2.bf16.msra.mxu0 %v10938_v42  ;;  %4263 = vmatprep.mubr.bf16.mxu0 %v13944_v0  ;;  %v1524_v39 = vld [vmem:[#allocation5 + $0xd88] sm:$0xff]  ;;  %v11171_v49 = vcombine.high %v1396_v46, %v1400_v11  ;;  %v11170_v26 = vcombine.low %v1396_v46, %v1400_v11 }
 0x1e6   : > { %4373 = vmatpush2.bf16.msra.mxu1 %v11066_v58  ;;  %4376 = vmatprep.mubr.bf16.mxu1 %v13946_v2  ;;  %v1528_v57 = vld [vmem:[#allocation5 + $0xda8] sm:$0xff] }
 0x1e7   : > { %4261 = vmatprep.subr.bf16.mxu0 %v10931_v56  ;;  %4374 = vmatprep.subr.bf16.mxu1 %v11059_v31  ;;  %v1388_v29 = vld [vmem:[#allocation5 + $0x948] sm:$0xff]  ;;  %v11299_v23 = vcombine.high %v1524_v39, %v1528_v57  ;;  %v11298_v58 = vcombine.low %v1524_v39, %v1528_v57 }
 0x1e8   : > { %v1392_v52 = vld [vmem:[#allocation5 + $0x968] sm:$0xff] }
 0x1e9   : > { %4262 = vmatpush2.bf16.msra.mxu0 %v10930_v33  ;;  %v1516_v47 = vld [vmem:[#allocation5 + $0xd48] sm:$0xff]  ;;  %v11163_v42 = vcombine.high %v1388_v29, %v1392_v52  ;;  %v11162_v25 = vcombine.low %v1388_v29, %v1392_v52 }
 0x1ea   : > { %4375 = vmatpush2.bf16.msra.mxu1 %v11058_v14  ;;  %4457 = vmatprep.subr.bf16.mxu0 %v11179_v44  ;;  %v1520_v41 = vld [vmem:[#allocation5 + $0xd68] sm:$0xff] }
 0x1eb   : > { %4570 = vmatprep.subr.bf16.mxu1 %v11307_v6  ;;  %v1380_v56 = vld [vmem:[#allocation5 + $0x908] sm:$0xff]  ;;  %v11291_v12 = vcombine.high %v1516_v47, %v1520_v41  ;;  %v11290_v6 = vcombine.low %v1516_v47, %v1520_v41 }
 0x1ec   : > { %4264 = vmatmul.mubr.bf16.vlgmr.msra.gmra.mxu0 %v13953_v62  ;;  %v1384_v31 = vld [vmem:[#allocation5 + $0x928] sm:$0xff] }
 0x1ed   : > { %4377 = vmatmul.mubr.bf16.vlgmr.msra.gmra.mxu1 %v13955_v1  ;;  %4458 = vmatpush1.bf16.msra.mxu0 %v11178_v7  ;;  %v1508_v63 = vld [vmem:[#allocation5 + $0xd08] sm:$0xff]  ;;  %v11155_v33 = vcombine.high %v1380_v56, %v1384_v31  ;;  %v11154_v11 = vcombine.low %v1380_v56, %v1384_v31 }
 0x1ee   : > { %4273 = vmatprep.mubr.bf16.mxu0 %v13961_v15  ;;  %4386 = vmatprep.mubr.bf16.mxu1 %v13967_v24  ;;  %v1512_v22 = vld [vmem:[#allocation5 + $0xd28] sm:$0xff] }
 0x1ef   : > { %4571 = vmatpush1.bf16.msra.mxu1 %v11306_v35  ;;  %4459 = vmatprep.subr.bf16.mxu0 %v11171_v49  ;;  %v1372_v14 = vld [vmem:[#allocation5 + $0x8c8] sm:$0xff]  ;;  %v11283_v46 = vcombine.high %v1508_v63, %v1512_v22  ;;  %v11282_v35 = vcombine.low %v1508_v63, %v1512_v22 }
 0x1f0   : > { %4572 = vmatprep.subr.bf16.mxu1 %v11299_v23  ;;  %v1376_v44 = vld [vmem:[#allocation5 + $0x8e8] sm:$0xff] }
 0x1f1   : > { %4460 = vmatpush1.bf16.msra.mxu0 %v11170_v26  ;;  %v1500_v7 = vld [vmem:[#allocation5 + $0xcc8] sm:$0xff]  ;;  %v11147_v57 = vcombine.high %v1372_v14, %v1376_v44  ;;  %v11146_v23 = vcombine.low %v1372_v14, %v1376_v44  ;;  %v17756_v14 = vld [vmem:[#allocation19_spill] sm:$0xff] }
 0x1f2   : > { %4461 = vmatprep.subr.bf16.mxu0 %v11163_v42  ;;  %v1504_v39 = vld [vmem:[#allocation5 + $0xce8] sm:$0xff] }
 0x1f3   : > { %4573 = vmatpush1.bf16.msra.mxu1 %v11298_v58  ;;  %v1364_v49 = vld [vmem:[#allocation5 + $0x888] sm:$0xff]  ;;  %v11275_v52 = vcombine.high %v1500_v7, %v1504_v39  ;;  %v11274_v56 = vcombine.low %v1500_v7, %v1504_v39 }
 0x1f4   : > { %4274 = vmatmul.mubr.bf16.gmra.mxu0 %v13969_v55  ;;  %4574 = vmatprep.subr.bf16.mxu1 %v11291_v12  ;;  %v1368_v29 = vld [vmem:[#allocation5 + $0x8a8] sm:$0xff]  ;;  %v17754_v12 = vld [vmem:[#allocation27_spill] sm:$0xff] }
 0x1f5   : > { %4387 = vmatmul.mubr.bf16.gmra.mxu1 %v13982_v53  ;;  %4462 = vmatpush1.bf16.msra.mxu0 %v11162_v25  ;;  %v1492_v26 = vld [vmem:[#allocation5 + $0xc88] sm:$0xff]  ;;  %v11139_v41 = vcombine.high %v1364_v49, %v1368_v29  ;;  %v11138_v25 = vcombine.low %v1364_v49, %v1368_v29 }
 0x1f6   : > { %4283 = vmatprep.mubr.bf16.mxu0 %v14063_v19  ;;  %4396 = vmatprep.mubr.bf16.mxu1 %v14065_v37  ;;  %v1496_v47 = vld [vmem:[#allocation5 + $0xca8] sm:$0xff] }
 0x1f7   : > { %4463 = vmatprep.subr.bf16.mxu0 %v11155_v33  ;;  %4575 = vmatpush1.bf16.msra.mxu1 %v11290_v6  ;;  %v1356_v42 = vld [vmem:[#allocation5 + $0x848] sm:$0xff]  ;;  %v11267_v31 = vcombine.high %v1492_v26, %v1496_v47  ;;  %v11266_v6 = vcombine.low %v1492_v26, %v1496_v47  ;;  %v14536_v47 = vld [vmem:[#allocation5 + $0x5d0] sm:$0xff] }
 0x1f8   : > { %4576 = vmatprep.subr.bf16.mxu1 %v11283_v46  ;;  %v1360_v58 = vld [vmem:[#allocation5 + $0x868] sm:$0xff] }
 0x1f9   : > { %4464 = vmatpush1.bf16.msra.mxu0 %v11154_v11  ;;  %v1484_v63 = vld [vmem:[#allocation5 + $0xc48] sm:$0xff]  ;;  %v11131_v44 = vcombine.high %v1356_v42, %v1360_v58  ;;  %v11130_v39 = vcombine.low %v1356_v42, %v1360_v58  ;;  %v17759_v42 = vld [vmem:[#allocation115_spill] sm:$0xff] }
 0x1fa   : > { %4465 = vmatprep.subr.bf16.mxu0 %v11147_v57  ;;  %v1488_v22 = vld [vmem:[#allocation5 + $0xc68] sm:$0xff] }
 0x1fb   : > { %4577 = vmatpush1.bf16.msra.mxu1 %v11282_v35  ;;  %v17755_v33 = vld [vmem:[#allocation28_spill] sm:$0xff]  ;;  %v11259_v7 = vcombine.high %v1484_v63, %v1488_v22 }
 0x1fc   : > { %4284 = vmatmul.mubr.bf16.gmra.mxu0 %v14091_v34  ;;  %4578 = vmatprep.subr.bf16.mxu1 %v11275_v52  ;;  %v1348_v46 = vld [vmem:[#allocation5 + $0x808] sm:$0xff] }
 0x1fd   : > { %4397 = vmatmul.mubr.bf16.gmra.mxu1 %v17754_v12  ;;  %4466 = vmatpush1.bf16.msra.mxu0 %v11146_v23  ;;  %v1352_v11 = vld [vmem:[#allocation5 + $0x828] sm:$0xff]  ;;  %v11258_v23 = vcombine.low %v1484_v63, %v1488_v22 }
 0x1fe   : > { %4293 = vmatprep.mubr.bf16.mxu0 %v17755_v33  ;;  %4406 = vmatprep.mubr.bf16.mxu1 %v17756_v14  ;;  %v1476_v57 = vld [vmem:[#allocation5 + $0xc08] sm:$0xff]  ;;  %v11123_v49 = vcombine.high %v1348_v46, %v1352_v11  ;;  %v11122_v26 = vcombine.low %v1348_v46, %v1352_v11 }
 0x1ff   : > { %4467 = vmatprep.subr.bf16.mxu0 %v11139_v41  ;;  %4579 = vmatpush1.bf16.msra.mxu1 %v11274_v56  ;;  %v1480_v35 = vld [vmem:[#allocation5 + $0xc28] sm:$0xff] }
 0x200   : > { %4580 = vmatprep.subr.bf16.mxu1 %v11267_v31  ;;  %v1468_v29 = vld [vmem:[#allocation5 + $0xbc8] sm:$0xff]  ;;  %v11251_v41 = vcombine.high %v1476_v57, %v1480_v35  ;;  %v14538_v31 = vld [vmem:[#allocation5 + $0x5f0] sm:$0xff]  ;;  %v11250_v63 = vcombine.low %v1476_v57, %v1480_v35  ;;  %v17763_v35 = vld [vmem:[#allocation35_spill] sm:$0xff] }
 0x201   : > { %4468 = vmatpush1.bf16.msra.mxu0 %v11138_v25  ;;  %v1472_v52 = vld [vmem:[#allocation5 + $0xbe8] sm:$0xff] }
 0x202   : > { %4469 = vmatprep.subr.bf16.mxu0 %v11131_v44  ;;  %v17758_v56 = vld [vmem:[#allocation104_spill] sm:$0xff]  ;;  %v11243_v25 = vcombine.high %v1468_v29, %v1472_v52  ;;  %v11242_v46 = vcombine.low %v1468_v29, %v1472_v52 }
 0x203   : > { %4581 = vmatpush1.bf16.msra.mxu1 %v11266_v6  ;;  %v17760_v58 = vld [vmem:[#allocation116_spill] sm:$0xff]  ;;  %v11053_v6 = vcombine.high %v14536_v47, %v14538_v31 }
 0x204   : > { %4294 = vmatmul.mubr.bf16.gmra.mxu0 %v17757_v8  ;;  %4582 = vmatprep.subr.bf16.mxu1 %v11259_v7  ;;  %v1460_v22 = vld [vmem:[#allocation5 + $0xb88] sm:$0xff]  ;;  %v1101_v8 = vld [vmem:[#allocation5 + $0x50] sm:$0xff] }
 0x205   : > { %4407 = vmatmul.mubr.bf16.gmra.mxu1 %v17758_v56  ;;  %4470 = vmatpush1.bf16.msra.mxu0 %v11130_v39  ;;  %v1464_v44 = vld [vmem:[#allocation5 + $0xba8] sm:$0xff]  ;;  %v1117_v56 = vld [vmem:[#allocation5 + $0xd0] sm:$0xff] }
 0x206   : > { %4303 = vmatprep.mubr.bf16.mxu0 %v17759_v42  ;;  %4416 = vmatprep.mubr.bf16.mxu1 %v17760_v58  ;;  %v11235_v11 = vcombine.high %v1460_v22, %v1464_v44  ;;  %v1452_v7 = vld [vmem:[#allocation5 + $0xb48] sm:$0xff]  ;;  %v17761_v42 = vld [vmem:[#allocation31_spill] sm:$0xff]  ;;  %v11234_v57 = vcombine.low %v1460_v22, %v1464_v44 }
 0x207   : > { %4471 = vmatprep.subr.bf16.mxu0 %v11123_v49  ;;  %4583 = vmatpush1.bf16.msra.mxu1 %v11258_v23  ;;  %v1456_v39 = vld [vmem:[#allocation5 + $0xb68] sm:$0xff]  ;;  %v17764_v49 = vld [vmem:[#allocation41_spill] sm:$0xff] }
 0x208   : > { %4584 = vmatprep.subr.bf16.mxu1 %v11251_v41  ;;  %v17762_v58 = vld [vmem:[#allocation24_spill] sm:$0xff]  ;;  %v11227_v23 = vcombine.high %v1452_v7, %v1456_v39  ;;  %v11226_v52 = vcombine.low %v1452_v7, %v1456_v39 }
 0x209   : > { %4472 = vmatpush1.bf16.msra.mxu0 %v11122_v26  ;;  %v1444_v41 = vld [vmem:[#allocation5 + $0xb08] sm:$0xff] }
 0x20a   : > { %4473 = vmatprep.subr.bf16.mxu0 %v11243_v25  ;;  %v1448_v29 = vld [vmem:[#allocation5 + $0xb28] sm:$0xff] }
 0x20b   : > { %4585 = vmatpush1.bf16.msra.mxu1 %v11250_v63  ;;  %v11219_v26 = vcombine.high %v1444_v41, %v1448_v29  ;;  %v1436_v25 = vld [vmem:[#allocation5 + $0xac8] sm:$0xff]  ;;  %v11218_v22 = vcombine.low %v1444_v41, %v1448_v29 }
 0x20c   : > { %4304 = vmatmul.mubr.bf16.gmra.mxu0 %v17761_v42  ;;  %4796 = vmatprep.subr.bf16.mxu1 %v11053_v6  ;;  %v1440_v63 = vld [vmem:[#allocation5 + $0xae8] sm:$0xff]  ;;  %v17765_v42 = vld [vmem:[#allocation43_spill] sm:$0xff] }
 0x20d   : > { %4417 = vmatmul.mubr.bf16.gmra.mxu1 %v17762_v58  ;;  %4474 = vmatpush2.bf16.msra.mxu0 %v11242_v46  ;;  %v17766_v6 = vld [vmem:[#allocation40_spill] sm:$0xff]  ;;  %v17768_v46 = vld [vmem:[#allocation50_spill] sm:$0xff]  ;;  %v11210_v7 = vcombine.low %v1436_v25, %v1440_v63  ;;  %v17769_v58 = vld [vmem:[#allocation109_spill] sm:$0xff] }
 0x20e   : > { %4313 = vmatprep.mubr.bf16.mxu0 %v17763_v35  ;;  %4426 = vmatprep.mubr.bf16.mxu1 %v17764_v49  ;;  %v17767_v44 = vld [vmem:[#allocation48_spill] sm:$0xff]  ;;  %v11211_v49 = vcombine.high %v1436_v25, %v1440_v63  ;;  %v1149_v63 = vld [vmem:[#allocation5 + $0x1d0] sm:$0xff] }
 0x20f   : > { %4475 = vmatprep.subr.bf16.mxu0 %v11235_v11  ;;  %v1428_v11 = vld [vmem:[#allocation5 + $0xa88] sm:$0xff] }
 0x210   : > { %v1432_v35 = vld [vmem:[#allocation5 + $0xaa8] sm:$0xff] }
 0x211   : > { %4476 = vmatpush2.bf16.msra.mxu0 %v11234_v57  ;;  %v11203_v39 = vcombine.high %v1428_v11, %v1432_v35  ;;  %v1420_v57 = vld [vmem:[#allocation5 + $0xa48] sm:$0xff]  ;;  %v11202_v41 = vcombine.low %v1428_v11, %v1432_v35 }
 0x212   : > { %4477 = vmatprep.subr.bf16.mxu0 %v11227_v23  ;;  %v1424_v23 = vld [vmem:[#allocation5 + $0xa68] sm:$0xff] }
 0x213   : > { %v11195_v29 = vcombine.high %v1420_v57, %v1424_v23  ;;  %v11194_v25 = vcombine.low %v1420_v57, %v1424_v23  ;;  %v1145_v23 = vld [vmem:[#allocation5 + $0x1b0] sm:$0xff] }
 0x214   : > { %4314 = vmatmul.mubr.bf16.gmra.mxu0 %v17765_v42  ;;  %v17770_v42 = vld [vmem:[#allocation110_spill] sm:$0xff] }
 0x215   : > { %4427 = vmatmul.mubr.bf16.gmra.mxu1 %v17766_v6  ;;  %4478 = vmatpush2.bf16.msra.mxu0 %v11226_v52  ;;  %v1412_v52 = vld [vmem:[#allocation5 + $0xa08] sm:$0xff] }
 0x216   : > { %4323 = vmatprep.mubr.bf16.mxu0 %v17767_v44  ;;  %4436 = vmatprep.mubr.bf16.mxu1 %v17768_v46  ;;  %v1133_v46 = vld [vmem:[#allocation5 + $0x150] sm:$0xff] }
 0x217   : > { %4479 = vmatprep.subr.bf16.mxu0 %v11219_v26  ;;  %v1416_v26 = vld [vmem:[#allocation5 + $0xa28] sm:$0xff]  ;;  %v1125_v44 = vld [vmem:[#allocation5 + $0x110] sm:$0xff] }
 0x218   : > { %v11186_v35 = vcombine.low %v1412_v52, %v1416_v26 }
 0x219   : > { %4480 = vmatpush2.bf16.msra.mxu0 %v11218_v22  ;;  %v1153_v22 = vld [vmem:[#allocation5 + $0x1f0] sm:$0xff] }
 0x21a   : > { %4481 = vmatprep.subr.bf16.mxu0 %v11211_v49  ;;  %v11187_v49 = vcombine.high %v1412_v52, %v1416_v26  ;;  %v10925_v11 = vcombine.high %v1149_v63, %v1153_v22  ;;  %v11052_v52 = vcombine.low %v14536_v47, %v14538_v31 }
 0x21c   : > { %4324 = vmatmul.mubr.bf16.gmra.mxu0 %v17769_v58 }
 0x21d   : > { %4437 = vmatmul.mubr.bf16.gmra.mxu1 %v17770_v42  ;;  %4482 = vmatpush2.bf16.msra.mxu0 %v11210_v7  ;;  %v17771_v7 = vmov 0  }
 0x21e   : > { %4333 = vmatprep.mubr.bf16.mxu0 %v14458_v18  ;;  %4446 = vmatprep.mubr.bf16.mxu1 %v14460_v45  ;;  %v3926_v45 = vpop.f32.mrf.mxu1  ;;  %v1273_v18 = vld [vmem:[#allocation5 + $0x5b0] sm:$0xff] }
 0x21f   : > { %4483 = vmatprep.subr.bf16.mxu0 %v11203_v39  ;;  %v3813_v39 = vpop.f32.mrf.mxu0 }
 0x220   : > { %v14560_v57 = vadd.f32 %v3926_v45, %v3813_v39  ;;  %v1137_v45 = vld [vmem:[#allocation5 + $0x170] sm:$0xff] }
 0x221   : > { %4484 = vmatpush2.bf16.msra.mxu0 %v11202_v41  ;;  %v1141_v41 = vld [vmem:[#allocation5 + $0x190] sm:$0xff]  ;;  %v3815_v42 = vpop.f32.mrf.mxu0 }
 0x222   : > { %4485 = vmatprep.subr.bf16.mxu0 %v11195_v29  ;;  %v1269_v29 = vld [vmem:[#allocation5 + $0x590] sm:$0xff] }
 0x223   : > { %v11045_v58 = vcombine.high %v1269_v29, %v1273_v18 }
 0x224   : > { %4334 = vmatmul.mubr.bf16.gmra.mxu0 %v14462_v10  ;;  %v10924_v10 = vcombine.low %v1149_v63, %v1153_v22  ;;  %v1265_v63 = vld [vmem:[#allocation5 + $0x570] sm:$0xff]  ;;  %v10916_v22 = vcombine.low %v1141_v41, %v1145_v23 }
 0x225   : > { %4447 = vmatmul.mubr.bf16.gmra.mxu1 %v14464_v48  ;;  %4486 = vmatpush2.bf16.msra.mxu0 %v11194_v25  ;;  %v3928_v48 = vpop.f32.mrf.mxu1  ;;  %v10917_v25 = vcombine.high %v1141_v41, %v1145_v23  ;;  %v1253_v41 = vld [vmem:[#allocation5 + $0x510] sm:$0xff] }
 0x226   : > { %4489 = vmatprep.mubr.bf16.mxu0 %v13995_v50  ;;  %4487 = vmatprep.subr.bf16.mxu0 %v11187_v49  ;;  %v14564_v26 = vadd.f32 %v3928_v48, %v3815_v42  ;;  %v3817_v49 = vpop.f32.mrf.mxu0  ;;  %v11044_v48 = vcombine.low %v1269_v29, %v1273_v18  ;;  %v10909_v42 = vcombine.high %v1133_v46, %v1137_v45  ;;  %v1257_v23 = vld [vmem:[#allocation5 + $0x530] sm:$0xff] }
 0x227   : > { %4602 = vmatprep.mubr.bf16.mxu1 %v17771_v7  ;;  %v3930_v50 = vpop.f32.mrf.mxu1  ;;  %v11029_v6 = vcombine.high %v1253_v41, %v1257_v23 }
 0x228   : > { %v14567_v39 = vadd.f32 %v3930_v50, %v3817_v49 }
 0x229   : > { %4488 = vmatpush2.bf16.msra.mxu0 %v11186_v35  ;;  %v1261_v35 = vld [vmem:[#allocation5 + $0x550] sm:$0xff]  ;;  %v3932_v47 = vpop.f32.mrf.mxu1 }
 0x22a   : > { %4683 = vmatprep.subr.bf16.mxu0 %v10925_v11  ;;  %v3819_v11 = vpop.f32.mrf.mxu0  ;;  %v11037_v49 = vcombine.high %v1261_v35, %v1265_v63  ;;  %v11036_v29 = vcombine.low %v1261_v35, %v1265_v63 }
 0x22b   : > { %v14571_v31 = vadd.f32 %v3932_v47, %v3819_v11  ;;  %v3936_v50 = vpop.f32.mrf.mxu1 }
 0x22c   : > { %4490 = vmatmul.mubr.bf16.vlgmr.msra.gmra.mxu0 %v13997_v17  ;;  %v3823_v17 = vpop.f32.mrf.mxu0 }
 0x22d   : > { %4603 = vmatmul.mubr.bf16.vlgmr.msra.gmra.mxu1 %v14028_v28  ;;  %4684 = vmatpush1.bf16.msra.mxu0 %v10924_v10  ;;  %v14574_v28 = vadd.f32 %v3936_v50, %v3823_v17  ;;  %v1129_v10 = vld [vmem:[#allocation5 + $0x130] sm:$0xff]  ;;  %v3938_v18 = vpop.f32.mrf.mxu1 }
 0x22e   : > { %4499 = vmatprep.mubr.bf16.mxu0 %v14010_v21  ;;  %4797 = vmatpush1.bf16.msra.mxu1 %v11052_v52  ;;  %v10908_v21 = vcombine.low %v1133_v46, %v1137_v45  ;;  %v3825_v52 = vpop.f32.mrf.mxu0  ;;  %v1121_v17 = vld [vmem:[#allocation5 + $0xf0] sm:$0xff]  ;;  %v10900_v45 = vcombine.low %v1125_v44, %v1129_v10 }
 0x22f   : > { %4685 = vmatprep.subr.bf16.mxu0 %v10917_v25  ;;  %4798 = vmatprep.subr.bf16.mxu1 %v11045_v58  ;;  %v14576_v25 = vadd.f32 %v3938_v18, %v3825_v52  ;;  %v10901_v58 = vcombine.high %v1125_v44, %v1129_v10  ;;  %v3940_v47 = vpop.f32.mrf.mxu1  ;;  %v1249_v46 = vld [vmem:[#allocation5 + $0x4f0] sm:$0xff] }
 0x230   : > { %4612 = vmatprep.mubr.bf16.mxu1 %v17771_v7  ;;  %v3827_v11 = vpop.f32.mrf.mxu0  ;;  %v1237_v44 = vld [vmem:[#allocation5 + $0x490] sm:$0xff] }
 0x231   : > { %4686 = vmatpush1.bf16.msra.mxu0 %v10916_v22  ;;  %v14579_v50 = vadd.f32 %v3940_v47, %v3827_v11  ;;  %v1245_v22 = vld [vmem:[#allocation5 + $0x4d0] sm:$0xff]  ;;  %v3942_v63 = vpop.f32.mrf.mxu1 }
 0x232   : > { %4799 = vmatpush1.bf16.msra.mxu1 %v11044_v48  ;;  %4687 = vmatprep.subr.bf16.mxu0 %v10909_v42  ;;  %v3829_v35 = vpop.f32.mrf.mxu0  ;;  %v11028_v48 = vcombine.low %v1253_v41, %v1257_v23  ;;  %v11021_v11 = vcombine.high %v1245_v22, %v1249_v46  ;;  %v1109_v47 = vld [vmem:[#allocation5 + $0x90] sm:$0xff]  ;;  %v11020_v23 = vcombine.low %v1245_v22, %v1249_v46 }
 0x233   : > { %4800 = vmatprep.subr.bf16.mxu1 %v11037_v49  ;;  %v14583_v42 = vadd.f32 %v3942_v63, %v3829_v35  ;;  %v10893_v49 = vcombine.high %v1117_v56, %v1121_v17  ;;  %v3946_v18 = vpop.f32.mrf.mxu1  ;;  %v1241_v10 = vld [vmem:[#allocation5 + $0x4b0] sm:$0xff] }
 0x234   : > { %4500 = vmatmul.mubr.bf16.gmra.mxu0 %v14055_v51  ;;  %v3833_v52 = vpop.f32.mrf.mxu0  ;;  %v11013_v51 = vcombine.high %v1237_v44, %v1241_v10 }
 0x235   : > { %4613 = vmatmul.mubr.bf16.gmra.mxu1 %v14131_v13  ;;  %4688 = vmatpush1.bf16.msra.mxu0 %v10908_v21  ;;  %v14586_v13 = vadd.f32 %v3946_v18, %v3833_v52  ;;  %v1113_v21 = vld [vmem:[#allocation5 + $0xb0] sm:$0xff]  ;;  %v3948_v41 = vpop.f32.mrf.mxu1 }
 0x236   : > { %4509 = vmatprep.mubr.bf16.mxu0 %v14152_v20  ;;  %4801 = vmatpush1.bf16.msra.mxu1 %v11036_v29  ;;  %v10892_v20 = vcombine.low %v1117_v56, %v1121_v17  ;;  %v3835_v29 = vpop.f32.mrf.mxu0  ;;  %v1105_v52 = vld [vmem:[#allocation5 + $0x70] sm:$0xff]  ;;  %v10884_v17 = vcombine.low %v1109_v47, %v1113_v21 }
 0x237   : > { %4689 = vmatprep.subr.bf16.mxu0 %v10901_v58  ;;  %4802 = vmatprep.subr.bf16.mxu1 %v11029_v6  ;;  %v14588_v58 = vadd.f32 %v3948_v41, %v3835_v29  ;;  %v10885_v6 = vcombine.high %v1109_v47, %v1113_v21  ;;  %v3950_v63 = vpop.f32.mrf.mxu1  ;;  %v1233_v56 = vld [vmem:[#allocation5 + $0x470] sm:$0xff] }
 0x238   : > { %4622 = vmatprep.mubr.bf16.mxu1 %v17771_v7  ;;  %v3837_v35 = vpop.f32.mrf.mxu0  ;;  %v1221_v47 = vld [vmem:[#allocation5 + $0x410] sm:$0xff] }
 0x239   : > { %4690 = vmatpush1.bf16.msra.mxu0 %v10900_v45  ;;  %v14591_v18 = vadd.f32 %v3950_v63, %v3837_v35  ;;  %v1229_v45 = vld [vmem:[#allocation5 + $0x450] sm:$0xff]  ;;  %v3952_v46 = vpop.f32.mrf.mxu1 }
 0x23a   : > { %4803 = vmatpush1.bf16.msra.mxu1 %v11028_v48  ;;  %4691 = vmatprep.subr.bf16.mxu0 %v10893_v49  ;;  %v3839_v22 = vpop.f32.mrf.mxu0  ;;  %v11012_v48 = vcombine.low %v1237_v44, %v1241_v10  ;;  %v11005_v35 = vcombine.high %v1229_v45, %v1233_v56  ;;  %v1093_v63 = vld [vmem:[#allocation5 + $0x10] sm:$0xff]  ;;  %v11004_v10 = vcombine.low %v1229_v45, %v1233_v56 }
 0x23b   : > { %4804 = vmatprep.subr.bf16.mxu1 %v11021_v11  ;;  %v14595_v49 = vadd.f32 %v3952_v46, %v3839_v22  ;;  %v10877_v11 = vcombine.high %v1101_v8, %v1105_v52  ;;  %v1225_v21 = vld [vmem:[#allocation5 + $0x430] sm:$0xff] }
 0x23c   : > { %4510 = vmatmul.mubr.bf16.gmra.mxu0 %v14243_v4  ;;  %v3843_v29 = vpop.f32.mrf.mxu0  ;;  %v10997_v4 = vcombine.high %v1221_v47, %v1225_v21 }
 0x23d   : > { %4623 = vmatmul.mubr.bf16.gmra.mxu1 %v14245_v9  ;;  %4692 = vmatpush1.bf16.msra.mxu0 %v10892_v20  ;;  %17772 = vst [vmem:[#allocation54_spill] sm:$0xff] %v14595_v49  ;;  %v3956_v41 = vpop.f32.mrf.mxu1  ;;  %v1097_v20 = vld [vmem:[#allocation5 + $0x30] sm:$0xff] }
 0x23e   : > { %4519 = vmatprep.mubr.bf16.mxu0 %v14262_v5  ;;  %4805 = vmatpush1.bf16.msra.mxu1 %v11020_v23  ;;  %v14598_v9 = vadd.f32 %v3956_v41, %v3843_v29  ;;  %v10876_v5 = vcombine.low %v1101_v8, %v1105_v52  ;;  %v3845_v23 = vpop.f32.mrf.mxu0  ;;  %v1213_v49 = vld [vmem:[#allocation5 + $0x3d0] sm:$0xff]  ;;  %v10868_v52 = vcombine.low %v1093_v63, %v1097_v20 }
 0x23f   : > { %4693 = vmatprep.subr.bf16.mxu0 %v10885_v6  ;;  %4806 = vmatprep.subr.bf16.mxu1 %v11013_v51  ;;  %v3958_v44 = vpop.f32.mrf.mxu1  ;;  %v10869_v51 = vcombine.high %v1093_v63, %v1097_v20  ;;  %v1217_v29 = vld [vmem:[#allocation5 + $0x3f0] sm:$0xff] }
 0x240   : > { %4632 = vmatprep.mubr.bf16.mxu1 %v17771_v7  ;;  %v14600_v6 = vadd.f32 %v3958_v44, %v3845_v23  ;;  %v3847_v22 = vpop.f32.mrf.mxu0  ;;  %v1345_v8 = vld [vmem:[#allocation5 + $0x7f0] sm:$0xff] }
 0x241   : > { %4694 = vmatpush1.bf16.msra.mxu0 %v10884_v17  ;;  %v3960_v46 = vpop.f32.mrf.mxu1  ;;  %v1341_v17 = vld [vmem:[#allocation5 + $0x7d0] sm:$0xff] }
 0x242   : > { %4807 = vmatpush1.bf16.msra.mxu1 %v11012_v48  ;;  %4695 = vmatprep.subr.bf16.mxu0 %v10877_v11  ;;  %v14603_v41 = vadd.f32 %v3960_v46, %v3847_v22  ;;  %v3849_v45 = vpop.f32.mrf.mxu0  ;;  %v10996_v48 = vcombine.low %v1221_v47, %v1225_v21  ;;  %v11117_v22 = vcombine.high %v1341_v17, %v1345_v8  ;;  %v1205_v46 = vld [vmem:[#allocation5 + $0x390] sm:$0xff] }
 0x243   : > { %4808 = vmatprep.subr.bf16.mxu1 %v11005_v35  ;;  %v3962_v56 = vpop.f32.mrf.mxu1  ;;  %v10989_v35 = vcombine.high %v1213_v49, %v1217_v29  ;;  %v1333_v63 = vld [vmem:[#allocation5 + $0x790] sm:$0xff]  ;;  %v11116_v21 = vcombine.low %v1341_v17, %v1345_v8 }
 0x244   : > { %4520 = vmatmul.mubr.bf16.gmra.mxu0 %v14296_v36  ;;  %v14607_v11 = vadd.f32 %v3962_v56, %v3849_v45  ;;  %v1337_v20 = vld [vmem:[#allocation5 + $0x7b0] sm:$0xff] }
 0x245   : > { %4633 = vmatmul.mubr.bf16.gmra.mxu1 %v14319_v43  ;;  %4696 = vmatpush1.bf16.msra.mxu0 %v10876_v5  ;;  %v3853_v23 = vpop.f32.mrf.mxu0  ;;  %v3966_v44 = vpop.f32.mrf.mxu1  ;;  %v1209_v5 = vld [vmem:[#allocation5 + $0x3b0] sm:$0xff]  ;;  %v11109_v36 = vcombine.high %v1333_v63, %v1337_v20 }
 0x246   : > { %4529 = vmatprep.mubr.bf16.mxu0 %v14336_v32  ;;  %4809 = vmatpush1.bf16.msra.mxu1 %v11004_v10  ;;  %17773 = vst [vmem:[#allocation56_spill] sm:$0xff] %v14607_v11  ;;  %v14610_v43 = vadd.f32 %v3966_v44, %v3853_v23  ;;  %v10988_v32 = vcombine.low %v1213_v49, %v1217_v29  ;;  %v1197_v11 = vld [vmem:[#allocation5 + $0x350] sm:$0xff]  ;;  %v17776_v29 = vld [vmem:[#allocation107_spill] sm:$0xff] }
 0x247   : > { %4697 = vmatprep.subr.bf16.mxu0 %v10869_v51  ;;  %4810 = vmatprep.subr.bf16.mxu1 %v10997_v4  ;;  %v3855_v10 = vpop.f32.mrf.mxu0  ;;  %v3968_v47 = vpop.f32.mrf.mxu1  ;;  %v10981_v4 = vcombine.high %v1205_v46, %v1209_v5  ;;  %v1201_v23 = vld [vmem:[#allocation5 + $0x370] sm:$0xff] }
 0x248   : > { %4642 = vmatprep.mubr.bf16.mxu1 %v17771_v7  ;;  %v14612_v51 = vadd.f32 %v3968_v47, %v3855_v10  ;;  %v1329_v49 = vld [vmem:[#allocation5 + $0x770] sm:$0xff]  ;;  %v10973_v10 = vcombine.high %v1197_v11, %v1201_v23 }
 0x249   : > { %4698 = vmatpush1.bf16.msra.mxu0 %v10868_v52  ;;  %v3857_v45 = vpop.f32.mrf.mxu0  ;;  %v3970_v56 = vpop.f32.mrf.mxu1  ;;  %v1325_v52 = vld [vmem:[#allocation5 + $0x750] sm:$0xff] }
 0x24a   : > { %4811 = vmatpush1.bf16.msra.mxu1 %v10996_v48  ;;  %4699 = vmatprep.subr.bf16.mxu0 %v10989_v35  ;;  %17774 = vst [vmem:[#allocation111_spill] sm:$0xff] %v14612_v51  ;;  %v14615_v44 = vadd.f32 %v3970_v56, %v3857_v45  ;;  %v10980_v48 = vcombine.low %v1205_v46, %v1209_v5  ;;  %v1189_v56 = vld [vmem:[#allocation5 + $0x310] sm:$0xff] }
 0x24b   : > { %4812 = vmatprep.subr.bf16.mxu1 %v11117_v22  ;;  %v3859_v17 = vpop.f32.mrf.mxu0  ;;  %v3972_v8 = vpop.f32.mrf.mxu1  ;;  %v11108_v35 = vcombine.low %v1333_v63, %v1337_v20  ;;  %v11101_v45 = vcombine.high %v1325_v52, %v1329_v49  ;;  %v1321_v46 = vld [vmem:[#allocation5 + $0x730] sm:$0xff]  ;;  %v10972_v5 = vcombine.low %v1197_v11, %v1201_v23  ;;  %v11100_v63 = vcombine.low %v1325_v52, %v1329_v49 }
 0x24c   : > { %4530 = vmatmul.mubr.bf16.gmra.mxu0 %v14353_v16  ;;  %17775 = vst [vmem:[#allocation112_spill] sm:$0xff] %v14615_v44  ;;  %v14619_v22 = vadd.f32 %v3972_v8, %v3859_v17  ;;  %v1313_v11 = vld [vmem:[#allocation5 + $0x6f0] sm:$0xff] }
 0x24d   : > { %4643 = vmatmul.mubr.bf16.gmra.mxu1 %v17776_v29  ;;  %4700 = vmatpush2.bf16.msra.mxu0 %v10988_v32  ;;  %v1193_v29 = vld [vmem:[#allocation5 + $0x330] sm:$0xff] }
 0x24e   : > { %4539 = vmatprep.mubr.bf16.mxu0 %v14384_v40  ;;  %4813 = vmatpush2.bf16.msra.mxu1 %v11116_v21  ;;  %17777 = vst [vmem:[#allocation123_spill] sm:$0xff] %v14619_v22  ;;  %v1317_v32 = vld [vmem:[#allocation5 + $0x710] sm:$0xff] }
 0x24f   : > { %4701 = vmatprep.subr.bf16.mxu0 %v10981_v4  ;;  %4814 = vmatprep.subr.bf16.mxu1 %v11109_v36  ;;  %v10965_v4 = vcombine.high %v1189_v56, %v1193_v29  ;;  %v11093_v8 = vcombine.high %v1317_v32, %v1321_v46  ;;  %v1181_v40 = vld [vmem:[#allocation5 + $0x2d0] sm:$0xff]  ;;  %v11092_v49 = vcombine.low %v1317_v32, %v1321_v46 }
 0x250   : > { %v3863_v47 = vpop.f32.mrf.mxu0  ;;  %4652 = vmatprep.mubr.bf16.mxu1 %v17771_v7  ;;  %v3976_v16 = vpop.f32.mrf.mxu1  ;;  %v1185_v22 = vld [vmem:[#allocation5 + $0x2f0] sm:$0xff] }
 0x251   : > { %4702 = vmatpush2.bf16.msra.mxu0 %v10980_v48  ;;  %v14622_v44 = vadd.f32 %v3976_v16, %v3863_v47  ;;  %v1309_v48 = vld [vmem:[#allocation5 + $0x6d0] sm:$0xff]  ;;  %v10964_v16 = vcombine.low %v1189_v56, %v1193_v29 }
 0x252   : > { %v3865_v21 = vpop.f32.mrf.mxu0  ;;  %4815 = vmatpush2.bf16.msra.mxu1 %v11108_v35  ;;  %4703 = vmatprep.subr.bf16.mxu0 %v10973_v10  ;;  %v3978_v20 = vpop.f32.mrf.mxu1  ;;  %v10957_v10 = vcombine.high %v1181_v40, %v1185_v22  ;;  %v1305_v29 = vld [vmem:[#allocation5 + $0x6b0] sm:$0xff]  ;;  %v11084_v32 = vcombine.low %v1309_v48, %v1313_v11 }
 0x253   : > { %4816 = vmatprep.subr.bf16.mxu1 %v11101_v45  ;;  %v14624_v36 = vadd.f32 %v3978_v20, %v3865_v21  ;;  %v11085_v45 = vcombine.high %v1309_v48, %v1313_v11  ;;  %v1173_v21 = vld [vmem:[#allocation5 + $0x290] sm:$0xff] }
 0x254   : > { %v3867_v17 = vpop.f32.mrf.mxu0  ;;  %4540 = vmatmul.mubr.bf16.gmra.mxu0 %v14390_v38  ;;  %v3980_v51 = vpop.f32.mrf.mxu1  ;;  %v1177_v20 = vld [vmem:[#allocation5 + $0x2b0] sm:$0xff] }
 0x255   : > { %4653 = vmatmul.mubr.bf16.gmra.mxu1 %v14392_v3  ;;  %4704 = vmatpush2.bf16.msra.mxu0 %v10972_v5  ;;  %v14628_v23 = vadd.f32 %v3980_v51, %v3867_v17  ;;  %v1301_v5 = vld [vmem:[#allocation5 + $0x690] sm:$0xff]  ;;  %v10956_v51 = vcombine.low %v1181_v40, %v1185_v22  ;;  %v10948_v22 = vcombine.low %v1173_v21, %v1177_v20 }
 0x256   : > { %v3869_v52 = vpop.f32.mrf.mxu0  ;;  %4549 = vmatprep.mubr.bf16.mxu0 %v14502_v27  ;;  %4817 = vmatpush2.bf16.msra.mxu1 %v11100_v63  ;;  %v3982_v35 = vpop.f32.mrf.mxu1  ;;  %v11077_v17 = vcombine.high %v1301_v5, %v1305_v29  ;;  %v1293_v3 = vld [vmem:[#allocation5 + $0x650] sm:$0xff] }
 0x257   : > { %4705 = vmatprep.subr.bf16.mxu0 %v10965_v4  ;;  %4818 = vmatprep.subr.bf16.mxu1 %v11093_v8  ;;  %v14631_v47 = vadd.f32 %v3982_v35, %v3869_v52  ;;  %v10949_v4 = vcombine.high %v1173_v21, %v1177_v20  ;;  %v1165_v8 = vld [vmem:[#allocation5 + $0x250] sm:$0xff] }
 0x258   : > { %4662 = vmatprep.mubr.bf16.mxu1 %v17771_v7  ;;  %v1169_v52 = vld [vmem:[#allocation5 + $0x270] sm:$0xff] }
 0x259   : > { %4706 = vmatpush2.bf16.msra.mxu0 %v10964_v16  ;;  %v1297_v38 = vld [vmem:[#allocation5 + $0x670] sm:$0xff]  ;;  %v11076_v16 = vcombine.low %v1301_v5, %v1305_v29  ;;  %v10940_v20 = vcombine.low %v1165_v8, %v1169_v52 }
 0x25a   : > { %4819 = vmatpush2.bf16.msra.mxu1 %v11092_v49  ;;  %4707 = vmatprep.subr.bf16.mxu0 %v10957_v10  ;;  %v10941_v49 = vcombine.high %v1165_v8, %v1169_v52  ;;  %v11068_v5 = vcombine.low %v1293_v3, %v1297_v38 }
 0x25b   : > { %v3986_v63 = vpop.f32.mrf.mxu1  ;;  %4820 = vmatprep.subr.bf16.mxu1 %v11085_v45  ;;  %v11069_v45 = vcombine.high %v1293_v3, %v1297_v38 }
 0x25c   : > { %v3873_v56 = vpop.f32.mrf.mxu0  ;;  %4550 = vmatmul.mubr.bf16.gmra.mxu0 %v14422_v60  ;;  %v1537_v60 = vld [vmem:[#allocation5 + $0xdf0] sm:$0xff] }
 0x25d   : > { %v14634_v46 = vadd.f32 %v3986_v63, %v3873_v56  ;;  %v3988_v27 = vpop.f32.mrf.mxu1  ;;  %4663 = vmatmul.mubr.bf16.gmra.mxu1 %v14424_v30  ;;  %4708 = vmatpush2.bf16.msra.mxu0 %v10956_v51  ;;  %v1157_v51 = vld [vmem:[#allocation5 + $0x210] sm:$0xff] }
 0x25e   : > { %v3875_v35 = vpop.f32.mrf.mxu0  ;;  %4559 = vmatprep.mubr.bf16.mxu0 %v14512_v61  ;;  %4821 = vmatpush2.bf16.msra.mxu1 %v11084_v32  ;;  %v1285_v32 = vld [vmem:[#allocation5 + $0x610] sm:$0xff] }
 0x25f   : > { %v14638_v40 = vadd.f32 %v3988_v27, %v3875_v35  ;;  %v3990_v11 = vpop.f32.mrf.mxu1  ;;  %4709 = vmatprep.subr.bf16.mxu0 %v10949_v4  ;;  %4822 = vmatprep.subr.bf16.mxu1 %v11077_v17  ;;  %v1161_v27 = vld [vmem:[#allocation5 + $0x230] sm:$0xff] }
 0x260   : > { %v3877_v48 = vpop.f32.mrf.mxu0  ;;  %4672 = vmatprep.mubr.bf16.mxu1 %v17771_v7  ;;  %v1289_v35 = vld [vmem:[#allocation5 + $0x630] sm:$0xff]  ;;  %v10933_v29 = vcombine.high %v1157_v51, %v1161_v27  ;;  %v10932_v8 = vcombine.low %v1157_v51, %v1161_v27 }
 0x261   : > { %v14641_v10 = vadd.f32 %v3990_v11, %v3877_v48  ;;  %v3992_v63 = vpop.f32.mrf.mxu1  ;;  %4710 = vmatpush2.bf16.msra.mxu0 %v10948_v22  ;;  %v1405_v4 = vld [vmem:[#allocation5 + $0x9d0] sm:$0xff]  ;;  %v11061_v61 = vcombine.high %v1285_v32, %v1289_v35  ;;  %v11060_v52 = vcombine.low %v1285_v32, %v1289_v35 }
 0x262   : > { %v3879_v56 = vpop.f32.mrf.mxu0  ;;  %4823 = vmatpush2.bf16.msra.mxu1 %v11076_v16  ;;  %4711 = vmatprep.subr.bf16.mxu0 %v10941_v49  ;;  %v1409_v17 = vld [vmem:[#allocation5 + $0x9f0] sm:$0xff] }
 0x263   : > { %v14644_v21 = vadd.f32 %v3992_v63, %v3879_v56  ;;  %4824 = vmatprep.subr.bf16.mxu1 %v11069_v45  ;;  %v1533_v30 = vld [vmem:[#allocation5 + $0xdd0] sm:$0xff]  ;;  %v11181_v16 = vcombine.high %v1405_v4, %v1409_v17  ;;  %v11180_v51 = vcombine.low %v1405_v4, %v1409_v17 }
 0x264   : > { %v3883_v48 = vpop.f32.mrf.mxu0  ;;  %v3996_v11 = vpop.f32.mrf.mxu1  ;;  %4560 = vmatmul.mubr.bf16.gmra.mxu0 %v14466_v59  ;;  %v11309_v45 = vcombine.high %v1533_v30, %v1537_v60  ;;  %v1525_v27 = vld [vmem:[#allocation5 + $0xd90] sm:$0xff] }
 0x265   : > { %v14647_v22 = vadd.f32 %v3996_v11, %v3883_v48  ;;  %4673 = vmatmul.mubr.bf16.gmra.mxu1 %v14468_v54  ;;  %4712 = vmatpush2.bf16.msra.mxu0 %v10940_v20  ;;  %v1397_v48 = vld [vmem:[#allocation5 + $0x990] sm:$0xff] }
 0x266   : > { %4715 = vmatprep.mubr.bf16.mxu0 %v13944_v0  ;;  %4825 = vmatpush2.bf16.msra.mxu1 %v11068_v5  ;;  %v3885_v38 = vpop.f32.mrf.mxu0  ;;  %v3998_v3 = vpop.f32.mrf.mxu1  ;;  %v1401_v11 = vld [vmem:[#allocation5 + $0x9b0] sm:$0xff] }
 0x267   : > { %4828 = vmatprep.mubr.bf16.mxu1 %v13946_v2  ;;  %v14652_v49 = vadd.f32 %v3998_v3, %v3885_v38  ;;  %4713 = vmatprep.subr.bf16.mxu0 %v10933_v29  ;;  %v1529_v5 = vld [vmem:[#allocation5 + $0xdb0] sm:$0xff]  ;;  %v11308_v38 = vcombine.low %v1533_v30, %v1537_v60  ;;  %v11173_v29 = vcombine.high %v1397_v48, %v1401_v11 }
 0x268   : > { %v3887_v56 = vpop.f32.mrf.mxu0  ;;  %v4000_v63 = vpop.f32.mrf.mxu1  ;;  %4826 = vmatprep.subr.bf16.mxu1 %v11061_v61  ;;  %v1389_v3 = vld [vmem:[#allocation5 + $0x950] sm:$0xff]  ;;  %v11172_v17 = vcombine.low %v1397_v48, %v1401_v11 }
 0x269   : > { %v14654_v20 = vadd.f32 %v4000_v63, %v3887_v56  ;;  %4714 = vmatpush2.bf16.msra.mxu0 %v10932_v8  ;;  %v1393_v0 = vld [vmem:[#allocation5 + $0x970] sm:$0xff]  ;;  %v11301_v56 = vcombine.high %v1525_v27, %v1529_v5 }
 0x26a   : > { %4827 = vmatpush2.bf16.msra.mxu1 %v11060_v52  ;;  %v3889_v32 = vpop.f32.mrf.mxu0  ;;  %v4002_v35 = vpop.f32.mrf.mxu1  ;;  %4909 = vmatprep.subr.bf16.mxu0 %v11181_v16  ;;  %v1517_v8 = vld [vmem:[#allocation5 + $0xd50] sm:$0xff]  ;;  %v11165_v16 = vcombine.high %v1389_v3, %v1393_v0 }
 0x26b   : > { %v14656_v2 = vadd.f32 %v4002_v35, %v3889_v32  ;;  %5022 = vmatprep.subr.bf16.mxu1 %v11309_v45  ;;  %v1521_v52 = vld [vmem:[#allocation5 + $0xd70] sm:$0xff]  ;;  %v11300_v32 = vcombine.low %v1525_v27, %v1529_v5 }
 0x26c   : > { %v4039_v61 = vpop.f32.mrf.mxu0  ;;  %v4152_v54 = vpop.f32.mrf.mxu1  ;;  %4716 = vmatmul.mubr.bf16.vlgmr.msra.gmra.mxu0 %v13953_v62  ;;  %v1385_v35 = vld [vmem:[#allocation5 + $0x930] sm:$0xff]  ;;  %v11293_v48 = vcombine.high %v1517_v8, %v1521_v52 }
 0x26d   : > { %v4040_v4 = vadd.f32 %v4039_v61, %v14560_v57  ;;  %4829 = vmatmul.mubr.bf16.vlgmr.msra.gmra.mxu1 %v13955_v1  ;;  %4910 = vmatpush1.bf16.msra.mxu0 %v11180_v51  ;;  %v1381_v57 = vld [vmem:[#allocation5 + $0x910] sm:$0xff] }
 0x26e   : > { %4725 = vmatprep.mubr.bf16.mxu0 %v13961_v15  ;;  %4838 = vmatprep.mubr.bf16.mxu1 %v13967_v24  ;;  %v4041_v60 = vpop.f32.mrf.mxu0  ;;  %v4154_v30 = vpop.f32.mrf.mxu1  ;;  %v11164_v24 = vcombine.low %v1389_v3, %v1393_v0  ;;  %v14665_v62 = vld [vmem:[#allocation5 + $0xd10] sm:$0xff]  ;;  %v11157_v27 = vcombine.high %v1381_v57, %v1385_v35 }
 0x26f   : > { %v4153_v45 = vadd.f32 %v4152_v54, %v4040_v4  ;;  %v4042_v63 = vadd.f32 %v4041_v60, %v14564_v26  ;;  %5023 = vmatpush1.bf16.msra.mxu1 %v11308_v38  ;;  %4911 = vmatprep.subr.bf16.mxu0 %v11173_v29  ;;  %v14667_v54 = vld [vmem:[#allocation5 + $0xd30] sm:$0xff] }
 0x270   : > { %v4043_v61 = vpop.f32.mrf.mxu0  ;;  %v4156_v51 = vpop.f32.mrf.mxu1  ;;  %5024 = vmatprep.subr.bf16.mxu1 %v11301_v56  ;;  %v14670_v56 = vld [vmem:[#allocation5 + $0x8d0] sm:$0xff] }
 0x271   : > { %v5587_v11 = vmax.f32 %v4153_v45, 0.0  ;;  %v4155_v1 = vadd.f32 %v4154_v30, %v4042_v63  ;;  %v4044_v15 = vadd.f32 %v4043_v61, %v14567_v39  ;;  %4912 = vmatpush1.bf16.msra.mxu0 %v11172_v17  ;;  %v14672_v60 = vld [vmem:[#allocation5 + $0x8f0] sm:$0xff]  ;;  %v11292_v39 = vcombine.low %v1517_v8, %v1521_v52 }
 0x272   : > { %v4045_v26 = vpop.f32.mrf.mxu0  ;;  %v4158_v38 = vpop.f32.mrf.mxu1  ;;  %4913 = vmatprep.subr.bf16.mxu0 %v11165_v16  ;;  %v11156_v30 = vcombine.low %v1381_v57, %v1385_v35  ;;  %v11285_v16 = vcombine.high %v14665_v62, %v14667_v54  ;;  %v14679_v63 = vld [vmem:[#allocation5 + $0xcd0] sm:$0xff]  ;;  %v11149_v57 = vcombine.high %v14670_v56, %v14672_v60 }
 0x273   : > { %v5588_v5 = vmax.f32 %v4155_v1, 0.0  ;;  %v4157_v29 = vadd.f32 %v4156_v51, %v4044_v15  ;;  %v4046_v4 = vadd.f32 %v4045_v26, %v14571_v31  ;;  %5025 = vmatpush1.bf16.msra.mxu1 %v11300_v32  ;;  %v5715_v17 = vmul.f32 %v5587_v11, %v5587_v11  ;;  %v14681_v8 = vld [vmem:[#allocation5 + $0xcf0] sm:$0xff] }
 0x274   : > { %v4049_v0 = vpop.f32.mrf.mxu0  ;;  %v4162_v3 = vpop.f32.mrf.mxu1  ;;  %4726 = vmatmul.mubr.bf16.gmra.mxu0 %v13969_v55  ;;  %5026 = vmatprep.subr.bf16.mxu1 %v11293_v48  ;;  %v14693_v51 = vld [vmem:[#allocation5 + $0x8b0] sm:$0xff]  ;;  %v11284_v48 = vcombine.low %v14665_v62, %v14667_v54 }
 0x275   : > { %v5716_v1 = vmul.f32 %v5588_v5, %v5588_v5  ;;  %v5595_v15 = vmax.f32 %v4157_v29, 0.0  ;;  %v4159_v45 = vadd.f32 %v4158_v38, %v4046_v4  ;;  %v4050_v31 = vadd.f32 %v4049_v0, %v14574_v28  ;;  %4839 = vmatmul.mubr.bf16.gmra.mxu1 %v13982_v53  ;;  %4914 = vmatpush1.bf16.msra.mxu0 %v11164_v24  ;;  %v14691_v24 = vld [vmem:[#allocation5 + $0x890] sm:$0xff] }
 0x276   : > { %4735 = vmatprep.mubr.bf16.mxu0 %v14063_v19  ;;  %4848 = vmatprep.mubr.bf16.mxu1 %v14065_v37  ;;  %v4051_v52 = vpop.f32.mrf.mxu0  ;;  %v4164_v32 = vpop.f32.mrf.mxu1  ;;  %v14705_v62 = vld [vmem:[#allocation5 + $0xcb0] sm:$0xff] }
 0x277   : > { %v14687_v35 = vadd.f32 %v5716_v1, %v5715_v17  ;;  %v14689_v61 = vpack.c.bf16 %v5595_v15, %v5587_v11  ;;  %v5596_v28 = vmax.f32 %v4159_v45, 0.0  ;;  %4915 = vmatprep.subr.bf16.mxu0 %v11157_v27  ;;  %5027 = vmatpush1.bf16.msra.mxu1 %v11292_v39  ;;  %v4163_v26 = vadd.f32 %v4162_v3, %v4050_v31  ;;  %v14703_v1 = vld [vmem:[#allocation5 + $0xc90] sm:$0xff] }
 0x278   : > { %v4052_v38 = vadd.f32 %v4051_v52, %v14576_v25  ;;  %v4053_v29 = vpop.f32.mrf.mxu0  ;;  %v4166_v4 = vpop.f32.mrf.mxu1  ;;  %v11148_v17 = vcombine.low %v14670_v56, %v14672_v60  ;;  %5028 = vmatprep.subr.bf16.mxu1 %v11285_v16  ;;  %v11277_v11 = vcombine.high %v14679_v63, %v14681_v8  ;;  %v5723_v27 = vmul.f32 %v5595_v15, %v5595_v15  ;;  %v14716_v15 = vld [vmem:[#allocation5 + $0x870] sm:$0xff] }
 0x279   : > { %17778 = vst [vmem:[#allocation124_spill] sm:$0xff] %v14689_v61  ;;  %v5724_v39 = vmul.f32 %v5596_v28, %v5596_v28  ;;  %v4054_v0 = vadd.f32 %v4053_v29, %v14579_v50  ;;  %4916 = vmatpush1.bf16.msra.mxu0 %v11156_v30  ;;  %v14707_v54 = vpack.c.bf16 %v5596_v28, %v5588_v5  ;;  %v5603_v25 = vmax.f32 %v4163_v26, 0.0  ;;  %v14714_v30 = vld [vmem:[#allocation5 + $0x850] sm:$0xff] }
 0x27a   : > { %v4165_v3 = vadd.f32 %v4164_v32, %v4052_v38  ;;  %v4055_v45 = vpop.f32.mrf.mxu0  ;;  %v4168_v31 = vpop.f32.mrf.mxu1  ;;  %4917 = vmatprep.subr.bf16.mxu0 %v11149_v57  ;;  %v11141_v56 = vcombine.high %v14691_v24, %v14693_v51  ;;  %v11276_v5 = vcombine.low %v14679_v63, %v14681_v8  ;;  %v11269_v57 = vcombine.high %v14703_v1, %v14705_v62  ;;  %v14727_v63 = vld [vmem:[#allocation5 + $0xc50] sm:$0xff] }
 0x27b   : > { %17779 = vst [vmem:[#allocation44_spill] sm:$0xff] %v14707_v54  ;;  %v14711_v60 = vadd.f32 %v5724_v39, %v5723_v27  ;;  %v4167_v16 = vadd.f32 %v4166_v4, %v4054_v0  ;;  %v4056_v50 = vadd.f32 %v4055_v45, %v14583_v42  ;;  %5029 = vmatpush1.bf16.msra.mxu1 %v11284_v48  ;;  %v14729_v8 = vld [vmem:[#allocation5 + $0xc70] sm:$0xff] }
 0x27c   : > { %v5604_v52 = vmax.f32 %v4165_v3, 0.0  ;;  %v4059_v32 = vpop.f32.mrf.mxu0  ;;  %v4172_v28 = vpop.f32.mrf.mxu1  ;;  %4736 = vmatmul.mubr.bf16.gmra.mxu0 %v14091_v34  ;;  %5030 = vmatprep.subr.bf16.mxu1 %v11277_v11  ;;  %v11140_v48 = vcombine.low %v14691_v24, %v14693_v51  ;;  %v5731_v29 = vmul.f32 %v5603_v25, %v5603_v25  ;;  %v14737_v24 = vld [vmem:[#allocation5 + $0x810] sm:$0xff]  ;;  %v11268_v3 = vcombine.low %v14703_v1, %v14705_v62 }
 0x27d   : > { %v5611_v26 = vmax.f32 %v4167_v16, 0.0  ;;  %v4169_v38 = vadd.f32 %v4168_v31, %v4056_v50  ;;  %v4060_v42 = vadd.f32 %v4059_v32, %v14586_v13  ;;  %4849 = vmatmul.mubr.bf16.gmra.mxu1 %v17754_v12  ;;  %4918 = vmatpush1.bf16.msra.mxu0 %v11148_v17  ;;  %v11133_v13 = vcombine.high %v14714_v30, %v14716_v15  ;;  %v14739_v51 = vld [vmem:[#allocation5 + $0x830] sm:$0xff] }
 0x27e   : > { %v5732_v4 = vmul.f32 %v5604_v52, %v5604_v52  ;;  %4745 = vmatprep.mubr.bf16.mxu0 %v17755_v33  ;;  %4858 = vmatprep.mubr.bf16.mxu1 %v17756_v14  ;;  %v4061_v11 = vpop.f32.mrf.mxu0  ;;  %v4174_v27 = vpop.f32.mrf.mxu1  ;;  %v14753_v1 = vld [vmem:[#allocation5 + $0xc30] sm:$0xff] }
 0x27f   : > { %v14735_v39 = vpack.c.bf16 %v5611_v26, %v5603_v25  ;;  %v5612_v17 = vmax.f32 %v4169_v38, 0.0  ;;  %v4173_v0 = vadd.f32 %v4172_v28, %v4060_v42  ;;  %4919 = vmatprep.subr.bf16.mxu0 %v11141_v56  ;;  %5031 = vmatpush1.bf16.msra.mxu1 %v11276_v5  ;;  %v4062_v31 = vadd.f32 %v4061_v11, %v14588_v58  ;;  %v14751_v38 = vld [vmem:[#allocation5 + $0xc10] sm:$0xff] }
 0x280   : > { %v14743_v45 = vadd.f32 %v5732_v4, %v5731_v29  ;;  %v4063_v16 = vpop.f32.mrf.mxu0  ;;  %v4176_v50 = vpop.f32.mrf.mxu1  ;;  %5032 = vmatprep.subr.bf16.mxu1 %v11269_v57  ;;  %v11261_v25 = vcombine.high %v14727_v63, %v14729_v8  ;;  %v5739_v32 = vmul.f32 %v5611_v26, %v5611_v26  ;;  %v11132_v5 = vcombine.low %v14714_v30, %v14716_v15  ;;  %v14762_v30 = vld [vmem:[#allocation5 + $0xbd0] sm:$0xff] }
 0x281   : > { %17780 = vst [vmem:[#allocation37_spill] sm:$0xff] %v14735_v39  ;;  %v5740_v56 = vmul.f32 %v5612_v17, %v5612_v17  ;;  %v4064_v28 = vadd.f32 %v4063_v16, %v14591_v18  ;;  %4920 = vmatpush1.bf16.msra.mxu0 %v11140_v48  ;;  %v5619_v62 = vmax.f32 %v4173_v0, 0.0  ;;  %v4175_v58 = vadd.f32 %v4174_v27, %v4062_v31  ;;  %v17782_v48 = vld [vmem:[#allocation54_spill] sm:$0xff]  ;;  %v14764_v15 = vld [vmem:[#allocation5 + $0xbf0] sm:$0xff]  ;;  %v17783_v16 = vld [vmem:[#allocation103_spill] sm:$0xff] }
 0x282   : > { %v4065_v42 = vpop.f32.mrf.mxu0  ;;  %v4178_v29 = vpop.f32.mrf.mxu1  ;;  %4921 = vmatprep.subr.bf16.mxu0 %v11133_v13  ;;  %v11125_v57 = vcombine.high %v14737_v24, %v14739_v51  ;;  %v14757_v26 = vpack.c.bf16 %v5612_v17, %v5604_v52  ;;  %v11260_v27 = vcombine.low %v14727_v63, %v14729_v8  ;;  %v11253_v52 = vcombine.high %v14751_v38, %v14753_v1  ;;  %v14775_v63 = vld [vmem:[#allocation5 + $0x5d8] sm:$0xff]  ;;  %v1461_v61 = vld [vmem:[#allocation5 + $0xb90] sm:$0xff] }
 0x283   : > { %v14759_v4 = vadd.f32 %v5740_v56, %v5739_v32  ;;  %v4177_v18 = vadd.f32 %v4176_v50, %v4064_v28  ;;  %v4066_v11 = vadd.f32 %v4065_v42, %v17782_v48  ;;  %5033 = vmatpush1.bf16.msra.mxu1 %v11268_v3  ;;  %v5620_v0 = vmax.f32 %v4175_v58, 0.0  ;;  %v17784_v56 = vld [vmem:[#allocation104_spill] sm:$0xff]  ;;  %v14777_v8 = vld [vmem:[#allocation5 + $0x5f8] sm:$0xff]  ;;  %v1465_v54 = vld [vmem:[#allocation5 + $0xbb0] sm:$0xff] }
 0x284   : > { %17781 = vst [vmem:[#allocation62_spill] sm:$0xff] %v14757_v26  ;;  %v4069_v13 = vpop.f32.mrf.mxu0  ;;  %v4182_v31 = vpop.f32.mrf.mxu1  ;;  %4746 = vmatmul.mubr.bf16.gmra.mxu0 %v17783_v16  ;;  %5034 = vmatprep.subr.bf16.mxu1 %v11261_v25  ;;  %v11124_v3 = vcombine.low %v14737_v24, %v14739_v51  ;;  %v5747_v28 = vmul.f32 %v5619_v62, %v5619_v62  ;;  %v17785_v25 = vld [vmem:[#allocation115_spill] sm:$0xff]  ;;  %v17786_v42 = vld [vmem:[#allocation116_spill] sm:$0xff] }
 0x285   : > { %v5627_v17 = vmax.f32 %v4177_v18, 0.0  ;;  %v4179_v50 = vadd.f32 %v4178_v29, %v4066_v11  ;;  %v4070_v32 = vadd.f32 %v4069_v13, %v14598_v9  ;;  %4859 = vmatmul.mubr.bf16.gmra.mxu1 %v17784_v56  ;;  %4922 = vmatpush1.bf16.msra.mxu0 %v11132_v5  ;;  %v5748_v58 = vmul.f32 %v5620_v0, %v5620_v0 }
 0x286   : > { %4755 = vmatprep.mubr.bf16.mxu0 %v17785_v25  ;;  %4868 = vmatprep.mubr.bf16.mxu1 %v17786_v42  ;;  %v4071_v18 = vpop.f32.mrf.mxu0  ;;  %v4184_v29 = vpop.f32.mrf.mxu1  ;;  %v11245_v9 = vcombine.high %v14762_v30, %v14764_v15  ;;  %v11252_v24 = vcombine.low %v14751_v38, %v14753_v1  ;;  %v11244_v38 = vcombine.low %v14762_v30, %v14764_v15  ;;  %v1453_v42 = vld [vmem:[#allocation5 + $0xb50] sm:$0xff]  ;;  %v17790_v30 = vld [vmem:[#allocation31_spill] sm:$0xff] }
 0x287   : > { %v14783_v48 = vpack.c.bf16 %v5627_v17, %v5619_v62  ;;  %v5628_v5 = vmax.f32 %v4179_v50, 0.0  ;;  %v4183_v11 = vadd.f32 %v4182_v31, %v4070_v32  ;;  %4923 = vmatprep.subr.bf16.mxu0 %v11125_v57  ;;  %5035 = vmatpush1.bf16.msra.mxu1 %v11260_v27  ;;  %v14787_v51 = vadd.f32 %v5748_v58, %v5747_v28  ;;  %v17789_v58 = vld [vmem:[#allocation56_spill] sm:$0xff]  ;;  %v1457_v25 = vld [vmem:[#allocation5 + $0xb70] sm:$0xff] }
 0x288   : > { %v4072_v13 = vadd.f32 %v4071_v18, %v14600_v6  ;;  %v4073_v39 = vpop.f32.mrf.mxu0  ;;  %v4186_v26 = vpop.f32.mrf.mxu1  ;;  %5036 = vmatprep.subr.bf16.mxu1 %v11253_v52  ;;  %v11055_v62 = vcombine.high %v14775_v63, %v14777_v8 }
 0x289   : > { %17787 = vst [vmem:[#allocation64_spill] sm:$0xff] %v14783_v48  ;;  %v5755_v48 = vmul.f32 %v5627_v17, %v5627_v17  ;;  %v5756_v50 = vmul.f32 %v5628_v5, %v5628_v5  ;;  %v4074_v57 = vadd.f32 %v4073_v39, %v14603_v41  ;;  %4924 = vmatpush1.bf16.msra.mxu0 %v11124_v3  ;;  %v5635_v1 = vmax.f32 %v4183_v11, 0.0  ;;  %v17792_v11 = vld [vmem:[#allocation35_spill] sm:$0xff] }
 0x28a   : > { %v4185_v27 = vadd.f32 %v4184_v29, %v4072_v13  ;;  %v4075_v31 = vpop.f32.mrf.mxu0  ;;  %v4188_v6 = vpop.f32.mrf.mxu1  ;;  %4925 = vmatprep.subr.bf16.mxu0 %v11245_v9  ;;  %v14795_v32 = vpack.c.bf16 %v5628_v5, %v5620_v0  ;;  %v11237_v17 = vcombine.high %v1461_v61, %v1465_v54  ;;  %v17791_v9 = vld [vmem:[#allocation24_spill] sm:$0xff]  ;;  %v17793_v13 = vld [vmem:[#allocation41_spill] sm:$0xff] }
 0x28b   : > { %v14797_v28 = vadd.f32 %v5756_v50, %v5755_v48  ;;  %v4187_v52 = vadd.f32 %v4186_v26, %v4074_v57  ;;  %v4076_v18 = vadd.f32 %v4075_v31, %v17789_v58  ;;  %5037 = vmatpush1.bf16.msra.mxu1 %v11252_v24  ;;  %v11236_v26 = vcombine.low %v1461_v61, %v1465_v54  ;;  %v1445_v54 = vld [vmem:[#allocation5 + $0xb10] sm:$0xff] }
 0x28c   : > { %17788 = vst [vmem:[#allocation61_spill] sm:$0xff] %v14795_v32  ;;  %v5636_v41 = vmax.f32 %v4185_v27, 0.0  ;;  %v4079_v39 = vpop.f32.mrf.mxu0  ;;  %v4192_v3 = vpop.f32.mrf.mxu1  ;;  %4756 = vmatmul.mubr.bf16.gmra.mxu0 %v17790_v30  ;;  %5248 = vmatprep.subr.bf16.mxu1 %v11055_v62  ;;  %v5763_v48 = vmul.f32 %v5635_v1, %v5635_v1  ;;  %v11229_v57 = vcombine.high %v1453_v42, %v1457_v25  ;;  %v1449_v58 = vld [vmem:[#allocation5 + $0xb30] sm:$0xff]  ;;  %v17797_v32 = vld [vmem:[#allocation112_spill] sm:$0xff] }
 0x28d   : > { %v5643_v15 = vmax.f32 %v4187_v52, 0.0  ;;  %v4189_v29 = vadd.f32 %v4188_v6, %v4076_v18  ;;  %v4080_v0 = vadd.f32 %v4079_v39, %v14610_v43  ;;  %4869 = vmatmul.mubr.bf16.gmra.mxu1 %v17791_v9  ;;  %4926 = vmatpush2.bf16.msra.mxu0 %v11244_v38  ;;  %v17796_v43 = vld [vmem:[#allocation111_spill] sm:$0xff] }
 0x28e   : > { %v5764_v5 = vmul.f32 %v5636_v41, %v5636_v41  ;;  %4765 = vmatprep.mubr.bf16.mxu0 %v17792_v11  ;;  %4878 = vmatprep.mubr.bf16.mxu1 %v17793_v13  ;;  %v4081_v24 = vpop.f32.mrf.mxu0  ;;  %v4194_v50 = vpop.f32.mrf.mxu1  ;;  %v11228_v11 = vcombine.low %v1453_v42, %v1457_v25 }
 0x28f   : > { %v14805_v27 = vpack.c.bf16 %v5643_v15, %v5635_v1  ;;  %v5644_v62 = vmax.f32 %v4189_v29, 0.0  ;;  %v4193_v31 = vadd.f32 %v4192_v3, %v4080_v0  ;;  %4927 = vmatprep.subr.bf16.mxu0 %v11237_v17  ;;  %v4082_v52 = vadd.f32 %v4081_v24, %v17796_v43  ;;  %v1437_v43 = vld [vmem:[#allocation5 + $0xad0] sm:$0xff] }
 0x290   : > { %v14807_v6 = vadd.f32 %v5764_v5, %v5763_v48  ;;  %v4083_v38 = vpop.f32.mrf.mxu0  ;;  %v4196_v61 = vpop.f32.mrf.mxu1  ;;  %v5771_v18 = vmul.f32 %v5643_v15, %v5643_v15  ;;  %v17799_v48 = vld [vmem:[#allocation123_spill] sm:$0xff]  ;;  %v11221_v24 = vcombine.high %v1445_v54, %v1449_v58  ;;  %v1441_v15 = vld [vmem:[#allocation5 + $0xaf0] sm:$0xff] }
 0x291   : > { %17794 = vst [vmem:[#allocation113_spill] sm:$0xff] %v14805_v27  ;;  %v5772_v39 = vmul.f32 %v5644_v62, %v5644_v62  ;;  %v4084_v13 = vadd.f32 %v4083_v38, %v17797_v32  ;;  %4928 = vmatpush2.bf16.msra.mxu0 %v11236_v26  ;;  %v5651_v9 = vmax.f32 %v4193_v31, 0.0  ;;  %v4195_v1 = vadd.f32 %v4194_v50, %v4082_v52  ;;  %v17800_v26 = vld [vmem:[#allocation43_spill] sm:$0xff]  ;;  %v17802_v31 = vld [vmem:[#allocation48_spill] sm:$0xff] }
 0x292   : > { %17795 = vst [vmem:[#allocation114_spill] sm:$0xff] %v14807_v6  ;;  %v4085_v27 = vpop.f32.mrf.mxu0  ;;  %v4198_v29 = vpop.f32.mrf.mxu1  ;;  %4929 = vmatprep.subr.bf16.mxu0 %v11229_v57  ;;  %v14811_v17 = vpack.c.bf16 %v5644_v62, %v5636_v41  ;;  %v17801_v57 = vld [vmem:[#allocation40_spill] sm:$0xff]  ;;  %v11220_v41 = vcombine.low %v1445_v54, %v1449_v58  ;;  %v1429_v54 = vld [vmem:[#allocation5 + $0xa90] sm:$0xff] }
 0x293   : > { %v14813_v3 = vadd.f32 %v5772_v39, %v5771_v18  ;;  %v4197_v0 = vadd.f32 %v4196_v61, %v4084_v13  ;;  %v4086_v5 = vadd.f32 %v4085_v27, %v17799_v48  ;;  %v5652_v6 = vmax.f32 %v4195_v1, 0.0  ;;  %v17803_v27 = vld [vmem:[#allocation50_spill] sm:$0xff]  ;;  %v1433_v58 = vld [vmem:[#allocation5 + $0xab0] sm:$0xff] }
 0x294   : > { %17798 = vst [vmem:[#allocation63_spill] sm:$0xff] %v14811_v17  ;;  %v4089_v30 = vpop.f32.mrf.mxu0  ;;  %v4202_v32 = vpop.f32.mrf.mxu1  ;;  %4766 = vmatmul.mubr.bf16.gmra.mxu0 %v17800_v26  ;;  %v5779_v62 = vmul.f32 %v5651_v9, %v5651_v9  ;;  %v11213_v61 = vcombine.high %v1437_v43, %v1441_v15  ;;  %v11212_v17 = vcombine.low %v1437_v43, %v1441_v15  ;;  %v1310_v26 = vld [vmem:[#allocation5 + $0x6d8] sm:$0xff] }
 0x295   : > { %v5659_v25 = vmax.f32 %v4197_v0, 0.0  ;;  %v4199_v42 = vadd.f32 %v4198_v29, %v4086_v5  ;;  %v4090_v50 = vadd.f32 %v4089_v30, %v14622_v44  ;;  %4879 = vmatmul.mubr.bf16.gmra.mxu1 %v17801_v57  ;;  %4930 = vmatpush2.bf16.msra.mxu0 %v11228_v11  ;;  %v5780_v13 = vmul.f32 %v5652_v6, %v5652_v6 }
 0x296   : > { %4775 = vmatprep.mubr.bf16.mxu0 %v17802_v31  ;;  %4888 = vmatprep.mubr.bf16.mxu1 %v17803_v27  ;;  %v4091_v52 = vpop.f32.mrf.mxu0  ;;  %v4204_v38 = vpop.f32.mrf.mxu1 }
 0x297   : > { %v14821_v18 = vpack.c.bf16 %v5659_v25, %v5651_v9  ;;  %v5660_v39 = vmax.f32 %v4199_v42, 0.0  ;;  %v4203_v1 = vadd.f32 %v4202_v32, %v4090_v50  ;;  %4931 = vmatprep.subr.bf16.mxu0 %v11221_v24  ;;  %v14823_v29 = vadd.f32 %v5780_v13, %v5779_v62  ;;  %v1421_v13 = vld [vmem:[#allocation5 + $0xa50] sm:$0xff] }
 0x298   : > { %v4092_v44 = vadd.f32 %v4091_v52, %v14624_v36  ;;  %v4093_v30 = vpop.f32.mrf.mxu0  ;;  %v4206_v11 = vpop.f32.mrf.mxu1  ;;  %v5787_v0 = vmul.f32 %v5659_v25, %v5659_v25  ;;  %v11205_v62 = vcombine.high %v1429_v54, %v1433_v58  ;;  %v1425_v25 = vld [vmem:[#allocation5 + $0xa70] sm:$0xff] }
 0x299   : > { %17804 = vst [vmem:[#allocation125_spill] sm:$0xff] %v14821_v18  ;;  %17805 = vst [vmem:[#allocation126_spill] sm:$0xff] %v14823_v29  ;;  %v5788_v48 = vmul.f32 %v5660_v39, %v5660_v39  ;;  %v4094_v5 = vadd.f32 %v4093_v30, %v14628_v23  ;;  %4932 = vmatpush2.bf16.msra.mxu0 %v11220_v41  ;;  %v5667_v27 = vmax.f32 %v4203_v1, 0.0  ;;  %v17808_v41 = vld [vmem:[#allocation109_spill] sm:$0xff] }
 0x29a   : > { %v4205_v9 = vadd.f32 %v4204_v38, %v4092_v44  ;;  %v4095_v18 = vpop.f32.mrf.mxu0  ;;  %v4208_v42 = vpop.f32.mrf.mxu1  ;;  %4933 = vmatprep.subr.bf16.mxu0 %v11213_v61  ;;  %v14827_v24 = vpack.c.bf16 %v5660_v39, %v5652_v6  ;;  %v17809_v61 = vld [vmem:[#allocation110_spill] sm:$0xff]  ;;  %v11204_v6 = vcombine.low %v1429_v54, %v1433_v58  ;;  %v17844_v29 = vld [vmem:[#allocation117_spill] sm:$0xff] }
 0x29b   : > { %v14829_v32 = vadd.f32 %v5788_v48, %v5787_v0  ;;  %v4207_v36 = vadd.f32 %v4206_v11, %v4094_v5  ;;  %v4096_v50 = vadd.f32 %v4095_v18, %v14631_v47  ;;  %v5795_v39 = vmul.f32 %v5667_v27, %v5667_v27  ;;  %v17810_v44 = vld [vmem:[#allocation30_spill] sm:$0xff]  ;;  %v17811_v47 = vld [vmem:[#allocation23_spill] sm:$0xff] }
 0x29c   : > { %17806 = vst [vmem:[#allocation46_spill] sm:$0xff] %v14827_v24  ;;  %v5668_v52 = vmax.f32 %v4205_v9, 0.0  ;;  %v4099_v31 = vpop.f32.mrf.mxu0  ;;  %v4212_v23 = vpop.f32.mrf.mxu1  ;;  %4776 = vmatmul.mubr.bf16.gmra.mxu0 %v17808_v41  ;;  %v11197_v11 = vcombine.high %v1421_v13, %v1425_v25  ;;  %v1413_v9 = vld [vmem:[#allocation5 + $0xa10] sm:$0xff]  ;;  %v11196_v24 = vcombine.low %v1421_v13, %v1425_v25  ;;  %v1326_v41 = vld [vmem:[#allocation5 + $0x758] sm:$0xff] }
 0x29d   : > { %17807 = vst [vmem:[#allocation39_spill] sm:$0xff] %v14829_v32  ;;  %v5675_v43 = vmax.f32 %v4207_v36, 0.0  ;;  %v4209_v15 = vadd.f32 %v4208_v42, %v4096_v50  ;;  %v4100_v38 = vadd.f32 %v4099_v31, %v14634_v46  ;;  %4889 = vmatmul.mubr.bf16.gmra.mxu1 %v17809_v61  ;;  %4934 = vmatpush2.bf16.msra.mxu0 %v11212_v17  ;;  %v1417_v46 = vld [vmem:[#allocation5 + $0xa30] sm:$0xff] }
 0x29e   : > { %v5796_v1 = vmul.f32 %v5668_v52, %v5668_v52  ;;  %4785 = vmatprep.mubr.bf16.mxu0 %v17810_v44  ;;  %4898 = vmatprep.mubr.bf16.mxu1 %v17811_v47  ;;  %v4101_v18 = vpop.f32.mrf.mxu0  ;;  %v4214_v30 = vpop.f32.mrf.mxu1 }
 0x29f   : > { %v14837_v0 = vpack.c.bf16 %v5675_v43, %v5667_v27  ;;  %v5676_v48 = vmax.f32 %v4209_v15, 0.0  ;;  %v4213_v5 = vadd.f32 %v4212_v23, %v4100_v38  ;;  %4935 = vmatprep.subr.bf16.mxu0 %v11205_v62  ;;  %v4102_v17 = vadd.f32 %v4101_v18, %v14638_v40 }
 0x2a0   : > { %v14839_v31 = vadd.f32 %v5796_v1, %v5795_v39  ;;  %v4103_v54 = vpop.f32.mrf.mxu0  ;;  %v4216_v58 = vpop.f32.mrf.mxu1  ;;  %v5803_v42 = vmul.f32 %v5675_v43, %v5675_v43  ;;  %v11189_v62 = vcombine.high %v1413_v9, %v1417_v46  ;;  %v1150_v1 = vld [vmem:[#allocation5 + $0x1d8] sm:$0xff] }
 0x2a1   : > { %17812 = vst [vmem:[#allocation59_spill] sm:$0xff] %v14837_v0  ;;  %v5804_v36 = vmul.f32 %v5676_v48, %v5676_v48  ;;  %v4104_v50 = vadd.f32 %v4103_v54, %v14641_v10  ;;  %4936 = vmatpush2.bf16.msra.mxu0 %v11204_v6  ;;  %v5683_v47 = vmax.f32 %v4213_v5, 0.0  ;;  %v4215_v27 = vadd.f32 %v4214_v30, %v4102_v17  ;;  %v1154_v43 = vld [vmem:[#allocation5 + $0x1f8] sm:$0xff]  ;;  %v17816_v6 = vld [vmem:[#allocation32_spill] sm:$0xff]  ;;  %v17818_v17 = vld [vmem:[#allocation133_spill] sm:$0xff] }
 0x2a2   : > { %17813 = vst [vmem:[#allocation52_spill] sm:$0xff] %v14839_v31  ;;  %v4105_v0 = vpop.f32.mrf.mxu0  ;;  %v4218_v15 = vpop.f32.mrf.mxu1  ;;  %4937 = vmatprep.subr.bf16.mxu0 %v11197_v11  ;;  %v14843_v23 = vpack.c.bf16 %v5676_v48, %v5668_v52  ;;  %v17817_v11 = vld [vmem:[#allocation25_spill] sm:$0xff]  ;;  %v11188_v52 = vcombine.low %v1413_v9, %v1417_v46  ;;  %v10927_v54 = vcombine.high %v1150_v1, %v1154_v43  ;;  %v17839_v31 = vld [vmem:[#allocation42_spill] sm:$0xff] }
 0x2a3   : > { %v14845_v38 = vadd.f32 %v5804_v36, %v5803_v42  ;;  %v4217_v39 = vadd.f32 %v4216_v58, %v4104_v50  ;;  %v4106_v40 = vadd.f32 %v4105_v0, %v14644_v21  ;;  %v5684_v18 = vmax.f32 %v4215_v27, 0.0  ;;  %v14855_v50 = vld [vmem:[#allocation5 + $0x198] sm:$0xff] }
 0x2a4   : > { %17814 = vst [vmem:[#allocation58_spill] sm:$0xff] %v14843_v23  ;;  %v4109_v44 = vpop.f32.mrf.mxu0  ;;  %v4222_v10 = vpop.f32.mrf.mxu1  ;;  %4786 = vmatmul.mubr.bf16.gmra.mxu0 %v17816_v6  ;;  %v5811_v48 = vmul.f32 %v5683_v47, %v5683_v47  ;;  %v10926_v27 = vcombine.low %v1150_v1, %v1154_v43  ;;  %v14866_v1 = vld [vmem:[#allocation5 + $0x178] sm:$0xff] }
 0x2a5   : > { %17815 = vst [vmem:[#allocation69_spill] sm:$0xff] %v14845_v38  ;;  %v5691_v13 = vmax.f32 %v4217_v39, 0.0  ;;  %v4219_v25 = vadd.f32 %v4218_v15, %v4106_v40  ;;  %v4110_v30 = vadd.f32 %v4109_v44, %v14647_v22  ;;  %4899 = vmatmul.mubr.bf16.gmra.mxu1 %v17817_v11  ;;  %4938 = vmatpush2.bf16.msra.mxu0 %v11196_v24  ;;  %v1146_v22 = vld [vmem:[#allocation5 + $0x1b8] sm:$0xff]  ;;  %v17824_v11 = vld [vmem:[#allocation21_spill] sm:$0xff] }
 0x2a6   : > { %v5812_v5 = vmul.f32 %v5684_v18, %v5684_v18  ;;  %4941 = vmatprep.mubr.bf16.mxu0 %v17818_v17  ;;  %v4111_v21 = vpop.f32.mrf.mxu0  ;;  %v4224_v0 = vpop.f32.mrf.mxu1  ;;  %4939 = vmatprep.subr.bf16.mxu0 %v11189_v62  ;;  %v1270_v15 = vld [vmem:[#allocation5 + $0x598] sm:$0xff] }
 0x2a7   : > { %v14852_v58 = vpack.c.bf16 %v5691_v13, %v5683_v47  ;;  %v5692_v42 = vmax.f32 %v4219_v25, 0.0  ;;  %v4223_v36 = vadd.f32 %v4222_v10, %v4110_v30  ;;  %5054 = vmatprep.mubr.bf16.mxu1 %v17771_v7  ;;  %v4112_v24 = vadd.f32 %v4111_v21, %v14652_v49  ;;  %v1274_v39 = vld [vmem:[#allocation5 + $0x5b8] sm:$0xff] }
 0x2a8   : > { %v14857_v44 = vadd.f32 %v5812_v5, %v5811_v48  ;;  %v4113_v9 = vpop.f32.mrf.mxu0  ;;  %v4226_v46 = vpop.f32.mrf.mxu1  ;;  %v5819_v62 = vmul.f32 %v5691_v13, %v5691_v13  ;;  %v11054_v10 = vcombine.low %v14775_v63, %v14777_v8  ;;  %v10919_v49 = vcombine.high %v14855_v50, %v1146_v22  ;;  %v14864_v5 = vld [vmem:[#allocation5 + $0x158] sm:$0xff] }
 0x2a9   : > { %17819 = vst [vmem:[#allocation71_spill] sm:$0xff] %v14852_v58  ;;  %v5820_v40 = vmul.f32 %v5692_v42, %v5692_v42  ;;  %v4114_v47 = vadd.f32 %v4113_v9, %v14654_v20  ;;  %4940 = vmatpush2.bf16.msra.mxu0 %v11188_v52  ;;  %v5699_v25 = vmax.f32 %v4223_v36, 0.0  ;;  %v4225_v30 = vadd.f32 %v4224_v0, %v4112_v24  ;;  %v17823_v0 = vld [vmem:[#allocation134_spill] sm:$0xff] }
 0x2aa   : > { %17820 = vst [vmem:[#allocation119_spill] sm:$0xff] %v14857_v44  ;;  %v4115_v58 = vpop.f32.mrf.mxu0  ;;  %v4228_v48 = vpop.f32.mrf.mxu1  ;;  %5135 = vmatprep.subr.bf16.mxu0 %v10927_v54  ;;  %v14868_v43 = vpack.c.bf16 %v5692_v42, %v5684_v18  ;;  %v11047_v21 = vcombine.high %v1270_v15, %v1274_v39  ;;  %v10918_v54 = vcombine.low %v14855_v50, %v1146_v22  ;;  %v1262_v36 = vld [vmem:[#allocation5 + $0x558] sm:$0xff] }
 0x2ab   : > { %v14870_v13 = vadd.f32 %v5820_v40, %v5819_v62  ;;  %v4227_v20 = vadd.f32 %v4226_v46, %v4114_v47  ;;  %v4116_v52 = vadd.f32 %v4115_v58, %v14656_v2  ;;  %v5700_v63 = vmax.f32 %v4225_v30, 0.0  ;;  %v1266_v24 = vld [vmem:[#allocation5 + $0x578] sm:$0xff]  ;;  %v17825_v62 = vld [vmem:[#allocation135_spill] sm:$0xff] }
 0x2ac   : > { %17821 = vst [vmem:[#allocation120_spill] sm:$0xff] %v14868_v43  ;;  %v4265_v8 = vpop.f32.mrf.mxu0  ;;  %4942 = vmatmul.mubr.bf16.vlgmr.msra.gmra.mxu0 %v17823_v0  ;;  %v11046_v18 = vcombine.low %v1270_v15, %v1274_v39  ;;  %v10911_v42 = vcombine.high %v14864_v5, %v14866_v1  ;;  %v5827_v2 = vmul.f32 %v5699_v25, %v5699_v25  ;;  %v1118_v43 = vld [vmem:[#allocation5 + $0xd8] sm:$0xff] }
 0x2ad   : > { %17822 = vst [vmem:[#allocation68_spill] sm:$0xff] %v14870_v13  ;;  %v5707_v9 = vmax.f32 %v4227_v20, 0.0  ;;  %v4229_v23 = vadd.f32 %v4228_v48, %v4116_v52  ;;  %v4378_v17 = vpop.f32.mrf.mxu1  ;;  %5055 = vmatmul.mubr.bf16.vlgmr.msra.gmra.mxu1 %v17824_v11  ;;  %5136 = vmatpush1.bf16.msra.mxu0 %v10926_v27  ;;  %v5828_v58 = vmul.f32 %v5700_v63, %v5700_v63  ;;  %v1126_v27 = vld [vmem:[#allocation5 + $0x118] sm:$0xff] }
 0x2ae   : > { %v14878_v46 = vadd.f32 %v4378_v17, %v4265_v8  ;;  %4951 = vmatprep.mubr.bf16.mxu0 %v17825_v62  ;;  %5249 = vmatpush1.bf16.msra.mxu1 %v11054_v10  ;;  %v4267_v50 = vpop.f32.mrf.mxu0  ;;  %v11039_v30 = vcombine.high %v1262_v36, %v1266_v24  ;;  %v1130_v17 = vld [vmem:[#allocation5 + $0x138] sm:$0xff] }
 0x2af   : > { %v14881_v22 = vpack.c.bf16 %v5707_v9, %v5699_v25  ;;  %v5708_v40 = vmax.f32 %v4229_v23, 0.0  ;;  %v4380_v47 = vpop.f32.mrf.mxu1  ;;  %5137 = vmatprep.subr.bf16.mxu0 %v10919_v49  ;;  %5250 = vmatprep.subr.bf16.mxu1 %v11047_v21  ;;  %v14883_v15 = vadd.f32 %v5828_v58, %v5827_v2  ;;  %v1254_v20 = vld [vmem:[#allocation5 + $0x518] sm:$0xff]  ;;  %v5835_v10 = vmul.f32 %v5707_v9, %v5707_v9 }
 0x2b0   : > { %v14885_v39 = vadd.f32 %v4380_v47, %v4267_v50  ;;  %v4269_v48 = vpop.f32.mrf.mxu0  ;;  %5064 = vmatprep.mubr.bf16.mxu1 %v17771_v7  ;;  %v1258_v52 = vld [vmem:[#allocation5 + $0x538] sm:$0xff]  ;;  %v10910_v23 = vcombine.low %v14864_v5, %v14866_v1  ;;  %v11038_v58 = vcombine.low %v1262_v36, %v1266_v24  ;;  %v10902_v36 = vcombine.low %v1126_v27, %v1130_v17 }
 0x2b1   : > { %17826 = vst [vmem:[#allocation70_spill] sm:$0xff] %v14881_v22  ;;  %17827 = vst [vmem:[#allocation51_spill] sm:$0xff] %v14883_v15  ;;  %v5836_v8 = vmul.f32 %v5708_v40, %v5708_v40  ;;  %v4382_v25 = vpop.f32.mrf.mxu1  ;;  %5138 = vmatpush1.bf16.msra.mxu0 %v10918_v54  ;;  %v14890_v49 = vpack.c.bf16 %v5708_v40, %v5700_v63  ;;  %v10903_v22 = vcombine.high %v1126_v27, %v1130_v17  ;;  %v1122_v62 = vld [vmem:[#allocation5 + $0xf8] sm:$0xff] }
 0x2b2   : > { %v14892_v21 = vadd.f32 %v4382_v25, %v4269_v48  ;;  %5251 = vmatpush1.bf16.msra.mxu1 %v11046_v18  ;;  %v4271_v2 = vpop.f32.mrf.mxu0  ;;  %5139 = vmatprep.subr.bf16.mxu0 %v10911_v42  ;;  %v11031_v9 = vcombine.high %v1254_v20, %v1258_v52  ;;  %v17830_v5 = vld [vmem:[#allocation22_spill] sm:$0xff]  ;;  %v17831_v18 = vld [vmem:[#allocation29_spill] sm:$0xff]  ;;  %v11030_v48 = vcombine.low %v1254_v20, %v1258_v52 }
 0x2b3   : > { %17828 = vst [vmem:[#allocation60_spill] sm:$0xff] %v14890_v49  ;;  %v14894_v50 = vadd.f32 %v5836_v8, %v5835_v10  ;;  %v4384_v47 = vpop.f32.mrf.mxu1  ;;  %5252 = vmatprep.subr.bf16.mxu1 %v11039_v30  ;;  %v1246_v1 = vld [vmem:[#allocation5 + $0x4d8] sm:$0xff]  ;;  %v10895_v10 = vcombine.high %v1118_v43, %v1122_v62 }
 0x2b4   : > { %v14896_v54 = vadd.f32 %v4384_v47, %v4271_v2  ;;  %v4275_v11 = vpop.f32.mrf.mxu0  ;;  %4952 = vmatmul.mubr.bf16.gmra.mxu0 %v17830_v5  ;;  %v1250_v63 = vld [vmem:[#allocation5 + $0x4f8] sm:$0xff] }
 0x2b5   : > { %17829 = vst [vmem:[#allocation53_spill] sm:$0xff] %v14894_v50  ;;  %v4388_v40 = vpop.f32.mrf.mxu1  ;;  %5065 = vmatmul.mubr.bf16.gmra.mxu1 %v17831_v18  ;;  %5140 = vmatpush1.bf16.msra.mxu0 %v10910_v23  ;;  %v17832_v42 = vld [vmem:[#allocation26_spill] sm:$0xff]  ;;  %v11023_v25 = vcombine.high %v1246_v1, %v1250_v63 }
 0x2b6   : > { %v14900_v24 = vadd.f32 %v4388_v40, %v4275_v11  ;;  %4961 = vmatprep.mubr.bf16.mxu0 %v17832_v42  ;;  %5253 = vmatpush1.bf16.msra.mxu1 %v11038_v58  ;;  %v4277_v30 = vpop.f32.mrf.mxu0  ;;  %v1110_v2 = vld [vmem:[#allocation5 + $0x98] sm:$0xff]  ;;  %v10894_v40 = vcombine.low %v1118_v43, %v1122_v62  ;;  %v17834_v62 = vld [vmem:[#allocation20_spill] sm:$0xff] }
 0x2b7   : > { %v4390_v8 = vpop.f32.mrf.mxu1  ;;  %5141 = vmatprep.subr.bf16.mxu0 %v10903_v22  ;;  %5254 = vmatprep.subr.bf16.mxu1 %v11031_v9  ;;  %v1114_v23 = vld [vmem:[#allocation5 + $0xb8] sm:$0xff]  ;;  %v11022_v22 = vcombine.low %v1246_v1, %v1250_v63  ;;  %v17835_v1 = vld [vmem:[#allocation105_spill] sm:$0xff] }
 0x2b8   : > { %v14903_v47 = vadd.f32 %v4390_v8, %v4277_v30  ;;  %v4279_v49 = vpop.f32.mrf.mxu0  ;;  %5074 = vmatprep.mubr.bf16.mxu1 %v17771_v7  ;;  %v1238_v27 = vld [vmem:[#allocation5 + $0x498] sm:$0xff]  ;;  %v10887_v9 = vcombine.high %v1110_v2, %v1114_v23 }
 0x2b9   : > { %v1242_v11 = vld [vmem:[#allocation5 + $0x4b8] sm:$0xff]  ;;  %v4392_v17 = vpop.f32.mrf.mxu1  ;;  %5142 = vmatpush1.bf16.msra.mxu0 %v10902_v36 }
 0x2ba   : > { %v14906_v58 = vadd.f32 %v4392_v17, %v4279_v49  ;;  %5255 = vmatpush1.bf16.msra.mxu1 %v11030_v48  ;;  %v4281_v20 = vpop.f32.mrf.mxu0  ;;  %5143 = vmatprep.subr.bf16.mxu0 %v10895_v10  ;;  %v11015_v30 = vcombine.high %v1238_v27, %v1242_v11  ;;  %v1102_v8 = vld [vmem:[#allocation5 + $0x58] sm:$0xff]  ;;  %v10886_v49 = vcombine.low %v1110_v2, %v1114_v23 }
 0x2bb   : > { %v4394_v52 = vpop.f32.mrf.mxu1  ;;  %5256 = vmatprep.subr.bf16.mxu1 %v11023_v25  ;;  %v1106_v42 = vld [vmem:[#allocation5 + $0x78] sm:$0xff]  ;;  %v11014_v10 = vcombine.low %v1238_v27, %v1242_v11 }
 0x2bc   : > { %v14908_v18 = vadd.f32 %v4394_v52, %v4281_v20  ;;  %v4285_v5 = vpop.f32.mrf.mxu0  ;;  %v17833_v50 = vld [vmem:[#allocation34_spill] sm:$0xff]  ;;  %v10879_v25 = vcombine.high %v1102_v8, %v1106_v42 }
 0x2bd   : > { %4962 = vmatmul.mubr.bf16.gmra.mxu0 %v17833_v50  ;;  %v1230_v15 = vld [vmem:[#allocation5 + $0x458] sm:$0xff]  ;;  %v4398_v43 = vpop.f32.mrf.mxu1  ;;  %5075 = vmatmul.mubr.bf16.gmra.mxu1 %v17834_v62 }
 0x2be   : > { %v1234_v36 = vld [vmem:[#allocation5 + $0x478] sm:$0xff]  ;;  %5144 = vmatpush1.bf16.msra.mxu0 %v10894_v40  ;;  %v14912_v48 = vadd.f32 %v4398_v43, %v4285_v5  ;;  %4971 = vmatprep.mubr.bf16.mxu0 %v17835_v1  ;;  %v4287_v63 = vpop.f32.mrf.mxu0  ;;  %v10878_v43 = vcombine.low %v1102_v8, %v1106_v42 }
 0x2bf   : > { %5257 = vmatpush1.bf16.msra.mxu1 %v11022_v22  ;;  %v4400_v17 = vpop.f32.mrf.mxu1  ;;  %5145 = vmatprep.subr.bf16.mxu0 %v10887_v9  ;;  %v11007_v20 = vcombine.high %v1230_v15, %v1234_v36  ;;  %v1094_v52 = vld [vmem:[#allocation5 + $0x18] sm:$0xff]  ;;  %v11006_v11 = vcombine.low %v1230_v15, %v1234_v36  ;;  %v17838_v15 = vld [vmem:[#allocation33_spill] sm:$0xff] }
 0x2c0   : > { %5258 = vmatprep.subr.bf16.mxu1 %v11015_v30  ;;  %v14915_v50 = vadd.f32 %v4400_v17, %v4287_v63  ;;  %v4289_v0 = vpop.f32.mrf.mxu0  ;;  %5084 = vmatprep.mubr.bf16.mxu1 %v17771_v7  ;;  %v1098_v40 = vld [vmem:[#allocation5 + $0x38] sm:$0xff] }
 0x2c1   : > { %v1222_v2 = vld [vmem:[#allocation5 + $0x418] sm:$0xff]  ;;  %v4402_v23 = vpop.f32.mrf.mxu1  ;;  %v10871_v30 = vcombine.high %v1094_v52, %v1098_v40  ;;  %v10870_v8 = vcombine.low %v1094_v52, %v1098_v40 }
 0x2c2   : > { %v1226_v5 = vld [vmem:[#allocation5 + $0x438] sm:$0xff]  ;;  %5146 = vmatpush1.bf16.msra.mxu0 %v10886_v49  ;;  %v14918_v22 = vadd.f32 %v4402_v23, %v4289_v0  ;;  %v4291_v27 = vpop.f32.mrf.mxu0  ;;  %v17837_v0 = vld [vmem:[#allocation36_spill] sm:$0xff] }
 0x2c3   : > { %5259 = vmatpush1.bf16.msra.mxu1 %v11014_v10  ;;  %5147 = vmatprep.subr.bf16.mxu0 %v10879_v25  ;;  %v4404_v9 = vpop.f32.mrf.mxu1  ;;  %v10999_v63 = vcombine.high %v1222_v2, %v1226_v5  ;;  %v1214_v17 = vld [vmem:[#allocation5 + $0x3d8] sm:$0xff]  ;;  %v10998_v25 = vcombine.low %v1222_v2, %v1226_v5 }
 0x2c4   : > { %5260 = vmatprep.subr.bf16.mxu1 %v11007_v20  ;;  %v1218_v1 = vld [vmem:[#allocation5 + $0x3f8] sm:$0xff]  ;;  %v14920_v62 = vadd.f32 %v4404_v9, %v4291_v27  ;;  %v4295_v13 = vpop.f32.mrf.mxu0 }
 0x2c5   : > { %v17836_v44 = vld [vmem:[#allocation106_spill] sm:$0xff]  ;;  %v4408_v42 = vpop.f32.mrf.mxu1  ;;  %5085 = vmatmul.mubr.bf16.gmra.mxu1 %v17837_v0  ;;  %v10991_v20 = vcombine.high %v1214_v17, %v1218_v1 }
 0x2c6   : > { %4972 = vmatmul.mubr.bf16.gmra.mxu0 %v17836_v44  ;;  %v1342_v6 = vld [vmem:[#allocation5 + $0x7d8] sm:$0xff]  ;;  %v14924_v10 = vadd.f32 %v4408_v42, %v4295_v13  ;;  %v4297_v36 = vpop.f32.mrf.mxu0  ;;  %5094 = vmatprep.mubr.bf16.mxu1 %v17771_v7  ;;  %v10990_v42 = vcombine.low %v1214_v17, %v1218_v1 }
 0x2c7   : > { %v1346_v49 = vld [vmem:[#allocation5 + $0x7f8] sm:$0xff]  ;;  %5148 = vmatpush1.bf16.msra.mxu0 %v10878_v43  ;;  %4981 = vmatprep.mubr.bf16.mxu0 %v17838_v15  ;;  %v4410_v23 = vpop.f32.mrf.mxu1 }
 0x2c8   : > { %5261 = vmatpush1.bf16.msra.mxu1 %v11006_v11  ;;  %5149 = vmatprep.subr.bf16.mxu0 %v10871_v30  ;;  %v11119_v27 = vcombine.high %v1342_v6, %v1346_v49  ;;  %v1206_v9 = vld [vmem:[#allocation5 + $0x398] sm:$0xff]  ;;  %v14927_v44 = vadd.f32 %v4410_v23, %v4297_v36  ;;  %v4299_v38 = vpop.f32.mrf.mxu0  ;;  %v11118_v5 = vcombine.low %v1342_v6, %v1346_v49  ;;  %v17841_v6 = vld [vmem:[#allocation108_spill] sm:$0xff] }
 0x2c9   : > { %5262 = vmatprep.subr.bf16.mxu1 %v10999_v63  ;;  %v1210_v43 = vld [vmem:[#allocation5 + $0x3b8] sm:$0xff]  ;;  %v4412_v40 = vpop.f32.mrf.mxu1 }
 0x2ca   : > { %v1334_v52 = vld [vmem:[#allocation5 + $0x798] sm:$0xff]  ;;  %v14930_v11 = vadd.f32 %v4412_v40, %v4299_v38  ;;  %v4301_v2 = vpop.f32.mrf.mxu0  ;;  %v10983_v63 = vcombine.high %v1206_v9, %v1210_v43  ;;  %v17840_v38 = vld [vmem:[#allocation107_spill] sm:$0xff]  ;;  %v10982_v17 = vcombine.low %v1206_v9, %v1210_v43 }
 0x2cb   : > { %v1338_v13 = vld [vmem:[#allocation5 + $0x7b8] sm:$0xff]  ;;  %5150 = vmatpush1.bf16.msra.mxu0 %v10870_v8  ;;  %v4414_v30 = vpop.f32.mrf.mxu1 }
 0x2cc   : > { %5263 = vmatpush1.bf16.msra.mxu1 %v10998_v25  ;;  %5151 = vmatprep.subr.bf16.mxu0 %v10991_v20  ;;  %v11111_v36 = vcombine.high %v1334_v52, %v1338_v13  ;;  %v1198_v23 = vld [vmem:[#allocation5 + $0x358] sm:$0xff]  ;;  %v14932_v0 = vadd.f32 %v4414_v30, %v4301_v2  ;;  %v4305_v61 = vpop.f32.mrf.mxu0  ;;  %v11110_v20 = vcombine.low %v1334_v52, %v1338_v13 }
 0x2cd   : > { %5264 = vmatprep.subr.bf16.mxu1 %v11119_v27  ;;  %v1202_v15 = vld [vmem:[#allocation5 + $0x378] sm:$0xff]  ;;  %v4418_v1 = vpop.f32.mrf.mxu1  ;;  %5095 = vmatmul.mubr.bf16.gmra.mxu1 %v17840_v38 }
 0x2ce   : > { %4982 = vmatmul.mubr.bf16.gmra.mxu0 %v17839_v31  ;;  %v1330_v8 = vld [vmem:[#allocation5 + $0x778] sm:$0xff]  ;;  %v14936_v25 = vadd.f32 %v4418_v1, %v4305_v61  ;;  %v4307_v49 = vpop.f32.mrf.mxu0  ;;  %v10975_v27 = vcombine.high %v1198_v23, %v1202_v15  ;;  %5104 = vmatprep.mubr.bf16.mxu1 %v17771_v7  ;;  %v10974_v1 = vcombine.low %v1198_v23, %v1202_v15 }
 0x2cf   : > { %5152 = vmatpush2.bf16.msra.mxu0 %v10990_v42  ;;  %4991 = vmatprep.mubr.bf16.mxu0 %v17841_v6  ;;  %v4420_v40 = vpop.f32.mrf.mxu1  ;;  %v11103_v2 = vcombine.high %v1326_v41, %v1330_v8  ;;  %v1190_v30 = vld [vmem:[#allocation5 + $0x318] sm:$0xff]  ;;  %v11102_v13 = vcombine.low %v1326_v41, %v1330_v8  ;;  %v17847_v41 = vld [vmem:[#allocation55_spill] sm:$0xff] }
 0x2d0   : > { %5265 = vmatpush2.bf16.msra.mxu1 %v11118_v5  ;;  %5153 = vmatprep.subr.bf16.mxu0 %v10983_v63  ;;  %v14939_v31 = vadd.f32 %v4420_v40, %v4307_v49  ;;  %v4309_v32 = vpop.f32.mrf.mxu0  ;;  %v1194_v42 = vld [vmem:[#allocation5 + $0x338] sm:$0xff] }
 0x2d1   : > { %5266 = vmatprep.subr.bf16.mxu1 %v11111_v36  ;;  %v1318_v9 = vld [vmem:[#allocation5 + $0x718] sm:$0xff]  ;;  %v4422_v43 = vpop.f32.mrf.mxu1  ;;  %v10967_v36 = vcombine.high %v1190_v30, %v1194_v42  ;;  %v10966_v23 = vcombine.low %v1190_v30, %v1194_v42 }
 0x2d2   : > { %v1322_v61 = vld [vmem:[#allocation5 + $0x738] sm:$0xff]  ;;  %v14942_v5 = vadd.f32 %v4422_v43, %v4309_v32  ;;  %v4311_v52 = vpop.f32.mrf.mxu0 }
 0x2d3   : > { %5154 = vmatpush2.bf16.msra.mxu0 %v10982_v17  ;;  %v4424_v63 = vpop.f32.mrf.mxu1  ;;  %v11095_v49 = vcombine.high %v1318_v9, %v1322_v61  ;;  %v1182_v40 = vld [vmem:[#allocation5 + $0x2d8] sm:$0xff] }
 0x2d4   : > { %17842 = vst [vmem:[#allocation73_spill] sm:$0xff] %v14942_v5  ;;  %5267 = vmatpush2.bf16.msra.mxu1 %v11110_v20  ;;  %5155 = vmatprep.subr.bf16.mxu0 %v10975_v27  ;;  %v1186_v6 = vld [vmem:[#allocation5 + $0x2f8] sm:$0xff]  ;;  %v14944_v38 = vadd.f32 %v4424_v63, %v4311_v52  ;;  %v4315_v57 = vpop.f32.mrf.mxu0  ;;  %v11094_v27 = vcombine.low %v1318_v9, %v1322_v61 }
 0x2d5   : > { %5268 = vmatprep.subr.bf16.mxu1 %v11103_v2  ;;  %v1314_v17 = vld [vmem:[#allocation5 + $0x6f8] sm:$0xff]  ;;  %v4428_v15 = vpop.f32.mrf.mxu1  ;;  %v10959_v2 = vcombine.high %v1182_v40, %v1186_v6 }
 0x2d6   : > { %17843 = vst [vmem:[#allocation121_spill] sm:$0xff] %v14944_v38  ;;  %4992 = vmatmul.mubr.bf16.gmra.mxu0 %v17844_v29  ;;  %v17845_v32 = vld [vmem:[#allocation118_spill] sm:$0xff]  ;;  %v14948_v20 = vadd.f32 %v4428_v15, %v4315_v57  ;;  %v4317_v8 = vpop.f32.mrf.mxu0  ;;  %v11087_v52 = vcombine.high %v1310_v26, %v1314_v17  ;;  %v10958_v15 = vcombine.low %v1182_v40, %v1186_v6 }
 0x2d7   : > { %5105 = vmatmul.mubr.bf16.gmra.mxu1 %v17845_v32  ;;  %5156 = vmatpush2.bf16.msra.mxu0 %v10974_v1  ;;  %v4430_v43 = vpop.f32.mrf.mxu1  ;;  %v1174_v63 = vld [vmem:[#allocation5 + $0x298] sm:$0xff]  ;;  %v11086_v61 = vcombine.low %v1310_v26, %v1314_v17  ;;  %v17851_v26 = vld [vmem:[#allocation57_spill] sm:$0xff] }
 0x2d8   : > { %17846 = vst [vmem:[#allocation122_spill] sm:$0xff] %v14948_v20  ;;  %5001 = vmatprep.mubr.bf16.mxu0 %v17847_v41  ;;  %5269 = vmatpush2.bf16.msra.mxu1 %v11102_v13  ;;  %v14951_v29 = vadd.f32 %v4430_v43, %v4317_v8  ;;  %v4319_v38 = vpop.f32.mrf.mxu0  ;;  %v1178_v1 = vld [vmem:[#allocation5 + $0x2b8] sm:$0xff]  ;;  %v17849_v20 = vld [vmem:[#allocation47_spill] sm:$0xff] }
 0x2d9   : > { %5157 = vmatprep.subr.bf16.mxu0 %v10967_v36  ;;  %5270 = vmatprep.subr.bf16.mxu1 %v11095_v49  ;;  %v1302_v30 = vld [vmem:[#allocation5 + $0x698] sm:$0xff]  ;;  %v4432_v42 = vpop.f32.mrf.mxu1  ;;  %v10951_v49 = vcombine.high %v1174_v63, %v1178_v1  ;;  %v10950_v40 = vcombine.low %v1174_v63, %v1178_v1 }
 0x2da   : > { %17848 = vst [vmem:[#allocation66_spill] sm:$0xff] %v14951_v29  ;;  %5114 = vmatprep.mubr.bf16.mxu1 %v17771_v7  ;;  %v1306_v57 = vld [vmem:[#allocation5 + $0x6b8] sm:$0xff]  ;;  %v14954_v13 = vadd.f32 %v4432_v42, %v4319_v38  ;;  %v4321_v9 = vpop.f32.mrf.mxu0  ;;  %v17850_v38 = vld [vmem:[#allocation49_spill] sm:$0xff] }
 0x2db   : > { %5158 = vmatpush2.bf16.msra.mxu0 %v10966_v23  ;;  %v4434_v36 = vpop.f32.mrf.mxu1  ;;  %v11079_v8 = vcombine.high %v1302_v30, %v1306_v57  ;;  %v1166_v43 = vld [vmem:[#allocation5 + $0x258] sm:$0xff] }
 0x2dc   : > { %5271 = vmatpush2.bf16.msra.mxu1 %v11094_v27  ;;  %5159 = vmatprep.subr.bf16.mxu0 %v10959_v2  ;;  %v1170_v41 = vld [vmem:[#allocation5 + $0x278] sm:$0xff]  ;;  %v14956_v32 = vadd.f32 %v4434_v36, %v4321_v9  ;;  %v4325_v29 = vpop.f32.mrf.mxu0  ;;  %v11078_v2 = vcombine.low %v1302_v30, %v1306_v57 }
 0x2dd   : > { %5272 = vmatprep.subr.bf16.mxu1 %v11087_v52  ;;  %v1294_v5 = vld [vmem:[#allocation5 + $0x658] sm:$0xff]  ;;  %v4438_v6 = vpop.f32.mrf.mxu1  ;;  %v10943_v52 = vcombine.high %v1166_v43, %v1170_v41 }
 0x2de   : > { %5002 = vmatmul.mubr.bf16.gmra.mxu0 %v17849_v20  ;;  %v1298_v23 = vld [vmem:[#allocation5 + $0x678] sm:$0xff]  ;;  %v14960_v27 = vadd.f32 %v4438_v6, %v4325_v29  ;;  %v4327_v17 = vpop.f32.mrf.mxu0  ;;  %v10942_v29 = vcombine.low %v1166_v43, %v1170_v41 }
 0x2df   : > { %5115 = vmatmul.mubr.bf16.gmra.mxu1 %v17850_v38  ;;  %5160 = vmatpush2.bf16.msra.mxu0 %v10958_v15  ;;  %v4440_v42 = vpop.f32.mrf.mxu1  ;;  %v11071_v9 = vcombine.high %v1294_v5, %v1298_v23  ;;  %v1158_v38 = vld [vmem:[#allocation5 + $0x218] sm:$0xff]  ;;  %v11070_v57 = vcombine.low %v1294_v5, %v1298_v23  ;;  %v17856_v5 = vld [vmem:[#allocation127_spill] sm:$0xff] }
 0x2e0   : > { %5011 = vmatprep.mubr.bf16.mxu0 %v17851_v26  ;;  %5273 = vmatpush2.bf16.msra.mxu1 %v11086_v61  ;;  %v14963_v36 = vadd.f32 %v4440_v42, %v4327_v17  ;;  %v4329_v20 = vpop.f32.mrf.mxu0  ;;  %v1162_v15 = vld [vmem:[#allocation5 + $0x238] sm:$0xff] }
 0x2e1   : > { %5161 = vmatprep.subr.bf16.mxu0 %v10951_v49  ;;  %5274 = vmatprep.subr.bf16.mxu1 %v11079_v8  ;;  %v4442_v63 = vpop.f32.mrf.mxu1  ;;  %v1286_v1 = vld [vmem:[#allocation5 + $0x618] sm:$0xff]  ;;  %v10935_v8 = vcombine.high %v1158_v38, %v1162_v15 }
 0x2e2   : > { %17852 = vst [vmem:[#allocation72_spill] sm:$0xff] %v14963_v36  ;;  %5124 = vmatprep.mubr.bf16.mxu1 %v17771_v7  ;;  %v1290_v6 = vld [vmem:[#allocation5 + $0x638] sm:$0xff]  ;;  %v14966_v61 = vadd.f32 %v4442_v63, %v4329_v20  ;;  %v4331_v30 = vpop.f32.mrf.mxu0 }
 0x2e3   : > { %5162 = vmatpush2.bf16.msra.mxu0 %v10950_v40  ;;  %v4444_v49 = vpop.f32.mrf.mxu1  ;;  %v1406_v17 = vld [vmem:[#allocation5 + $0x9d8] sm:$0xff]  ;;  %v11063_v40 = vcombine.high %v1286_v1, %v1290_v6 }
 0x2e4   : > { %17853 = vst [vmem:[#allocation65_spill] sm:$0xff] %v14966_v61  ;;  %5275 = vmatpush2.bf16.msra.mxu1 %v11078_v2  ;;  %5163 = vmatprep.subr.bf16.mxu0 %v10943_v52  ;;  %v1410_v42 = vld [vmem:[#allocation5 + $0x9f8] sm:$0xff]  ;;  %v14968_v26 = vadd.f32 %v4444_v49, %v4331_v30  ;;  %v4335_v7 = vpop.f32.mrf.mxu0  ;;  %v10934_v2 = vcombine.low %v1158_v38, %v1162_v15  ;;  %v17857_v30 = vld [vmem:[#allocation128_spill] sm:$0xff] }
 0x2e5   : > { %5276 = vmatprep.subr.bf16.mxu1 %v11071_v9  ;;  %v1534_v41 = vld [vmem:[#allocation5 + $0xdd8] sm:$0xff]  ;;  %v4448_v36 = vpop.f32.mrf.mxu1  ;;  %v11062_v9 = vcombine.low %v1286_v1, %v1290_v6  ;;  %v11183_v63 = vcombine.high %v1406_v17, %v1410_v42 }
 0x2e6   : > { %17854 = vst [vmem:[#allocation74_spill] sm:$0xff] %v14968_v26  ;;  %5012 = vmatmul.mubr.bf16.gmra.mxu0 %v14466_v59  ;;  %v1538_v43 = vld [vmem:[#allocation5 + $0xdf8] sm:$0xff]  ;;  %v14972_v52 = vadd.f32 %v4448_v36, %v4335_v7  ;;  %v4337_v23 = vpop.f32.mrf.mxu0  ;;  %v11182_v7 = vcombine.low %v1406_v17, %v1410_v42 }
 0x2e7   : > { %v17855_v20 = vld [vmem:[#allocation38_spill] sm:$0xff]  ;;  %5164 = vmatpush2.bf16.msra.mxu0 %v10942_v29  ;;  %5167 = vmatprep.mubr.bf16.mxu0 %v17856_v5  ;;  %v4450_v49 = vpop.f32.mrf.mxu1  ;;  %v11311_v59 = vcombine.high %v1534_v41, %v1538_v43  ;;  %v11310_v5 = vcombine.low %v1534_v41, %v1538_v43  ;;  %v17864_v43 = vld [vmem:[#allocation132_spill] sm:$0xff] }
 0x2e8   : > { %5125 = vmatmul.mubr.bf16.gmra.mxu1 %v17855_v20  ;;  %5165 = vmatprep.subr.bf16.mxu0 %v10935_v8  ;;  %v14976_v26 = vadd.f32 %v4450_v49, %v4337_v23  ;;  %v4339_v61 = vpop.f32.mrf.mxu0  ;;  %v1398_v20 = vld [vmem:[#allocation5 + $0x998] sm:$0xff] }
 0x2e9   : > { %5277 = vmatpush2.bf16.msra.mxu1 %v11070_v57  ;;  %5280 = vmatprep.mubr.bf16.mxu1 %v17857_v30  ;;  %v1402_v29 = vld [vmem:[#allocation5 + $0x9b8] sm:$0xff]  ;;  %v4452_v38 = vpop.f32.mrf.mxu1 }
 0x2ea   : > { %17858 = vst [vmem:[#allocation67_spill] sm:$0xff] %v14976_v26  ;;  %5278 = vmatprep.subr.bf16.mxu1 %v11063_v40  ;;  %v1526_v36 = vld [vmem:[#allocation5 + $0xd98] sm:$0xff]  ;;  %v14978_v57 = vadd.f32 %v4452_v38, %v4339_v61  ;;  %v4341_v1 = vpop.f32.mrf.mxu0  ;;  %v11175_v8 = vcombine.high %v1398_v20, %v1402_v29  ;;  %v17861_v26 = vld [vmem:[#allocation129_spill] sm:$0xff] }
 0x2eb   : > { %5166 = vmatpush2.bf16.msra.mxu0 %v10934_v2  ;;  %v1530_v15 = vld [vmem:[#allocation5 + $0xdb8] sm:$0xff]  ;;  %v4454_v6 = vpop.f32.mrf.mxu1 }
 0x2ec   : > { %17859 = vst [vmem:[#allocation76_spill] sm:$0xff] %v14978_v57  ;;  %5361 = vmatprep.subr.bf16.mxu0 %v11183_v63  ;;  %v1390_v23 = vld [vmem:[#allocation5 + $0x958] sm:$0xff]  ;;  %v14980_v49 = vadd.f32 %v4454_v6, %v4341_v1  ;;  %v4491_v40 = vpop.f32.mrf.mxu0  ;;  %v11303_v2 = vcombine.high %v1526_v36, %v1530_v15 }
 0x2ed   : > { %5279 = vmatpush2.bf16.msra.mxu1 %v11062_v9  ;;  %v1394_v30 = vld [vmem:[#allocation5 + $0x978] sm:$0xff]  ;;  %v4492_v17 = vadd.f32 %v4491_v40, %v14878_v46  ;;  %v4604_v42 = vpop.f32.mrf.mxu1  ;;  %v11174_v9 = vcombine.low %v1398_v20, %v1402_v29  ;;  %v11302_v46 = vcombine.low %v1526_v36, %v1530_v15 }
 0x2ee   : > { %5474 = vmatprep.subr.bf16.mxu1 %v11311_v59  ;;  %17860 = vst [vmem:[#allocation78_spill] sm:$0xff] %v14980_v49  ;;  %5168 = vmatmul.mubr.bf16.vlgmr.msra.gmra.mxu0 %v17861_v26  ;;  %v17862_v61 = vld [vmem:[#allocation130_spill] sm:$0xff]  ;;  %v17863_v59 = vld [vmem:[#allocation131_spill] sm:$0xff]  ;;  %v4493_v38 = vpop.f32.mrf.mxu0  ;;  %v11167_v1 = vcombine.high %v1390_v23, %v1394_v30 }
 0x2ef   : > { %5362 = vmatpush1.bf16.msra.mxu0 %v11182_v7  ;;  %v14985_v63 = vld [vmem:[#allocation5 + $0xd58] sm:$0xff]  ;;  %5177 = vmatprep.mubr.bf16.mxu0 %v17863_v59  ;;  %v4605_v6 = vadd.f32 %v4604_v42, %v4492_v17  ;;  %v4494_v26 = vadd.f32 %v4493_v38, %v14885_v39  ;;  %v4606_v49 = vpop.f32.mrf.mxu1  ;;  %v11166_v17 = vcombine.low %v1390_v23, %v1394_v30 }
 0x2f0   : > { %5281 = vmatmul.mubr.bf16.vlgmr.msra.gmra.mxu1 %v17862_v61  ;;  %v1522_v41 = vld [vmem:[#allocation5 + $0xd78] sm:$0xff]  ;;  %5363 = vmatprep.subr.bf16.mxu0 %v11175_v8  ;;  %v4495_v20 = vpop.f32.mrf.mxu0 }
 0x2f1   : > { %5290 = vmatprep.mubr.bf16.mxu1 %v17864_v43  ;;  %5475 = vmatpush1.bf16.msra.mxu1 %v11310_v5  ;;  %v14990_v40 = vld [vmem:[#allocation5 + $0x918] sm:$0xff]  ;;  %v11295_v29 = vcombine.high %v14985_v63, %v1522_v41  ;;  %v5589_v61 = vmax.f32 %v4605_v6, 0.0  ;;  %v4607_v59 = vadd.f32 %v4606_v49, %v4494_v26  ;;  %v4496_v43 = vadd.f32 %v4495_v20, %v14892_v21  ;;  %v4608_v57 = vpop.f32.mrf.mxu1 }
 0x2f2   : > { %v14992_v7 = vld [vmem:[#allocation5 + $0x938] sm:$0xff]  ;;  %5476 = vmatprep.subr.bf16.mxu1 %v11303_v2  ;;  %v4497_v36 = vpop.f32.mrf.mxu0  ;;  %v11294_v8 = vcombine.low %v14985_v63, %v1522_v41 }
 0x2f3   : > { %5364 = vmatpush1.bf16.msra.mxu0 %v11174_v9  ;;  %v14996_v39 = vld [vmem:[#allocation5 + $0xd18] sm:$0xff]  ;;  %v11159_v15 = vcombine.high %v14990_v40, %v14992_v7  ;;  %v5717_v2 = vmul.f32 %v5589_v61, %v5589_v61  ;;  %v5590_v42 = vmax.f32 %v4607_v59, 0.0  ;;  %v4609_v38 = vadd.f32 %v4608_v57, %v4496_v43  ;;  %v4610_v21 = vpop.f32.mrf.mxu1 }
 0x2f4   : > { %v14998_v5 = vld [vmem:[#allocation5 + $0xd38] sm:$0xff]  ;;  %5365 = vmatprep.subr.bf16.mxu0 %v11167_v1  ;;  %v4498_v49 = vadd.f32 %v4497_v36, %v14896_v54  ;;  %v4501_v30 = vpop.f32.mrf.mxu0  ;;  %v11158_v1 = vcombine.low %v14990_v40, %v14992_v7 }
 0x2f5   : > { %5477 = vmatpush1.bf16.msra.mxu1 %v11302_v46  ;;  %v15004_v9 = vld [vmem:[#allocation5 + $0x8d8] sm:$0xff]  ;;  %v11287_v63 = vcombine.high %v14996_v39, %v14998_v5  ;;  %v5844_v57 = vadd.f32 %v14687_v35, %v5717_v2  ;;  %v5718_v41 = vmul.f32 %v5590_v42, %v5590_v42  ;;  %v5597_v54 = vmax.f32 %v4609_v38, 0.0  ;;  %v4614_v26 = vpop.f32.mrf.mxu1 }
 0x2f6   : > { %v15006_v23 = vld [vmem:[#allocation5 + $0x8f8] sm:$0xff]  ;;  %5178 = vmatmul.mubr.bf16.gmra.mxu0 %v13969_v55  ;;  %5478 = vmatprep.subr.bf16.mxu1 %v11295_v29  ;;  %v4611_v6 = vadd.f32 %v4610_v21, %v4498_v49  ;;  %v4502_v55 = vadd.f32 %v4501_v30, %v14900_v24  ;;  %v4503_v40 = vpop.f32.mrf.mxu0  ;;  %v11286_v7 = vcombine.low %v14996_v39, %v14998_v5 }
 0x2f7   : > { %5366 = vmatpush1.bf16.msra.mxu0 %v11166_v17  ;;  %v15015_v46 = vld [vmem:[#allocation5 + $0xcd8] sm:$0xff]  ;;  %5187 = vmatprep.mubr.bf16.mxu0 %v14063_v19  ;;  %v11151_v35 = vcombine.high %v15004_v9, %v15006_v23  ;;  %v15026_v29 = vadd.f32 %v5844_v57, %v5718_v41  ;;  %v15028_v59 = vpack.c.bf16 %v5597_v54, %v5589_v61  ;;  %v4616_v17 = vpop.f32.mrf.mxu1 }
 0x2f8   : > { %5291 = vmatmul.mubr.bf16.gmra.mxu1 %v13982_v53  ;;  %v15017_v20 = vld [vmem:[#allocation5 + $0xcf8] sm:$0xff]  ;;  %v5725_v53 = vmul.f32 %v5597_v54, %v5597_v54  ;;  %v5598_v43 = vmax.f32 %v4611_v6, 0.0  ;;  %5367 = vmatprep.subr.bf16.mxu0 %v11159_v15  ;;  %v4504_v36 = vadd.f32 %v4503_v40, %v14903_v47  ;;  %v4505_v2 = vpop.f32.mrf.mxu0  ;;  %v11150_v39 = vcombine.low %v15004_v9, %v15006_v23 }
 0x2f9   : > { %5300 = vmatprep.mubr.bf16.mxu1 %v14065_v37  ;;  %17865 = vst [vmem:[#allocation75_spill] sm:$0xff] %v15028_v59  ;;  %5479 = vmatpush1.bf16.msra.mxu1 %v11294_v8  ;;  %v15030_v24 = vld [vmem:[#allocation5 + $0x898] sm:$0xff]  ;;  %v4615_v37 = vadd.f32 %v4614_v26, %v4502_v55  ;;  %v11279_v61 = vcombine.high %v15015_v46, %v15017_v20  ;;  %v4618_v8 = vpop.f32.mrf.mxu1 }
 0x2fa   : > { %v15032_v19 = vld [vmem:[#allocation5 + $0x8b8] sm:$0xff]  ;;  %5480 = vmatprep.subr.bf16.mxu1 %v11287_v63  ;;  %v5853_v5 = vadd.f32 %v14711_v60, %v5725_v53  ;;  %v5726_v38 = vmul.f32 %v5598_v43, %v5598_v43  ;;  %v4506_v15 = vadd.f32 %v4505_v2, %v14906_v58  ;;  %v15045_v47 = vpack.c.bf16 %v5598_v43, %v5590_v42  ;;  %v4507_v9 = vpop.f32.mrf.mxu0 }
 0x2fb   : > { %5368 = vmatpush1.bf16.msra.mxu0 %v11158_v1  ;;  %v15041_v49 = vld [vmem:[#allocation5 + $0xc98] sm:$0xff]  ;;  %v5605_v30 = vmax.f32 %v4615_v37, 0.0  ;;  %v4617_v57 = vadd.f32 %v4616_v17, %v4504_v36  ;;  %v11143_v23 = vcombine.high %v15030_v24, %v15032_v19  ;;  %v4508_v41 = vadd.f32 %v4507_v9, %v14908_v18  ;;  %v4620_v54 = vpop.f32.mrf.mxu1 }
 0x2fc   : > { %v15043_v21 = vld [vmem:[#allocation5 + $0xcb8] sm:$0xff]  ;;  %17866 = vst [vmem:[#allocation77_spill] sm:$0xff] %v15045_v47  ;;  %5369 = vmatprep.subr.bf16.mxu0 %v11151_v35  ;;  %v15053_v58 = vadd.f32 %v5853_v5, %v5726_v38  ;;  %v4619_v1 = vadd.f32 %v4618_v8, %v4506_v15  ;;  %v11278_v42 = vcombine.low %v15015_v46, %v15017_v20  ;;  %v4511_v55 = vpop.f32.mrf.mxu0 }
 0x2fd   : > { %v15049_v63 = vld [vmem:[#allocation5 + $0x858] sm:$0xff]  ;;  %5481 = vmatpush1.bf16.msra.mxu1 %v11286_v7  ;;  %v5733_v6 = vmul.f32 %v5605_v30, %v5605_v30  ;;  %v5606_v26 = vmax.f32 %v4617_v57, 0.0  ;;  %v11142_v40 = vcombine.low %v15030_v24, %v15032_v19  ;;  %v11271_v35 = vcombine.high %v15041_v49, %v15043_v21  ;;  %v4624_v7 = vpop.f32.mrf.mxu1 }
 0x2fe   : > { %v15051_v60 = vld [vmem:[#allocation5 + $0x878] sm:$0xff]  ;;  %5188 = vmatmul.mubr.bf16.gmra.mxu0 %v14091_v34  ;;  %5482 = vmatprep.subr.bf16.mxu1 %v11279_v61  ;;  %v5613_v53 = vmax.f32 %v4619_v1, 0.0  ;;  %v4621_v43 = vadd.f32 %v4620_v54, %v4508_v41  ;;  %v4512_v18 = vadd.f32 %v4511_v55, %v14912_v48  ;;  %v4513_v19 = vpop.f32.mrf.mxu0  ;;  %v11270_v48 = vcombine.low %v15041_v49, %v15043_v21 }
 0x2ff   : > { %5370 = vmatpush1.bf16.msra.mxu0 %v11150_v39  ;;  %v11135_v46 = vcombine.high %v15049_v63, %v15051_v60  ;;  %v15067_v20 = vld [vmem:[#allocation5 + $0xc58] sm:$0xff]  ;;  %v5862_v17 = vadd.f32 %v14743_v45, %v5733_v6  ;;  %v5734_v24 = vmul.f32 %v5606_v26, %v5606_v26  ;;  %5197 = vmatprep.mubr.bf16.mxu0 %v17755_v33  ;;  %v4626_v39 = vpop.f32.mrf.mxu1 }
 0x300   : > { %5301 = vmatmul.mubr.bf16.gmra.mxu1 %v17754_v12  ;;  %v15069_v34 = vld [vmem:[#allocation5 + $0xc78] sm:$0xff]  ;;  %v5741_v12 = vmul.f32 %v5613_v53, %v5613_v53  ;;  %v15076_v37 = vpack.c.bf16 %v5613_v53, %v5605_v30  ;;  %v5614_v36 = vmax.f32 %v4621_v43, 0.0  ;;  %v4625_v2 = vadd.f32 %v4624_v7, %v4512_v18  ;;  %5371 = vmatprep.subr.bf16.mxu0 %v11143_v23 }
 0x301   : > { %5310 = vmatprep.mubr.bf16.mxu1 %v17756_v14  ;;  %v15078_v61 = vld [vmem:[#allocation5 + $0x818] sm:$0xff]  ;;  %5483 = vmatpush1.bf16.msra.mxu1 %v11278_v42  ;;  %v15082_v45 = vadd.f32 %v5862_v17, %v5734_v24  ;;  %v4514_v33 = vadd.f32 %v4513_v19, %v14915_v50  ;;  %v4515_v14 = vpop.f32.mrf.mxu0  ;;  %v11134_v38 = vcombine.low %v15049_v63, %v15051_v60  ;;  %v4628_v57 = vpop.f32.mrf.mxu1  ;;  %v17869_v17 = vld [vmem:[#allocation115_spill] sm:$0xff] }
 0x302   : > { %17867 = vst [vmem:[#allocation79_spill] sm:$0xff] %v15076_v37  ;;  %v15080_v5 = vld [vmem:[#allocation5 + $0x838] sm:$0xff]  ;;  %5484 = vmatprep.subr.bf16.mxu1 %v11271_v35  ;;  %v11263_v15 = vcombine.high %v15067_v20, %v15069_v34  ;;  %v5871_v8 = vadd.f32 %v14759_v4, %v5741_v12  ;;  %v5742_v49 = vmul.f32 %v5614_v36, %v5614_v36  ;;  %v5621_v21 = vmax.f32 %v4625_v2, 0.0 }
 0x303   : > { %v4516_v30 = vadd.f32 %v4515_v14, %v14918_v22  ;;  %5372 = vmatpush1.bf16.msra.mxu0 %v11142_v40  ;;  %v15091_v9 = vld [vmem:[#allocation5 + $0xc18] sm:$0xff]  ;;  %v4627_v50 = vadd.f32 %v4626_v39, %v4514_v33  ;;  %v4517_v1 = vpop.f32.mrf.mxu0  ;;  %v11127_v63 = vcombine.high %v15078_v61, %v15080_v5  ;;  %v11262_v60 = vcombine.low %v15067_v20, %v15069_v34  ;;  %v4630_v6 = vpop.f32.mrf.mxu1 }
 0x304   : > { %v15093_v23 = vld [vmem:[#allocation5 + $0xc38] sm:$0xff]  ;;  %5373 = vmatprep.subr.bf16.mxu0 %v11135_v46  ;;  %v15099_v4 = vpack.c.bf16 %v5614_v36, %v5606_v26  ;;  %v15101_v41 = vadd.f32 %v5871_v8, %v5742_v49  ;;  %v5749_v22 = vmul.f32 %v5621_v21, %v5621_v21  ;;  %v4518_v42 = vadd.f32 %v4517_v1, %v14920_v62 }
 0x305   : > { %v4629_v54 = vadd.f32 %v4628_v57, %v4516_v30  ;;  %v15104_v55 = vld [vmem:[#allocation5 + $0xbd8] sm:$0xff]  ;;  %5485 = vmatpush1.bf16.msra.mxu1 %v11270_v48  ;;  %v5622_v35 = vmax.f32 %v4627_v50, 0.0  ;;  %v4521_v53 = vpop.f32.mrf.mxu0  ;;  %v11126_v26 = vcombine.low %v15078_v61, %v15080_v5  ;;  %v11255_v43 = vcombine.high %v15091_v9, %v15093_v23  ;;  %v4634_v20 = vpop.f32.mrf.mxu1 }
 0x306   : > { %17868 = vst [vmem:[#allocation81_spill] sm:$0xff] %v15099_v4  ;;  %v15106_v40 = vld [vmem:[#allocation5 + $0xbf8] sm:$0xff]  ;;  %5198 = vmatmul.mubr.bf16.gmra.mxu0 %v17783_v16  ;;  %5486 = vmatprep.subr.bf16.mxu1 %v11263_v15  ;;  %v5880_v18 = vadd.f32 %v14787_v51, %v5749_v22  ;;  %v4631_v7 = vadd.f32 %v4630_v6, %v4518_v42  ;;  %v17870_v16 = vld [vmem:[#allocation116_spill] sm:$0xff]  ;;  %v17873_v6 = vld [vmem:[#allocation31_spill] sm:$0xff] }
 0x307   : > { %v5629_v62 = vmax.f32 %v4629_v54, 0.0  ;;  %v4522_v46 = vadd.f32 %v4521_v53, %v14924_v10  ;;  %5374 = vmatpush1.bf16.msra.mxu0 %v11134_v38  ;;  %v5750_v34 = vmul.f32 %v5622_v35, %v5622_v35  ;;  %5207 = vmatprep.mubr.bf16.mxu0 %v17869_v17  ;;  %v4523_v24 = vpop.f32.mrf.mxu0  ;;  %v11247_v19 = vcombine.high %v15104_v55, %v15106_v40  ;;  %v4636_v2 = vpop.f32.mrf.mxu1  ;;  %v1466_v39 = vld [vmem:[#allocation5 + $0xbb8] sm:$0xff]  ;;  %v11892_v38 = vld [vmem:[#allocation7 + $0x2e4] ss:$16 sps:$4 sm:$0xff]  }
 0x308   : > { %5311 = vmatmul.mubr.bf16.gmra.mxu1 %v17784_v56  ;;  %v11254_v51 = vcombine.low %v15091_v9, %v15093_v23  ;;  %v5630_v10 = vmax.f32 %v4631_v7, 0.0  ;;  %5375 = vmatprep.subr.bf16.mxu0 %v11127_v63  ;;  %v1462_v56 = vld [vmem:[#allocation5 + $0xb98] sm:$0xff]  ;;  %v4524_v5 = vadd.f32 %v4523_v24, %v14927_v44  ;;  %v11246_v14 = vcombine.low %v15104_v55, %v15106_v40  ;;  %v17876_v7 = vld [vmem:[#allocation35_spill] sm:$0xff] }
 0x309   : > { %5320 = vmatprep.mubr.bf16.mxu1 %v17870_v16  ;;  %v5757_v48 = vmul.f32 %v5629_v62, %v5629_v62  ;;  %v15122_v12 = vpack.c.bf16 %v5629_v62, %v5621_v21  ;;  %v4635_v36 = vadd.f32 %v4634_v20, %v4522_v46  ;;  %5487 = vmatpush1.bf16.msra.mxu1 %v11262_v60  ;;  %v4525_v33 = vpop.f32.mrf.mxu0  ;;  %v4638_v30 = vpop.f32.mrf.mxu1  ;;  %v1458_v54 = vld [vmem:[#allocation5 + $0xb78] sm:$0xff]  ;;  %v17875_v62 = vld [vmem:[#allocation24_spill] sm:$0xff]  ;;  %v17877_v46 = vld [vmem:[#allocation41_spill] sm:$0xff] }
 0x30a   : > { %v15124_v61 = vadd.f32 %v5880_v18, %v5750_v34  ;;  %5488 = vmatprep.subr.bf16.mxu1 %v11255_v43  ;;  %v5758_v8 = vmul.f32 %v5630_v10, %v5630_v10  ;;  %v4526_v21 = vadd.f32 %v4525_v33, %v14930_v11  ;;  %v4637_v57 = vadd.f32 %v4636_v2, %v4524_v5  ;;  %v17874_v40 = vld [vmem:[#allocation114_spill] sm:$0xff] }
 0x30b   : > { %17871 = vst [vmem:[#allocation83_spill] sm:$0xff] %v15122_v12  ;;  %v5889_v15 = vadd.f32 %v14797_v28, %v5757_v48  ;;  %v5637_v49 = vmax.f32 %v4635_v36, 0.0  ;;  %5376 = vmatpush1.bf16.msra.mxu0 %v11126_v26  ;;  %v4527_v9 = vpop.f32.mrf.mxu0  ;;  %v11239_v23 = vcombine.high %v1462_v56, %v1466_v39  ;;  %v15131_v50 = vpack.c.bf16 %v5630_v10, %v5622_v35  ;;  %v4640_v22 = vpop.f32.mrf.mxu1  ;;  %v1454_v28 = vld [vmem:[#allocation5 + $0xb58] sm:$0xff] }
 0x30c   : > { %5377 = vmatprep.subr.bf16.mxu0 %v11247_v19  ;;  %v4639_v63 = vadd.f32 %v4638_v30, %v4526_v21  ;;  %v4528_v60 = vadd.f32 %v4527_v9, %v14932_v0  ;;  %v5638_v42 = vmax.f32 %v4637_v57, 0.0  ;;  %v11238_v55 = vcombine.low %v1462_v56, %v1466_v39  ;;  %v1446_v48 = vld [vmem:[#allocation5 + $0xb18] sm:$0xff] }
 0x30d   : > { %17872 = vst [vmem:[#allocation85_spill] sm:$0xff] %v15131_v50  ;;  %v15133_v44 = vadd.f32 %v5889_v15, %v5758_v8  ;;  %v5765_v1 = vmul.f32 %v5637_v49, %v5637_v49  ;;  %5489 = vmatpush1.bf16.msra.mxu1 %v11254_v51  ;;  %v4531_v11 = vpop.f32.mrf.mxu0  ;;  %v4644_v18 = vpop.f32.mrf.mxu1  ;;  %v11231_v34 = vcombine.high %v1454_v28, %v1458_v54 }
 0x30e   : > { %5208 = vmatmul.mubr.bf16.gmra.mxu0 %v17873_v6  ;;  %7860 = vmatprep.subr.bf16.mxu1 %v11892_v38  ;;  %v5645_v35 = vmax.f32 %v4639_v63, 0.0  ;;  %v4641_v26 = vadd.f32 %v4640_v22, %v4528_v60  ;;  %v4532_v43 = vadd.f32 %v4531_v11, %v14936_v25  ;;  %v5766_v0 = vmul.f32 %v5638_v42, %v5638_v42  ;;  %v1450_v25 = vld [vmem:[#allocation5 + $0xb38] sm:$0xff] }
 0x30f   : > { %v5898_v53 = vadd.f32 %v17874_v40, %v5765_v1  ;;  %5378 = vmatpush2.bf16.msra.mxu0 %v11246_v14  ;;  %5217 = vmatprep.mubr.bf16.mxu0 %v17876_v7  ;;  %v4533_v20 = vpop.f32.mrf.mxu0  ;;  %v4646_v51 = vpop.f32.mrf.mxu1  ;;  %v11230_v56 = vcombine.low %v1454_v28, %v1458_v54  ;;  %v17879_v14 = vld [vmem:[#allocation73_spill] sm:$0xff]  ;;  %v11223_v21 = vcombine.high %v1446_v48, %v1450_v25  ;;  %v1442_v60 = vld [vmem:[#allocation5 + $0xaf8] sm:$0xff]  ;;  %v17882_v54 = vld [vmem:[#allocation43_spill] sm:$0xff] }
 0x310   : > { %5321 = vmatmul.mubr.bf16.gmra.mxu1 %v17875_v62  ;;  %v5773_v17 = vmul.f32 %v5645_v35, %v5645_v35  ;;  %v15142_v16 = vpack.c.bf16 %v5645_v35, %v5637_v49  ;;  %v5646_v24 = vmax.f32 %v4641_v26, 0.0  ;;  %v4645_v19 = vadd.f32 %v4644_v18, %v4532_v43  ;;  %5379 = vmatprep.subr.bf16.mxu0 %v11239_v23  ;;  %v17881_v23 = vld [vmem:[#allocation121_spill] sm:$0xff]  ;;  %v17883_v6 = vld [vmem:[#allocation126_spill] sm:$0xff]  ;;  %v17885_v43 = vld [vmem:[#allocation40_spill] sm:$0xff] }
 0x311   : > { %5330 = vmatprep.mubr.bf16.mxu1 %v17877_v46  ;;  %v15144_v10 = vadd.f32 %v5898_v53, %v5766_v0  ;;  %v4534_v36 = vadd.f32 %v4533_v20, %v14939_v31  ;;  %v4535_v2 = vpop.f32.mrf.mxu0  ;;  %v4648_v15 = vpop.f32.mrf.mxu1  ;;  %v11222_v11 = vcombine.low %v1446_v48, %v1450_v25  ;;  %v17886_v62 = vld [vmem:[#allocation48_spill] sm:$0xff]  ;;  %v17887_v0 = vld [vmem:[#allocation50_spill] sm:$0xff] }
 0x312   : > { %17878 = vst [vmem:[#allocation82_spill] sm:$0xff] %v15142_v16  ;;  %v5907_v39 = vadd.f32 %v14813_v3, %v5773_v17  ;;  %v5774_v5 = vmul.f32 %v5646_v24, %v5646_v24  ;;  %v5653_v33 = vmax.f32 %v4645_v19, 0.0  ;;  %v4536_v38 = vadd.f32 %v4535_v2, %v17879_v14  ;;  %v1438_v3 = vld [vmem:[#allocation5 + $0xad8] sm:$0xff] }
 0x313   : > { %5380 = vmatpush2.bf16.msra.mxu0 %v11238_v55  ;;  %v4647_v8 = vadd.f32 %v4646_v51, %v4534_v36  ;;  %v4537_v49 = vpop.f32.mrf.mxu0  ;;  %v15149_v30 = vpack.c.bf16 %v5646_v24, %v5638_v42  ;;  %v4650_v63 = vpop.f32.mrf.mxu1  ;;  %v17884_v42 = vld [vmem:[#allocation122_spill] sm:$0xff]  ;;  %v11215_v46 = vcombine.high %v1438_v3, %v1442_v60 }
 0x314   : > { %5381 = vmatprep.subr.bf16.mxu0 %v11231_v34  ;;  %v15151_v57 = vadd.f32 %v5907_v39, %v5774_v5  ;;  %v5781_v9 = vmul.f32 %v5653_v33, %v5653_v33  ;;  %v4649_v31 = vadd.f32 %v4648_v15, %v4536_v38  ;;  %v4538_v1 = vadd.f32 %v4537_v49, %v17881_v23  ;;  %v1430_v51 = vld [vmem:[#allocation5 + $0xa98] sm:$0xff]  ;;  %v17890_v5 = vld [vmem:[#allocation39_spill] sm:$0xff] }
 0x315   : > { %17880 = vst [vmem:[#allocation84_spill] sm:$0xff] %v15149_v30  ;;  %v5654_v22 = vmax.f32 %v4647_v8, 0.0  ;;  %v4541_v28 = vpop.f32.mrf.mxu0  ;;  %v4654_v26 = vpop.f32.mrf.mxu1  ;;  %v1434_v48 = vld [vmem:[#allocation5 + $0xab8] sm:$0xff]  ;;  %v11214_v39 = vcombine.low %v1438_v3, %v1442_v60 }
 0x316   : > { %5218 = vmatmul.mubr.bf16.gmra.mxu0 %v17882_v54  ;;  %v5916_v55 = vadd.f32 %v17883_v6, %v5781_v9  ;;  %v5661_v40 = vmax.f32 %v4649_v31, 0.0  ;;  %v4651_v53 = vadd.f32 %v4650_v63, %v4538_v1  ;;  %v4542_v35 = vadd.f32 %v4541_v28, %v17884_v42  ;;  %v17889_v36 = vld [vmem:[#allocation66_spill] sm:$0xff] }
 0x317   : > { %5382 = vmatpush2.bf16.msra.mxu0 %v11230_v56  ;;  %v5782_v18 = vmul.f32 %v5654_v22, %v5654_v22  ;;  %5227 = vmatprep.mubr.bf16.mxu0 %v17886_v62  ;;  %v4543_v7 = vpop.f32.mrf.mxu0  ;;  %v4656_v19 = vpop.f32.mrf.mxu1  ;;  %v1422_v28 = vld [vmem:[#allocation5 + $0xa58] sm:$0xff]  ;;  %v17896_v62 = vld [vmem:[#allocation23_spill] sm:$0xff] }
 0x318   : > { %5331 = vmatmul.mubr.bf16.gmra.mxu1 %v17885_v43  ;;  %v5789_v20 = vmul.f32 %v5661_v40, %v5661_v40  ;;  %v15160_v34 = vpack.c.bf16 %v5661_v40, %v5653_v33  ;;  %v5662_v17 = vmax.f32 %v4651_v53, 0.0  ;;  %v4655_v24 = vadd.f32 %v4654_v26, %v4542_v35  ;;  %5383 = vmatprep.subr.bf16.mxu0 %v11223_v21  ;;  %v1426_v54 = vld [vmem:[#allocation5 + $0xa78] sm:$0xff]  ;;  %v17893_v40 = vld [vmem:[#allocation52_spill] sm:$0xff] }
 0x319   : > { %5340 = vmatprep.mubr.bf16.mxu1 %v17887_v0  ;;  %v15162_v25 = vadd.f32 %v5916_v55, %v5782_v18  ;;  %v4544_v2 = vadd.f32 %v4543_v7, %v17889_v36  ;;  %v4545_v56 = vpop.f32.mrf.mxu0  ;;  %v4658_v33 = vpop.f32.mrf.mxu1  ;;  %v11207_v21 = vcombine.high %v1430_v51, %v1434_v48  ;;  %v17894_v43 = vld [vmem:[#allocation110_spill] sm:$0xff]  ;;  %v11199_v7 = vcombine.high %v1422_v28, %v1426_v54  ;;  %v17899_v36 = vld [vmem:[#allocation72_spill] sm:$0xff] }
 0x31a   : > { %17888 = vst [vmem:[#allocation86_spill] sm:$0xff] %v15160_v34  ;;  %v5925_v14 = vadd.f32 %v17890_v5, %v5789_v20  ;;  %v5790_v38 = vmul.f32 %v5662_v17, %v5662_v17  ;;  %v5669_v15 = vmax.f32 %v4655_v24, 0.0  ;;  %v4546_v8 = vadd.f32 %v4545_v56, %v14954_v13  ;;  %v17892_v13 = vld [vmem:[#allocation109_spill] sm:$0xff] }
 0x31b   : > { %5384 = vmatpush2.bf16.msra.mxu0 %v11222_v11  ;;  %v4657_v49 = vadd.f32 %v4656_v19, %v4544_v2  ;;  %v4547_v9 = vpop.f32.mrf.mxu0  ;;  %v15167_v31 = vpack.c.bf16 %v5662_v17, %v5654_v22  ;;  %v4660_v60 = vpop.f32.mrf.mxu1  ;;  %v11206_v11 = vcombine.low %v1430_v51, %v1434_v48  ;;  %v1414_v51 = vld [vmem:[#allocation5 + $0xa18] sm:$0xff]  ;;  %v17900_v5 = vld [vmem:[#allocation69_spill] sm:$0xff] }
 0x31c   : > { %5385 = vmatprep.subr.bf16.mxu0 %v11215_v46  ;;  %v15169_v23 = vadd.f32 %v5925_v14, %v5790_v38  ;;  %v5797_v1 = vmul.f32 %v5669_v15, %v5669_v15  ;;  %v4659_v63 = vadd.f32 %v4658_v33, %v4546_v8  ;;  %v4548_v3 = vadd.f32 %v4547_v9, %v14956_v32  ;;  %v17895_v32 = vld [vmem:[#allocation30_spill] sm:$0xff]  ;;  %v17901_v33 = vld [vmem:[#allocation65_spill] sm:$0xff] }
 0x31d   : > { %17891 = vst [vmem:[#allocation88_spill] sm:$0xff] %v15167_v31  ;;  %v5670_v6 = vmax.f32 %v4657_v49, 0.0  ;;  %v4551_v55 = vpop.f32.mrf.mxu0  ;;  %v4664_v26 = vpop.f32.mrf.mxu1 }
 0x31e   : > { %5228 = vmatmul.mubr.bf16.gmra.mxu0 %v17892_v13  ;;  %v5934_v53 = vadd.f32 %v17893_v40, %v5797_v1  ;;  %v5677_v42 = vmax.f32 %v4659_v63, 0.0  ;;  %v4661_v35 = vadd.f32 %v4660_v60, %v4548_v3  ;;  %v4552_v22 = vadd.f32 %v4551_v55, %v14960_v27  ;;  %v1418_v27 = vld [vmem:[#allocation5 + $0xa38] sm:$0xff] }
 0x31f   : > { %5386 = vmatpush2.bf16.msra.mxu0 %v11214_v39  ;;  %v5798_v18 = vmul.f32 %v5670_v6, %v5670_v6  ;;  %5237 = vmatprep.mubr.bf16.mxu0 %v17895_v32  ;;  %v4553_v0 = vpop.f32.mrf.mxu0  ;;  %v4666_v19 = vpop.f32.mrf.mxu1  ;;  %v11198_v39 = vcombine.low %v1422_v28, %v1426_v54  ;;  %v17904_v13 = vld [vmem:[#allocation74_spill] sm:$0xff]  ;;  %v17907_v32 = vld [vmem:[#allocation25_spill] sm:$0xff] }
 0x320   : > { %5341 = vmatmul.mubr.bf16.gmra.mxu1 %v17894_v43  ;;  %v5805_v46 = vmul.f32 %v5677_v42, %v5677_v42  ;;  %v15178_v20 = vpack.c.bf16 %v5677_v42, %v5669_v15  ;;  %v5678_v17 = vmax.f32 %v4661_v35, 0.0  ;;  %v4665_v24 = vadd.f32 %v4664_v26, %v4552_v22  ;;  %5387 = vmatprep.subr.bf16.mxu0 %v11207_v21  ;;  %v17905_v42 = vld [vmem:[#allocation32_spill] sm:$0xff]  ;;  %v17906_v22 = vld [vmem:[#allocation119_spill] sm:$0xff] }
 0x321   : > { %5350 = vmatprep.mubr.bf16.mxu1 %v17896_v62  ;;  %v15180_v48 = vadd.f32 %v5934_v53, %v5798_v18  ;;  %v4554_v2 = vadd.f32 %v4553_v0, %v17899_v36  ;;  %v4555_v56 = vpop.f32.mrf.mxu0  ;;  %v4668_v15 = vpop.f32.mrf.mxu1  ;;  %v11191_v21 = vcombine.high %v1414_v51, %v1418_v27  ;;  %v11190_v35 = vcombine.low %v1414_v51, %v1418_v27  ;;  %v17908_v0 = vld [vmem:[#allocation133_spill] sm:$0xff] }
 0x322   : > { %17897 = vst [vmem:[#allocation90_spill] sm:$0xff] %v15178_v20  ;;  %v5943_v14 = vadd.f32 %v17900_v5, %v5805_v46  ;;  %v5806_v38 = vmul.f32 %v5678_v17, %v5678_v17  ;;  %v5685_v8 = vmax.f32 %v4665_v24, 0.0  ;;  %v4556_v49 = vadd.f32 %v4555_v56, %v17901_v33  ;;  %v11889_v46 = vld [vmem:[#allocation7 + $0xe4] ss:$16 sps:$4 sm:$0xff]  }
 0x323   : > { %17898 = vst [vmem:[#allocation92_spill] sm:$0xff] %v15180_v48  ;;  %5388 = vmatpush2.bf16.msra.mxu0 %v11206_v11  ;;  %v4667_v9 = vadd.f32 %v4666_v19, %v4554_v2  ;;  %v4557_v1 = vpop.f32.mrf.mxu0  ;;  %v15185_v63 = vpack.c.bf16 %v5678_v17, %v5670_v6  ;;  %v4670_v54 = vpop.f32.mrf.mxu1  ;;  %v17910_v36 = vmov 0   ;;  %v17945_v48 = vld [vmem:[#allocation49_spill] sm:$0xff] }
 0x324   : > { %5389 = vmatprep.subr.bf16.mxu0 %v11199_v7  ;;  %v15187_v3 = vadd.f32 %v5943_v14, %v5806_v38  ;;  %v5813_v60 = vmul.f32 %v5685_v8, %v5685_v8  ;;  %v4669_v55 = vadd.f32 %v4668_v15, %v4556_v49  ;;  %v4558_v28 = vadd.f32 %v4557_v1, %v17904_v13  ;;  %v17914_v49 = vld [vmem:[#allocation76_spill] sm:$0xff] }
 0x325   : > { %17902 = vst [vmem:[#allocation89_spill] sm:$0xff] %v15185_v63  ;;  %v5686_v40 = vmax.f32 %v4667_v9, 0.0  ;;  %v4561_v53 = vpop.f32.mrf.mxu0  ;;  %v4674_v6 = vpop.f32.mrf.mxu1 }
 0x326   : > { %17903 = vst [vmem:[#allocation91_spill] sm:$0xff] %v15187_v3  ;;  %5238 = vmatmul.mubr.bf16.gmra.mxu0 %v17905_v42  ;;  %v5952_v11 = vadd.f32 %v17906_v22, %v5813_v60  ;;  %v5693_v26 = vmax.f32 %v4669_v55, 0.0  ;;  %v4671_v43 = vadd.f32 %v4670_v54, %v4558_v28  ;;  %v4562_v18 = vadd.f32 %v4561_v53, %v14972_v52  ;;  %v17912_v52 = vld [vmem:[#allocation67_spill] sm:$0xff]  ;;  %v17917_v53 = vld [vmem:[#allocation78_spill] sm:$0xff] }
 0x327   : > { %5390 = vmatpush2.bf16.msra.mxu0 %v11198_v39  ;;  %v5814_v62 = vmul.f32 %v5686_v40, %v5686_v40  ;;  %5393 = vmatprep.mubr.bf16.mxu0 %v17908_v0  ;;  %v4563_v7 = vpop.f32.mrf.mxu0  ;;  %v4676_v27 = vpop.f32.mrf.mxu1  ;;  %v17913_v39 = vld [vmem:[#allocation68_spill] sm:$0xff]  ;;  %v11890_v60 = vld [vmem:[#allocation7 + $0x2e0] ss:$16 sps:$4 sm:$0xff]  }
 0x328   : > { %5351 = vmatmul.mubr.bf16.gmra.mxu1 %v17907_v32  ;;  %5391 = vmatprep.subr.bf16.mxu0 %v11191_v21  ;;  %v5821_v17 = vmul.f32 %v5693_v26, %v5693_v26  ;;  %v15195_v24 = vpack.c.bf16 %v5693_v26, %v5685_v8  ;;  %v5694_v19 = vmax.f32 %v4671_v43, 0.0  ;;  %v4675_v51 = vadd.f32 %v4674_v6, %v4562_v18  ;;  %v11887_v21 = vld [vmem:[#allocation7 + $0xe0] ss:$16 sps:$4 sm:$0xff]   ;;  %v11898_v26 = vld [vmem:[#allocation7 + $0x2c4] ss:$16 sps:$4 sm:$0xff]   ;;  %v17918_v6 = vld [vmem:[#allocation134_spill] sm:$0xff] }
 0x329   : > { %5506 = vmatprep.mubr.bf16.mxu1 %v17910_v36  ;;  %v15198_v2 = vadd.f32 %v5952_v11, %v5814_v62  ;;  %v4564_v56 = vadd.f32 %v4563_v7, %v17912_v52  ;;  %v4565_v5 = vpop.f32.mrf.mxu0  ;;  %v4678_v9 = vpop.f32.mrf.mxu1  ;;  %v11895_v11 = vld [vmem:[#allocation7 + $0xc4] ss:$16 sps:$4 sm:$0xff]   ;;  %v11896_v52 = vld [vmem:[#allocation7 + $0x2c0] ss:$16 sps:$4 sm:$0xff]  }
 0x32a   : > { %17909 = vst [vmem:[#allocation93_spill] sm:$0xff] %v15195_v24  ;;  %v5961_v14 = vadd.f32 %v17913_v39, %v5821_v17  ;;  %v5822_v38 = vmul.f32 %v5694_v19, %v5694_v19  ;;  %v5701_v33 = vmax.f32 %v4675_v51, 0.0  ;;  %v4566_v15 = vadd.f32 %v4565_v5, %v17914_v49  ;;  %v11904_v49 = vld [vmem:[#allocation7 + $0x2a4] ss:$16 sps:$4 sm:$0xff]  }
 0x32b   : > { %17911 = vst [vmem:[#allocation95_spill] sm:$0xff] %v15198_v2  ;;  %5392 = vmatpush2.bf16.msra.mxu0 %v11190_v35  ;;  %v4677_v8 = vadd.f32 %v4676_v27, %v4564_v56  ;;  %v4567_v1 = vpop.f32.mrf.mxu0  ;;  %v15203_v55 = vpack.c.bf16 %v5694_v19, %v5686_v40  ;;  %v4680_v22 = vpop.f32.mrf.mxu1  ;;  %v17919_v35 = vld [vmem:[#allocation51_spill] sm:$0xff]  ;;  %v17920_v40 = vld [vmem:[#allocation21_spill] sm:$0xff]  ;;  %v17940_v2 = vld [vmem:[#allocation118_spill] sm:$0xff] }
 0x32c   : > { %7747 = vmatprep.subr.bf16.mxu0 %v11889_v46  ;;  %v15205_v13 = vadd.f32 %v5961_v14, %v5822_v38  ;;  %v5829_v28 = vmul.f32 %v5701_v33, %v5701_v33  ;;  %v4679_v54 = vadd.f32 %v4678_v9, %v4566_v15  ;;  %v4568_v42 = vadd.f32 %v4567_v1, %v17917_v53  ;;  %v17921_v46 = vld [vmem:[#allocation135_spill] sm:$0xff]  ;;  %v17924_v1 = vld [vmem:[#allocation53_spill] sm:$0xff] }
 0x32d   : > { %17915 = vst [vmem:[#allocation97_spill] sm:$0xff] %v15203_v55  ;;  %v5702_v43 = vmax.f32 %v4677_v8, 0.0  ;;  %v4717_v18 = vpop.f32.mrf.mxu0  ;;  %v4830_v7 = vpop.f32.mrf.mxu1  ;;  %v11893_v27 = vld [vmem:[#allocation7 + $0xc0] ss:$16 sps:$4 sm:$0xff]   ;;  %v11901_v38 = vld [vmem:[#allocation7 + $0xa4] ss:$16 sps:$4 sm:$0xff]  }
 0x32e   : > { %17916 = vst [vmem:[#allocation99_spill] sm:$0xff] %v15205_v13  ;;  %5394 = vmatmul.mubr.bf16.vlgmr.msra.gmra.mxu0 %v17918_v6  ;;  %v5970_v32 = vadd.f32 %v17919_v35, %v5829_v28  ;;  %v5709_v62 = vmax.f32 %v4679_v54, 0.0  ;;  %v4681_v0 = vadd.f32 %v4680_v22, %v4568_v42  ;;  %v15212_v19 = vadd.f32 %v4830_v7, %v4717_v18  ;;  %v11899_v42 = vld [vmem:[#allocation7 + $0xa0] ss:$16 sps:$4 sm:$0xff]   ;;  %v11907_v18 = vld [vmem:[#allocation7 + $0x84] ss:$16 sps:$4 sm:$0xff]  }
 0x32f   : > { %5403 = vmatprep.mubr.bf16.mxu0 %v17921_v46  ;;  %v5830_v17 = vmul.f32 %v5702_v43, %v5702_v43  ;;  %7748 = vmatpush1.bf16.msra.mxu0 %v11887_v21  ;;  %v4719_v51 = vpop.f32.mrf.mxu0  ;;  %v4832_v14 = vpop.f32.mrf.mxu1  ;;  %v11902_v22 = vld [vmem:[#allocation7 + $0x2a0] ss:$16 sps:$4 sm:$0xff]   ;;  %v11910_v6 = vld [vmem:[#allocation7 + $0x284] ss:$16 sps:$4 sm:$0xff]   ;;  %v17929_v7 = vld [vmem:[#allocation26_spill] sm:$0xff] }
 0x330   : > { %5507 = vmatmul.mubr.bf16.vlgmr.msra.gmra.mxu1 %v17920_v40  ;;  %v5837_v56 = vmul.f32 %v5709_v62, %v5709_v62  ;;  %v15214_v5 = vpack.c.bf16 %v5709_v62, %v5701_v33  ;;  %v5710_v39 = vmax.f32 %v4681_v0, 0.0  ;;  %7749 = vmatprep.subr.bf16.mxu0 %v11895_v11  ;;  %v15218_v9 = vadd.f32 %v4832_v14, %v4719_v51  ;;  %v17927_v62 = vld [vmem:[#allocation22_spill] sm:$0xff]  ;;  %v17928_v0 = vld [vmem:[#allocation29_spill] sm:$0xff] }
 0x331   : > { %7861 = vmatpush1.bf16.msra.mxu1 %v11890_v60  ;;  %v15216_v15 = vadd.f32 %v5970_v32, %v5830_v17  ;;  %v4721_v8 = vpop.f32.mrf.mxu0  ;;  %5516 = vmatprep.mubr.bf16.mxu1 %v17910_v36  ;;  %v4834_v28 = vpop.f32.mrf.mxu1  ;;  %v11905_v17 = vld [vmem:[#allocation7 + $0x80] ss:$16 sps:$4 sm:$0xff]  }
 0x332   : > { %17922 = vst [vmem:[#allocation96_spill] sm:$0xff] %v15214_v5  ;;  %7862 = vmatprep.subr.bf16.mxu1 %v11898_v26  ;;  %v5979_v21 = vadd.f32 %v17924_v1, %v5837_v56  ;;  %v5838_v60 = vmul.f32 %v5710_v39, %v5710_v39  ;;  %v15222_v54 = vpack.c.bf16 %v5710_v39, %v5702_v43  ;;  %v11908_v51 = vld [vmem:[#allocation7 + $0x280] ss:$16 sps:$4 sm:$0xff]   ;;  %v11916_v56 = vld [vmem:[#allocation7 + $0x264] ss:$16 sps:$4 sm:$0xff]  }
 0x333   : > { %17923 = vst [vmem:[#allocation98_spill] sm:$0xff] %v15216_v15  ;;  %v15224_v33 = vadd.f32 %v4834_v28, %v4721_v8  ;;  %7750 = vmatpush1.bf16.msra.mxu0 %v11893_v27  ;;  %v4723_v53 = vpop.f32.mrf.mxu0  ;;  %v4836_v26 = vpop.f32.mrf.mxu1  ;;  %v11911_v1 = vld [vmem:[#allocation7 + $0x60] ss:$16 sps:$4 sm:$0xff]   ;;  %v11919_v28 = vld [vmem:[#allocation7 + $0x44] ss:$16 sps:$4 sm:$0xff]  }
 0x334   : > { %17925 = vst [vmem:[#allocation100_spill] sm:$0xff] %v15222_v54  ;;  %v15226_v11 = vadd.f32 %v5979_v21, %v5838_v60  ;;  %7751 = vmatprep.subr.bf16.mxu0 %v11901_v38  ;;  %v15228_v35 = vadd.f32 %v4836_v26, %v4723_v53  ;;  %v11914_v21 = vld [vmem:[#allocation7 + $0x260] ss:$16 sps:$4 sm:$0xff]   ;;  %v11922_v53 = vld [vmem:[#allocation7 + $0x244] ss:$16 sps:$4 sm:$0xff]   ;;  %v17930_v26 = vld [vmem:[#allocation34_spill] sm:$0xff] }
 0x335   : > { %7863 = vmatpush1.bf16.msra.mxu1 %v11896_v52  ;;  %v4727_v32 = vpop.f32.mrf.mxu0  ;;  %v4840_v43 = vpop.f32.mrf.mxu1  ;;  %v11913_v52 = vld [vmem:[#allocation7 + $0x64] ss:$16 sps:$4 sm:$0xff]  }
 0x336   : > { %17926 = vst [vmem:[#allocation102_spill] sm:$0xff] %v15226_v11  ;;  %7864 = vmatprep.subr.bf16.mxu1 %v11904_v49  ;;  %5404 = vmatmul.mubr.bf16.gmra.mxu0 %v17927_v62  ;;  %v15233_v40 = vadd.f32 %v4840_v43, %v4727_v32  ;;  %v17932_v32 = vld [vmem:[#allocation105_spill] sm:$0xff]  ;;  %v17937_v11 = vld [vmem:[#allocation107_spill] sm:$0xff] }
 0x337   : > { %5413 = vmatprep.mubr.bf16.mxu0 %v17929_v7  ;;  %7752 = vmatpush1.bf16.msra.mxu0 %v11899_v42  ;;  %v4729_v46 = vpop.f32.mrf.mxu0  ;;  %v4842_v27 = vpop.f32.mrf.mxu1  ;;  %v11920_v7 = vld [vmem:[#allocation7 + $0x240] ss:$16 sps:$4 sm:$0xff]  }
 0x338   : > { %5517 = vmatmul.mubr.bf16.gmra.mxu1 %v17928_v0  ;;  %7753 = vmatprep.subr.bf16.mxu0 %v11907_v18  ;;  %v15235_v39 = vadd.f32 %v4842_v27, %v4729_v46  ;;  %v11917_v0 = vld [vmem:[#allocation7 + $0x40] ss:$16 sps:$4 sm:$0xff]  }
 0x339   : > { %7865 = vmatpush1.bf16.msra.mxu1 %v11902_v22  ;;  %v4731_v14 = vpop.f32.mrf.mxu0  ;;  %5526 = vmatprep.mubr.bf16.mxu1 %v17910_v36  ;;  %v4844_v38 = vpop.f32.mrf.mxu1 }
 0x33a   : > { %7866 = vmatprep.subr.bf16.mxu1 %v11910_v6  ;;  %v15238_v49 = vadd.f32 %v4844_v38, %v4731_v14  ;;  %v17931_v6 = vld [vmem:[#allocation20_spill] sm:$0xff] }
 0x33b   : > { %7754 = vmatpush1.bf16.msra.mxu0 %v11905_v17  ;;  %v4733_v8 = vpop.f32.mrf.mxu0  ;;  %v4846_v60 = vpop.f32.mrf.mxu1  ;;  %v11925_v17 = vld [vmem:[#allocation7 + $0x24] ss:$16 sps:$4 sm:$0xff]  }
 0x33c   : > { %7755 = vmatprep.subr.bf16.mxu0 %v11913_v52  ;;  %v15240_v42 = vadd.f32 %v4846_v60, %v4733_v8  ;;  %v11923_v8 = vld [vmem:[#allocation7 + $0x20] ss:$16 sps:$4 sm:$0xff]   ;;  %v11931_v60 = vld [vmem:[#allocation7 + $0x4] ss:$16 sps:$4 sm:$0xff]  }
 0x33d   : > { %7867 = vmatpush1.bf16.msra.mxu1 %v11908_v51  ;;  %v4737_v22 = vpop.f32.mrf.mxu0  ;;  %v4850_v18 = vpop.f32.mrf.mxu1  ;;  %v11928_v51 = vld [vmem:[#allocation7 + $0x224] ss:$16 sps:$4 sm:$0xff]  }
 0x33e   : > { %7868 = vmatprep.subr.bf16.mxu1 %v11916_v56  ;;  %5414 = vmatmul.mubr.bf16.gmra.mxu0 %v17930_v26  ;;  %v15245_v62 = vadd.f32 %v4850_v18, %v4737_v22  ;;  %v17933_v26 = vld [vmem:[#allocation106_spill] sm:$0xff] }
 0x33f   : > { %5423 = vmatprep.mubr.bf16.mxu0 %v17932_v32  ;;  %7756 = vmatpush1.bf16.msra.mxu0 %v11911_v1  ;;  %v4739_v43 = vpop.f32.mrf.mxu0  ;;  %v4852_v46 = vpop.f32.mrf.mxu1  ;;  %v11926_v1 = vld [vmem:[#allocation7 + $0x220] ss:$16 sps:$4 sm:$0xff]  }
 0x340   : > { %5527 = vmatmul.mubr.bf16.gmra.mxu1 %v17931_v6  ;;  %7757 = vmatprep.subr.bf16.mxu0 %v11919_v28  ;;  %v15247_v27 = vadd.f32 %v4852_v46, %v4739_v43  ;;  %v11934_v28 = vld [vmem:[#allocation7 + $0x204] ss:$16 sps:$4 sm:$0xff]   ;;  %v17934_v6 = vld [vmem:[#allocation36_spill] sm:$0xff]  ;;  %v11932_v46 = vld [vmem:[#allocation7 + $0x200] ss:$16 sps:$4 sm:$0xff]  }
 0x341   : > { %7869 = vmatpush1.bf16.msra.mxu1 %v11914_v21  ;;  %v4741_v52 = vpop.f32.mrf.mxu0  ;;  %5536 = vmatprep.mubr.bf16.mxu1 %v17910_v36  ;;  %v4854_v56 = vpop.f32.mrf.mxu1  ;;  %v17935_v32 = vld [vmem:[#allocation33_spill] sm:$0xff] }
 0x342   : > { %7870 = vmatprep.subr.bf16.mxu1 %v11922_v53  ;;  %v15250_v14 = vadd.f32 %v4854_v56, %v4741_v52  ;;  %v11940_v52 = vld [vmem:[#allocation7 + $0x3e4] ss:$16 sps:$4 sm:$0xff]  }
 0x343   : > { %7758 = vmatpush1.bf16.msra.mxu0 %v11917_v0  ;;  %v4743_v38 = vpop.f32.mrf.mxu0  ;;  %v4856_v21 = vpop.f32.mrf.mxu1 }
 0x344   : > { %7759 = vmatprep.subr.bf16.mxu0 %v11925_v17  ;;  %v15252_v53 = vadd.f32 %v4856_v21, %v4743_v38 }
 0x345   : > { %7871 = vmatpush1.bf16.msra.mxu1 %v11920_v7  ;;  %v4747_v22 = vpop.f32.mrf.mxu0  ;;  %v4860_v18 = vpop.f32.mrf.mxu1  ;;  %v11929_v7 = vld [vmem:[#allocation7] ss:$16 sps:$4 sm:$0xff]  }
 0x346   : > { %7872 = vmatprep.subr.bf16.mxu1 %v11928_v51  ;;  %5424 = vmatmul.mubr.bf16.gmra.mxu0 %v17933_v26  ;;  %v15257_v43 = vadd.f32 %v4860_v18, %v4747_v22  ;;  %v11937_v51 = vld [vmem:[#allocation7 + $0x1e4] ss:$16 sps:$4 sm:$0xff]   ;;  %v11938_v22 = vld [vmem:[#allocation7 + $0x3e0] ss:$16 sps:$4 sm:$0xff]  }
 0x347   : > { %5433 = vmatprep.mubr.bf16.mxu0 %v17935_v32  ;;  %7760 = vmatpush1.bf16.msra.mxu0 %v11923_v8  ;;  %v4749_v0 = vpop.f32.mrf.mxu0  ;;  %v4862_v17 = vpop.f32.mrf.mxu1 }
 0x348   : > { %5537 = vmatmul.mubr.bf16.gmra.mxu1 %v17934_v6  ;;  %7761 = vmatprep.subr.bf16.mxu0 %v11931_v60  ;;  %v15259_v56 = vadd.f32 %v4862_v17, %v4749_v0  ;;  %v11943_v60 = vld [vmem:[#allocation7 + $0x1c4] ss:$16 sps:$4 sm:$0xff]   ;;  %v17936_v0 = vld [vmem:[#allocation42_spill] sm:$0xff] }
 0x349   : > { %7873 = vmatpush1.bf16.msra.mxu1 %v11926_v1  ;;  %v4751_v38 = vpop.f32.mrf.mxu0  ;;  %5546 = vmatprep.mubr.bf16.mxu1 %v17910_v36  ;;  %v4864_v21 = vpop.f32.mrf.mxu1  ;;  %v11935_v1 = vld [vmem:[#allocation7 + $0x1e0] ss:$16 sps:$4 sm:$0xff]  }
 0x34a   : > { %7874 = vmatprep.subr.bf16.mxu1 %v11934_v28  ;;  %v15262_v26 = vadd.f32 %v4864_v21, %v4751_v38  ;;  %v11946_v28 = vld [vmem:[#allocation7 + $0x3c4] ss:$16 sps:$4 sm:$0xff]   ;;  %v17938_v38 = vld [vmem:[#allocation108_spill] sm:$0xff]  ;;  %v11941_v21 = vld [vmem:[#allocation7 + $0x1c0] ss:$16 sps:$4 sm:$0xff]  }
 0x34b   : > { %7762 = vmatpush1.bf16.msra.mxu0 %v11929_v7  ;;  %v4753_v8 = vpop.f32.mrf.mxu0  ;;  %v4866_v18 = vpop.f32.mrf.mxu1 }
 0x34c   : > { %7763 = vmatprep.subr.bf16.mxu0 %v11937_v51  ;;  %v15264_v6 = vadd.f32 %v4866_v18, %v4753_v8  ;;  %v11944_v51 = vld [vmem:[#allocation7 + $0x3c0] ss:$16 sps:$4 sm:$0xff]   ;;  %v11949_v8 = vld [vmem:[#allocation7 + $0x1a4] ss:$16 sps:$4 sm:$0xff]  }
 0x34d   : > { %7875 = vmatpush1.bf16.msra.mxu1 %v11932_v46  ;;  %v4757_v32 = vpop.f32.mrf.mxu0  ;;  %v4870_v17 = vpop.f32.mrf.mxu1  ;;  %v11952_v18 = vld [vmem:[#allocation7 + $0x3a4] ss:$16 sps:$4 sm:$0xff]  }
 0x34e   : > { %7876 = vmatprep.subr.bf16.mxu1 %v11940_v52  ;;  %5434 = vmatmul.mubr.bf16.gmra.mxu0 %v17936_v0  ;;  %v15269_v7 = vadd.f32 %v4870_v17, %v4757_v32  ;;  %v11950_v32 = vld [vmem:[#allocation7 + $0x3a0] ss:$16 sps:$4 sm:$0xff]  }
 0x34f   : > { %5443 = vmatprep.mubr.bf16.mxu0 %v17938_v38  ;;  %7764 = vmatpush2.bf16.msra.mxu0 %v11935_v1  ;;  %v4759_v46 = vpop.f32.mrf.mxu0  ;;  %v4872_v52 = vpop.f32.mrf.mxu1 }
 0x350   : > { %5547 = vmatmul.mubr.bf16.gmra.mxu1 %v17937_v11  ;;  %7765 = vmatprep.subr.bf16.mxu0 %v11943_v60  ;;  %v15271_v15 = vadd.f32 %v4872_v52, %v4759_v46  ;;  %v11955_v60 = vld [vmem:[#allocation7 + $0x184] ss:$16 sps:$4 sm:$0xff]  }
 0x351   : > { %7877 = vmatpush2.bf16.msra.mxu1 %v11938_v22  ;;  %v4761_v0 = vpop.f32.mrf.mxu0  ;;  %5556 = vmatprep.mubr.bf16.mxu1 %v17910_v36  ;;  %v4874_v11 = vpop.f32.mrf.mxu1  ;;  %v11947_v22 = vld [vmem:[#allocation7 + $0x1a0] ss:$16 sps:$4 sm:$0xff]  }
 0x352   : > { %7878 = vmatprep.subr.bf16.mxu1 %v11946_v28  ;;  %v15274_v13 = vadd.f32 %v4874_v11, %v4761_v0  ;;  %v11958_v28 = vld [vmem:[#allocation7 + $0x384] ss:$16 sps:$4 sm:$0xff]   ;;  %v11953_v11 = vld [vmem:[#allocation7 + $0x180] ss:$16 sps:$4 sm:$0xff]  }
 0x353   : > { %7766 = vmatpush2.bf16.msra.mxu0 %v11941_v21  ;;  %v4763_v1 = vpop.f32.mrf.mxu0  ;;  %v4876_v17 = vpop.f32.mrf.mxu1  ;;  %v17939_v52 = vld [vmem:[#allocation117_spill] sm:$0xff]  ;;  %v17941_v0 = vld [vmem:[#allocation55_spill] sm:$0xff] }
 0x354   : > { %7767 = vmatprep.subr.bf16.mxu0 %v11949_v8  ;;  %v15276_v38 = vadd.f32 %v4876_v17, %v4763_v1  ;;  %v11956_v8 = vld [vmem:[#allocation7 + $0x380] ss:$16 sps:$4 sm:$0xff]   ;;  %v11961_v1 = vld [vmem:[#allocation7 + $0x164] ss:$16 sps:$4 sm:$0xff]  }
 0x355   : > { %7879 = vmatpush2.bf16.msra.mxu1 %v11944_v51  ;;  %v4767_v46 = vpop.f32.mrf.mxu0  ;;  %v4880_v5 = vpop.f32.mrf.mxu1  ;;  %v11964_v17 = vld [vmem:[#allocation7 + $0x364] ss:$16 sps:$4 sm:$0xff]  }
 0x356   : > { %7880 = vmatprep.subr.bf16.mxu1 %v11952_v18  ;;  %5444 = vmatmul.mubr.bf16.gmra.mxu0 %v17939_v52  ;;  %v15281_v21 = vadd.f32 %v4880_v5, %v4767_v46 }
 0x357   : > { %5453 = vmatprep.mubr.bf16.mxu0 %v17941_v0  ;;  %7768 = vmatpush2.bf16.msra.mxu0 %v11947_v22  ;;  %v4769_v51 = vpop.f32.mrf.mxu0  ;;  %v4882_v18 = vpop.f32.mrf.mxu1  ;;  %v11959_v22 = vld [vmem:[#allocation7 + $0x160] ss:$16 sps:$4 sm:$0xff]  }
 0x358   : > { %5557 = vmatmul.mubr.bf16.gmra.mxu1 %v17940_v2  ;;  %7769 = vmatprep.subr.bf16.mxu0 %v11955_v60  ;;  %v15283_v3 = vadd.f32 %v4882_v18, %v4769_v51  ;;  %v11967_v60 = vld [vmem:[#allocation7 + $0x144] ss:$16 sps:$4 sm:$0xff]  }
 0x359   : > { %7881 = vmatpush2.bf16.msra.mxu1 %v11950_v32  ;;  %v4771_v52 = vpop.f32.mrf.mxu0  ;;  %5566 = vmatprep.mubr.bf16.mxu1 %v17910_v36  ;;  %v4884_v2 = vpop.f32.mrf.mxu1  ;;  %v11962_v32 = vld [vmem:[#allocation7 + $0x360] ss:$16 sps:$4 sm:$0xff]  }
 0x35a   : > { %7882 = vmatprep.subr.bf16.mxu1 %v11958_v28  ;;  %v15286_v54 = vadd.f32 %v4884_v2, %v4771_v52  ;;  %v11970_v28 = vld [vmem:[#allocation7 + $0x344] ss:$16 sps:$4 sm:$0xff]   ;;  %v11965_v2 = vld [vmem:[#allocation7 + $0x140] ss:$16 sps:$4 sm:$0xff]  }
 0x35b   : > { %7770 = vmatpush2.bf16.msra.mxu0 %v11953_v11  ;;  %v4773_v5 = vpop.f32.mrf.mxu0  ;;  %v4886_v46 = vpop.f32.mrf.mxu1  ;;  %v17944_v18 = vld [vmem:[#allocation47_spill] sm:$0xff]  ;;  %v17946_v52 = vld [vmem:[#allocation57_spill] sm:$0xff] }
 0x35c   : > { %17942 = vst [vmem:[#allocation87_spill] sm:$0xff] %v15286_v54  ;;  %7771 = vmatprep.subr.bf16.mxu0 %v11961_v1  ;;  %v15288_v0 = vadd.f32 %v4886_v46, %v4773_v5  ;;  %v11968_v1 = vld [vmem:[#allocation7 + $0x340] ss:$16 sps:$4 sm:$0xff]   ;;  %v11973_v5 = vld [vmem:[#allocation7 + $0x124] ss:$16 sps:$4 sm:$0xff]  }
 0x35d   : > { %7883 = vmatpush2.bf16.msra.mxu1 %v11956_v8  ;;  %v4777_v51 = vpop.f32.mrf.mxu0  ;;  %v4890_v24 = vpop.f32.mrf.mxu1  ;;  %v11976_v46 = vld [vmem:[#allocation7 + $0x324] ss:$16 sps:$4 sm:$0xff]  }
 0x35e   : > { %7884 = vmatprep.subr.bf16.mxu1 %v11964_v17  ;;  %17943 = vst [vmem:[#allocation80_spill] sm:$0xff] %v15288_v0  ;;  %5454 = vmatmul.mubr.bf16.gmra.mxu0 %v17944_v18  ;;  %v15293_v11 = vadd.f32 %v4890_v24, %v4777_v51 }
 0x35f   : > { %5463 = vmatprep.mubr.bf16.mxu0 %v17946_v52  ;;  %7772 = vmatpush2.bf16.msra.mxu0 %v11959_v22  ;;  %v4779_v8 = vpop.f32.mrf.mxu0  ;;  %v4892_v17 = vpop.f32.mrf.mxu1  ;;  %v11971_v22 = vld [vmem:[#allocation7 + $0x120] ss:$16 sps:$4 sm:$0xff]  }
 0x360   : > { %5567 = vmatmul.mubr.bf16.gmra.mxu1 %v17945_v48  ;;  %7773 = vmatprep.subr.bf16.mxu0 %v11967_v60  ;;  %v15295_v0 = vadd.f32 %v4892_v17, %v4779_v8  ;;  %v11979_v60 = vld [vmem:[#allocation7 + $0x104] ss:$16 sps:$4 sm:$0xff]  }
 0x361   : > { %7885 = vmatpush2.bf16.msra.mxu1 %v11962_v32  ;;  %v4781_v18 = vpop.f32.mrf.mxu0  ;;  %5576 = vmatprep.mubr.bf16.mxu1 %v17910_v36  ;;  %v4894_v48 = vpop.f32.mrf.mxu1  ;;  %v11974_v32 = vld [vmem:[#allocation7 + $0x320] ss:$16 sps:$4 sm:$0xff]   ;;  %v11982_v17 = vld [vmem:[#allocation7 + $0x304] ss:$16 sps:$4 sm:$0xff]   ;;  %v17951_v36 = vld [vmem:[#allocation38_spill] sm:$0xff] }
 0x362   : > { %7886 = vmatprep.subr.bf16.mxu1 %v11970_v28  ;;  %17947 = vst [vmem:[#allocation101_spill] sm:$0xff] %v15295_v0  ;;  %v15298_v54 = vadd.f32 %v4894_v48, %v4781_v18  ;;  %v17950_v8 = vld [vmem:[#allocation45_spill] sm:$0xff]  ;;  %v17952_v18 = vld [vmem:[#allocation44_spill] sm:$0xff] }
 0x363   : > { %7774 = vmatpush2.bf16.msra.mxu0 %v11965_v2  ;;  %v4783_v24 = vpop.f32.mrf.mxu0  ;;  %v4896_v51 = vpop.f32.mrf.mxu1  ;;  %v11977_v48 = vld [vmem:[#allocation7 + $0x100] ss:$16 sps:$4 sm:$0xff]  }
 0x364   : > { %17948 = vst [vmem:[#allocation94_spill] sm:$0xff] %v15298_v54  ;;  %7775 = vmatprep.subr.bf16.mxu0 %v11973_v5  ;;  %v15300_v28 = vadd.f32 %v4896_v51, %v4783_v24  ;;  %v11980_v5 = vld [vmem:[#allocation7 + $0x300] ss:$16 sps:$4 sm:$0xff]   ;;  %v11985_v24 = vld [vmem:[#allocation7 + $0x4e4] ss:$16 sps:$4 sm:$0xff]  }
 0x365   : > { %7887 = vmatpush2.bf16.msra.mxu1 %v11968_v1  ;;  %v4787_v52 = vpop.f32.mrf.mxu0  ;;  %v4900_v0 = vpop.f32.mrf.mxu1  ;;  %v12045_v51 = vld [vmem:[#allocation7 + $0x6e4] ss:$16 sps:$4 sm:$0xff]  }
 0x366   : > { %7888 = vmatprep.subr.bf16.mxu1 %v11976_v46  ;;  %17949 = vst [vmem:[#allocation27_spill] sm:$0xff] %v15300_v28  ;;  %5464 = vmatmul.mubr.bf16.gmra.mxu0 %v17950_v8  ;;  %v15305_v2 = vadd.f32 %v4900_v0, %v4787_v52  ;;  %v12043_v52 = vld [vmem:[#allocation7 + $0x6e0] ss:$16 sps:$4 sm:$0xff]  }
 0x367   : > { %7779 = vmatprep.mubr.bf16.mxu0 %v17952_v18  ;;  %7776 = vmatpush2.bf16.msra.mxu0 %v11971_v22  ;;  %v4789_v1 = vpop.f32.mrf.mxu0  ;;  %v4902_v46 = vpop.f32.mrf.mxu1  ;;  %v11988_v18 = vld [vmem:[#allocation7 + $0x4c4] ss:$16 sps:$4 sm:$0xff]  }
 0x368   : > { %5577 = vmatmul.mubr.bf16.gmra.mxu1 %v17951_v36  ;;  %17953 = vst [vmem:[#allocation28_spill] sm:$0xff] %v15305_v2  ;;  %7777 = vmatprep.subr.bf16.mxu0 %v11979_v60  ;;  %v15308_v8 = vadd.f32 %v4902_v46, %v4789_v1  ;;  %v12051_v2 = vld [vmem:[#allocation7 + $0x6c4] ss:$16 sps:$4 sm:$0xff]  }
 0x369   : > { %7889 = vmatpush2.bf16.msra.mxu1 %v11974_v32  ;;  %7892 = vmatprep.mubr.bf16.mxu1 %v15045_v47  ;;  %v4791_v28 = vpop.f32.mrf.mxu0  ;;  %v4904_v36 = vpop.f32.mrf.mxu1  ;;  %v11983_v32 = vld [vmem:[#allocation7 + $0x4e0] ss:$16 sps:$4 sm:$0xff]  }
 0x36a   : > { %17954 = vst [vmem:[#allocation19_spill] sm:$0xff] %v15308_v8  ;;  %7890 = vmatprep.subr.bf16.mxu1 %v11982_v17  ;;  %v15310_v54 = vadd.f32 %v4904_v36, %v4791_v28  ;;  %v17957_v17 = vld [vmem:[#allocation124_spill] sm:$0xff]  ;;  %v17958_v28 = vld [vmem:[#allocation62_spill] sm:$0xff]  ;;  %v11986_v36 = vld [vmem:[#allocation7 + $0x4c0] ss:$16 sps:$4 sm:$0xff]  }
 0x36b   : > { %7778 = vmatpush2.bf16.msra.mxu0 %v11977_v48  ;;  %v4793_v0 = vpop.f32.mrf.mxu0  ;;  %v4906_v22 = vpop.f32.mrf.mxu1 }
 0x36c   : > { %17955 = vst [vmem:[#allocation54_spill] sm:$0xff] %v15310_v54  ;;  %7973 = vmatprep.subr.bf16.mxu0 %v11985_v24  ;;  %v15312_v47 = vadd.f32 %v4906_v22, %v4793_v0  ;;  %v12049_v0 = vld [vmem:[#allocation7 + $0x6c0] ss:$16 sps:$4 sm:$0xff]  }
 0x36d   : > { %7891 = vmatpush2.bf16.msra.mxu1 %v11980_v5  ;;  %v4943_v60 = vpop.f32.mrf.mxu0  ;;  %v5056_v46 = vpop.f32.mrf.mxu1 }
 0x36e   : > { %8086 = vmatprep.subr.bf16.mxu1 %v12045_v51  ;;  %17956 = vst [vmem:[#allocation103_spill] sm:$0xff] %v15312_v47  ;;  %v4944_v1 = vadd.f32 %v4943_v60, %v15212_v19  ;;  %7780 = vmatmul.mubr.bf16.vlgmr.msra.gmra.mxu0 %v17957_v17  ;;  %v11991_v19 = vld [vmem:[#allocation7 + $0x4a4] ss:$16 sps:$4 sm:$0xff]  }
 0x36f   : > { %7789 = vmatprep.mubr.bf16.mxu0 %v17958_v28  ;;  %v4945_v48 = vpop.f32.mrf.mxu0  ;;  %7974 = vmatpush1.bf16.msra.mxu0 %v11983_v32  ;;  %v5058_v51 = vpop.f32.mrf.mxu1  ;;  %v12057_v60 = vld [vmem:[#allocation7 + $0x6a4] ss:$16 sps:$4 sm:$0xff]  }
 0x370   : > { %7893 = vmatmul.mubr.bf16.vlgmr.msra.gmra.mxu1 %v15028_v59  ;;  %v5057_v5 = vadd.f32 %v5056_v46, %v4944_v1  ;;  %v4946_v24 = vadd.f32 %v4945_v48, %v15218_v9  ;;  %7975 = vmatprep.subr.bf16.mxu0 %v11988_v18  ;;  %v12055_v48 = vld [vmem:[#allocation7 + $0x6a0] ss:$16 sps:$4 sm:$0xff]  }
 0x371   : > { %7902 = vmatprep.mubr.bf16.mxu1 %v15099_v4  ;;  %8087 = vmatpush1.bf16.msra.mxu1 %v12043_v52  ;;  %v4947_v22 = vpop.f32.mrf.mxu0  ;;  %v5060_v47 = vpop.f32.mrf.mxu1  ;;  %v11989_v52 = vld [vmem:[#allocation7 + $0x4a0] ss:$16 sps:$4 sm:$0xff]  }
 0x372   : > { %8088 = vmatprep.subr.bf16.mxu1 %v12051_v2  ;;  %v5591_v17 = vmax.f32 %v5057_v5, 0.0  ;;  %v5059_v59 = vadd.f32 %v5058_v51, %v4946_v24  ;;  %v4948_v28 = vadd.f32 %v4947_v22, %v15224_v33  ;;  %v11994_v2 = vld [vmem:[#allocation7 + $0x484] ss:$16 sps:$4 sm:$0xff]  }
 0x373   : > { %v4949_v4 = vpop.f32.mrf.mxu0  ;;  %7976 = vmatpush1.bf16.msra.mxu0 %v11986_v36  ;;  %v5062_v46 = vpop.f32.mrf.mxu1  ;;  %v12063_v5 = vld [vmem:[#allocation7 + $0x684] ss:$16 sps:$4 sm:$0xff]  }
 0x374   : > { %v5719_v54 = vmul.f32 %v5591_v17, %v5591_v17  ;;  %v5592_v1 = vmax.f32 %v5059_v59, 0.0  ;;  %v5061_v32 = vadd.f32 %v5060_v47, %v4948_v28  ;;  %v4950_v9 = vadd.f32 %v4949_v4, %v15228_v35  ;;  %7977 = vmatprep.subr.bf16.mxu0 %v11991_v19  ;;  %v17959_v59 = vld [vmem:[#allocation37_spill] sm:$0xff] }
 0x375   : > { %8089 = vmatpush1.bf16.msra.mxu1 %v12049_v0  ;;  %v4953_v18 = vpop.f32.mrf.mxu0  ;;  %v5066_v8 = vpop.f32.mrf.mxu1  ;;  %v17960_v4 = vld [vmem:[#allocation61_spill] sm:$0xff] }
 0x376   : > { %8090 = vmatprep.subr.bf16.mxu1 %v12057_v60  ;;  %v5846_v24 = vadd.f32 %v15026_v29, %v5719_v54  ;;  %v5720_v33 = vmul.f32 %v5592_v1, %v5592_v1  ;;  %v5599_v51 = vmax.f32 %v5061_v32, 0.0  ;;  %v5063_v22 = vadd.f32 %v5062_v46, %v4950_v9  ;;  %7790 = vmatmul.mubr.bf16.gmra.mxu0 %v17959_v59  ;;  %v11992_v19 = vld [vmem:[#allocation7 + $0x480] ss:$16 sps:$4 sm:$0xff]   ;;  %v11997_v46 = vld [vmem:[#allocation7 + $0x464] ss:$16 sps:$4 sm:$0xff]  }
 0x377   : > { %v4954_v47 = vadd.f32 %v4953_v18, %v15233_v40  ;;  %7799 = vmatprep.mubr.bf16.mxu0 %v17960_v4  ;;  %v4955_v35 = vpop.f32.mrf.mxu0  ;;  %7978 = vmatpush1.bf16.msra.mxu0 %v11989_v52  ;;  %v5068_v54 = vpop.f32.mrf.mxu1  ;;  %v12061_v60 = vld [vmem:[#allocation7 + $0x680] ss:$16 sps:$4 sm:$0xff]   ;;  %v12069_v18 = vld [vmem:[#allocation7 + $0x664] ss:$16 sps:$4 sm:$0xff]  }
 0x378   : > { %7903 = vmatmul.mubr.bf16.gmra.mxu1 %v15076_v37  ;;  %v15328_v28 = vadd.f32 %v5846_v24, %v5720_v33  ;;  %v5727_v36 = vmul.f32 %v5599_v51, %v5599_v51  ;;  %v15330_v0 = vpack.c.bf16 %v5599_v51, %v5591_v17  ;;  %v5600_v29 = vmax.f32 %v5063_v22, 0.0  ;;  %7979 = vmatprep.subr.bf16.mxu0 %v11994_v2  ;;  %v11995_v2 = vld [vmem:[#allocation7 + $0x460] ss:$16 sps:$4 sm:$0xff]  }
 0x379   : > { %7912 = vmatprep.mubr.bf16.mxu1 %v15131_v50  ;;  %8091 = vmatpush1.bf16.msra.mxu1 %v12055_v48  ;;  %v5067_v32 = vadd.f32 %v5066_v8, %v4954_v47  ;;  %v4956_v9 = vadd.f32 %v4955_v35, %v15235_v39  ;;  %v4957_v40 = vpop.f32.mrf.mxu0  ;;  %v5070_v51 = vpop.f32.mrf.mxu1 }
 0x37a   : > { %17961 = vst [vmem:[#allocation104_spill] sm:$0xff] %v15330_v0  ;;  %8092 = vmatprep.subr.bf16.mxu1 %v12063_v5  ;;  %v5855_v24 = vadd.f32 %v15053_v58, %v5727_v36  ;;  %v5728_v33 = vmul.f32 %v5600_v29, %v5600_v29  ;;  %v4958_v17 = vadd.f32 %v4957_v40, %v15238_v49  ;;  %v12067_v5 = vld [vmem:[#allocation7 + $0x660] ss:$16 sps:$4 sm:$0xff]   ;;  %v12000_v49 = vld [vmem:[#allocation7 + $0x444] ss:$16 sps:$4 sm:$0xff]  }
 0x37b   : > { %v15335_v22 = vpack.c.bf16 %v5600_v29, %v5592_v1  ;;  %v5607_v52 = vmax.f32 %v5067_v32, 0.0  ;;  %v5069_v50 = vadd.f32 %v5068_v54, %v4956_v9  ;;  %v4959_v48 = vpop.f32.mrf.mxu0  ;;  %7980 = vmatpush1.bf16.msra.mxu0 %v11992_v19  ;;  %v5072_v8 = vpop.f32.mrf.mxu1  ;;  %v12075_v1 = vld [vmem:[#allocation7 + $0x644] ss:$16 sps:$4 sm:$0xff]   ;;  %v17963_v9 = vld [vmem:[#allocation64_spill] sm:$0xff] }
 0x37c   : > { %v5071_v37 = vadd.f32 %v5070_v51, %v4958_v17  ;;  %v4960_v39 = vadd.f32 %v4959_v48, %v15240_v42  ;;  %v15338_v47 = vadd.f32 %v5855_v24, %v5728_v33  ;;  %7981 = vmatprep.subr.bf16.mxu0 %v11997_v46  ;;  %v17964_v40 = vld [vmem:[#allocation63_spill] sm:$0xff] }
 0x37d   : > { %17962 = vst [vmem:[#allocation56_spill] sm:$0xff] %v15335_v22  ;;  %8093 = vmatpush1.bf16.msra.mxu1 %v12061_v60  ;;  %v5735_v58 = vmul.f32 %v5607_v52, %v5607_v52  ;;  %v5608_v35 = vmax.f32 %v5069_v50, 0.0  ;;  %v4963_v36 = vpop.f32.mrf.mxu0  ;;  %v5076_v19 = vpop.f32.mrf.mxu1  ;;  %v11998_v33 = vld [vmem:[#allocation7 + $0x440] ss:$16 sps:$4 sm:$0xff]  }
 0x37e   : > { %8094 = vmatprep.subr.bf16.mxu1 %v12069_v18  ;;  %v5615_v29 = vmax.f32 %v5071_v37, 0.0  ;;  %v5073_v54 = vadd.f32 %v5072_v8, %v4960_v39  ;;  %v4964_v32 = vadd.f32 %v4963_v36, %v15245_v62  ;;  %7800 = vmatmul.mubr.bf16.gmra.mxu0 %v17963_v9  ;;  %v12073_v17 = vld [vmem:[#allocation7 + $0x640] ss:$16 sps:$4 sm:$0xff]   ;;  %v12003_v39 = vld [vmem:[#allocation7 + $0x424] ss:$16 sps:$4 sm:$0xff]  }
 0x37f   : > { %v5864_v42 = vadd.f32 %v15082_v45, %v5735_v58  ;;  %v5736_v60 = vmul.f32 %v5608_v35, %v5608_v35  ;;  %7809 = vmatprep.mubr.bf16.mxu0 %v17964_v40  ;;  %v4965_v50 = vpop.f32.mrf.mxu0  ;;  %7982 = vmatpush1.bf16.msra.mxu0 %v11995_v2  ;;  %v5078_v62 = vpop.f32.mrf.mxu1  ;;  %v12081_v8 = vld [vmem:[#allocation7 + $0x624] ss:$16 sps:$4 sm:$0xff]  }
 0x380   : > { %7913 = vmatmul.mubr.bf16.gmra.mxu1 %v15122_v12  ;;  %v5743_v46 = vmul.f32 %v5615_v29, %v5615_v29  ;;  %v15346_v18 = vpack.c.bf16 %v5615_v29, %v5607_v52  ;;  %v5616_v37 = vmax.f32 %v5073_v54, 0.0  ;;  %v5077_v24 = vadd.f32 %v5076_v19, %v4964_v32  ;;  %7983 = vmatprep.subr.bf16.mxu0 %v12000_v49  ;;  %v18005_v12 = vld [vmem:[#allocation99_spill] sm:$0xff] }
 0x381   : > { %7922 = vmatprep.mubr.bf16.mxu1 %v15149_v30  ;;  %8095 = vmatpush1.bf16.msra.mxu1 %v12067_v5  ;;  %v15348_v51 = vadd.f32 %v5864_v42, %v5736_v60  ;;  %v4966_v45 = vadd.f32 %v4965_v50, %v15247_v27  ;;  %v4967_v48 = vpop.f32.mrf.mxu0  ;;  %v5080_v2 = vpop.f32.mrf.mxu1  ;;  %v12001_v60 = vld [vmem:[#allocation7 + $0x420] ss:$16 sps:$4 sm:$0xff]  }
 0x382   : > { %17965 = vst [vmem:[#allocation111_spill] sm:$0xff] %v15346_v18  ;;  %8096 = vmatprep.subr.bf16.mxu1 %v12075_v1  ;;  %v5873_v58 = vadd.f32 %v15101_v41, %v5743_v46  ;;  %v5744_v52 = vmul.f32 %v5616_v37, %v5616_v37  ;;  %v5623_v36 = vmax.f32 %v5077_v24, 0.0  ;;  %v4968_v29 = vadd.f32 %v4967_v48, %v15250_v14  ;;  %v12079_v1 = vld [vmem:[#allocation7 + $0x620] ss:$16 sps:$4 sm:$0xff]   ;;  %v12006_v46 = vld [vmem:[#allocation7 + $0x404] ss:$16 sps:$4 sm:$0xff]  }
 0x383   : > { %v5079_v54 = vadd.f32 %v5078_v62, %v4966_v45  ;;  %v4969_v32 = vpop.f32.mrf.mxu0  ;;  %v15353_v5 = vpack.c.bf16 %v5616_v37, %v5608_v35  ;;  %7984 = vmatpush1.bf16.msra.mxu0 %v11998_v33  ;;  %v5082_v49 = vpop.f32.mrf.mxu1  ;;  %v12087_v14 = vld [vmem:[#allocation7 + $0x604] ss:$16 sps:$4 sm:$0xff]   ;;  %v17968_v48 = vld [vmem:[#allocation46_spill] sm:$0xff] }
 0x384   : > { %v5751_v19 = vmul.f32 %v5623_v36, %v5623_v36  ;;  %v5081_v42 = vadd.f32 %v5080_v2, %v4968_v29  ;;  %v4970_v27 = vadd.f32 %v4969_v32, %v15252_v53  ;;  %7985 = vmatprep.subr.bf16.mxu0 %v12003_v39  ;;  %v15356_v24 = vadd.f32 %v5873_v58, %v5744_v52  ;;  %v17967_v53 = vld [vmem:[#allocation113_spill] sm:$0xff] }
 0x385   : > { %17966 = vst [vmem:[#allocation112_spill] sm:$0xff] %v15353_v5  ;;  %8097 = vmatpush1.bf16.msra.mxu1 %v12073_v17  ;;  %v5624_v50 = vmax.f32 %v5079_v54, 0.0  ;;  %v5086_v45 = vpop.f32.mrf.mxu1  ;;  %v12004_v2 = vld [vmem:[#allocation7 + $0x400] ss:$16 sps:$4 sm:$0xff]  }
 0x386   : > { %v4973_v41 = vpop.f32.mrf.mxu0  ;;  %8098 = vmatprep.subr.bf16.mxu1 %v12081_v8  ;;  %v5882_v35 = vadd.f32 %v15124_v61, %v5751_v19  ;;  %v5631_v37 = vmax.f32 %v5081_v42, 0.0  ;;  %v5083_v62 = vadd.f32 %v5082_v49, %v4970_v27  ;;  %7810 = vmatmul.mubr.bf16.gmra.mxu0 %v17967_v53  ;;  %v12009_v42 = vld [vmem:[#allocation7 + $0x5e4] ss:$16 sps:$4 sm:$0xff]  }
 0x387   : > { %v4974_v33 = vadd.f32 %v4973_v41, %v15257_v43  ;;  %v5752_v17 = vmul.f32 %v5624_v50, %v5624_v50  ;;  %7819 = vmatprep.mubr.bf16.mxu0 %v17968_v48  ;;  %7986 = vmatpush1.bf16.msra.mxu0 %v12001_v60  ;;  %v5088_v29 = vpop.f32.mrf.mxu1  ;;  %v12085_v43 = vld [vmem:[#allocation7 + $0x600] ss:$16 sps:$4 sm:$0xff]   ;;  %v12093_v27 = vld [vmem:[#allocation7 + $0x7e4] ss:$16 sps:$4 sm:$0xff]  }
 0x388   : > { %7923 = vmatmul.mubr.bf16.gmra.mxu1 %v15142_v16  ;;  %v4975_v39 = vpop.f32.mrf.mxu0  ;;  %v5759_v8 = vmul.f32 %v5631_v37, %v5631_v37  ;;  %v15364_v58 = vpack.c.bf16 %v5631_v37, %v5623_v36  ;;  %v5632_v52 = vmax.f32 %v5083_v62, 0.0  ;;  %7987 = vmatprep.subr.bf16.mxu0 %v12006_v46  ;;  %v12025_v16 = vld [vmem:[#allocation7 + $0x520] ss:$16 sps:$4 sm:$0xff]  }
 0x389   : > { %7932 = vmatprep.mubr.bf16.mxu1 %v15167_v31  ;;  %v5087_v61 = vadd.f32 %v5086_v45, %v4974_v33  ;;  %8099 = vmatpush1.bf16.msra.mxu1 %v12079_v1  ;;  %v15366_v54 = vadd.f32 %v5882_v35, %v5752_v17  ;;  %v4976_v32 = vadd.f32 %v4975_v39, %v15259_v56  ;;  %v5090_v60 = vpop.f32.mrf.mxu1  ;;  %v12007_v17 = vld [vmem:[#allocation7 + $0x5e0] ss:$16 sps:$4 sm:$0xff]  }
 0x38a   : > { %17969 = vst [vmem:[#allocation123_spill] sm:$0xff] %v15364_v58  ;;  %v4977_v19 = vpop.f32.mrf.mxu0  ;;  %8100 = vmatprep.subr.bf16.mxu1 %v12087_v14  ;;  %v5891_v49 = vadd.f32 %v15133_v44, %v5759_v8  ;;  %v5760_v36 = vmul.f32 %v5632_v52, %v5632_v52  ;;  %v15371_v1 = vpack.c.bf16 %v5632_v52, %v5624_v50  ;;  %v12091_v14 = vld [vmem:[#allocation7 + $0x7e0] ss:$16 sps:$4 sm:$0xff]   ;;  %v12012_v8 = vld [vmem:[#allocation7 + $0x5c4] ss:$16 sps:$4 sm:$0xff]  }
 0x38b   : > { %v5639_v41 = vmax.f32 %v5087_v61, 0.0  ;;  %v4978_v37 = vadd.f32 %v4977_v19, %v15262_v26  ;;  %v5089_v62 = vadd.f32 %v5088_v29, %v4976_v32  ;;  %7988 = vmatpush1.bf16.msra.mxu0 %v12004_v2  ;;  %v5092_v46 = vpop.f32.mrf.mxu1  ;;  %v12099_v26 = vld [vmem:[#allocation7 + $0x7c4] ss:$16 sps:$4 sm:$0xff]   ;;  %v17972_v19 = vld [vmem:[#allocation58_spill] sm:$0xff] }
 0x38c   : > { %v4979_v33 = vpop.f32.mrf.mxu0  ;;  %17970 = vst [vmem:[#allocation127_spill] sm:$0xff] %v15371_v1  ;;  %7989 = vmatprep.subr.bf16.mxu0 %v12009_v42  ;;  %v15374_v61 = vadd.f32 %v5891_v49, %v5760_v36 }
 0x38d   : > { %v5767_v35 = vmul.f32 %v5639_v41, %v5639_v41  ;;  %v5091_v45 = vadd.f32 %v5090_v60, %v4978_v37  ;;  %v4980_v56 = vadd.f32 %v4979_v33, %v15264_v6  ;;  %8101 = vmatpush1.bf16.msra.mxu1 %v12085_v43  ;;  %v5640_v39 = vmax.f32 %v5089_v62, 0.0  ;;  %v5096_v32 = vpop.f32.mrf.mxu1  ;;  %v17971_v6 = vld [vmem:[#allocation125_spill] sm:$0xff] }
 0x38e   : > { %v4983_v44 = vpop.f32.mrf.mxu0  ;;  %8102 = vmatprep.subr.bf16.mxu1 %v12093_v27  ;;  %7820 = vmatmul.mubr.bf16.gmra.mxu0 %v17971_v6  ;;  %v12010_v60 = vld [vmem:[#allocation7 + $0x5c0] ss:$16 sps:$4 sm:$0xff]  }
 0x38f   : > { %v5900_v50 = vadd.f32 %v15144_v10, %v5767_v35  ;;  %v5647_v52 = vmax.f32 %v5091_v45, 0.0  ;;  %v5093_v29 = vadd.f32 %v5092_v46, %v4980_v56  ;;  %v4984_v2 = vadd.f32 %v4983_v44, %v15269_v7  ;;  %7829 = vmatprep.mubr.bf16.mxu0 %v17972_v19  ;;  %7990 = vmatpush2.bf16.msra.mxu0 %v12007_v17  ;;  %v5098_v37 = vpop.f32.mrf.mxu1  ;;  %v12097_v7 = vld [vmem:[#allocation7 + $0x7c0] ss:$16 sps:$4 sm:$0xff]   ;;  %v12015_v45 = vld [vmem:[#allocation7 + $0x5a4] ss:$16 sps:$4 sm:$0xff]  }
 0x390   : > { %7933 = vmatmul.mubr.bf16.gmra.mxu1 %v15160_v34  ;;  %v5768_v43 = vmul.f32 %v5640_v39, %v5640_v39  ;;  %v4985_v42 = vpop.f32.mrf.mxu0  ;;  %7991 = vmatprep.subr.bf16.mxu0 %v12012_v8  ;;  %v12105_v56 = vld [vmem:[#allocation7 + $0x7a4] ss:$16 sps:$4 sm:$0xff]  }
 0x391   : > { %7942 = vmatprep.mubr.bf16.mxu1 %v15185_v63  ;;  %v5775_v27 = vmul.f32 %v5647_v52, %v5647_v52  ;;  %v15382_v49 = vpack.c.bf16 %v5647_v52, %v5639_v41  ;;  %v5648_v36 = vmax.f32 %v5093_v29, 0.0  ;;  %v5097_v10 = vadd.f32 %v5096_v32, %v4984_v2  ;;  %8103 = vmatpush2.bf16.msra.mxu1 %v12091_v14  ;;  %v5100_v17 = vpop.f32.mrf.mxu1  ;;  %v17993_v63 = vld [vmem:[#allocation91_spill] sm:$0xff] }
 0x392   : > { %v15384_v62 = vadd.f32 %v5900_v50, %v5768_v43  ;;  %v4986_v33 = vadd.f32 %v4985_v42, %v15271_v15  ;;  %v4987_v35 = vpop.f32.mrf.mxu0  ;;  %8104 = vmatprep.subr.bf16.mxu1 %v12099_v26  ;;  %v12013_v43 = vld [vmem:[#allocation7 + $0x5a0] ss:$16 sps:$4 sm:$0xff]  }
 0x393   : > { %17973 = vst [vmem:[#allocation128_spill] sm:$0xff] %v15382_v49  ;;  %v5909_v46 = vadd.f32 %v15151_v57, %v5775_v27  ;;  %v5776_v41 = vmul.f32 %v5648_v36, %v5648_v36  ;;  %v5655_v44 = vmax.f32 %v5097_v10, 0.0  ;;  %v4988_v52 = vadd.f32 %v4987_v35, %v15274_v13  ;;  %7992 = vmatpush2.bf16.msra.mxu0 %v12010_v60  ;;  %v5102_v8 = vpop.f32.mrf.mxu1  ;;  %v12103_v26 = vld [vmem:[#allocation7 + $0x7a0] ss:$16 sps:$4 sm:$0xff]   ;;  %v12018_v27 = vld [vmem:[#allocation7 + $0x584] ss:$16 sps:$4 sm:$0xff]  }
 0x394   : > { %17974 = vst [vmem:[#allocation129_spill] sm:$0xff] %v15384_v62  ;;  %v5099_v29 = vadd.f32 %v5098_v37, %v4986_v33  ;;  %v4989_v2 = vpop.f32.mrf.mxu0  ;;  %v15389_v14 = vpack.c.bf16 %v5648_v36, %v5640_v39  ;;  %7993 = vmatprep.subr.bf16.mxu0 %v12015_v45  ;;  %v12111_v13 = vld [vmem:[#allocation7 + $0x784] ss:$16 sps:$4 sm:$0xff]   ;;  %v17978_v35 = vld [vmem:[#allocation120_spill] sm:$0xff] }
 0x395   : > { %v5783_v50 = vmul.f32 %v5655_v44, %v5655_v44  ;;  %v5101_v32 = vadd.f32 %v5100_v17, %v4988_v52  ;;  %v4990_v15 = vadd.f32 %v4989_v2, %v15276_v38  ;;  %8105 = vmatpush2.bf16.msra.mxu1 %v12097_v7  ;;  %v15392_v10 = vadd.f32 %v5909_v46, %v5776_v41  ;;  %v17977_v38 = vld [vmem:[#allocation59_spill] sm:$0xff] }
 0x396   : > { %17975 = vst [vmem:[#allocation130_spill] sm:$0xff] %v15389_v14  ;;  %v5656_v42 = vmax.f32 %v5099_v29, 0.0  ;;  %v4993_v57 = vpop.f32.mrf.mxu0  ;;  %8106 = vmatprep.subr.bf16.mxu1 %v12105_v56  ;;  %7830 = vmatmul.mubr.bf16.gmra.mxu0 %v17977_v38  ;;  %v12016_v17 = vld [vmem:[#allocation7 + $0x580] ss:$16 sps:$4 sm:$0xff]  }
 0x397   : > { %17976 = vst [vmem:[#allocation131_spill] sm:$0xff] %v15392_v10  ;;  %v5918_v39 = vadd.f32 %v15162_v25, %v5783_v50  ;;  %v5663_v36 = vmax.f32 %v5101_v32, 0.0  ;;  %v5103_v37 = vadd.f32 %v5102_v8, %v4990_v15  ;;  %v4994_v60 = vadd.f32 %v4993_v57, %v15281_v21  ;;  %v5106_v33 = vpop.f32.mrf.mxu1  ;;  %7839 = vmatprep.mubr.bf16.mxu0 %v17978_v35  ;;  %v12109_v21 = vld [vmem:[#allocation7 + $0x780] ss:$16 sps:$4 sm:$0xff]   ;;  %v12021_v32 = vld [vmem:[#allocation7 + $0x564] ss:$16 sps:$4 sm:$0xff]  }
 0x398   : > { %7943 = vmatmul.mubr.bf16.gmra.mxu1 %v15178_v20  ;;  %v5784_v7 = vmul.f32 %v5656_v42, %v5656_v42  ;;  %v4995_v45 = vpop.f32.mrf.mxu0  ;;  %7994 = vmatpush2.bf16.msra.mxu0 %v12013_v43  ;;  %v12117_v15 = vld [vmem:[#allocation7 + $0x764] ss:$16 sps:$4 sm:$0xff]   ;;  %v12084_v10 = vld [vmem:[#allocation7 + $0x1ac] ss:$16 sps:$4 sm:$0xff]  }
 0x399   : > { %7952 = vmatprep.mubr.bf16.mxu1 %v15203_v55  ;;  %v5791_v56 = vmul.f32 %v5663_v36, %v5663_v36  ;;  %v15400_v46 = vpack.c.bf16 %v5663_v36, %v5655_v44  ;;  %v5664_v41 = vmax.f32 %v5103_v37, 0.0  ;;  %v5107_v25 = vadd.f32 %v5106_v33, %v4994_v60  ;;  %v5108_v52 = vpop.f32.mrf.mxu1  ;;  %8107 = vmatpush2.bf16.msra.mxu1 %v12103_v26  ;;  %v17981_v36 = vld [vmem:[#allocation87_spill] sm:$0xff] }
 0x39a   : > { %v15402_v29 = vadd.f32 %v5918_v39, %v5784_v7  ;;  %v4996_v2 = vadd.f32 %v4995_v45, %v15283_v3  ;;  %v4997_v50 = vpop.f32.mrf.mxu0  ;;  %7995 = vmatprep.subr.bf16.mxu0 %v12018_v27  ;;  %8108 = vmatprep.subr.bf16.mxu1 %v12111_v13  ;;  %v17983_v3 = vld [vmem:[#allocation80_spill] sm:$0xff]  ;;  %v12019_v55 = vld [vmem:[#allocation7 + $0x560] ss:$16 sps:$4 sm:$0xff]  }
 0x39b   : > { %17979 = vst [vmem:[#allocation132_spill] sm:$0xff] %v15400_v46  ;;  %v5927_v8 = vadd.f32 %v15169_v23, %v5791_v56  ;;  %v5792_v44 = vmul.f32 %v5664_v41, %v5664_v41  ;;  %v5671_v57 = vmax.f32 %v5107_v25, 0.0  ;;  %v4998_v37 = vadd.f32 %v4997_v50, %v17981_v36  ;;  %v5110_v43 = vpop.f32.mrf.mxu1  ;;  %v12115_v13 = vld [vmem:[#allocation7 + $0x760] ss:$16 sps:$4 sm:$0xff]   ;;  %v12024_v56 = vld [vmem:[#allocation7 + $0x544] ss:$16 sps:$4 sm:$0xff]  }
 0x39c   : > { %17980 = vst [vmem:[#allocation115_spill] sm:$0xff] %v15402_v29  ;;  %v5109_v60 = vadd.f32 %v5108_v52, %v4996_v2  ;;  %v4999_v33 = vpop.f32.mrf.mxu0  ;;  %v15407_v26 = vpack.c.bf16 %v5664_v41, %v5656_v42  ;;  %7996 = vmatpush2.bf16.msra.mxu0 %v12016_v17  ;;  %v12123_v25 = vld [vmem:[#allocation7 + $0x744] ss:$16 sps:$4 sm:$0xff]   ;;  %v17985_v52 = vld [vmem:[#allocation92_spill] sm:$0xff] }
 0x39d   : > { %v5799_v39 = vmul.f32 %v5671_v57, %v5671_v57  ;;  %v5111_v7 = vadd.f32 %v5110_v43, %v4998_v37  ;;  %v5000_v45 = vadd.f32 %v4999_v33, %v17983_v3  ;;  %v5112_v27 = vpop.f32.mrf.mxu1  ;;  %8109 = vmatpush2.bf16.msra.mxu1 %v12109_v21  ;;  %7997 = vmatprep.subr.bf16.mxu0 %v12021_v32  ;;  %v17986_v37 = vld [vmem:[#allocation71_spill] sm:$0xff]  ;;  %v17987_v43 = vld [vmem:[#allocation93_spill] sm:$0xff]  ;;  %v17989_v32 = vld [vmem:[#allocation100_spill] sm:$0xff] }
 0x39e   : > { %17982 = vst [vmem:[#allocation116_spill] sm:$0xff] %v15407_v26  ;;  %v5672_v20 = vmax.f32 %v5109_v60, 0.0  ;;  %v5003_v23 = vpop.f32.mrf.mxu0  ;;  %8110 = vmatprep.subr.bf16.mxu1 %v12117_v15  ;;  %v15410_v50 = vadd.f32 %v5927_v8, %v5792_v44  ;;  %7840 = vmatmul.mubr.bf16.gmra.mxu0 %v17986_v37  ;;  %v17988_v60 = vld [vmem:[#allocation60_spill] sm:$0xff]  ;;  %v12022_v3 = vld [vmem:[#allocation7 + $0x540] ss:$16 sps:$4 sm:$0xff]  }
 0x39f   : > { %v5936_v42 = vadd.f32 %v17985_v52, %v5799_v39  ;;  %v5679_v41 = vmax.f32 %v5111_v7, 0.0  ;;  %v5113_v2 = vadd.f32 %v5112_v27, %v5000_v45  ;;  %v5004_v17 = vadd.f32 %v5003_v23, %v15293_v11  ;;  %v5116_v36 = vpop.f32.mrf.mxu1  ;;  %7849 = vmatprep.mubr.bf16.mxu0 %v17988_v60  ;;  %v12121_v11 = vld [vmem:[#allocation7 + $0x740] ss:$16 sps:$4 sm:$0xff]   ;;  %v12064_v60 = vld [vmem:[#allocation7 + $0x8] ss:$16 sps:$4 sm:$0xff]  }
 0x3a0   : > { %17984 = vst [vmem:[#allocation31_spill] sm:$0xff] %v15410_v50  ;;  %7953 = vmatmul.mubr.bf16.gmra.mxu1 %v17987_v43  ;;  %v5800_v21 = vmul.f32 %v5672_v20, %v5672_v20  ;;  %v5005_v15 = vpop.f32.mrf.mxu0  ;;  %7998 = vmatpush2.bf16.msra.mxu0 %v12019_v55  ;;  %v17992_v27 = vld [vmem:[#allocation101_spill] sm:$0xff]  ;;  %v12072_v37 = vld [vmem:[#allocation7 + $0x1ec] ss:$16 sps:$4 sm:$0xff]   ;;  %v12076_v29 = vld [vmem:[#allocation7 + $0x1c8] ss:$16 sps:$4 sm:$0xff]  }
 0x3a1   : > { %7962 = vmatprep.mubr.bf16.mxu1 %v17989_v32  ;;  %v5807_v33 = vmul.f32 %v5679_v41, %v5679_v41  ;;  %v15418_v8 = vpack.c.bf16 %v5679_v41, %v5671_v57  ;;  %v5680_v44 = vmax.f32 %v5113_v2, 0.0  ;;  %v5117_v39 = vadd.f32 %v5116_v36, %v5004_v17  ;;  %v5118_v7 = vpop.f32.mrf.mxu1  ;;  %8111 = vmatpush2.bf16.msra.mxu1 %v12115_v13  ;;  %v12027_v43 = vld [vmem:[#allocation7 + $0x524] ss:$16 sps:$4 sm:$0xff]   ;;  %v17994_v2 = vld [vmem:[#allocation94_spill] sm:$0xff] }
 0x3a2   : > { %v15420_v45 = vadd.f32 %v5936_v42, %v5800_v21  ;;  %v5006_v23 = vadd.f32 %v5005_v15, %v17992_v27  ;;  %v5007_v52 = vpop.f32.mrf.mxu0  ;;  %7999 = vmatprep.subr.bf16.mxu0 %v12024_v56  ;;  %8112 = vmatprep.subr.bf16.mxu1 %v12123_v25  ;;  %v12129_v32 = vld [vmem:[#allocation7 + $0x724] ss:$16 sps:$4 sm:$0xff]   ;;  %v12127_v25 = vld [vmem:[#allocation7 + $0x720] ss:$16 sps:$4 sm:$0xff]  }
 0x3a3   : > { %17990 = vst [vmem:[#allocation114_spill] sm:$0xff] %v15418_v8  ;;  %v5945_v34 = vadd.f32 %v17993_v63, %v5807_v33  ;;  %v5808_v57 = vmul.f32 %v5680_v44, %v5680_v44  ;;  %v5687_v41 = vmax.f32 %v5117_v39, 0.0  ;;  %v5008_v17 = vadd.f32 %v5007_v52, %v17994_v2  ;;  %v5120_v55 = vpop.f32.mrf.mxu1  ;;  %v17996_v15 = vld [vmem:[#allocation27_spill] sm:$0xff]  ;;  %v17999_v2 = vld [vmem:[#allocation28_spill] sm:$0xff] }
 0x3a4   : > { %17991 = vst [vmem:[#allocation24_spill] sm:$0xff] %v15420_v45  ;;  %v5119_v36 = vadd.f32 %v5118_v7, %v5006_v23  ;;  %v5009_v31 = vpop.f32.mrf.mxu0  ;;  %v15425_v13 = vpack.c.bf16 %v5680_v44, %v5672_v20  ;;  %8000 = vmatpush2.bf16.msra.mxu0 %v12022_v3  ;;  %v12030_v33 = vld [vmem:[#allocation7 + $0x504] ss:$16 sps:$4 sm:$0xff]  }
 0x3a5   : > { %v5815_v42 = vmul.f32 %v5687_v41, %v5687_v41  ;;  %v5121_v21 = vadd.f32 %v5120_v55, %v5008_v17  ;;  %v5010_v27 = vadd.f32 %v5009_v31, %v17996_v15  ;;  %v5122_v56 = vpop.f32.mrf.mxu1  ;;  %8113 = vmatpush2.bf16.msra.mxu1 %v12121_v11  ;;  %8001 = vmatprep.subr.bf16.mxu0 %v12027_v43  ;;  %v12135_v39 = vld [vmem:[#allocation7 + $0x704] ss:$16 sps:$4 sm:$0xff]   ;;  %v18000_v31 = vld [vmem:[#allocation70_spill] sm:$0xff]  ;;  %v18001_v55 = vld [vmem:[#allocation96_spill] sm:$0xff] }
 0x3a6   : > { %17995 = vst [vmem:[#allocation35_spill] sm:$0xff] %v15425_v13  ;;  %v5688_v30 = vmax.f32 %v5119_v36, 0.0  ;;  %v5013_v63 = vpop.f32.mrf.mxu0  ;;  %8114 = vmatprep.subr.bf16.mxu1 %v12129_v32  ;;  %v15428_v52 = vadd.f32 %v5945_v34, %v5808_v57  ;;  %v17998_v7 = vld [vmem:[#allocation95_spill] sm:$0xff]  ;;  %7850 = vmatmul.mubr.bf16.gmra.mxu0 %v18000_v31 }
 0x3a7   : > { %v5954_v20 = vadd.f32 %v17998_v7, %v5815_v42  ;;  %v5695_v44 = vmax.f32 %v5121_v21, 0.0  ;;  %v5123_v23 = vadd.f32 %v5122_v56, %v5010_v27  ;;  %v5014_v3 = vadd.f32 %v5013_v63, %v17999_v2  ;;  %8005 = vmatprep.mubr.bf16.mxu0 %v15335_v22  ;;  %v12028_v21 = vld [vmem:[#allocation7 + $0x500] ss:$16 sps:$4 sm:$0xff]   ;;  %v12033_v2 = vld [vmem:[#allocation7 + $0xec] ss:$16 sps:$4 sm:$0xff]  }
 0x3a8   : > { %17997 = vst [vmem:[#allocation41_spill] sm:$0xff] %v15428_v52  ;;  %v5126_v17 = vpop.f32.mrf.mxu1  ;;  %7963 = vmatmul.mubr.bf16.gmra.mxu1 %v18001_v55  ;;  %v5816_v11 = vmul.f32 %v5688_v30, %v5688_v30  ;;  %v5015_v43 = vpop.f32.mrf.mxu0  ;;  %8002 = vmatpush2.bf16.msra.mxu0 %v12025_v16  ;;  %v12133_v15 = vld [vmem:[#allocation7 + $0x700] ss:$16 sps:$4 sm:$0xff]   ;;  %v12141_v55 = vld [vmem:[#allocation7 + $0x2ec] ss:$16 sps:$4 sm:$0xff]  }
 0x3a9   : > { %v5823_v36 = vmul.f32 %v5695_v44, %v5695_v44  ;;  %v15435_v32 = vpack.c.bf16 %v5695_v44, %v5687_v41  ;;  %v5696_v34 = vmax.f32 %v5123_v23, 0.0  ;;  %v5127_v57 = vadd.f32 %v5126_v17, %v5014_v3  ;;  %8115 = vmatpush2.bf16.msra.mxu1 %v12127_v25  ;;  %v18004_v56 = vld [vmem:[#allocation19_spill] sm:$0xff]  ;;  %8003 = vmatprep.subr.bf16.mxu0 %v12030_v33  ;;  %v18006_v23 = vld [vmem:[#allocation54_spill] sm:$0xff] }
 0x3aa   : > { %v5128_v42 = vpop.f32.mrf.mxu1  ;;  %v15437_v27 = vadd.f32 %v5954_v20, %v5816_v11  ;;  %v5016_v63 = vadd.f32 %v5015_v43, %v18004_v56  ;;  %v5017_v7 = vpop.f32.mrf.mxu0  ;;  %8116 = vmatprep.subr.bf16.mxu1 %v12135_v39  ;;  %v18008_v43 = vld [vmem:[#allocation103_spill] sm:$0xff] }
 0x3ab   : > { %18002 = vst [vmem:[#allocation73_spill] sm:$0xff] %v15435_v32  ;;  %v5963_v22 = vadd.f32 %v18005_v12, %v5823_v36  ;;  %v5824_v41 = vmul.f32 %v5696_v34, %v5696_v34  ;;  %v5703_v44 = vmax.f32 %v5127_v57, 0.0  ;;  %v5018_v3 = vadd.f32 %v5017_v7, %v18006_v23  ;;  %v12036_v12 = vld [vmem:[#allocation7 + $0xcc] ss:$16 sps:$4 sm:$0xff]  }
 0x3ac   : > { %18003 = vst [vmem:[#allocation121_spill] sm:$0xff] %v15437_v27  ;;  %v5130_v16 = vpop.f32.mrf.mxu1  ;;  %v5129_v17 = vadd.f32 %v5128_v42, %v5016_v63  ;;  %v5019_v31 = vpop.f32.mrf.mxu0  ;;  %v15442_v25 = vpack.c.bf16 %v5696_v34, %v5688_v30  ;;  %8004 = vmatpush2.bf16.msra.mxu0 %v12028_v21  ;;  %v12031_v27 = vld [vmem:[#allocation7 + $0xe8] ss:$16 sps:$4 sm:$0xff]  }
 0x3ad   : > { %v5831_v20 = vmul.f32 %v5703_v44, %v5703_v44  ;;  %v5131_v11 = vadd.f32 %v5130_v16, %v5018_v3  ;;  %v5020_v56 = vadd.f32 %v5019_v31, %v18008_v43  ;;  %8117 = vmatpush2.bf16.msra.mxu1 %v12133_v15  ;;  %8199 = vmatprep.subr.bf16.mxu0 %v12033_v2  ;;  %v18010_v57 = vld [vmem:[#allocation98_spill] sm:$0xff] }
 0x3ae   : > { %18007 = vst [vmem:[#allocation43_spill] sm:$0xff] %v15442_v25  ;;  %v5132_v33 = vpop.f32.mrf.mxu1  ;;  %v5704_v39 = vmax.f32 %v5129_v17, 0.0  ;;  %v15445_v52 = vpop.f32.mrf.mxu0  ;;  %8312 = vmatprep.subr.bf16.mxu1 %v12141_v55  ;;  %v15447_v36 = vadd.f32 %v5963_v22, %v5824_v41  ;;  %v12034_v55 = vld [vmem:[#allocation7 + $0xc8] ss:$16 sps:$4 sm:$0xff]   ;;  %v12039_v3 = vld [vmem:[#allocation7 + $0xac] ss:$16 sps:$4 sm:$0xff]  }
 0x3af   : > { %v5972_v42 = vadd.f32 %v18010_v57, %v5831_v20  ;;  %v5711_v30 = vmax.f32 %v5131_v11, 0.0  ;;  %v5133_v34 = vadd.f32 %v5132_v33, %v5020_v56  ;;  %8006 = vmatmul.mubr.bf16.vlgmr.msra.gmra.mxu0 %v15330_v0  ;;  %v18013_v16 = vld [vmem:[#allocation102_spill] sm:$0xff] }
 0x3b0   : > { %18009 = vst [vmem:[#allocation126_spill] sm:$0xff] %v15447_v36  ;;  %v15450_v63 = vpop.f32.mrf.mxu1  ;;  %v5832_v21 = vmul.f32 %v5704_v39, %v5704_v39  ;;  %v15453_v31 = vpop.f32.mrf.mxu0  ;;  %8015 = vmatprep.mubr.bf16.mxu0 %v15353_v5  ;;  %8200 = vmatpush1.bf16.msra.mxu0 %v12031_v27  ;;  %v12037_v56 = vld [vmem:[#allocation7 + $0xa8] ss:$16 sps:$4 sm:$0xff]  }
 0x3b1   : > { %v5839_v15 = vmul.f32 %v5711_v30, %v5711_v30  ;;  %v15455_v7 = vpack.c.bf16 %v5711_v30, %v5703_v44  ;;  %v5712_v23 = vmax.f32 %v5133_v34, 0.0  ;;  %8201 = vmatprep.subr.bf16.mxu0 %v12036_v12  ;;  %v12042_v12 = vld [vmem:[#allocation7 + $0x8c] ss:$16 sps:$4 sm:$0xff]   ;;  %v12040_v34 = vld [vmem:[#allocation7 + $0x88] ss:$16 sps:$4 sm:$0xff]  }
 0x3b2   : > { %v15458_v22 = vpop.f32.mrf.mxu1  ;;  %v15460_v2 = vadd.f32 %v5972_v42, %v5832_v21  ;;  %v15462_v41 = vpop.f32.mrf.mxu0 }
 0x3b3   : > { %18011 = vst [vmem:[#allocation122_spill] sm:$0xff] %v15455_v7  ;;  %v5981_v17 = vadd.f32 %v18013_v16, %v5839_v15  ;;  %v5840_v20 = vmul.f32 %v5712_v23, %v5712_v23  ;;  %v15467_v44 = vpack.c.bf16 %v5712_v23, %v5704_v39  ;;  %v12048_v15 = vld [vmem:[#allocation7 + $0x6c] ss:$16 sps:$4 sm:$0xff]   ;;  %v12046_v16 = vld [vmem:[#allocation7 + $0x68] ss:$16 sps:$4 sm:$0xff]  }
 0x3b4   : > { %18012 = vst [vmem:[#allocation40_spill] sm:$0xff] %v15460_v2  ;;  %v15465_v11 = vpop.f32.mrf.mxu1  ;;  %v15469_v43 = vpop.f32.mrf.mxu0  ;;  %8202 = vmatpush1.bf16.msra.mxu0 %v12034_v55 }
 0x3b5   : > { %18014 = vst [vmem:[#allocation48_spill] sm:$0xff] %v15467_v44  ;;  %v15473_v33 = vadd.f32 %v5981_v17, %v5840_v20  ;;  %8203 = vmatprep.subr.bf16.mxu0 %v12039_v3  ;;  %v12054_v20 = vld [vmem:[#allocation7 + $0x4c] ss:$16 sps:$4 sm:$0xff]  }
 0x3b6   : > { %v15471_v27 = vpop.f32.mrf.mxu1  ;;  %v15475_v57 = vpop.f32.mrf.mxu0 }
 0x3b7   : > { %18015 = vst [vmem:[#allocation50_spill] sm:$0xff] %v15473_v33  ;;  %8016 = vmatmul.mubr.bf16.gmra.mxu0 %v15346_v18  ;;  %v12052_v18 = vld [vmem:[#allocation7 + $0x48] ss:$16 sps:$4 sm:$0xff]   ;;  %v12060_v33 = vld [vmem:[#allocation7 + $0x2c] ss:$16 sps:$4 sm:$0xff]  }
 0x3b8   : > { %v15477_v42 = vpop.f32.mrf.mxu1  ;;  %v15480_v30 = vpop.f32.mrf.mxu0  ;;  %8025 = vmatprep.mubr.bf16.mxu0 %v15371_v1  ;;  %8204 = vmatpush1.bf16.msra.mxu0 %v12037_v56 }
 0x3b9   : > { %8205 = vmatprep.subr.bf16.mxu0 %v12042_v12 }
 0x3ba   : > { %v15483_v39 = vpop.f32.mrf.mxu1  ;;  %v15485_v21 = vpop.f32.mrf.mxu0 }
 0x3bc   : > { %v15487_v23 = vpop.f32.mrf.mxu1  ;;  %v15489_v55 = vpop.f32.mrf.mxu0  ;;  %8206 = vmatpush1.bf16.msra.mxu0 %v12040_v34 }
 0x3bd   : > { %8207 = vmatprep.subr.bf16.mxu0 %v12048_v15 }
 0x3be   : > { %v15491_v3 = vpop.f32.mrf.mxu1  ;;  %v15493_v17 = vpop.f32.mrf.mxu0 }
 0x3bf   : > { %8026 = vmatmul.mubr.bf16.gmra.mxu0 %v15364_v58  ;;  %v12058_v58 = vld [vmem:[#allocation7 + $0x28] ss:$16 sps:$4 sm:$0xff]  }
 0x3c0   : > { %v15495_v56 = vpop.f32.mrf.mxu1  ;;  %v15498_v1 = vpop.f32.mrf.mxu0  ;;  %8035 = vmatprep.mubr.bf16.mxu0 %v15389_v14  ;;  %8208 = vmatpush1.bf16.msra.mxu0 %v12046_v16  ;;  %v12066_v14 = vld [vmem:[#allocation7 + $0xc] ss:$16 sps:$4 sm:$0xff]  }
 0x3c1   : > { %8209 = vmatprep.subr.bf16.mxu0 %v12054_v20 }
 0x3c2   : > { %v15501_v12 = vpop.f32.mrf.mxu1  ;;  %v15503_v34 = vpop.f32.mrf.mxu0 }
 0x3c4   : > { %v15505_v5 = vpop.f32.mrf.mxu1  ;;  %v15507_v15 = vpop.f32.mrf.mxu0  ;;  %8210 = vmatpush1.bf16.msra.mxu0 %v12052_v18 }
 0x3c5   : > { %8211 = vmatprep.subr.bf16.mxu0 %v12060_v33 }
 0x3c6   : > { %v15509_v0 = vpop.f32.mrf.mxu1  ;;  %v15511_v2 = vpop.f32.mrf.mxu0 }
 0x3c7   : > { %8036 = vmatmul.mubr.bf16.gmra.mxu0 %v15382_v49  ;;  %v12070_v49 = vld [vmem:[#allocation7 + $0x1e8] ss:$16 sps:$4 sm:$0xff]  }
 0x3c8   : > { %v15513_v16 = vpop.f32.mrf.mxu1  ;;  %v15516_v36 = vpop.f32.mrf.mxu0  ;;  %8045 = vmatprep.mubr.bf16.mxu0 %v15407_v26  ;;  %8212 = vmatpush1.bf16.msra.mxu0 %v12058_v58  ;;  %v12078_v26 = vld [vmem:[#allocation7 + $0x1cc] ss:$16 sps:$4 sm:$0xff]  }
 0x3c9   : > { %8213 = vmatprep.subr.bf16.mxu0 %v12066_v14 }
 0x3ca   : > { %v15519_v20 = vpop.f32.mrf.mxu1  ;;  %v15521_v18 = vpop.f32.mrf.mxu0 }
 0x3cc   : > { %v15523_v45 = vpop.f32.mrf.mxu1  ;;  %v15525_v33 = vpop.f32.mrf.mxu0  ;;  %8214 = vmatpush1.bf16.msra.mxu0 %v12064_v60 }
 0x3cd   : > { %8215 = vmatprep.subr.bf16.mxu0 %v12072_v37 }
 0x3ce   : > { %v15527_v50 = vpop.f32.mrf.mxu1  ;;  %v15529_v35 = vpop.f32.mrf.mxu0 }
 0x3cf   : > { %8046 = vmatmul.mubr.bf16.gmra.mxu0 %v15400_v46  ;;  %v12082_v46 = vld [vmem:[#allocation7 + $0x1a8] ss:$16 sps:$4 sm:$0xff]  }
 0x3d0   : > { %v15531_v58 = vpop.f32.mrf.mxu1  ;;  %v15534_v38 = vpop.f32.mrf.mxu0  ;;  %8055 = vmatprep.mubr.bf16.mxu0 %v15425_v13  ;;  %8216 = vmatpush2.bf16.msra.mxu0 %v12070_v49  ;;  %v12090_v13 = vld [vmem:[#allocation7 + $0x18c] ss:$16 sps:$4 sm:$0xff]  }
 0x3d1   : > { %8217 = vmatprep.subr.bf16.mxu0 %v12078_v26 }
 0x3d2   : > { %v15537_v14 = vpop.f32.mrf.mxu1  ;;  %v15539_v60 = vpop.f32.mrf.mxu0 }
 0x3d3   : > { %18016 = vst [vmem:[#allocation66_spill] sm:$0xff] %v15537_v14  ;;  %18017 = vst [vmem:[#allocation39_spill] sm:$0xff] %v15539_v60 }
 0x3d4   : > { %v15541_v19 = vpop.f32.mrf.mxu1  ;;  %v15543_v37 = vpop.f32.mrf.mxu0  ;;  %8218 = vmatpush2.bf16.msra.mxu0 %v12076_v29 }
 0x3d5   : > { %18018 = vst [vmem:[#allocation109_spill] sm:$0xff] %v15541_v19  ;;  %18019 = vst [vmem:[#allocation52_spill] sm:$0xff] %v15543_v37  ;;  %8219 = vmatprep.subr.bf16.mxu0 %v12084_v10  ;;  %v12088_v37 = vld [vmem:[#allocation7 + $0x188] ss:$16 sps:$4 sm:$0xff]  }
 0x3d6   : > { %v15545_v6 = vpop.f32.mrf.mxu1  ;;  %v15547_v62 = vpop.f32.mrf.mxu0 }
 0x3d7   : > { %18020 = vst [vmem:[#allocation110_spill] sm:$0xff] %v15545_v6  ;;  %18021 = vst [vmem:[#allocation30_spill] sm:$0xff] %v15547_v62  ;;  %8056 = vmatmul.mubr.bf16.gmra.mxu0 %v15418_v8  ;;  %v12096_v6 = vld [vmem:[#allocation7 + $0x16c] ss:$16 sps:$4 sm:$0xff]   ;;  %v12094_v8 = vld [vmem:[#allocation7 + $0x168] ss:$16 sps:$4 sm:$0xff]  }
 0x3d8   : > { %v15549_v49 = vpop.f32.mrf.mxu1  ;;  %v15552_v14 = vpop.f32.mrf.mxu0  ;;  %8065 = vmatprep.mubr.bf16.mxu0 %v15442_v25  ;;  %8220 = vmatpush2.bf16.msra.mxu0 %v12082_v46  ;;  %v12102_v25 = vld [vmem:[#allocation7 + $0x14c] ss:$16 sps:$4 sm:$0xff]  }
 0x3d9   : > { %18022 = vst [vmem:[#allocation23_spill] sm:$0xff] %v15549_v49  ;;  %18023 = vst [vmem:[#allocation72_spill] sm:$0xff] %v15552_v14  ;;  %8221 = vmatprep.subr.bf16.mxu0 %v12090_v13  ;;  %v12138_v14 = vld [vmem:[#allocation7 + $0x48c] ss:$16 sps:$4 sm:$0xff]  }
 0x3da   : > { %v15555_v26 = vpop.f32.mrf.mxu1  ;;  %v15557_v29 = vpop.f32.mrf.mxu0 }
 0x3db   : > { %18024 = vst [vmem:[#allocation69_spill] sm:$0xff] %v15555_v26  ;;  %18025 = vst [vmem:[#allocation65_spill] sm:$0xff] %v15557_v29  ;;  %v12132_v29 = vld [vmem:[#allocation7 + $0x4ac] ss:$16 sps:$4 sm:$0xff]  }
 0x3dc   : > { %v15559_v19 = vpop.f32.mrf.mxu1  ;;  %v15561_v10 = vpop.f32.mrf.mxu0  ;;  %8222 = vmatpush2.bf16.msra.mxu0 %v12088_v37 }
 0x3dd   : > { %18026 = vst [vmem:[#allocation74_spill] sm:$0xff] %v15559_v19  ;;  %18027 = vst [vmem:[#allocation32_spill] sm:$0xff] %v15561_v10  ;;  %8223 = vmatprep.subr.bf16.mxu0 %v12096_v6  ;;  %v12100_v10 = vld [vmem:[#allocation7 + $0x148] ss:$16 sps:$4 sm:$0xff]  }
 0x3de   : > { %v15563_v49 = vpop.f32.mrf.mxu1  ;;  %v15565_v62 = vpop.f32.mrf.mxu0 }
 0x3df   : > { %18028 = vst [vmem:[#allocation119_spill] sm:$0xff] %v15563_v49  ;;  %18029 = vst [vmem:[#allocation25_spill] sm:$0xff] %v15565_v62  ;;  %8066 = vmatmul.mubr.bf16.gmra.mxu0 %v15435_v32  ;;  %v12108_v49 = vld [vmem:[#allocation7 + $0x12c] ss:$16 sps:$4 sm:$0xff]   ;;  %v12106_v32 = vld [vmem:[#allocation7 + $0x128] ss:$16 sps:$4 sm:$0xff]  }
 0x3e0   : > { %v15567_v46 = vpop.f32.mrf.mxu1  ;;  %v15570_v26 = vpop.f32.mrf.mxu0  ;;  %8075 = vmatprep.mubr.bf16.mxu0 %v15467_v44  ;;  %8224 = vmatpush2.bf16.msra.mxu0 %v12094_v8  ;;  %v12114_v44 = vld [vmem:[#allocation7 + $0x10c] ss:$16 sps:$4 sm:$0xff]  }
 0x3e1   : > { %18030 = vst [vmem:[#allocation133_spill] sm:$0xff] %v15567_v46  ;;  %18031 = vst [vmem:[#allocation67_spill] sm:$0xff] %v15570_v26  ;;  %8225 = vmatprep.subr.bf16.mxu0 %v12102_v25  ;;  %v18040_v25 = vld [vmem:[#allocation44_spill] sm:$0xff] }
 0x3e2   : > { %v15573_v13 = vpop.f32.mrf.mxu1  ;;  %v15575_v37 = vpop.f32.mrf.mxu0 }
 0x3e3   : > { %18032 = vst [vmem:[#allocation68_spill] sm:$0xff] %v15573_v13  ;;  %18033 = vst [vmem:[#allocation76_spill] sm:$0xff] %v15575_v37 }
 0x3e4   : > { %v15577_v19 = vpop.f32.mrf.mxu1  ;;  %v15579_v6 = vpop.f32.mrf.mxu0  ;;  %8226 = vmatpush2.bf16.msra.mxu0 %v12100_v10 }
 0x3e5   : > { %18034 = vst [vmem:[#allocation78_spill] sm:$0xff] %v15577_v19  ;;  %18035 = vst [vmem:[#allocation134_spill] sm:$0xff] %v15579_v6  ;;  %8227 = vmatprep.subr.bf16.mxu0 %v12108_v49  ;;  %v12112_v6 = vld [vmem:[#allocation7 + $0x108] ss:$16 sps:$4 sm:$0xff]  }
 0x3e6   : > { %v15581_v46 = vpop.f32.mrf.mxu1  ;;  %v15583_v62 = vpop.f32.mrf.mxu0 }
 0x3e7   : > { %18036 = vst [vmem:[#allocation51_spill] sm:$0xff] %v15581_v46  ;;  %18037 = vst [vmem:[#allocation21_spill] sm:$0xff] %v15583_v62  ;;  %8076 = vmatmul.mubr.bf16.gmra.mxu0 %v15455_v7  ;;  %v12120_v46 = vld [vmem:[#allocation7 + $0x4ec] ss:$16 sps:$4 sm:$0xff]  }
 0x3e8   : > { %v15585_v8 = vpop.f32.mrf.mxu1  ;;  %v15588_v13 = vpop.f32.mrf.mxu0  ;;  %8228 = vmatpush2.bf16.msra.mxu0 %v12106_v32  ;;  %8231 = vmatprep.mubr.bf16.mxu0 %v18040_v25  ;;  %v12118_v32 = vld [vmem:[#allocation7 + $0x4e8] ss:$16 sps:$4 sm:$0xff]   ;;  %v12126_v25 = vld [vmem:[#allocation7 + $0x4cc] ss:$16 sps:$4 sm:$0xff]  }
 0x3e9   : > { %18038 = vst [vmem:[#allocation135_spill] sm:$0xff] %v15585_v8  ;;  %18039 = vst [vmem:[#allocation53_spill] sm:$0xff] %v15588_v13  ;;  %8229 = vmatprep.subr.bf16.mxu0 %v12114_v44  ;;  %v5283_v8 = vadd.f32 %v15450_v63, %v15445_v52  ;;  %v18046_v62 = vld [vmem:[#allocation124_spill] sm:$0xff]  ;;  %v18047_v52 = vld [vmem:[#allocation62_spill] sm:$0xff] }
 0x3ea   : > { %v15591_v19 = vpop.f32.mrf.mxu1  ;;  %v15593_v10 = vpop.f32.mrf.mxu0 }
 0x3eb   : > { %18041 = vst [vmem:[#allocation22_spill] sm:$0xff] %v15591_v19  ;;  %18042 = vst [vmem:[#allocation29_spill] sm:$0xff] %v15593_v10  ;;  %v5285_v19 = vadd.f32 %v15458_v22, %v15453_v31  ;;  %v5289_v31 = vadd.f32 %v15471_v27, %v15469_v43 }
 0x3ec   : > { %v15595_v37 = vpop.f32.mrf.mxu1  ;;  %v15597_v49 = vpop.f32.mrf.mxu0  ;;  %8230 = vmatpush2.bf16.msra.mxu0 %v12112_v6 }
 0x3ed   : > { %18043 = vst [vmem:[#allocation26_spill] sm:$0xff] %v15595_v37  ;;  %18044 = vst [vmem:[#allocation34_spill] sm:$0xff] %v15597_v49  ;;  %8425 = vmatprep.subr.bf16.mxu0 %v12120_v46  ;;  %v5287_v49 = vadd.f32 %v15465_v11, %v15462_v41  ;;  %v5293_v41 = vadd.f32 %v15477_v42, %v15475_v57 }
 0x3ee   : > { %v15601_v7 = vpop.f32.mrf.mxu1  ;;  %v5395_v13 = vpop.f32.mrf.mxu0 }
 0x3ef   : > { %18045 = vst [vmem:[#allocation20_spill] sm:$0xff] %v15601_v7  ;;  %v5396_v10 = vadd.f32 %v5395_v13, %v5283_v8  ;;  %8232 = vmatmul.mubr.bf16.vlgmr.msra.gmra.mxu0 %v18046_v62  ;;  %v12124_v7 = vld [vmem:[#allocation7 + $0x4c8] ss:$16 sps:$4 sm:$0xff]  }
 0x3f0   : > { %v5508_v44 = vpop.f32.mrf.mxu1  ;;  %v5397_v37 = vpop.f32.mrf.mxu0  ;;  %8241 = vmatprep.mubr.bf16.mxu0 %v18047_v52  ;;  %8426 = vmatpush1.bf16.msra.mxu0 %v12118_v32  ;;  %v12130_v52 = vld [vmem:[#allocation7 + $0x4a8] ss:$16 sps:$4 sm:$0xff]  }
 0x3f1   : > { %v5509_v26 = vadd.f32 %v5508_v44, %v5396_v10  ;;  %v5398_v63 = vadd.f32 %v5397_v37, %v5285_v19  ;;  %8427 = vmatprep.subr.bf16.mxu0 %v12126_v25 }
 0x3f2   : > { %v5510_v6 = vpop.f32.mrf.mxu1  ;;  %v5399_v46 = vpop.f32.mrf.mxu0 }
 0x3f3   : > { %v5593_v22 = vmax.f32 %v5509_v26, 0.0  ;;  %v5511_v13 = vadd.f32 %v5510_v6, %v5398_v63  ;;  %v5400_v62 = vadd.f32 %v5399_v46, %v5287_v49  ;;  %v5295_v63 = vadd.f32 %v15483_v39, %v15480_v30 }
 0x3f4   : > { %v5512_v8 = vpop.f32.mrf.mxu1  ;;  %v5401_v11 = vpop.f32.mrf.mxu0  ;;  %8428 = vmatpush1.bf16.msra.mxu0 %v12124_v7  ;;  %v5297_v7 = vadd.f32 %v15487_v23, %v15485_v21  ;;  %v12139_v23 = vld [vmem:[#allocation7 + $0x2e8] ss:$16 sps:$4 sm:$0xff]  }
 0x3f5   : > { %v5721_v10 = vmul.f32 %v5593_v22, %v5593_v22  ;;  %v5594_v44 = vmax.f32 %v5511_v13, 0.0  ;;  %v5513_v32 = vadd.f32 %v5512_v8, %v5400_v62  ;;  %v5402_v19 = vadd.f32 %v5401_v11, %v5289_v31  ;;  %8429 = vmatprep.subr.bf16.mxu0 %v12132_v29  ;;  %v12136_v13 = vld [vmem:[#allocation7 + $0x488] ss:$16 sps:$4 sm:$0xff]   ;;  %v12144_v8 = vld [vmem:[#allocation7 + $0x46c] ss:$16 sps:$4 sm:$0xff]  }
 0x3f6   : > { %v5514_v37 = vpop.f32.mrf.mxu1  ;;  %v5405_v25 = vpop.f32.mrf.mxu0  ;;  %v5299_v62 = vadd.f32 %v15491_v3, %v15489_v55 }
 0x3f7   : > { %v5722_v60 = vmul.f32 %v5594_v44, %v5594_v44  ;;  %v5601_v43 = vmax.f32 %v5513_v32, 0.0  ;;  %v5515_v27 = vadd.f32 %v5514_v37, %v5402_v19  ;;  %v5406_v26 = vadd.f32 %v5405_v25, %v5293_v41  ;;  %8242 = vmatmul.mubr.bf16.gmra.mxu0 %v17959_v59 }
 0x3f8   : > { %v5518_v49 = vpop.f32.mrf.mxu1  ;;  %v5407_v57 = vpop.f32.mrf.mxu0  ;;  %v5848_v42 = vadd.f32 %v15328_v28, %v5721_v10  ;;  %8251 = vmatprep.mubr.bf16.mxu0 %v17960_v4  ;;  %8430 = vmatpush1.bf16.msra.mxu0 %v12130_v52  ;;  %v5303_v4 = vadd.f32 %v15495_v56, %v15493_v17  ;;  %v12147_v56 = vld [vmem:[#allocation7 + $0x2cc] ss:$16 sps:$4 sm:$0xff]  }
 0x3f9   : > { %v5729_v6 = vmul.f32 %v5601_v43, %v5601_v43  ;;  %v5602_v46 = vmax.f32 %v5515_v27, 0.0  ;;  %v5519_v29 = vadd.f32 %v5518_v49, %v5406_v26  ;;  %v5408_v30 = vadd.f32 %v5407_v57, %v5295_v63  ;;  %8431 = vmatprep.subr.bf16.mxu0 %v12138_v14  ;;  %v12145_v63 = vld [vmem:[#allocation7 + $0x2c8] ss:$16 sps:$4 sm:$0xff]  }
 0x3fa   : > { %v5520_v31 = vpop.f32.mrf.mxu1  ;;  %v5409_v39 = vpop.f32.mrf.mxu0  ;;  %v5849_v59 = vadd.f32 %v5848_v42, %v5722_v60  ;;  %v15626_v32 = vpack.c.bf16 %v5601_v43, %v5593_v22  ;;  %v12150_v22 = vld [vmem:[#allocation7 + $0x44c] ss:$16 sps:$4 sm:$0xff]   ;;  %v5305_v42 = vadd.f32 %v15501_v12, %v15498_v1  ;;  %v12148_v1 = vld [vmem:[#allocation7 + $0x448] ss:$16 sps:$4 sm:$0xff]  }
 0x3fb   : > { %v5609_v28 = vmax.f32 %v5519_v29, 0.0  ;;  %v5410_v41 = vadd.f32 %v5409_v39, %v5297_v7  ;;  %v15622_v21 = vpack.c.bf16 %v5602_v46, %v5594_v44  ;;  %v5730_v10 = vmul.f32 %v5602_v46, %v5602_v46  ;;  %v12142_v44 = vld [vmem:[#allocation7 + $0x468] ss:$16 sps:$4 sm:$0xff]   ;;  %v12153_v29 = vld [vmem:[#allocation7 + $0x2ac] ss:$16 sps:$4 sm:$0xff]  }
 0x3fc   : > { %v5522_v11 = vpop.f32.mrf.mxu1  ;;  %v5521_v19 = vadd.f32 %v5520_v31, %v5408_v30  ;;  %5850 = vadd.xlane.f32.xlu0 %v5849_v59  ;;  %v5411_v55 = vpop.f32.mrf.mxu0  ;;  %v5857_v3 = vadd.f32 %v15338_v47, %v5729_v6  ;;  %8432 = vmatpush1.bf16.msra.mxu0 %v12136_v13  ;;  %v5307_v7 = vadd.f32 %v15505_v5, %v15503_v34  ;;  %v12156_v39 = vld [vmem:[#allocation7 + $0x42c] ss:$16 sps:$4 sm:$0xff]  }
 0x3fd   : > { %v5737_v14 = vmul.f32 %v5609_v28, %v5609_v28  ;;  %v5523_v60 = vadd.f32 %v5522_v11, %v5410_v41  ;;  %v5412_v37 = vadd.f32 %v5411_v55, %v5299_v62  ;;  %8118 = vmatprep.mubr.bf16.mxu1 %v15622_v21  ;;  %8433 = vmatprep.subr.bf16.mxu0 %v12144_v8 }
 0x3fe   : > { %v5524_v52 = vpop.f32.mrf.mxu1  ;;  %v5610_v25 = vmax.f32 %v5521_v19, 0.0  ;;  %v5415_v27 = vpop.f32.mrf.mxu0  ;;  %8119 = vmatmul.mubr.bf16.vlgmr.msra.gmra.mxu1 %v15626_v32  ;;  %v5858_v17 = vadd.f32 %v5857_v3, %v5730_v10  ;;  %v5309_v31 = vadd.f32 %v15509_v0, %v15507_v15  ;;  %v5313_v5 = vadd.f32 %v15513_v16, %v15511_v2  ;;  %v12154_v3 = vld [vmem:[#allocation7 + $0x428] ss:$16 sps:$4 sm:$0xff]  }
 0x3ff   : > { %v5617_v43 = vmax.f32 %v5523_v60, 0.0  ;;  %v5525_v26 = vadd.f32 %v5524_v52, %v5412_v37  ;;  %v5416_v49 = vadd.f32 %v5415_v27, %v5303_v4  ;;  %8313 = vmatpush1.bf16.msra.mxu1 %v12139_v23  ;;  %v5866_v57 = vadd.f32 %v15348_v51, %v5737_v14  ;;  %8252 = vmatmul.mubr.bf16.gmra.mxu0 %v17963_v9  ;;  %v12159_v37 = vld [vmem:[#allocation7 + $0x28c] ss:$16 sps:$4 sm:$0xff]  }
 0x400   : > { %v5528_v47 = vpop.f32.mrf.mxu1  ;;  %v5738_v6 = vmul.f32 %v5610_v25, %v5610_v25  ;;  %5859 = vadd.xlane.f32.xlu1 %v5858_v17  ;;  %v5417_v46 = vpop.f32.mrf.mxu0  ;;  %8261 = vmatprep.mubr.bf16.mxu0 %v17964_v40  ;;  %v12151_v40 = vld [vmem:[#allocation7 + $0x2a8] ss:$16 sps:$4 sm:$0xff]   ;;  %v12162_v52 = vld [vmem:[#allocation7 + $0x40c] ss:$16 sps:$4 sm:$0xff]  }
 0x401   : > { %v5745_v13 = vmul.f32 %v5617_v43, %v5617_v43  ;;  %v5618_v62 = vmax.f32 %v5525_v26, 0.0  ;;  %v5529_v30 = vadd.f32 %v5528_v47, %v5416_v49  ;;  %8434 = vmatpush1.bf16.msra.mxu0 %v12142_v44  ;;  %v5418_v12 = vadd.f32 %v5417_v46, %v5305_v42  ;;  %8314 = vmatprep.subr.bf16.mxu1 %v12147_v56  ;;  %v12157_v17 = vld [vmem:[#allocation7 + $0x288] ss:$16 sps:$4 sm:$0xff]   ;;  %v12165_v47 = vld [vmem:[#allocation7 + $0x26c] ss:$16 sps:$4 sm:$0xff]  }
 0x402   : > { %v5530_v51 = vpop.f32.mrf.mxu1  ;;  %v5419_v9 = vpop.f32.mrf.mxu0  ;;  %8435 = vmatprep.subr.bf16.mxu0 %v12150_v22  ;;  %v5867_v34 = vadd.f32 %v5866_v57, %v5738_v6  ;;  %v15646_v11 = vpack.c.bf16 %v5617_v43, %v5609_v28  ;;  %v5315_v22 = vadd.f32 %v15519_v20, %v15516_v36  ;;  %v5317_v43 = vadd.f32 %v15523_v45, %v15521_v18  ;;  %v12160_v36 = vld [vmem:[#allocation7 + $0x408] ss:$16 sps:$4 sm:$0xff]   ;;  %v12168_v6 = vld [vmem:[#allocation7 + $0x5ec] ss:$16 sps:$4 sm:$0xff]  }
 0x403   : > { %v15642_v59 = vmax.f32 %v5529_v30, 0.0  ;;  %v5420_v0 = vadd.f32 %v5419_v9, %v5307_v7  ;;  %8315 = vmatpush1.bf16.msra.mxu1 %v12145_v63  ;;  %v15644_v8 = vpack.c.bf16 %v5618_v62, %v5610_v25  ;;  %v5746_v41 = vmul.f32 %v5618_v62, %v5618_v62 }
 0x404   : > { %v5532_v15 = vpop.f32.mrf.mxu1  ;;  %v5531_v23 = vadd.f32 %v5530_v51, %v5418_v12  ;;  %5868 = vadd.xlane.f32.xlu0 %v5867_v34  ;;  %v5421_v2 = vpop.f32.mrf.mxu0  ;;  %8316 = vmatprep.subr.bf16.mxu1 %v12153_v29  ;;  %v5875_v16 = vadd.f32 %v15356_v24, %v5745_v13  ;;  %v5319_v63 = vadd.f32 %v15527_v50, %v15525_v33  ;;  %v12166_v12 = vld [vmem:[#allocation7 + $0x5e8] ss:$16 sps:$4 sm:$0xff]  }
 0x405   : > { %v5753_v10 = vmul.f32 %v15642_v59, %v15642_v59  ;;  %v5533_v4 = vadd.f32 %v5532_v15, %v5420_v0  ;;  %8436 = vmatpush1.bf16.msra.mxu0 %v12148_v1  ;;  %v5422_v19 = vadd.f32 %v5421_v2, %v5309_v31  ;;  %8128 = vmatprep.mubr.bf16.mxu1 %v15644_v8  ;;  %v12174_v0 = vld [vmem:[#allocation7 + $0x5cc] ss:$16 sps:$4 sm:$0xff]   ;;  %v18048_v2 = vld [vmem:[#allocation129_spill] sm:$0xff] }
 0x406   : > { %v5534_v55 = vpop.f32.mrf.mxu1  ;;  %v5626_v14 = vmax.f32 %v5531_v23, 0.0  ;;  %v5425_v60 = vpop.f32.mrf.mxu0  ;;  %8129 = vmatmul.mubr.bf16.gmra.mxu1 %v15646_v11  ;;  %8437 = vmatprep.subr.bf16.mxu0 %v12156_v39  ;;  %v5876_v28 = vadd.f32 %v5875_v16, %v5746_v41  ;;  %v5323_v45 = vadd.f32 %v15531_v58, %v15529_v35  ;;  %v12169_v23 = vld [vmem:[#allocation7 + $0x248] ss:$16 sps:$4 sm:$0xff]  }
 0x407   : > { %v5633_v44 = vmax.f32 %v5533_v4, 0.0  ;;  %v5535_v24 = vadd.f32 %v5534_v55, %v5422_v19  ;;  %v5426_v25 = vadd.f32 %v5425_v60, %v5313_v5  ;;  %8317 = vmatpush1.bf16.msra.mxu1 %v12151_v40  ;;  %v5884_v56 = vadd.f32 %v15366_v54, %v5753_v10  ;;  %8262 = vmatmul.mubr.bf16.gmra.mxu0 %v17967_v53  ;;  %v18049_v10 = vld [vmem:[#allocation66_spill] sm:$0xff]  ;;  %v18050_v19 = vld [vmem:[#allocation39_spill] sm:$0xff]  ;;  %v18051_v55 = vld [vmem:[#allocation109_spill] sm:$0xff] }
 0x408   : > { %v5538_v27 = vpop.f32.mrf.mxu1  ;;  %v5754_v26 = vmul.f32 %v5626_v14, %v5626_v14  ;;  %5877 = vadd.xlane.f32.xlu1 %v5876_v28  ;;  %v5427_v49 = vpop.f32.mrf.mxu0  ;;  %8271 = vmatprep.mubr.bf16.mxu0 %v17968_v48  ;;  %v12163_v48 = vld [vmem:[#allocation7 + $0x268] ss:$16 sps:$4 sm:$0xff]   ;;  %v5325_v4 = vadd.f32 %v18049_v10, %v15534_v38  ;;  %v18052_v60 = vld [vmem:[#allocation125_spill] sm:$0xff] }
 0x409   : > { %v5761_v57 = vmul.f32 %v5633_v44, %v5633_v44  ;;  %v5634_v42 = vmax.f32 %v5535_v24, 0.0  ;;  %v5539_v7 = vadd.f32 %v5538_v27, %v5426_v25  ;;  %8438 = vmatpush1.bf16.msra.mxu0 %v12154_v3  ;;  %v5428_v20 = vadd.f32 %v5427_v49, %v5315_v22  ;;  %8318 = vmatprep.subr.bf16.mxu1 %v12159_v37  ;;  %v12177_v37 = vld [vmem:[#allocation7 + $0x22c] ss:$16 sps:$4 sm:$0xff]   ;;  %v12172_v38 = vld [vmem:[#allocation7 + $0x5c8] ss:$16 sps:$4 sm:$0xff]  }
 0x40a   : > { %v5540_v54 = vpop.f32.mrf.mxu1  ;;  %v5429_v53 = vpop.f32.mrf.mxu0  ;;  %8439 = vmatprep.subr.bf16.mxu0 %v12162_v52  ;;  %v5885_v18 = vadd.f32 %v5884_v56, %v5754_v26  ;;  %v15669_v13 = vpack.c.bf16 %v5633_v44, %v15642_v59  ;;  %v12171_v59 = vld [vmem:[#allocation7 + $0x24c] ss:$16 sps:$4 sm:$0xff]   ;;  %v5327_v3 = vadd.f32 %v18051_v55, %v18050_v19  ;;  %v18057_v26 = vld [vmem:[#allocation23_spill] sm:$0xff] }
 0x40b   : > { %v15664_v46 = vmax.f32 %v5539_v7, 0.0  ;;  %v5430_v50 = vadd.f32 %v5429_v53, %v5317_v43  ;;  %8319 = vmatpush1.bf16.msra.mxu1 %v12157_v17  ;;  %v15666_v29 = vpack.c.bf16 %v5634_v42, %v5626_v14  ;;  %v5762_v31 = vmul.f32 %v5634_v42, %v5634_v42  ;;  %v18053_v52 = vld [vmem:[#allocation52_spill] sm:$0xff]  ;;  %v18054_v44 = vld [vmem:[#allocation110_spill] sm:$0xff]  ;;  %v18064_v19 = vld [vmem:[#allocation59_spill] sm:$0xff] }
 0x40c   : > { %v5542_v33 = vpop.f32.mrf.mxu1  ;;  %v5541_v62 = vadd.f32 %v5540_v54, %v5428_v20  ;;  %5886 = vadd.xlane.f32.xlu0 %v5885_v18  ;;  %v5431_v35 = vpop.f32.mrf.mxu0  ;;  %8320 = vmatprep.subr.bf16.mxu1 %v12165_v47  ;;  %v5893_v58 = vadd.f32 %v15374_v61, %v5761_v57  ;;  %v5329_v24 = vadd.f32 %v18054_v44, %v18053_v52  ;;  %v18055_v56 = vld [vmem:[#allocation58_spill] sm:$0xff] }
 0x40d   : > { %v5769_v30 = vmul.f32 %v15664_v46, %v15664_v46  ;;  %v5543_v51 = vadd.f32 %v5542_v33, %v5430_v50  ;;  %8440 = vmatpush1.bf16.msra.mxu0 %v12160_v36  ;;  %v5432_v1 = vadd.f32 %v5431_v35, %v5319_v63  ;;  %8138 = vmatprep.mubr.bf16.mxu1 %v15666_v29  ;;  %v18056_v43 = vld [vmem:[#allocation30_spill] sm:$0xff]  ;;  %v18058_v33 = vld [vmem:[#allocation131_spill] sm:$0xff] }
 0x40e   : > { %v5544_v5 = vpop.f32.mrf.mxu1  ;;  %v5642_v9 = vmax.f32 %v5541_v62, 0.0  ;;  %v5435_v34 = vpop.f32.mrf.mxu0  ;;  %8139 = vmatmul.mubr.bf16.gmra.mxu1 %v15669_v13  ;;  %8441 = vmatprep.subr.bf16.mxu0 %v12168_v6  ;;  %v5894_v39 = vadd.f32 %v5893_v58, %v5762_v31  ;;  %v5333_v49 = vadd.f32 %v18057_v26, %v18056_v43  ;;  %v12180_v42 = vld [vmem:[#allocation7 + $0x5ac] ss:$16 sps:$4 sm:$0xff]   ;;  %v12175_v20 = vld [vmem:[#allocation7 + $0x228] ss:$16 sps:$4 sm:$0xff]  }
 0x40f   : > { %v5649_v15 = vmax.f32 %v5543_v51, 0.0  ;;  %v5545_v61 = vadd.f32 %v5544_v5, %v5432_v1  ;;  %v5436_v40 = vadd.f32 %v5435_v34, %v5323_v45  ;;  %8321 = vmatpush1.bf16.msra.mxu1 %v12163_v48  ;;  %v5902_v16 = vadd.f32 %v18048_v2, %v5769_v30  ;;  %8272 = vmatmul.mubr.bf16.gmra.mxu0 %v18052_v60  ;;  %v12178_v30 = vld [vmem:[#allocation7 + $0x5a8] ss:$16 sps:$4 sm:$0xff]   ;;  %v12183_v5 = vld [vmem:[#allocation7 + $0x20c] ss:$16 sps:$4 sm:$0xff]   ;;  %v18062_v2 = vld [vmem:[#allocation65_spill] sm:$0xff] }
 0x410   : > { %v5548_v41 = vpop.f32.mrf.mxu1  ;;  %v5770_v14 = vmul.f32 %v5642_v9, %v5642_v9  ;;  %5895 = vadd.xlane.f32.xlu1 %v5894_v39  ;;  %v5437_v28 = vpop.f32.mrf.mxu0  ;;  %8281 = vmatprep.mubr.bf16.mxu0 %v18055_v56  ;;  %v18066_v60 = vld [vmem:[#allocation119_spill] sm:$0xff]  ;;  %v18069_v56 = vld [vmem:[#allocation133_spill] sm:$0xff] }
 0x411   : > { %v5777_v25 = vmul.f32 %v5649_v15, %v5649_v15  ;;  %v5650_v27 = vmax.f32 %v5545_v61, 0.0  ;;  %v5549_v17 = vadd.f32 %v5548_v41, %v5436_v40  ;;  %8442 = vmatpush2.bf16.msra.mxu0 %v12166_v12  ;;  %v5438_v47 = vadd.f32 %v5437_v28, %v5325_v4  ;;  %8322 = vmatprep.subr.bf16.mxu1 %v12171_v59  ;;  %v12186_v12 = vld [vmem:[#allocation7 + $0x58c] ss:$16 sps:$4 sm:$0xff]   ;;  %v18061_v41 = vld [vmem:[#allocation69_spill] sm:$0xff] }
 0x412   : > { %v5550_v22 = vpop.f32.mrf.mxu1  ;;  %v5439_v63 = vpop.f32.mrf.mxu0  ;;  %8443 = vmatprep.subr.bf16.mxu0 %v12174_v0  ;;  %v5903_v57 = vadd.f32 %v5902_v16, %v5770_v14  ;;  %v15692_v18 = vpack.c.bf16 %v5649_v15, %v15664_v46  ;;  %v12181_v0 = vld [vmem:[#allocation7 + $0x208] ss:$16 sps:$4 sm:$0xff]   ;;  %v18059_v15 = vld [vmem:[#allocation115_spill] sm:$0xff] }
 0x413   : > { %v15687_v7 = vmax.f32 %v5549_v17, 0.0  ;;  %v5440_v54 = vadd.f32 %v5439_v63, %v5327_v3  ;;  %8323 = vmatpush1.bf16.msra.mxu1 %v12169_v23  ;;  %v15689_v45 = vpack.c.bf16 %v5650_v27, %v5642_v9  ;;  %v5778_v53 = vmul.f32 %v5650_v27, %v5650_v27  ;;  %v18060_v40 = vld [vmem:[#allocation72_spill] sm:$0xff]  ;;  %v18063_v16 = vld [vmem:[#allocation74_spill] sm:$0xff]  ;;  %v18068_v17 = vld [vmem:[#allocation25_spill] sm:$0xff] }
 0x414   : > { %v5552_v36 = vpop.f32.mrf.mxu1  ;;  %v5551_v6 = vadd.f32 %v5550_v22, %v5438_v47  ;;  %5904 = vadd.xlane.f32.xlu0 %v5903_v57  ;;  %v5441_v50 = vpop.f32.mrf.mxu0  ;;  %8324 = vmatprep.subr.bf16.mxu1 %v12177_v37  ;;  %v5911_v48 = vadd.f32 %v18058_v33, %v5777_v25  ;;  %v5335_v23 = vadd.f32 %v18061_v41, %v18060_v40  ;;  %v12189_v3 = vld [vmem:[#allocation7 + $0x3ec] ss:$16 sps:$4 sm:$0xff]   ;;  %v12184_v27 = vld [vmem:[#allocation7 + $0x588] ss:$16 sps:$4 sm:$0xff]  }
 0x415   : > { %v5785_v31 = vmul.f32 %v15687_v7, %v15687_v7  ;;  %v5553_v62 = vadd.f32 %v5552_v36, %v5440_v54  ;;  %8444 = vmatpush2.bf16.msra.mxu0 %v12172_v38  ;;  %v5442_v35 = vadd.f32 %v5441_v50, %v5329_v24  ;;  %8148 = vmatprep.mubr.bf16.mxu1 %v15689_v45  ;;  %v18065_v14 = vld [vmem:[#allocation32_spill] sm:$0xff]  ;;  %v18070_v50 = vld [vmem:[#allocation31_spill] sm:$0xff] }
 0x416   : > { %v5554_v58 = vpop.f32.mrf.mxu1  ;;  %v5658_v51 = vmax.f32 %v5551_v6, 0.0  ;;  %v5445_v1 = vpop.f32.mrf.mxu0  ;;  %8149 = vmatmul.mubr.bf16.gmra.mxu1 %v15692_v18  ;;  %8445 = vmatprep.subr.bf16.mxu0 %v12180_v42  ;;  %v5912_v46 = vadd.f32 %v5911_v48, %v5778_v53  ;;  %v5337_v10 = vadd.f32 %v18063_v16, %v18062_v2  ;;  %v5339_v28 = vadd.f32 %v18066_v60, %v18065_v14  ;;  %v18067_v24 = vld [vmem:[#allocation120_spill] sm:$0xff] }
 0x417   : > { %v5665_v9 = vmax.f32 %v5553_v62, 0.0  ;;  %v5555_v34 = vadd.f32 %v5554_v58, %v5442_v35  ;;  %v5446_v39 = vadd.f32 %v5445_v1, %v5333_v49  ;;  %8325 = vmatpush1.bf16.msra.mxu1 %v12175_v20  ;;  %v5920_v61 = vadd.f32 %v18059_v15, %v5785_v31  ;;  %8282 = vmatmul.mubr.bf16.gmra.mxu0 %v18064_v19  ;;  %v12192_v49 = vld [vmem:[#allocation7 + $0x56c] ss:$16 sps:$4 sm:$0xff]   ;;  %v12187_v54 = vld [vmem:[#allocation7 + $0x3e8] ss:$16 sps:$4 sm:$0xff]   ;;  %v18072_v15 = vld [vmem:[#allocation67_spill] sm:$0xff] }
 0x418   : > { %v5558_v59 = vpop.f32.mrf.mxu1  ;;  %v5786_v4 = vmul.f32 %v5658_v51, %v5658_v51  ;;  %5913 = vadd.xlane.f32.xlu1 %v5912_v46  ;;  %v5447_v55 = vpop.f32.mrf.mxu0  ;;  %8291 = vmatprep.mubr.bf16.mxu0 %v18067_v24  ;;  %v5343_v22 = vadd.f32 %v18069_v56, %v18068_v17  ;;  %v12190_v58 = vld [vmem:[#allocation7 + $0x568] ss:$16 sps:$4 sm:$0xff]   ;;  %v12195_v1 = vld [vmem:[#allocation7 + $0x3cc] ss:$16 sps:$4 sm:$0xff]  }
 0x419   : > { %v5793_v37 = vmul.f32 %v5665_v9, %v5665_v9  ;;  %v5666_v52 = vmax.f32 %v5555_v34, 0.0  ;;  %v5559_v44 = vadd.f32 %v5558_v59, %v5446_v39  ;;  %8446 = vmatpush2.bf16.msra.mxu0 %v12178_v30  ;;  %v5448_v38 = vadd.f32 %v5447_v55, %v5335_v23  ;;  %8326 = vmatprep.subr.bf16.mxu1 %v12183_v5  ;;  %v12198_v46 = vld [vmem:[#allocation7 + $0x54c] ss:$16 sps:$4 sm:$0xff]   ;;  %v12193_v39 = vld [vmem:[#allocation7 + $0x3c8] ss:$16 sps:$4 sm:$0xff]  }
 0x41a   : > { %v5560_v25 = vpop.f32.mrf.mxu1  ;;  %v5449_v43 = vpop.f32.mrf.mxu0  ;;  %8447 = vmatprep.subr.bf16.mxu0 %v12186_v12  ;;  %v5921_v26 = vadd.f32 %v5920_v61, %v5786_v4  ;;  %v15715_v20 = vpack.c.bf16 %v5665_v9, %v15687_v7  ;;  %v18071_v59 = vld [vmem:[#allocation24_spill] sm:$0xff]  ;;  %v18075_v23 = vld [vmem:[#allocation78_spill] sm:$0xff] }
 0x41b   : > { %v15710_v47 = vmax.f32 %v5559_v44, 0.0  ;;  %v5450_v63 = vadd.f32 %v5449_v43, %v5337_v10  ;;  %8327 = vmatpush1.bf16.msra.mxu1 %v12181_v0  ;;  %v15712_v42 = vpack.c.bf16 %v5666_v52, %v5658_v51  ;;  %v5794_v36 = vmul.f32 %v5666_v52, %v5666_v52  ;;  %v18073_v61 = vld [vmem:[#allocation68_spill] sm:$0xff]  ;;  %v18076_v10 = vld [vmem:[#allocation71_spill] sm:$0xff]  ;;  %v18077_v55 = vld [vmem:[#allocation134_spill] sm:$0xff] }
 0x41c   : > { %v5562_v57 = vpop.f32.mrf.mxu1  ;;  %v5561_v53 = vadd.f32 %v5560_v25, %v5448_v38  ;;  %5922 = vadd.xlane.f32.xlu0 %v5921_v26  ;;  %v5451_v6 = vpop.f32.mrf.mxu0  ;;  %8328 = vmatprep.subr.bf16.mxu1 %v12189_v3  ;;  %v5929_v33 = vadd.f32 %v18070_v50, %v5793_v37  ;;  %v5345_v40 = vadd.f32 %v18073_v61, %v18072_v15  ;;  %v18074_v41 = vld [vmem:[#allocation76_spill] sm:$0xff]  ;;  %v18078_v3 = vld [vmem:[#allocation51_spill] sm:$0xff]  ;;  %v18080_v25 = vld [vmem:[#allocation21_spill] sm:$0xff] }
 0x41d   : > { %v5801_v48 = vmul.f32 %v15710_v47, %v15710_v47  ;;  %v5563_v31 = vadd.f32 %v5562_v57, %v5450_v63  ;;  %8448 = vmatpush2.bf16.msra.mxu0 %v12184_v27  ;;  %v5452_v62 = vadd.f32 %v5451_v6, %v5339_v28  ;;  %8158 = vmatprep.mubr.bf16.mxu1 %v15712_v42  ;;  %v12201_v19 = vld [vmem:[#allocation7 + $0x3ac] ss:$16 sps:$4 sm:$0xff]   ;;  %v12196_v24 = vld [vmem:[#allocation7 + $0x548] ss:$16 sps:$4 sm:$0xff]   ;;  %v18081_v27 = vld [vmem:[#allocation135_spill] sm:$0xff] }
 0x41e   : > { %v5564_v35 = vpop.f32.mrf.mxu1  ;;  %v5674_v30 = vmax.f32 %v5561_v53, 0.0  ;;  %v5455_v51 = vpop.f32.mrf.mxu0  ;;  %8159 = vmatmul.mubr.bf16.gmra.mxu1 %v15715_v20  ;;  %8449 = vmatprep.subr.bf16.mxu0 %v12192_v49  ;;  %v5930_v7 = vadd.f32 %v5929_v33, %v5794_v36  ;;  %v5347_v2 = vadd.f32 %v18075_v23, %v18074_v41  ;;  %v5349_v14 = vadd.f32 %v18078_v3, %v18077_v55  ;;  %v18079_v52 = vld [vmem:[#allocation60_spill] sm:$0xff]  ;;  %v18082_v33 = vld [vmem:[#allocation41_spill] sm:$0xff]  ;;  %v18085_v61 = vld [vmem:[#allocation22_spill] sm:$0xff] }
 0x41f   : > { %v5681_v5 = vmax.f32 %v5563_v31, 0.0  ;;  %v5565_v12 = vadd.f32 %v5564_v35, %v5452_v62  ;;  %v5456_v9 = vadd.f32 %v5455_v51, %v5343_v22  ;;  %8329 = vmatpush2.bf16.msra.mxu1 %v12187_v54  ;;  %v5938_v0 = vadd.f32 %v18071_v59, %v5801_v48  ;;  %8292 = vmatmul.mubr.bf16.gmra.mxu0 %v18076_v10  ;;  %v12204_v43 = vld [vmem:[#allocation7 + $0x52c] ss:$16 sps:$4 sm:$0xff]   ;;  %v12199_v54 = vld [vmem:[#allocation7 + $0x3a8] ss:$16 sps:$4 sm:$0xff]   ;;  %v18083_v59 = vld [vmem:[#allocation121_spill] sm:$0xff] }
 0x420   : > { %v5568_v34 = vpop.f32.mrf.mxu1  ;;  %v5802_v16 = vmul.f32 %v5674_v30, %v5674_v30  ;;  %5931 = vadd.xlane.f32.xlu1 %v5930_v7  ;;  %v5457_v4 = vpop.f32.mrf.mxu0  ;;  %8301 = vmatprep.mubr.bf16.mxu0 %v18079_v52  ;;  %v5353_v17 = vadd.f32 %v18081_v27, %v18080_v25  ;;  %v18084_v15 = vld [vmem:[#allocation53_spill] sm:$0xff]  ;;  %v18086_v23 = vld [vmem:[#allocation70_spill] sm:$0xff] }
 0x421   : > { %v5809_v60 = vmul.f32 %v5681_v5, %v5681_v5  ;;  %v5682_v28 = vmax.f32 %v5565_v12, 0.0  ;;  %v5569_v37 = vadd.f32 %v5568_v34, %v5456_v9  ;;  %8450 = vmatpush2.bf16.msra.mxu0 %v12190_v58  ;;  %v5458_v56 = vadd.f32 %v5457_v4, %v5345_v40  ;;  %8330 = vmatprep.subr.bf16.mxu1 %v12195_v1  ;;  %v12207_v1 = vld [vmem:[#allocation7 + $0x38c] ss:$16 sps:$4 sm:$0xff]   ;;  %v18087_v10 = vld [vmem:[#allocation29_spill] sm:$0xff] }
 0x422   : > { %v5570_v44 = vpop.f32.mrf.mxu1  ;;  %v5459_v22 = vpop.f32.mrf.mxu0  ;;  %8451 = vmatprep.subr.bf16.mxu0 %v12198_v46  ;;  %v5939_v38 = vadd.f32 %v5938_v0, %v5802_v16  ;;  %v15736_v53 = vpack.c.bf16 %v5681_v5, %v15710_v47  ;;  %v12210_v46 = vld [vmem:[#allocation7 + $0x50c] ss:$16 sps:$4 sm:$0xff]   ;;  %v5355_v40 = vadd.f32 %v18085_v61, %v18084_v15 }
 0x423   : > { %v5689_v26 = vmax.f32 %v5569_v37, 0.0  ;;  %v5460_v49 = vadd.f32 %v5459_v22, %v5347_v2  ;;  %8331 = vmatpush2.bf16.msra.mxu1 %v12193_v39  ;;  %v15733_v57 = vpack.c.bf16 %v5682_v28, %v5674_v30  ;;  %v5810_v36 = vmul.f32 %v5682_v28, %v5682_v28  ;;  %v12202_v30 = vld [vmem:[#allocation7 + $0x528] ss:$16 sps:$4 sm:$0xff]   ;;  %v12213_v16 = vld [vmem:[#allocation7 + $0x36c] ss:$16 sps:$4 sm:$0xff]  }
 0x424   : > { %v5572_v63 = vpop.f32.mrf.mxu1  ;;  %v5571_v6 = vadd.f32 %v5570_v44, %v5458_v56  ;;  %5940 = vadd.xlane.f32.xlu0 %v5939_v38  ;;  %v5461_v50 = vpop.f32.mrf.mxu0  ;;  %8332 = vmatprep.subr.bf16.mxu1 %v12201_v19  ;;  %v5947_v48 = vadd.f32 %v18082_v33, %v5809_v60  ;;  %v12205_v39 = vld [vmem:[#allocation7 + $0x388] ss:$16 sps:$4 sm:$0xff]   ;;  %v12273_v56 = vld [vmem:[#allocation8 + $0x74] ss:$8 sps:$4 sm:$0xff]  }
 0x425   : > { %v5817_v31 = vmul.f32 %v5689_v26, %v5689_v26  ;;  %v5573_v62 = vadd.f32 %v5572_v63, %v5460_v49  ;;  %8452 = vmatpush2.bf16.msra.mxu0 %v12196_v24  ;;  %v5462_v35 = vadd.f32 %v5461_v50, %v5349_v14  ;;  %8168 = vmatprep.mubr.bf16.mxu1 %v15733_v57  ;;  %v18088_v4 = vld [vmem:[#allocation26_spill] sm:$0xff]  ;;  %v18089_v60 = vld [vmem:[#allocation56_spill] sm:$0xff] }
 0x426   : > { %v5574_v58 = vpop.f32.mrf.mxu1  ;;  %v5690_v51 = vmax.f32 %v5571_v6, 0.0  ;;  %v5465_v7 = vpop.f32.mrf.mxu0  ;;  %8169 = vmatmul.mubr.bf16.gmra.mxu1 %v15736_v53  ;;  %8453 = vmatprep.subr.bf16.mxu0 %v12204_v43  ;;  %v5948_v47 = vadd.f32 %v5947_v48, %v5810_v36  ;;  %v5357_v19 = vadd.f32 %v18088_v4, %v18087_v10  ;;  %v12208_v37 = vld [vmem:[#allocation7 + $0x508] ss:$16 sps:$4 sm:$0xff]   ;;  %v12219_v61 = vld [vmem:[#allocation7 + $0x32c] ss:$16 sps:$4 sm:$0xff]  }
 0x427   : > { %v5697_v5 = vmax.f32 %v5573_v62, 0.0  ;;  %v5575_v12 = vadd.f32 %v5574_v58, %v5462_v35  ;;  %v5466_v9 = vadd.f32 %v5465_v7, %v5353_v17  ;;  %8333 = vmatpush2.bf16.msra.mxu1 %v12199_v54  ;;  %v5956_v0 = vadd.f32 %v18083_v59, %v5817_v31  ;;  %8302 = vmatmul.mubr.bf16.gmra.mxu0 %v18086_v23  ;;  %v18090_v52 = vld [vmem:[#allocation34_spill] sm:$0xff]  ;;  %v18091_v44 = vld [vmem:[#allocation20_spill] sm:$0xff] }
 0x428   : > { %v5578_v34 = vpop.f32.mrf.mxu1  ;;  %v5818_v41 = vmul.f32 %v5690_v51, %v5690_v51  ;;  %5949 = vadd.xlane.f32.xlu1 %v5948_v47  ;;  %v5467_v2 = vpop.f32.mrf.mxu0  ;;  %8457 = vmatprep.mubr.bf16.mxu0 %v18089_v60  ;;  %v5359_v24 = vadd.f32 %v18091_v44, %v18090_v52  ;;  %v12211_v63 = vld [vmem:[#allocation7 + $0x368] ss:$16 sps:$4 sm:$0xff]  }
 0x429   : > { %v5825_v55 = vmul.f32 %v5697_v5, %v5697_v5  ;;  %v5698_v3 = vmax.f32 %v5575_v12, 0.0  ;;  %v5579_v14 = vadd.f32 %v5578_v34, %v5466_v9  ;;  %8454 = vmatpush2.bf16.msra.mxu0 %v12202_v30  ;;  %v5468_v25 = vadd.f32 %v5467_v2, %v5355_v40  ;;  %8334 = vmatprep.subr.bf16.mxu1 %v12207_v1  ;;  %v18092_v33 = vld [vmem:[#allocation126_spill] sm:$0xff]  ;;  %v18093_v9 = vld [vmem:[#allocation40_spill] sm:$0xff] }
 0x42a   : > { %v5580_v28 = vpop.f32.mrf.mxu1  ;;  %v5469_v27 = vpop.f32.mrf.mxu0  ;;  %8455 = vmatprep.subr.bf16.mxu0 %v12210_v46  ;;  %v5957_v17 = vadd.f32 %v5956_v0, %v5818_v41  ;;  %v15752_v36 = vpack.c.bf16 %v5697_v5, %v5689_v26  ;;  %v12216_v30 = vld [vmem:[#allocation7 + $0x34c] ss:$16 sps:$4 sm:$0xff]   ;;  %v12271_v26 = vld [vmem:[#allocation8 + $0x70] ss:$8 sps:$4 sm:$0xff]  }
 0x42b   : > { %v5705_v22 = vmax.f32 %v5579_v14, 0.0  ;;  %v5470_v38 = vadd.f32 %v5469_v27, %v5357_v19  ;;  %8335 = vmatpush2.bf16.msra.mxu1 %v12205_v39  ;;  %v15750_v49 = vpack.c.bf16 %v5698_v3, %v5690_v51  ;;  %v5826_v54 = vmul.f32 %v5698_v3, %v5698_v3  ;;  %v12214_v12 = vld [vmem:[#allocation7 + $0x348] ss:$16 sps:$4 sm:$0xff]   ;;  %v12276_v39 = vld [vmem:[#allocation8 + $0x64] ss:$8 sps:$4 sm:$0xff]  }
 0x42c   : > { %v5582_v43 = vpop.f32.mrf.mxu1  ;;  %v5581_v6 = vadd.f32 %v5580_v28, %v5468_v25  ;;  %5958 = vadd.xlane.f32.xlu0 %v5957_v17  ;;  %v5471_v50 = vpop.f32.mrf.mxu0  ;;  %8336 = vmatprep.subr.bf16.mxu1 %v12213_v16  ;;  %v5965_v48 = vadd.f32 %v18092_v33, %v5825_v55  ;;  %v18094_v15 = vld [vmem:[#allocation104_spill] sm:$0xff]  ;;  %v18098_v33 = vld [vmem:[#allocation111_spill] sm:$0xff] }
 0x42d   : > { %v5833_v31 = vmul.f32 %v5705_v22, %v5705_v22  ;;  %v5583_v62 = vadd.f32 %v5582_v43, %v5470_v38  ;;  %8456 = vmatpush2.bf16.msra.mxu0 %v12208_v37  ;;  %v5472_v35 = vadd.f32 %v5471_v50, %v5359_v24  ;;  %8178 = vmatprep.mubr.bf16.mxu1 %v15750_v49  ;;  %v18095_v23 = vld [vmem:[#allocation112_spill] sm:$0xff]  ;;  %v18096_v37 = vld [vmem:[#allocation50_spill] sm:$0xff] }
 0x42e   : > { %v5584_v58 = vpop.f32.mrf.mxu1  ;;  %v5706_v51 = vmax.f32 %v5581_v6, 0.0  ;;  %8179 = vmatmul.mubr.bf16.gmra.mxu1 %v15752_v36  ;;  %v5966_v7 = vadd.f32 %v5965_v48, %v5826_v54  ;;  %9499 = vmatprep.subr.bf16.mxu0 %v12273_v56  ;;  %v7781_v46 = vpop.f32.mrf.mxu0  ;;  %v12274_v19 = vld [vmem:[#allocation8 + $0x60] ss:$8 sps:$4 sm:$0xff]   ;;  %v12222_v56 = vld [vmem:[#allocation7 + $0x30c] ss:$16 sps:$4 sm:$0xff]  }
 0x42f   : > { %v5713_v47 = vmax.f32 %v5583_v62, 0.0  ;;  %v5585_v1 = vadd.f32 %v5584_v58, %v5472_v35  ;;  %8337 = vmatpush2.bf16.msra.mxu1 %v12211_v63  ;;  %v5974_v34 = vadd.f32 %v18093_v9, %v5833_v31  ;;  %v12217_v60 = vld [vmem:[#allocation7 + $0x328] ss:$16 sps:$4 sm:$0xff]   ;;  %v12279_v38 = vld [vmem:[#allocation8 + $0x54] ss:$8 sps:$4 sm:$0xff]   ;;  %v18099_v62 = vld [vmem:[#allocation127_spill] sm:$0xff] }
 0x430   : > { %v7894_v5 = vpop.f32.mrf.mxu1  ;;  %v5834_v59 = vmul.f32 %v5706_v51, %v5706_v51  ;;  %8458 = vmatmul.mubr.bf16.vlgmr.msra.gmra.mxu0 %v18094_v15  ;;  %5967 = vadd.xlane.f32.xlu1 %v5966_v7  ;;  %v7783_v2 = vpop.f32.mrf.mxu0  ;;  %v12220_v54 = vld [vmem:[#allocation7 + $0x308] ss:$16 sps:$4 sm:$0xff]   ;;  %v12225_v48 = vld [vmem:[#allocation7 + $0x6ec] ss:$16 sps:$4 sm:$0xff]   ;;  %v18100_v9 = vld [vmem:[#allocation75_spill] sm:$0xff] }
 0x431   : > { %v15758_v0 = vadd.f32 %v7894_v5, %v7781_v46  ;;  %v5841_v40 = vmul.f32 %v5713_v47, %v5713_v47  ;;  %v5714_v41 = vmax.f32 %v5585_v1, 0.0  ;;  %8467 = vmatprep.mubr.bf16.mxu0 %v18095_v23  ;;  %8338 = vmatprep.subr.bf16.mxu1 %v12216_v30  ;;  %v15767_v44 = vpack.c.bf16 %v5713_v47, %v5705_v22  ;;  %v18097_v22 = vld [vmem:[#allocation77_spill] sm:$0xff]  ;;  %v12282_v31 = vld [vmem:[#allocation8 + $0x44] ss:$8 sps:$4 sm:$0xff]  }
 0x432   : > { %v7896_v16 = vpop.f32.mrf.mxu1  ;;  %v5975_v4 = vadd.f32 %v5974_v34, %v5834_v59  ;;  %9500 = vmatpush1.bf16.msra.mxu0 %v12271_v26  ;;  %v7785_v55 = vpop.f32.mrf.mxu0  ;;  %v12277_v6 = vld [vmem:[#allocation8 + $0x50] ss:$8 sps:$4 sm:$0xff]   ;;  %v12228_v1 = vld [vmem:[#allocation7 + $0x6cc] ss:$16 sps:$4 sm:$0xff]  }
 0x433   : > { %v15762_v10 = vadd.f32 %v7896_v16, %v7783_v2  ;;  %8339 = vmatpush2.bf16.msra.mxu1 %v12214_v12  ;;  %v15764_v14 = vpack.c.bf16 %v5714_v41, %v5706_v51  ;;  %v5842_v28 = vmul.f32 %v5714_v41, %v5714_v41  ;;  %v5983_v52 = vadd.f32 %v18096_v37, %v5841_v40  ;;  %v12223_v26 = vld [vmem:[#allocation7 + $0x6e8] ss:$16 sps:$4 sm:$0xff]   ;;  %v12285_v34 = vld [vmem:[#allocation8 + $0x34] ss:$8 sps:$4 sm:$0xff]   ;;  %v18102_v41 = vld [vmem:[#allocation123_spill] sm:$0xff] }
 0x434   : > { %v7898_v3 = vpop.f32.mrf.mxu1  ;;  %9501 = vmatprep.subr.bf16.mxu0 %v12276_v39  ;;  %5976 = vadd.xlane.f32.xlu0 %v5975_v4  ;;  %v15771_v25 = vpop.f32.mrf.mxu0  ;;  %v12280_v12 = vld [vmem:[#allocation8 + $0x40] ss:$8 sps:$4 sm:$0xff]   ;;  %v18101_v15 = vld [vmem:[#allocation81_spill] sm:$0xff]  ;;  %v12231_v23 = vld [vmem:[#allocation7 + $0x6ac] ss:$16 sps:$4 sm:$0xff]  }
 0x435   : > { %v15769_v24 = vadd.f32 %v7898_v3, %v7785_v55  ;;  %8340 = vmatprep.subr.bf16.mxu1 %v12219_v61  ;;  %8188 = vmatprep.mubr.bf16.mxu1 %v15764_v14  ;;  %v5984_v17 = vadd.f32 %v5983_v52, %v5842_v28  ;;  %v12226_v61 = vld [vmem:[#allocation7 + $0x6c8] ss:$16 sps:$4 sm:$0xff]   ;;  %v12288_v3 = vld [vmem:[#allocation8 + $0x24] ss:$8 sps:$4 sm:$0xff]  }
 0x436   : > { %v15773_v27 = vpop.f32.mrf.mxu1  ;;  %8189 = vmatmul.mubr.bf16.gmra.mxu1 %v15767_v44  ;;  %9502 = vmatpush1.bf16.msra.mxu0 %v12274_v19  ;;  %v7791_v43 = vpop.f32.mrf.mxu0  ;;  %v18103_v2 = vld [vmem:[#allocation130_spill] sm:$0xff] }
 0x437   : > { %8341 = vmatpush2.bf16.msra.mxu1 %v12217_v60  ;;  %8344 = vmatprep.mubr.bf16.mxu1 %v18097_v22  ;;  %v12283_v19 = vld [vmem:[#allocation8 + $0x30] ss:$8 sps:$4 sm:$0xff]   ;;  %v12291_v22 = vld [vmem:[#allocation8 + $0x14] ss:$8 sps:$4 sm:$0xff]  }
 0x438   : > { %v7904_v63 = vpop.f32.mrf.mxu1  ;;  %8468 = vmatmul.mubr.bf16.gmra.mxu0 %v18098_v33  ;;  %5985 = vadd.xlane.f32.xlu1 %v5984_v17  ;;  %v7793_v35 = vpop.f32.mrf.mxu0  ;;  %v12229_v37 = vld [vmem:[#allocation7 + $0x6a8] ss:$16 sps:$4 sm:$0xff]   ;;  %v12234_v17 = vld [vmem:[#allocation7 + $0x68c] ss:$16 sps:$4 sm:$0xff]   ;;  %v18105_v33 = vld [vmem:[#allocation85_spill] sm:$0xff] }
 0x439   : > { %v15778_v50 = vadd.f32 %v7904_v63, %v7791_v43  ;;  %8477 = vmatprep.mubr.bf16.mxu0 %v18099_v62  ;;  %8342 = vmatprep.subr.bf16.mxu1 %v12222_v56  ;;  %v12286_v43 = vld [vmem:[#allocation8 + $0x20] ss:$8 sps:$4 sm:$0xff]  }
 0x43a   : > { %v7906_v58 = vpop.f32.mrf.mxu1  ;;  %9503 = vmatprep.subr.bf16.mxu0 %v12279_v38  ;;  %v7795_v51 = vpop.f32.mrf.mxu0  ;;  %v18104_v63 = vld [vmem:[#allocation79_spill] sm:$0xff]  ;;  %v18106_v62 = vld [vmem:[#allocation128_spill] sm:$0xff] }
 0x43b   : > { %v15782_v30 = vadd.f32 %v7906_v58, %v7793_v35  ;;  %8343 = vmatpush2.bf16.msra.mxu1 %v12220_v54  ;;  %9504 = vmatpush1.bf16.msra.mxu0 %v12277_v6  ;;  %v12237_v35 = vld [vmem:[#allocation7 + $0x66c] ss:$16 sps:$4 sm:$0xff]  }
 0x43c   : > { %v7908_v7 = vpop.f32.mrf.mxu1  ;;  %8538 = vmatprep.subr.bf16.mxu1 %v12225_v48  ;;  %9505 = vmatprep.subr.bf16.mxu0 %v12282_v31  ;;  %v15786_v46 = vpop.f32.mrf.mxu0  ;;  %v12232_v48 = vld [vmem:[#allocation7 + $0x688] ss:$16 sps:$4 sm:$0xff]  }
 0x43d   : > { %v15784_v47 = vadd.f32 %v7908_v7, %v7795_v51  ;;  %v18107_v58 = vld [vmem:[#allocation116_spill] sm:$0xff] }
 0x43e   : > { %v15788_v5 = vpop.f32.mrf.mxu1  ;;  %8345 = vmatmul.mubr.bf16.vlgmr.msra.gmra.mxu1 %v18100_v9  ;;  %v7801_v39 = vpop.f32.mrf.mxu0 }
 0x43f   : > { %8539 = vmatpush1.bf16.msra.mxu1 %v12223_v26  ;;  %8354 = vmatprep.mubr.bf16.mxu1 %v18101_v15  ;;  %v12289_v26 = vld [vmem:[#allocation8 + $0x10] ss:$8 sps:$4 sm:$0xff]   ;;  %v12240_v15 = vld [vmem:[#allocation7 + $0x64c] ss:$16 sps:$4 sm:$0xff]  }
 0x440   : > { %v7914_v59 = vpop.f32.mrf.mxu1  ;;  %8478 = vmatmul.mubr.bf16.gmra.mxu0 %v18102_v41  ;;  %8540 = vmatprep.subr.bf16.mxu1 %v12228_v1  ;;  %v7803_v16 = vpop.f32.mrf.mxu0 }
 0x441   : > { %v15792_v40 = vadd.f32 %v7914_v59, %v7801_v39  ;;  %8487 = vmatprep.mubr.bf16.mxu0 %v18103_v2  ;;  %9506 = vmatpush1.bf16.msra.mxu0 %v12280_v12  ;;  %v12294_v12 = vld [vmem:[#allocation8 + $0x4] ss:$8 sps:$4 sm:$0xff]   ;;  %v12235_v39 = vld [vmem:[#allocation7 + $0x668] ss:$16 sps:$4 sm:$0xff]  }
 0x442   : > { %v7916_v4 = vpop.f32.mrf.mxu1  ;;  %9507 = vmatprep.subr.bf16.mxu0 %v12285_v34  ;;  %v7805_v60 = vpop.f32.mrf.mxu0  ;;  %v18108_v2 = vld [vmem:[#allocation83_spill] sm:$0xff] }
 0x443   : > { %v15796_v55 = vadd.f32 %v7916_v4, %v7803_v16  ;;  %8541 = vmatpush1.bf16.msra.mxu1 %v12226_v61  ;;  %v12297_v16 = vld [vmem:[#allocation8 + $0xf4] ss:$8 sps:$4 sm:$0xff]  }
 0x444   : > { %v7918_v28 = vpop.f32.mrf.mxu1  ;;  %8542 = vmatprep.subr.bf16.mxu1 %v12231_v23  ;;  %v15800_v56 = vpop.f32.mrf.mxu0  ;;  %v12292_v23 = vld [vmem:[#allocation8] ss:$8 sps:$4 sm:$0xff]  }
 0x445   : > { %v15798_v52 = vadd.f32 %v7918_v28, %v7805_v60  ;;  %9508 = vmatpush1.bf16.msra.mxu0 %v12283_v19  ;;  %v12238_v60 = vld [vmem:[#allocation7 + $0x648] ss:$16 sps:$4 sm:$0xff]  }
 0x446   : > { %v15802_v38 = vpop.f32.mrf.mxu1  ;;  %8355 = vmatmul.mubr.bf16.gmra.mxu1 %v18104_v63  ;;  %9509 = vmatprep.subr.bf16.mxu0 %v12288_v3  ;;  %v7811_v54 = vpop.f32.mrf.mxu0  ;;  %v18109_v3 = vld [vmem:[#allocation84_spill] sm:$0xff] }
 0x447   : > { %8543 = vmatpush1.bf16.msra.mxu1 %v12229_v37  ;;  %8364 = vmatprep.mubr.bf16.mxu1 %v18105_v33  ;;  %v18111_v37 = vld [vmem:[#allocation132_spill] sm:$0xff] }
 0x448   : > { %v7924_v6 = vpop.f32.mrf.mxu1  ;;  %8488 = vmatmul.mubr.bf16.gmra.mxu0 %v18106_v62  ;;  %8544 = vmatprep.subr.bf16.mxu1 %v12234_v17  ;;  %v7813_v51 = vpop.f32.mrf.mxu0  ;;  %v12243_v17 = vld [vmem:[#allocation7 + $0x62c] ss:$16 sps:$4 sm:$0xff]  }
 0x449   : > { %v15806_v31 = vadd.f32 %v7924_v6, %v7811_v54  ;;  %8497 = vmatprep.mubr.bf16.mxu0 %v18107_v58  ;;  %9510 = vmatpush1.bf16.msra.mxu0 %v12286_v43  ;;  %v18112_v43 = vld [vmem:[#allocation35_spill] sm:$0xff]  ;;  %v12295_v54 = vld [vmem:[#allocation8 + $0xf0] ss:$8 sps:$4 sm:$0xff]  }
 0x44a   : > { %v7926_v7 = vpop.f32.mrf.mxu1  ;;  %9511 = vmatprep.subr.bf16.mxu0 %v12291_v22  ;;  %v7815_v9 = vpop.f32.mrf.mxu0  ;;  %v12300_v33 = vld [vmem:[#allocation8 + $0xe4] ss:$8 sps:$4 sm:$0xff]  }
 0x44b   : > { %v15810_v1 = vadd.f32 %v7926_v7, %v7813_v51  ;;  %8545 = vmatpush1.bf16.msra.mxu1 %v12232_v48  ;;  %v12246_v51 = vld [vmem:[#allocation7 + $0x60c] ss:$16 sps:$4 sm:$0xff]  }
 0x44c   : > { %v7928_v34 = vpop.f32.mrf.mxu1  ;;  %8546 = vmatprep.subr.bf16.mxu1 %v12237_v35  ;;  %v15814_v61 = vpop.f32.mrf.mxu0  ;;  %v12241_v35 = vld [vmem:[#allocation7 + $0x628] ss:$16 sps:$4 sm:$0xff]  }
 0x44d   : > { %v15812_v59 = vadd.f32 %v7928_v34, %v7815_v9  ;;  %9512 = vmatpush1.bf16.msra.mxu0 %v12289_v26  ;;  %v18115_v9 = vld [vmem:[#allocation82_spill] sm:$0xff] }
 0x44e   : > { %v15816_v41 = vpop.f32.mrf.mxu1  ;;  %8365 = vmatmul.mubr.bf16.gmra.mxu1 %v18108_v2  ;;  %9513 = vmatprep.subr.bf16.mxu0 %v12294_v12  ;;  %v7821_v4 = vpop.f32.mrf.mxu0  ;;  %v12298_v12 = vld [vmem:[#allocation8 + $0xe0] ss:$8 sps:$4 sm:$0xff]   ;;  %v12303_v34 = vld [vmem:[#allocation8 + $0xd4] ss:$8 sps:$4 sm:$0xff]  }
 0x44f   : > { %8547 = vmatpush1.bf16.msra.mxu1 %v12235_v39  ;;  %8374 = vmatprep.mubr.bf16.mxu1 %v18109_v3  ;;  %v12244_v2 = vld [vmem:[#allocation7 + $0x608] ss:$16 sps:$4 sm:$0xff]   ;;  %v18119_v3 = vld [vmem:[#allocation43_spill] sm:$0xff] }
 0x450   : > { %v7934_v19 = vpop.f32.mrf.mxu1  ;;  %8498 = vmatmul.mubr.bf16.gmra.mxu0 %v18111_v37  ;;  %8548 = vmatprep.subr.bf16.mxu1 %v12240_v15  ;;  %v7823_v63 = vpop.f32.mrf.mxu0 }
 0x451   : > { %v15820_v28 = vadd.f32 %v7934_v19, %v7821_v4  ;;  %8507 = vmatprep.mubr.bf16.mxu0 %v18112_v43  ;;  %9514 = vmatpush1.bf16.msra.mxu0 %v12292_v23  ;;  %v18116_v23 = vld [vmem:[#allocation88_spill] sm:$0xff]  ;;  %v18118_v4 = vld [vmem:[#allocation114_spill] sm:$0xff] }
 0x452   : > { %v7936_v22 = vpop.f32.mrf.mxu1  ;;  %9515 = vmatprep.subr.bf16.mxu0 %v12297_v16  ;;  %v7825_v48 = vpop.f32.mrf.mxu0  ;;  %v12249_v19 = vld [vmem:[#allocation7 + $0x7ec] ss:$16 sps:$4 sm:$0xff]  }
 0x453   : > { %18110 = vst [vmem:[#allocation105_spill] sm:$0xff] %v15820_v28  ;;  %v15824_v6 = vadd.f32 %v7936_v22, %v7823_v63  ;;  %8549 = vmatpush1.bf16.msra.mxu1 %v12238_v60  ;;  %v12306_v63 = vld [vmem:[#allocation8 + $0xc4] ss:$8 sps:$4 sm:$0xff]  }
 0x454   : > { %v7938_v62 = vpop.f32.mrf.mxu1  ;;  %8550 = vmatprep.subr.bf16.mxu1 %v12243_v17  ;;  %v15828_v7 = vpop.f32.mrf.mxu0  ;;  %v12301_v17 = vld [vmem:[#allocation8 + $0xd0] ss:$8 sps:$4 sm:$0xff]  }
 0x455   : > { %18113 = vst [vmem:[#allocation106_spill] sm:$0xff] %v15824_v6  ;;  %v15826_v58 = vadd.f32 %v7938_v62, %v7825_v48  ;;  %9516 = vmatpush2.bf16.msra.mxu0 %v12295_v54  ;;  %v12252_v62 = vld [vmem:[#allocation7 + $0x7cc] ss:$16 sps:$4 sm:$0xff]  }
 0x456   : > { %v15830_v26 = vpop.f32.mrf.mxu1  ;;  %8375 = vmatmul.mubr.bf16.gmra.mxu1 %v18115_v9  ;;  %9517 = vmatprep.subr.bf16.mxu0 %v12300_v33  ;;  %v7831_v39 = vpop.f32.mrf.mxu0  ;;  %v12247_v33 = vld [vmem:[#allocation7 + $0x7e8] ss:$16 sps:$4 sm:$0xff]  }
 0x457   : > { %18114 = vst [vmem:[#allocation36_spill] sm:$0xff] %v15826_v58  ;;  %8551 = vmatpush1.bf16.msra.mxu1 %v12241_v35  ;;  %8384 = vmatprep.mubr.bf16.mxu1 %v18116_v23  ;;  %v12304_v9 = vld [vmem:[#allocation8 + $0xc0] ss:$8 sps:$4 sm:$0xff]   ;;  %v18125_v23 = vld [vmem:[#allocation89_spill] sm:$0xff]  ;;  %v12330_v58 = vld [vmem:[#allocation8 + $0x144] ss:$8 sps:$4 sm:$0xff]  }
 0x458   : > { %v7944_v15 = vpop.f32.mrf.mxu1  ;;  %8508 = vmatmul.mubr.bf16.gmra.mxu0 %v18118_v4  ;;  %8552 = vmatprep.subr.bf16.mxu1 %v12246_v51  ;;  %v7833_v60 = vpop.f32.mrf.mxu0 }
 0x459   : > { %v15834_v16 = vadd.f32 %v7944_v15, %v7831_v39  ;;  %8517 = vmatprep.mubr.bf16.mxu0 %v18119_v3  ;;  %9518 = vmatpush2.bf16.msra.mxu0 %v12298_v12  ;;  %v18124_v12 = vld [vmem:[#allocation86_spill] sm:$0xff] }
 0x45a   : > { %v7946_v37 = vpop.f32.mrf.mxu1  ;;  %9519 = vmatprep.subr.bf16.mxu0 %v12303_v34  ;;  %v7835_v22 = vpop.f32.mrf.mxu0  ;;  %v12309_v39 = vld [vmem:[#allocation8 + $0xb4] ss:$8 sps:$4 sm:$0xff]  }
 0x45b   : > { %18117 = vst [vmem:[#allocation33_spill] sm:$0xff] %v15834_v16  ;;  %v15838_v43 = vadd.f32 %v7946_v37, %v7833_v60  ;;  %8553 = vmatpush1.bf16.msra.mxu1 %v12244_v2  ;;  %v12250_v2 = vld [vmem:[#allocation7 + $0x7c8] ss:$16 sps:$4 sm:$0xff]   ;;  %v12255_v3 = vld [vmem:[#allocation7 + $0x7ac] ss:$16 sps:$4 sm:$0xff]  }
 0x45c   : > { %v7948_v54 = vpop.f32.mrf.mxu1  ;;  %8554 = vmatprep.subr.bf16.mxu1 %v12249_v19  ;;  %v15842_v35 = vpop.f32.mrf.mxu0  ;;  %v18127_v19 = vld [vmem:[#allocation73_spill] sm:$0xff]  ;;  %v18128_v60 = vld [vmem:[#allocation48_spill] sm:$0xff] }
 0x45d   : > { %18120 = vst [vmem:[#allocation42_spill] sm:$0xff] %v15838_v43  ;;  %v15840_v48 = vadd.f32 %v7948_v54, %v7835_v22  ;;  %18122 = vst [vmem:[#allocation108_spill] sm:$0xff] %v15842_v35  ;;  %9520 = vmatpush2.bf16.msra.mxu0 %v12301_v17  ;;  %v12307_v22 = vld [vmem:[#allocation8 + $0xb0] ss:$8 sps:$4 sm:$0xff]   ;;  %v12312_v54 = vld [vmem:[#allocation8 + $0xa4] ss:$8 sps:$4 sm:$0xff]  }
 0x45e   : > { %v15844_v51 = vpop.f32.mrf.mxu1  ;;  %8385 = vmatmul.mubr.bf16.gmra.mxu1 %v18124_v12  ;;  %9521 = vmatprep.subr.bf16.mxu0 %v12306_v63  ;;  %v7841_v34 = vpop.f32.mrf.mxu0 }
 0x45f   : > { %18121 = vst [vmem:[#allocation107_spill] sm:$0xff] %v15840_v48  ;;  %18123 = vst [vmem:[#allocation117_spill] sm:$0xff] %v15844_v51  ;;  %8555 = vmatpush2.bf16.msra.mxu1 %v12247_v33  ;;  %8394 = vmatprep.mubr.bf16.mxu1 %v18125_v23  ;;  %v12253_v23 = vld [vmem:[#allocation7 + $0x7a8] ss:$16 sps:$4 sm:$0xff]  }
 0x460   : > { %v7954_v15 = vpop.f32.mrf.mxu1  ;;  %8518 = vmatmul.mubr.bf16.gmra.mxu0 %v18127_v19  ;;  %8556 = vmatprep.subr.bf16.mxu1 %v12252_v62  ;;  %v7843_v37 = vpop.f32.mrf.mxu0  ;;  %v12322_v48 = vld [vmem:[#allocation8 + $0x160] ss:$8 sps:$4 sm:$0xff]  }
 0x461   : > { %v15848_v4 = vadd.f32 %v7954_v15, %v7841_v34  ;;  %8527 = vmatprep.mubr.bf16.mxu0 %v18128_v60  ;;  %9522 = vmatpush2.bf16.msra.mxu0 %v12304_v9  ;;  %v12258_v15 = vld [vmem:[#allocation7 + $0x78c] ss:$16 sps:$4 sm:$0xff]   ;;  %v12310_v60 = vld [vmem:[#allocation8 + $0xa0] ss:$8 sps:$4 sm:$0xff]  }
 0x462   : > { %v7956_v17 = vpop.f32.mrf.mxu1  ;;  %9523 = vmatprep.subr.bf16.mxu0 %v12309_v39  ;;  %v7845_v33 = vpop.f32.mrf.mxu0  ;;  %v18133_v9 = vld [vmem:[#allocation90_spill] sm:$0xff] }
 0x463   : > { %18126 = vst [vmem:[#allocation118_spill] sm:$0xff] %v15848_v4  ;;  %v15852_v63 = vadd.f32 %v7956_v17, %v7843_v37  ;;  %8557 = vmatpush2.bf16.msra.mxu1 %v12250_v2  ;;  %v12315_v37 = vld [vmem:[#allocation8 + $0x94] ss:$8 sps:$4 sm:$0xff]   ;;  %v12256_v2 = vld [vmem:[#allocation7 + $0x788] ss:$16 sps:$4 sm:$0xff]  }
 0x464   : > { %v7958_v12 = vpop.f32.mrf.mxu1  ;;  %8558 = vmatprep.subr.bf16.mxu1 %v12255_v3  ;;  %v15856_v62 = vpop.f32.mrf.mxu0  ;;  %v18136_v3 = vld [vmem:[#allocation122_spill] sm:$0xff] }
 0x465   : > { %18129 = vst [vmem:[#allocation55_spill] sm:$0xff] %v15852_v63  ;;  %v15854_v34 = vadd.f32 %v7958_v12, %v7845_v33  ;;  %18131 = vst [vmem:[#allocation49_spill] sm:$0xff] %v15856_v62  ;;  %9524 = vmatpush2.bf16.msra.mxu0 %v12307_v22  ;;  %v18134_v63 = vld [vmem:[#allocation97_spill] sm:$0xff]  ;;  %v12261_v12 = vld [vmem:[#allocation7 + $0x76c] ss:$16 sps:$4 sm:$0xff]  }
 0x466   : > { %v15858_v19 = vpop.f32.mrf.mxu1  ;;  %8395 = vmatmul.mubr.bf16.gmra.mxu1 %v18133_v9  ;;  %9525 = vmatprep.subr.bf16.mxu0 %v12312_v54  ;;  %v7851_v39 = vpop.f32.mrf.mxu0  ;;  %v12313_v22 = vld [vmem:[#allocation8 + $0x90] ss:$8 sps:$4 sm:$0xff]   ;;  %v12318_v54 = vld [vmem:[#allocation8 + $0x84] ss:$8 sps:$4 sm:$0xff]  }
 0x467   : > { %18130 = vst [vmem:[#allocation47_spill] sm:$0xff] %v15854_v34  ;;  %18132 = vst [vmem:[#allocation57_spill] sm:$0xff] %v15858_v19  ;;  %8559 = vmatpush2.bf16.msra.mxu1 %v12253_v23  ;;  %8404 = vmatprep.mubr.bf16.mxu1 %v18134_v63  ;;  %v12259_v23 = vld [vmem:[#allocation7 + $0x768] ss:$16 sps:$4 sm:$0xff]  }
 0x468   : > { %v7964_v17 = vpop.f32.mrf.mxu1  ;;  %8528 = vmatmul.mubr.bf16.gmra.mxu0 %v18136_v3  ;;  %8560 = vmatprep.subr.bf16.mxu1 %v12258_v15  ;;  %v7853_v34 = vpop.f32.mrf.mxu0  ;;  %v12316_v15 = vld [vmem:[#allocation8 + $0x80] ss:$8 sps:$4 sm:$0xff]   ;;  %v18140_v3 = vld [vmem:[#allocation93_spill] sm:$0xff] }
 0x469   : > { %v15862_v33 = vadd.f32 %v7964_v17, %v7851_v39  ;;  %9526 = vmatpush2.bf16.msra.mxu0 %v12310_v60  ;;  %v12264_v39 = vld [vmem:[#allocation7 + $0x74c] ss:$16 sps:$4 sm:$0xff]  }
 0x46a   : > { %v7966_v19 = vpop.f32.mrf.mxu1  ;;  %9527 = vmatprep.subr.bf16.mxu0 %v12315_v37  ;;  %v7855_v9 = vpop.f32.mrf.mxu0  ;;  %v12267_v37 = vld [vmem:[#allocation7 + $0x72c] ss:$16 sps:$4 sm:$0xff]  }
 0x46b   : > { %18135 = vst [vmem:[#allocation45_spill] sm:$0xff] %v15862_v33  ;;  %v15865_v62 = vadd.f32 %v7966_v19, %v7853_v34  ;;  %8561 = vmatpush2.bf16.msra.mxu1 %v12256_v2  ;;  %v18141_v34 = vld [vmem:[#allocation100_spill] sm:$0xff] }
 0x46c   : > { %v7968_v4 = vpop.f32.mrf.mxu1  ;;  %8562 = vmatprep.subr.bf16.mxu1 %v12261_v12  ;;  %v15869_v17 = vpop.f32.mrf.mxu0  ;;  %v12262_v19 = vld [vmem:[#allocation7 + $0x748] ss:$16 sps:$4 sm:$0xff]  }
 0x46d   : > { %18137 = vst [vmem:[#allocation38_spill] sm:$0xff] %v15865_v62  ;;  %v15867_v63 = vadd.f32 %v7968_v4, %v7855_v9  ;;  %18139 = vst [vmem:[#allocation61_spill] sm:$0xff] %v15869_v17  ;;  %9528 = vmatpush2.bf16.msra.mxu0 %v12313_v22  ;;  %v12265_v2 = vld [vmem:[#allocation7 + $0x728] ss:$16 sps:$4 sm:$0xff]   ;;  %v12270_v22 = vld [vmem:[#allocation7 + $0x70c] ss:$16 sps:$4 sm:$0xff]  }
 0x46e   : > { %8405 = vmatmul.mubr.bf16.gmra.mxu1 %v18140_v3  ;;  %9529 = vmatprep.subr.bf16.mxu0 %v12318_v54  ;;  %v18142_v54 = vld [vmem:[#allocation96_spill] sm:$0xff]  ;;  %v12321_v62 = vld [vmem:[#allocation8 + $0x174] ss:$8 sps:$4 sm:$0xff]  }
 0x46f   : > { %18138 = vst [vmem:[#allocation37_spill] sm:$0xff] %v15867_v63  ;;  %8563 = vmatpush2.bf16.msra.mxu1 %v12259_v23  ;;  %8414 = vmatprep.mubr.bf16.mxu1 %v18141_v34  ;;  %v15873_v60 = vpop.f32.mrf.mxu0  ;;  %v12268_v23 = vld [vmem:[#allocation7 + $0x708] ss:$16 sps:$4 sm:$0xff]  }
 0x470   : > { %8564 = vmatprep.subr.bf16.mxu1 %v12264_v39  ;;  %v12319_v63 = vld [vmem:[#allocation8 + $0x170] ss:$8 sps:$4 sm:$0xff]  }
 0x471   : > { %9530 = vmatpush2.bf16.msra.mxu0 %v12316_v15  ;;  %v15875_v4 = vpop.f32.mrf.mxu0 }
 0x473   : > { %8565 = vmatpush2.bf16.msra.mxu1 %v12262_v19  ;;  %v15877_v12 = vpop.f32.mrf.mxu0 }
 0x474   : > { %8566 = vmatprep.subr.bf16.mxu1 %v12267_v37 }
 0x475   : > { %v15879_v9 = vpop.f32.mrf.mxu0 }
 0x476   : > { %8415 = vmatmul.mubr.bf16.gmra.mxu1 %v18142_v54 }
 0x477   : > { %8567 = vmatpush2.bf16.msra.mxu1 %v12265_v2  ;;  %8570 = vmatprep.mubr.bf16.mxu1 %v15622_v21  ;;  %v15883_v3 = vpop.f32.mrf.mxu0 }
 0x478   : > { %8568 = vmatprep.subr.bf16.mxu1 %v12270_v22 }
 0x479   : > { %v15885_v39 = vpop.f32.mrf.mxu0 }
 0x47b   : > { %8569 = vmatpush2.bf16.msra.mxu1 %v12268_v23  ;;  %v15887_v15 = vpop.f32.mrf.mxu0 }
 0x47c   : > { %9612 = vmatprep.subr.bf16.mxu1 %v12321_v62  ;;  %v12327_v62 = vld [vmem:[#allocation8 + $0x154] ss:$8 sps:$4 sm:$0xff]  }
 0x47d   : > { %v15889_v34 = vpop.f32.mrf.mxu0 }
 0x47e   : > { %8571 = vmatmul.mubr.bf16.vlgmr.msra.gmra.mxu1 %v15626_v32 }
 0x47f   : > { %8580 = vmatprep.mubr.bf16.mxu1 %v15644_v8  ;;  %v15893_v19 = vpop.f32.mrf.mxu0  ;;  %9613 = vmatpush1.bf16.msra.mxu1 %v12319_v63  ;;  %v12325_v63 = vld [vmem:[#allocation8 + $0x150] ss:$8 sps:$4 sm:$0xff]  }
 0x481   : > { %v15895_v37 = vpop.f32.mrf.mxu0 }
 0x483   : > { %v15897_v21 = vpop.f32.mrf.mxu0 }
 0x485   : > { %v15899_v2 = vpop.f32.mrf.mxu0  ;;  %v15909_v32 = vpop.xlane.xlu0 %5850 }
 0x486   : > { %8581 = vmatmul.mubr.bf16.gmra.mxu1 %v15646_v11  ;;  %12455 = vrsqrt.f32 %v15909_v32  ;;  %vm5989_vm0 = vcmp.eq.f32.partialorder %v15909_v32, inf  ;;  %vm5991_vm2 = vcmp.eq.f32.partialorder %v15909_v32, 0.0 }
 0x487   : > { %8590 = vmatprep.mubr.bf16.mxu1 %v15666_v29  ;;  %v15903_v22 = vpop.f32.mrf.mxu0 }
 0x489   : > { %v15905_v54 = vpop.f32.mrf.mxu0  ;;  %v15915_v17 = vpop.xlane.xlu1 %5859 }
 0x48a   : > { %12457 = vrsqrt.f32 %v15915_v17  ;;  %vm5996_vm1 = vcmp.eq.f32.partialorder %v15915_v17, inf  ;;  %vm5998_vm4 = vcmp.eq.f32.partialorder %v15915_v17, 0.0 }
 0x48b   : > { %v15907_v23 = vpop.f32.mrf.mxu0 }
 0x48c   : > { %18143 = vst [vmem:[#allocation64_spill] sm:$0xff] %v15907_v23  ;;  %v5999_v23 = vand.u32 2147483648, %v15915_v17 }
 0x48d   : > { %v15911_v8 = vpop.f32.mrf.mxu0  ;;  %v15920_v29 = vpop.xlane.xlu0 %5868 }
 0x48e   : > { %18144 = vst [vmem:[#allocation63_spill] sm:$0xff] %v15911_v8  ;;  %8591 = vmatmul.mubr.bf16.gmra.mxu1 %v15669_v13  ;;  %v12324_v13 = vld [vmem:[#allocation8 + $0x164] ss:$8 sps:$4 sm:$0xff]   ;;  %12459 = vrsqrt.f32 %v15920_v29  ;;  %v12339_v8 = vld [vmem:[#allocation8 + $0x114] ss:$8 sps:$4 sm:$0xff]   ;;  %vm6003_vm3 = vcmp.eq.f32.partialorder %v15920_v29, inf }
 0x48f   : > { %8600 = vmatprep.mubr.bf16.mxu1 %v15689_v45  ;;  %v15917_v11 = vpop.f32.mrf.mxu0  ;;  %9614 = vmatprep.subr.bf16.mxu1 %v12324_v13  ;;  %vm6005_vm6 = vcmp.eq.f32.partialorder %v15920_v29, 0.0 }
 0x490   : > { %18145 = vst [vmem:[#allocation113_spill] sm:$0xff] %v15917_v11  ;;  %9615 = vmatpush1.bf16.msra.mxu1 %v12322_v48  ;;  %v12336_v11 = vld [vmem:[#allocation8 + $0x124] ss:$8 sps:$4 sm:$0xff]  }
 0x491   : > { %v15922_v33 = vpop.f32.mrf.mxu0  ;;  %v15925_v43 = vpop.xlane.xlu1 %5877  ;;  %9616 = vmatprep.subr.bf16.mxu1 %v12327_v62  ;;  %v12333_v62 = vld [vmem:[#allocation8 + $0x134] ss:$8 sps:$4 sm:$0xff]  }
 0x492   : > { %18146 = vst [vmem:[#allocation46_spill] sm:$0xff] %v15922_v33  ;;  %12461 = vrsqrt.f32 %v15925_v43  ;;  %vm6010_vm5 = vcmp.eq.f32.partialorder %v15925_v43, inf  ;;  %vm6012_vm8 = vcmp.eq.f32.partialorder %v15925_v43, 0.0 }
 0x493   : > { %v15927_v45 = vpop.f32.mrf.mxu0 }
 0x494   : > { %18147 = vst [vmem:[#allocation87_spill] sm:$0xff] %v15927_v45  ;;  %9617 = vmatpush1.bf16.msra.mxu1 %v12325_v63 }
 0x495   : > { %v15930_v51 = vpop.xlane.xlu0 %5886  ;;  %v15932_v35 = vpop.f32.mrf.mxu0  ;;  %9618 = vmatprep.subr.bf16.mxu1 %v12330_v58 }
 0x496   : > { %18148 = vst [vmem:[#allocation80_spill] sm:$0xff] %v15932_v35  ;;  %8601 = vmatmul.mubr.bf16.gmra.mxu1 %v15692_v18  ;;  %12463 = vrsqrt.f32 %v15930_v51  ;;  %v12328_v35 = vld [vmem:[#allocation8 + $0x140] ss:$8 sps:$4 sm:$0xff]   ;;  %vm6017_vm7 = vcmp.eq.f32.partialorder %v15930_v51, inf  ;;  %vm6019_vm9 = vcmp.eq.f32.partialorder %v15930_v51, 0.0 }
 0x497   : > { %8610 = vmatprep.mubr.bf16.mxu1 %v15712_v42  ;;  %v15937_v16 = vpop.f32.mrf.mxu0  ;;  %v12456_v42 = vpop.eup %12455 }
 0x498   : > { %18149 = vst [vmem:[#allocation92_spill] sm:$0xff] %v15937_v16  ;;  %9619 = vmatpush1.bf16.msra.mxu1 %v12328_v35  ;;  %v12331_v16 = vld [vmem:[#allocation8 + $0x130] ss:$8 sps:$4 sm:$0xff]   ;;  %v12458_v33 = vpop.eup %12457  ;;  %v5988_v63 = vmul.f32 %v12456_v42, %v15909_v32 }
 0x499   : > { %v15940_v45 = vpop.xlane.xlu1 %5895  ;;  %v15942_v13 = vpop.f32.mrf.mxu0  ;;  %9620 = vmatprep.subr.bf16.mxu1 %v12333_v62 }
 0x49a   : > { %18150 = vst [vmem:[#allocation101_spill] sm:$0xff] %v15942_v13  ;;  %12465 = vrsqrt.f32 %v15940_v45  ;;  %v5990_v42 = vsel %vm5989_vm0, %v15909_v32, %v5988_v63  ;;  %v12337_v63 = vld [vmem:[#allocation8 + $0x110] ss:$8 sps:$4 sm:$0xff]   ;;  %vm6024_vm10 = vcmp.eq.f32.partialorder %v15940_v45, inf  ;;  %vm6026_vm11 = vcmp.eq.f32.partialorder %v15940_v45, 0.0 }
 0x49b   : > { %v15944_v18 = vpop.f32.mrf.mxu0 }
 0x49c   : > { %18151 = vst [vmem:[#allocation91_spill] sm:$0xff] %v15944_v18  ;;  %v12460_v18 = vpop.eup %12459  ;;  %9621 = vmatpush1.bf16.msra.mxu1 %v12331_v16 }
 0x49d   : > { %v15947_v48 = vpop.f32.mrf.mxu0  ;;  %v15954_v58 = vpop.xlane.xlu0 %5904  ;;  %9622 = vmatprep.subr.bf16.mxu1 %v12336_v11  ;;  %v6002_v62 = vmul.f32 %v12460_v18, %v15920_v29 }
 0x49e   : > { %18152 = vst [vmem:[#allocation94_spill] sm:$0xff] %v15947_v48  ;;  %8611 = vmatmul.mubr.bf16.gmra.mxu1 %v15715_v20  ;;  %v5995_v48 = vmul.f32 %v12458_v33, %v15915_v17  ;;  %v12334_v20 = vld [vmem:[#allocation8 + $0x120] ss:$8 sps:$4 sm:$0xff]   ;;  %12467 = vrsqrt.f32 %v15954_v58  ;;  %vm6031_vm12 = vcmp.eq.f32.partialorder %v15954_v58, inf  ;;  %vm6033_vm14 = vcmp.eq.f32.partialorder %v15954_v58, 0.0 }
 0x49f   : > { %8620 = vmatprep.mubr.bf16.mxu1 %v15733_v57  ;;  %v15951_v13 = vpop.f32.mrf.mxu0  ;;  %v12462_v28 = vpop.eup %12461 }
 0x4a0   : > { %18153 = vst [vmem:[#allocation27_spill] sm:$0xff] %v15951_v13  ;;  %v5992_v13 = vand.u32 2147483648, %v15909_v32  ;;  %v5997_v11 = vsel %vm5996_vm1, %v15915_v17, %v5995_v48  ;;  %v6009_v18 = vmul.f32 %v12462_v28, %v15925_v43  ;;  %9623 = vmatpush1.bf16.msra.mxu1 %v12334_v20  ;;  %v6006_v48 = vand.u32 2147483648, %v15920_v29  ;;  %v12342_v20 = vld [vmem:[#allocation8 + $0x104] ss:$8 sps:$4 sm:$0xff]  }
 0x4a1   : > { %v15956_v6 = vpop.f32.mrf.mxu0  ;;  %v15960_v57 = vpop.xlane.xlu1 %5913  ;;  %9624 = vmatprep.subr.bf16.mxu1 %v12339_v8 }
 0x4a2   : > { %18154 = vst [vmem:[#allocation95_spill] sm:$0xff] %v15956_v6  ;;  %12469 = vrsqrt.f32 %v15960_v57  ;;  %v6011_v17 = vsel %vm6010_vm5, %v15925_v43, %v6009_v18  ;;  %vm6038_vm13 = vcmp.eq.f32.partialorder %v15960_v57, inf  ;;  %vm6040_vm0 = vcmp.eq.f32.partialorder %v15960_v57, 0.0 }
 0x4a3   : > { %v15962_v35 = vpop.f32.mrf.mxu0  ;;  %v12464_v6 = vpop.eup %12463 }
 0x4a4   : > { %18155 = vst [vmem:[#allocation28_spill] sm:$0xff] %v15962_v35  ;;  %v5993_v35 = vsel %vm5991_vm2, %v5992_v13, %v5990_v42  ;;  %v6016_v28 = vmul.f32 %v12464_v6, %v15930_v51  ;;  %9625 = vmatpush1.bf16.msra.mxu1 %v12337_v63  ;;  %v12340_v6 = vld [vmem:[#allocation8 + $0x100] ss:$8 sps:$4 sm:$0xff]  }
 0x4a5   : > { %v15969_v16 = vpop.xlane.xlu0 %5922  ;;  %v15971_v33 = vpop.f32.mrf.mxu0  ;;  %v6099_v42 = vadd.f32 1e-08, %v5993_v35  ;;  %9626 = vmatprep.subr.bf16.mxu1 %v12342_v20 }
 0x4a6   : > { %18156 = vst [vmem:[#allocation19_spill] sm:$0xff] %v15971_v33  ;;  %8621 = vmatmul.mubr.bf16.gmra.mxu1 %v15736_v53  ;;  %v6004_v53 = vsel %vm6003_vm3, %v15920_v29, %v6002_v62  ;;  %12471 = vrsqrt.f32 %v15969_v16  ;;  %v6018_v35 = vsel %vm6017_vm7, %v15930_v51, %v6016_v28  ;;  %vm6045_vm15 = vcmp.eq.f32.partialorder %v15969_v16, inf }
 0x4a7   : > { %8630 = vmatprep.mubr.bf16.mxu1 %v15750_v49  ;;  %v15981_v33 = vpop.f32.mrf.mxu0  ;;  %v12466_v32 = vpop.eup %12465  ;;  %v6000_v49 = vsel %vm5998_vm4, %v5999_v23, %v5997_v11  ;;  %v6007_v62 = vsel %vm6005_vm6, %v6006_v48, %v6004_v53  ;;  %v12345_v53 = vld [vmem:[#allocation8 + $0x1f4] ss:$8 sps:$4 sm:$0xff]   ;;  %vm6047_vm1 = vcmp.eq.f32.partialorder %v15969_v16, 0.0 }
 0x4a8   : > { %18157 = vst [vmem:[#allocation99_spill] sm:$0xff] %v15981_v33  ;;  %v6013_v33 = vand.u32 2147483648, %v15925_v43  ;;  %v6100_v11 = vadd.f32 1e-08, %v6000_v49  ;;  %v6023_v29 = vmul.f32 %v12466_v32, %v15940_v45  ;;  %v6101_v48 = vadd.f32 1e-08, %v6007_v62  ;;  %9627 = vmatpush1.bf16.msra.mxu1 %v12340_v6 }
 0x4a9   : > { %v15989_v13 = vpop.f32.mrf.mxu0  ;;  %v15993_v8 = vpop.xlane.xlu1 %5931  ;;  %v12343_v43 = vld [vmem:[#allocation8 + $0x1f0] ss:$8 sps:$4 sm:$0xff]   ;;  %9628 = vmatprep.subr.bf16.mxu1 %v12345_v53 }
 0x4aa   : > { %18158 = vst [vmem:[#allocation54_spill] sm:$0xff] %v15989_v13  ;;  %v6014_v18 = vsel %vm6012_vm8, %v6013_v33, %v6011_v17  ;;  %v6020_v13 = vand.u32 2147483648, %v15930_v51  ;;  %12473 = vrsqrt.f32 %v15993_v8  ;;  %v7901_v33 = vadd.f32 %v15773_v27, %v15771_v25 }
 0x4ab   : > { %v15997_v23 = vpop.f32.mrf.mxu0  ;;  %12475 = vrcp.f32 %v6099_v42  ;;  %v6102_v49 = vadd.f32 1e-08, %v6014_v18  ;;  %v6025_v51 = vsel %vm6024_vm10, %v15940_v45, %v6023_v29  ;;  %v12468_v42 = vpop.eup %12467  ;;  %v7921_v25 = vadd.f32 %v15802_v38, %v15800_v56  ;;  %v12346_v56 = vld [vmem:[#allocation8 + $0x1e0] ss:$8 sps:$4 sm:$0xff]   ;;  %v18161_v29 = vld [vmem:[#allocation105_spill] sm:$0xff] }
 0x4ac   : > { %v6021_v28 = vsel %vm6019_vm9, %v6020_v13, %v6018_v35  ;;  %12477 = vrcp.f32 %v6100_v11  ;;  %v7931_v27 = vadd.f32 %v15816_v41, %v15814_v61  ;;  %v16025_v13 = vadd.f32 %v15830_v26, %v15828_v7  ;;  %9629 = vmatpush2.bf16.msra.mxu1 %v12343_v43  ;;  %v18162_v18 = vld [vmem:[#allocation113_spill] sm:$0xff]  ;;  %v12352_v43 = vld [vmem:[#allocation8 + $0x1c0] ss:$8 sps:$4 sm:$0xff]  }
 0x4ad   : > { %v16004_v63 = vpop.f32.mrf.mxu0  ;;  %v16017_v20 = vpop.xlane.xlu0 %5940  ;;  %v16032_v17 = vadd.f32 %v15873_v60, %v15758_v0  ;;  %v6103_v6 = vadd.f32 1e-08, %v6021_v28  ;;  %12479 = vrcp.f32 %v6101_v48  ;;  %v16037_v61 = vadd.f32 %v15875_v4, %v15762_v10  ;;  %v12351_v4 = vld [vmem:[#allocation8 + $0x1d4] ss:$8 sps:$4 sm:$0xff]  }
 0x4ae   : > { %8631 = vmatmul.mubr.bf16.gmra.mxu1 %v15752_v36  ;;  %v7911_v36 = vadd.f32 %v15788_v5, %v15786_v46  ;;  %v6027_v46 = vand.u32 2147483648, %v15940_v45  ;;  %v16041_v41 = vadd.f32 %v15877_v12, %v15769_v24  ;;  %12481 = vrsqrt.f32 %v16017_v20  ;;  %v16119_v28 = vpop.f32.mrf.mxu1 }
 0x4af   : > { %8640 = vmatprep.mubr.bf16.mxu1 %v15764_v14  ;;  %v16012_v32 = vpop.f32.mrf.mxu0  ;;  %v12348_v14 = vld [vmem:[#allocation8 + $0x1e4] ss:$8 sps:$4 sm:$0xff]   ;;  %v12470_v38 = vpop.eup %12469  ;;  %v16047_v26 = vadd.f32 %v15879_v9, %v7901_v33  ;;  %v16051_v60 = vadd.f32 %v15883_v3, %v15778_v50  ;;  %v6030_v10 = vmul.f32 %v12468_v42, %v15954_v58  ;;  %12483 = vrcp.f32 %v6102_v49  ;;  %v18164_v49 = vld [vmem:[#allocation46_spill] sm:$0xff] }
 0x4b0   : > { %v6028_v7 = vsel %vm6026_vm11, %v6027_v46, %v6025_v51  ;;  %9630 = vmatprep.subr.bf16.mxu1 %v12348_v14  ;;  %v16056_v24 = vadd.f32 %v15885_v39, %v15782_v30  ;;  %v16060_v12 = vadd.f32 %v15887_v15, %v15784_v47  ;;  %v16063_v9 = vadd.f32 %v15889_v34, %v7911_v36  ;;  %v12349_v15 = vld [vmem:[#allocation8 + $0x1d0] ss:$8 sps:$4 sm:$0xff]  }
 0x4b1   : > { %v16028_v5 = vpop.f32.mrf.mxu0  ;;  %v16067_v50 = vadd.f32 %v15893_v19, %v15792_v40  ;;  %v16069_v3 = vpop.xlane.xlu1 %5949  ;;  %v16076_v30 = vadd.f32 %v15895_v37, %v15796_v55  ;;  %v6104_v39 = vadd.f32 1e-08, %v6028_v7  ;;  %v6037_v47 = vmul.f32 %v12470_v38, %v15960_v57  ;;  %9631 = vmatpush2.bf16.msra.mxu1 %v12346_v56  ;;  %v18163_v36 = vld [vmem:[#allocation106_spill] sm:$0xff] }
 0x4b2   : > { %12485 = vrcp.f32 %v6103_v6  ;;  %v16081_v40 = vadd.f32 %v15897_v21, %v15798_v52  ;;  %v16084_v34 = vadd.f32 %v15899_v2, %v7921_v25  ;;  %9632 = vmatprep.subr.bf16.mxu1 %v12351_v4  ;;  %v16095_v19 = vadd.f32 %v15905_v54, %v15810_v1  ;;  %v12354_v21 = vld [vmem:[#allocation8 + $0x1c4] ss:$8 sps:$4 sm:$0xff]   ;;  %v12357_v56 = vld [vmem:[#allocation8 + $0x1b4] ss:$8 sps:$4 sm:$0xff]  }
 0x4b3   : > { %v16044_v0 = vpop.f32.mrf.mxu0  ;;  %v12472_v45 = vpop.eup %12471  ;;  %v6032_v37 = vsel %vm6031_vm12, %v15954_v58, %v6030_v10  ;;  %12487 = vrsqrt.f32 %v16069_v3  ;;  %v18159_v2 = vld [vmem:[#allocation64_spill] sm:$0xff]  ;;  %v6034_v35 = vand.u32 2147483648, %v15954_v58  ;;  %v16113_v53 = vadd.f32 %v18162_v18, %v18161_v29 }
 0x4b4   : > { %v6044_v52 = vmul.f32 %v12472_v45, %v15969_v16  ;;  %v6039_v48 = vsel %vm6038_vm13, %v15960_v57, %v6037_v47  ;;  %12489 = vrcp.f32 %v6104_v39  ;;  %v16123_v51 = vadd.f32 %v18164_v49, %v18163_v36  ;;  %v18165_v25 = vld [vmem:[#allocation36_spill] sm:$0xff] }
 0x4b5   : > { %v16071_v62 = vpop.f32.mrf.mxu0  ;;  %9633 = vmatpush2.bf16.msra.mxu1 %v12349_v15  ;;  %v6035_v14 = vsel %vm6033_vm14, %v6034_v35, %v6032_v37  ;;  %v6041_v42 = vand.u32 2147483648, %v15960_v57  ;;  %v6048_v10 = vand.u32 2147483648, %v15969_v16  ;;  %v18167_v47 = vld [vmem:[#allocation80_spill] sm:$0xff]  ;;  %vm6052_vm2 = vcmp.eq.f32.partialorder %v15993_v8, inf }
 0x4b6   : > { %8641 = vmatmul.mubr.bf16.gmra.mxu1 %v15767_v44  ;;  %v16088_v44 = vadd.f32 %v15903_v22, %v15806_v31  ;;  %v16102_v31 = vadd.f32 %v18159_v2, %v15812_v59  ;;  %v18160_v22 = vld [vmem:[#allocation63_spill] sm:$0xff]  ;;  %v16117_v59 = vpop.xlane.xlu0 %5958  ;;  %9634 = vmatprep.subr.bf16.mxu1 %v12354_v21  ;;  %v6046_v6 = vsel %vm6045_vm15, %v15969_v16, %v6044_v52  ;;  %v6105_v57 = vadd.f32 1e-08, %v6035_v14  ;;  %v12355_v21 = vld [vmem:[#allocation8 + $0x1b0] ss:$8 sps:$4 sm:$0xff]  }
 0x4b7   : > { %v16091_v55 = vpop.f32.mrf.mxu0  ;;  %v16105_v11 = vadd.f32 %v18160_v22, %v7931_v27  ;;  %v12474_v54 = vpop.eup %12473  ;;  %v18166_v27 = vld [vmem:[#allocation87_spill] sm:$0xff]  ;;  %v6042_v7 = vsel %vm6040_vm0, %v6041_v42, %v6039_v48  ;;  %12491 = vrsqrt.f32 %v16117_v59  ;;  %v16143_v15 = vadd.f32 %v18167_v47, %v16025_v13 }
 0x4b8   : > { %v12476_v33 = vpop.eup %12475  ;;  %v16131_v46 = vadd.f32 %v18166_v27, %v18165_v25  ;;  %v6051_v4 = vmul.f32 %v12474_v54, %v15993_v8  ;;  %v6049_v22 = vsel %vm6047_vm1, %v6048_v10, %v6046_v6  ;;  %vm6054_vm3 = vcmp.eq.f32.partialorder %v15993_v8, 0.0 }
 0x4b9   : > { %v16109_v1 = vpop.f32.mrf.mxu0  ;;  %v12478_v38 = vpop.eup %12477  ;;  %v16148_v52 = vmul.f32 5.0, %v12476_v33  ;;  %9635 = vmatpush2.bf16.msra.mxu1 %v12352_v43  ;;  %v6055_v35 = vand.u32 2147483648, %v15993_v8  ;;  %v6106_v48 = vadd.f32 1e-08, %v6042_v7  ;;  %vm6059_vm4 = vcmp.eq.f32.partialorder %v16017_v20, inf }
 0x4ba   : > { %v16146_v37 = vpop.xlane.xlu1 %5967  ;;  %v12480_v2 = vpop.eup %12479  ;;  %9636 = vmatprep.subr.bf16.mxu1 %v12357_v56  ;;  %v16159_v33 = vmul.f32 5.0, %v12478_v38  ;;  %v6053_v36 = vsel %vm6052_vm2, %v15993_v8, %v6051_v4  ;;  %vm6061_vm5 = vcmp.eq.f32.partialorder %v16017_v20, 0.0  ;;  %v6107_v42 = vadd.f32 1e-08, %v6049_v22  ;;  %v12360_v22 = vld [vmem:[#allocation8 + $0x1a4] ss:$8 sps:$4 sm:$0xff]  }
 0x4bb   : > { %v16127_v58 = vpop.f32.mrf.mxu0  ;;  %v12482_v18 = vpop.eup %12481  ;;  %12493 = vrsqrt.f32 %v16146_v37  ;;  %v16172_v27 = vmul.f32 5.0, %v12480_v2  ;;  %vm6066_vm6 = vcmp.eq.f32.partialorder %v16069_v3, inf  ;;  %v6056_v47 = vsel %vm6054_vm3, %v6055_v35, %v6053_v36  ;;  %v12358_v2 = vld [vmem:[#allocation8 + $0x1a0] ss:$8 sps:$4 sm:$0xff]  }
 0x4bc   : > { %v12484_v16 = vpop.eup %12483  ;;  %12495 = vrcp.f32 %v6105_v57  ;;  %v6058_v56 = vmul.f32 %v12482_v18, %v16017_v20  ;;  %vm6068_vm7 = vcmp.eq.f32.partialorder %v16069_v3, 0.0  ;;  %v6108_v36 = vadd.f32 1e-08, %v6056_v47  ;;  %v12361_v47 = vld [vmem:[#allocation8 + $0x190] ss:$8 sps:$4 sm:$0xff]  }
 0x4bd   : > { %v16139_v45 = vpop.f32.mrf.mxu0  ;;  %v16169_v25 = vpop.xlane.xlu0 %5976  ;;  %9637 = vmatpush2.bf16.msra.mxu1 %v12355_v21  ;;  %v16184_v21 = vmul.f32 5.0, %v12484_v16  ;;  %12497 = vrcp.f32 %v6106_v48  ;;  %vm6073_vm8 = vcmp.eq.f32.partialorder %v16117_v59, inf  ;;  %vm6075_vm9 = vcmp.eq.f32.partialorder %v16117_v59, 0.0 }
 0x4be   : > { %v8120_v39 = vpop.f32.mrf.mxu1  ;;  %12499 = vrsqrt.f32 %v16169_v25  ;;  %9638 = vmatprep.subr.bf16.mxu1 %v12360_v22  ;;  %v12363_v22 = vld [vmem:[#allocation8 + $0x194] ss:$8 sps:$4 sm:$0xff]   ;;  %vm6080_vm10 = vcmp.eq.f32.partialorder %v16146_v37, inf  ;;  %vm6082_vm11 = vcmp.eq.f32.partialorder %v16146_v37, 0.0  ;;  %vm6087_vm12 = vcmp.eq.f32.partialorder %v16169_v25, inf }
 0x4bf   : > { %v8121_v13 = vadd.f32 %v8120_v39, %v16032_v17  ;;  %v16155_v54 = vpop.f32.mrf.mxu0  ;;  %v6062_v17 = vand.u32 2147483648, %v16017_v20  ;;  %v12486_v6 = vpop.eup %12485  ;;  %12501 = vrcp.f32 %v6107_v42  ;;  %vm6089_vm13 = vcmp.eq.f32.partialorder %v16169_v25, 0.0 }
 0x4c0   : > { %v8122_v29 = vpop.f32.mrf.mxu1  ;;  %v16196_v48 = vmul.f32 5.0, %v12486_v6 }
 0x4c1   : > { %v8123_v43 = vadd.f32 %v8122_v29, %v16037_v61  ;;  %v16167_v49 = vpop.f32.mrf.mxu0  ;;  %v8651_v7 = vmul.f32 %v8121_v13, %v16148_v52  ;;  %v12488_v29 = vpop.eup %12487  ;;  %9639 = vmatpush2.bf16.msra.mxu1 %v12358_v2 }
 0x4c2   : > { %18168 = vst [vmem:[#allocation103_spill] sm:$0xff] %v16167_v49  ;;  %v8124_v14 = vpop.f32.mrf.mxu1  ;;  %v16192_v8 = vpop.xlane.xlu1 %5985  ;;  %9640 = vmatprep.subr.bf16.mxu1 %v12363_v22 }
 0x4c3   : > { %v8652_v61 = vmul.f32 %v8123_v43, %v16148_v52  ;;  %v8125_v10 = vadd.f32 %v8124_v14, %v16041_v41  ;;  %v16179_v4 = vpop.f32.mrf.mxu0  ;;  %v12490_v16 = vpop.eup %12489  ;;  %12503 = vrsqrt.f32 %v16192_v8  ;;  %vm6094_vm14 = vcmp.eq.f32.partialorder %v16192_v8, inf }
 0x4c4   : > { %18169 = vst [vmem:[#allocation98_spill] sm:$0xff] %v16179_v4  ;;  %v8126_v39 = vpop.f32.mrf.mxu1  ;;  %12505 = vrcp.f32 %v6108_v36  ;;  %vm6096_vm15 = vcmp.eq.f32.partialorder %v16192_v8, 0.0 }
 0x4c5   : > { %v8127_v57 = vadd.f32 %v8126_v39, %v16047_v26  ;;  %v8716_v13 = vmax.f32 %v8652_v61, 0.0  ;;  %v8655_v41 = vmul.f32 %v8125_v10, %v16159_v33  ;;  %v16189_v43 = vpop.f32.mrf.mxu0  ;;  %v6060_v61 = vsel %vm6059_vm4, %v16017_v20, %v6058_v56  ;;  %9641 = vmatpush2.bf16.msra.mxu1 %v12361_v47 }
 0x4c6   : > { %18170 = vst [vmem:[#allocation102_spill] sm:$0xff] %v16189_v43  ;;  %v8130_v14 = vpop.f32.mrf.mxu1  ;;  %v8715_v10 = vmax.f32 %v8651_v7, 0.0 }
 0x4c7   : > { %v8656_v26 = vmul.f32 %v8127_v57, %v16159_v33  ;;  %v8131_v35 = vadd.f32 %v8130_v14, %v16051_v60  ;;  %v8719_v39 = vmax.f32 %v8655_v41, 0.0  ;;  %v16201_v18 = vpop.f32.mrf.mxu0  ;;  %v6065_v57 = vmul.f32 %v12488_v29, %v16069_v3 }
 0x4c8   : > { %18171 = vst [vmem:[#allocation44_spill] sm:$0xff] %v16201_v18  ;;  %v8132_v38 = vpop.f32.mrf.mxu1  ;;  %v8780_v56 = vmul.f32 %v8716_v13, %v8716_v13  ;;  %v12492_v18 = vpop.eup %12491  ;;  %v6063_v29 = vsel %vm6061_vm5, %v6062_v17, %v6060_v61 }
 0x4c9   : > { %v8720_v60 = vmax.f32 %v8656_v26, 0.0  ;;  %v8659_v42 = vmul.f32 %v8131_v35, %v16172_v27  ;;  %v8133_v6 = vadd.f32 %v8132_v38, %v16056_v24  ;;  %v9083_v7 = vpack.c.bf16 %v8719_v39, %v8715_v10  ;;  %v16209_v41 = vpop.f32.mrf.mxu0 }
 0x4ca   : > { %18172 = vst [vmem:[#allocation124_spill] sm:$0xff] %v16209_v41  ;;  %v8134_v2 = vpop.f32.mrf.mxu1  ;;  %v16216_v24 = vmul.f32 5.0, %v12490_v16  ;;  %v8779_v38 = vmul.f32 %v8715_v10, %v8715_v10  ;;  %v6067_v20 = vsel %vm6066_vm6, %v16069_v3, %v6065_v57  ;;  %v6072_v61 = vmul.f32 %v12492_v18, %v16117_v59  ;;  %v12494_v57 = vpop.eup %12493 }
 0x4cb   : > { %v16213_v26 = vmax.f32 %v8659_v42, 0.0  ;;  %v8660_v35 = vmul.f32 %v8133_v6, %v16172_v27  ;;  %v8784_v14 = vmul.f32 %v8720_v60, %v8720_v60  ;;  %v8135_v43 = vadd.f32 %v8134_v2, %v16060_v12  ;;  %v16220_v4 = vpop.f32.mrf.mxu0  ;;  %v12366_v6 = vld [vmem:[#allocation8 + $0x184] ss:$8 sps:$4 sm:$0xff]   ;;  %v12496_v36 = vpop.eup %12495 }
 0x4cc   : > { %v8136_v41 = vpop.f32.mrf.mxu1  ;;  %v9084_v49 = vpack.c.bf16 %v8720_v60, %v8716_v13  ;;  %v8783_v10 = vmul.f32 %v8719_v39, %v8719_v39  ;;  %v12364_v60 = vld [vmem:[#allocation8 + $0x180] ss:$8 sps:$4 sm:$0xff]   ;;  %v16231_v47 = vadd.f32 %v8780_v56, %v8779_v38  ;;  %v18173_v39 = vand.u32 2147483648, %v16069_v3  ;;  %9642 = vmatprep.subr.bf16.mxu1 %v12366_v6 }
 0x4cd   : > { %v8724_v17 = vmax.f32 %v8660_v35, 0.0  ;;  %v8137_v16 = vadd.f32 %v8136_v41, %v16063_v9  ;;  %v8663_v12 = vmul.f32 %v8135_v43, %v16184_v21  ;;  %v16229_v42 = vpop.f32.mrf.mxu0  ;;  %v8787_v22 = vmul.f32 %v16213_v26, %v16213_v26  ;;  %9643 = vmatpush2.bf16.msra.mxu1 %v12364_v60 }
 0x4ce   : > { %9531 = vmatprep.mubr.bf16.mxu0 %v9084_v49  ;;  %v8140_v13 = vpop.f32.mrf.mxu1  ;;  %v6109_v43 = vadd.f32 1e-08, %v6063_v29  ;;  %v6070_v49 = vsel %vm6068_vm7, %v18173_v39, %v6067_v20  ;;  %v16243_v38 = vadd.f32 %v8784_v14, %v8783_v10  ;;  %v6074_v3 = vsel %vm6073_vm8, %v16117_v59, %v6072_v61 }
 0x4cf   : > { %v8788_v2 = vmul.f32 %v8724_v17, %v8724_v17  ;;  %v8664_v9 = vmul.f32 %v8137_v16, %v16184_v21  ;;  %v8141_v18 = vadd.f32 %v8140_v13, %v16067_v50  ;;  %9532 = vmatmul.mubr.bf16.vlgmr.msra.gmra.mxu0 %v9083_v7  ;;  %v8727_v41 = vmax.f32 %v8663_v12, 0.0  ;;  %v16241_v56 = vpop.f32.mrf.mxu0  ;;  %v12498_v13 = vpop.eup %12497 }
 0x4d0   : > { %18174 = vst [vmem:[#allocation62_spill] sm:$0xff] %v16241_v56  ;;  %v8142_v35 = vpop.f32.mrf.mxu1  ;;  %v6079_v20 = vmul.f32 %v12494_v57, %v16146_v37  ;;  %12507 = vrcp.f32 %v6109_v43 }
 0x4d1   : > { %v8728_v16 = vmax.f32 %v8664_v9, 0.0  ;;  %v8667_v50 = vmul.f32 %v8141_v18, %v16196_v48  ;;  %v8143_v7 = vadd.f32 %v8142_v35, %v16076_v30  ;;  %v16248_v29 = vadd.f32 %v8788_v2, %v8787_v22  ;;  %v16257_v12 = vpop.f32.mrf.mxu0  ;;  %v12500_v30 = vpop.eup %12499 }
 0x4d2   : > { %v9087_v10 = vpack.c.bf16 %v8727_v41, %v16213_v26  ;;  %18175 = vst [vmem:[#allocation129_spill] sm:$0xff] %v16257_v12  ;;  %v8144_v6 = vpop.f32.mrf.mxu1  ;;  %v16262_v9 = vmul.f32 5.0, %v12496_v36  ;;  %v12502_v61 = vpop.eup %12501  ;;  %v6110_v18 = vadd.f32 1e-08, %v6070_v49  ;;  %v8791_v57 = vmul.f32 %v8727_v41, %v8727_v41 }
 0x4d3   : > { %v8792_v60 = vmul.f32 %v8728_v16, %v8728_v16  ;;  %v16259_v22 = vmax.f32 %v8667_v50, 0.0  ;;  %v8668_v2 = vmul.f32 %v8143_v7, %v16196_v48  ;;  %v8145_v39 = vadd.f32 %v8144_v6, %v16081_v40  ;;  %v16265_v35 = vpop.f32.mrf.mxu0  ;;  %v12504_v7 = vpop.eup %12503 }
 0x4d4   : > { %18176 = vst [vmem:[#allocation66_spill] sm:$0xff] %v16262_v9  ;;  %18177 = vst [vmem:[#allocation39_spill] sm:$0xff] %v16265_v35  ;;  %v8146_v14 = vpop.f32.mrf.mxu1  ;;  %v9088_v26 = vpack.c.bf16 %v8728_v16, %v8724_v17  ;;  %v18178_v12 = vand.u32 2147483648, %v16117_v59  ;;  %v6081_v49 = vsel %vm6080_vm10, %v16146_v37, %v6079_v20  ;;  %v6086_v40 = vmul.f32 %v12500_v30, %v16169_v25 }
 0x4d5   : > { %v8732_v50 = vmax.f32 %v8668_v2, 0.0  ;;  %v8147_v36 = vadd.f32 %v8146_v14, %v16084_v34  ;;  %v8671_v41 = vmul.f32 %v8145_v39, %v16216_v24  ;;  %v16278_v17 = vpop.f32.mrf.mxu0  ;;  %v16280_v59 = vadd.f32 %v8792_v60, %v8791_v57 }
 0x4d6   : > { %v6077_v56 = vsel %vm6075_vm9, %v18178_v12, %v6074_v3  ;;  %18179 = vst [vmem:[#allocation109_spill] sm:$0xff] %v16278_v17  ;;  %9541 = vmatprep.mubr.bf16.mxu0 %v9088_v26  ;;  %v8150_v16 = vpop.f32.mrf.mxu1  ;;  %v8795_v3 = vmul.f32 %v16259_v22, %v16259_v22  ;;  %v16289_v30 = vmul.f32 5.0, %v12498_v13  ;;  %12509 = vrcp.f32 %v6110_v18  ;;  %v12506_v26 = vpop.eup %12505 }
 0x4d7   : > { %v8796_v34 = vmul.f32 %v8732_v50, %v8732_v50  ;;  %v8672_v43 = vmul.f32 %v8147_v36, %v16216_v24  ;;  %v8151_v14 = vadd.f32 %v8150_v16, %v16088_v44  ;;  %9542 = vmatmul.mubr.bf16.gmra.mxu0 %v9087_v10  ;;  %v8735_v20 = vmax.f32 %v8671_v41, 0.0  ;;  %v16287_v12 = vpop.f32.mrf.mxu0 }
 0x4d8   : > { %18180 = vst [vmem:[#allocation125_spill] sm:$0xff] %v16287_v12  ;;  %v8152_v6 = vpop.f32.mrf.mxu1  ;;  %18181 = vst [vmem:[#allocation52_spill] sm:$0xff] %v16289_v30  ;;  %v6111_v36 = vadd.f32 1e-08, %v6077_v56  ;;  %v18182_v44 = vand.u32 2147483648, %v16146_v37  ;;  %v6093_v41 = vmul.f32 %v12504_v7, %v16192_v8 }
 0x4d9   : > { %v8736_v60 = vmax.f32 %v8672_v43, 0.0  ;;  %v8675_v2 = vmul.f32 %v8151_v14, %v16262_v9  ;;  %v8153_v57 = vadd.f32 %v8152_v6, %v16095_v19  ;;  %v16293_v39 = vadd.f32 %v8796_v34, %v8795_v3  ;;  %v16301_v16 = vpop.f32.mrf.mxu0 }
 0x4da   : > { %v6084_v10 = vsel %vm6082_vm11, %v18182_v44, %v6081_v49  ;;  %v9091_v13 = vpack.c.bf16 %v8735_v20, %v16259_v22  ;;  %18183 = vst [vmem:[#allocation110_spill] sm:$0xff] %v16301_v16  ;;  %v8154_v18 = vpop.f32.mrf.mxu1  ;;  %v6088_v19 = vsel %vm6087_vm12, %v16169_v25, %v6086_v40  ;;  %v8799_v43 = vmul.f32 %v8735_v20, %v8735_v20 }
 0x4db   : > { %v8800_v3 = vmul.f32 %v8736_v60, %v8736_v60  ;;  %v8676_v34 = vmul.f32 %v8153_v57, %v16262_v9  ;;  %v8155_v56 = vadd.f32 %v8154_v18, %v16102_v31  ;;  %v8739_v14 = vmax.f32 %v8675_v2, 0.0  ;;  %v16308_v37 = vpop.f32.mrf.mxu0 }
 0x4dc   : > { %18184 = vst [vmem:[#allocation58_spill] sm:$0xff] %v16308_v37  ;;  %v8156_v49 = vpop.f32.mrf.mxu1  ;;  %v9092_v7 = vpack.c.bf16 %v8736_v60, %v8732_v50  ;;  %v16310_v6 = vmul.f32 5.0, %v12502_v61  ;;  %v6112_v22 = vadd.f32 1e-08, %v6084_v10  ;;  %v18186_v40 = vand.u32 2147483648, %v16169_v25 }
 0x4dd   : > { %v8740_v44 = vmax.f32 %v8676_v34, 0.0  ;;  %v8679_v16 = vmul.f32 %v8155_v56, %v16289_v30  ;;  %v8157_v12 = vadd.f32 %v8156_v49, %v16105_v11  ;;  %v6095_v31 = vsel %vm6094_vm14, %v16192_v8, %v6093_v41  ;;  %v16321_v20 = vpop.f32.mrf.mxu0 }
 0x4de   : > { %18185 = vst [vmem:[#allocation30_spill] sm:$0xff] %v16310_v6  ;;  %v6091_v57 = vsel %vm6089_vm13, %v18186_v40, %v6088_v19  ;;  %18187 = vst [vmem:[#allocation23_spill] sm:$0xff] %v16321_v20  ;;  %9551 = vmatprep.mubr.bf16.mxu0 %v9092_v7  ;;  %v8160_v61 = vpop.f32.mrf.mxu1  ;;  %12511 = vrcp.f32 %v6111_v36  ;;  %v16323_v50 = vadd.f32 %v8800_v3, %v8799_v43  ;;  %v6097_v25 = vand.u32 2147483648, %v16192_v8 }
 0x4df   : > { %v8804_v60 = vmul.f32 %v8740_v44, %v8740_v44  ;;  %v8743_v2 = vmax.f32 %v8679_v16, 0.0  ;;  %v8680_v11 = vmul.f32 %v8157_v12, %v16289_v30  ;;  %v8161_v10 = vadd.f32 %v8160_v61, %v16113_v53  ;;  %9552 = vmatmul.mubr.bf16.gmra.mxu0 %v9091_v13  ;;  %v16329_v41 = vpop.f32.mrf.mxu0  ;;  %v12508_v16 = vpop.eup %12507 }
 0x4e0   : > { %18188 = vst [vmem:[#allocation131_spill] sm:$0xff] %v16323_v50  ;;  %v8803_v18 = vmul.f32 %v8739_v14, %v8739_v14  ;;  %18189 = vst [vmem:[#allocation115_spill] sm:$0xff] %v16329_v41  ;;  %v8162_v19 = vpop.f32.mrf.mxu1  ;;  %v16331_v34 = vmul.f32 5.0, %v12506_v26  ;;  %12513 = vrcp.f32 %v6112_v22  ;;  %v6113_v12 = vadd.f32 1e-08, %v6091_v57  ;;  %v18193_v41 = vld [vmem:[#allocation33_spill] sm:$0xff] }
 0x4e1   : > { %v9095_v36 = vpack.c.bf16 %v8743_v2, %v8739_v14  ;;  %v8744_v3 = vmax.f32 %v8680_v11, 0.0  ;;  %v8683_v56 = vmul.f32 %v8161_v10, %v16310_v6  ;;  %v6098_v43 = vsel %vm6096_vm15, %v6097_v25, %v6095_v31  ;;  %v16335_v13 = vpop.f32.mrf.mxu0  ;;  %v18194_v57 = vld [vmem:[#allocation92_spill] sm:$0xff] }
 0x4e2   : > { %18190 = vst [vmem:[#allocation72_spill] sm:$0xff] %v16331_v34  ;;  %v8163_v53 = vadd.f32 %v8162_v19, %v16123_v51  ;;  %18191 = vst [vmem:[#allocation69_spill] sm:$0xff] %v16335_v13  ;;  %v8164_v49 = vpop.f32.mrf.mxu1  ;;  %v16337_v8 = vadd.f32 %v8804_v60, %v8803_v18  ;;  %v8807_v7 = vmul.f32 %v8743_v2, %v8743_v2  ;;  %v18197_v18 = vld [vmem:[#allocation108_spill] sm:$0xff]  ;;  %v6114_v19 = vadd.f32 1e-08, %v6098_v43  ;;  %v18204_v43 = vld [vmem:[#allocation94_spill] sm:$0xff] }
 0x4e3   : > { %v8808_v40 = vmul.f32 %v8744_v3, %v8744_v3  ;;  %v8165_v26 = vadd.f32 %v8164_v49, %v16131_v46  ;;  %v9096_v61 = vpack.c.bf16 %v8744_v3, %v8740_v44  ;;  %v8747_v14 = vmax.f32 %v8683_v56, 0.0  ;;  %v12510_v22 = vpop.eup %12509  ;;  %v16344_v25 = vpop.f32.mrf.mxu0  ;;  %v18198_v46 = vld [vmem:[#allocation117_spill] sm:$0xff] }
 0x4e4   : > { %18192 = vst [vmem:[#allocation65_spill] sm:$0xff] %v16337_v8  ;;  %v8684_v11 = vmul.f32 %v8163_v53, %v16310_v6  ;;  %v8166_v10 = vpop.f32.mrf.mxu1  ;;  %v8058_v31 = vadd.f32 %v18194_v57, %v18193_v41  ;;  %18195 = vst [vmem:[#allocation74_spill] sm:$0xff] %v16344_v25  ;;  %v7951_v44 = vadd.f32 %v18198_v46, %v18197_v18  ;;  %v16351_v56 = vmul.f32 5.0, %v12508_v16  ;;  %v18201_v25 = vld [vmem:[#allocation101_spill] sm:$0xff] }
 0x4e5   : > { %v8687_v51 = vmul.f32 %v8165_v26, %v16331_v34  ;;  %v8167_v60 = vadd.f32 %v8166_v10, %v16143_v15  ;;  %9561 = vmatprep.mubr.bf16.mxu0 %v9096_v61  ;;  %v16347_v2 = vadd.f32 %v8808_v40, %v8807_v7  ;;  %12515 = vrcp.f32 %v6113_v12  ;;  %v18200_v26 = vld [vmem:[#allocation42_spill] sm:$0xff]  ;;  %v18202_v61 = vld [vmem:[#allocation107_spill] sm:$0xff]  ;;  %v16359_v20 = vpop.f32.mrf.mxu0 }
 0x4e6   : > { %v8748_v3 = vmax.f32 %v8684_v11, 0.0  ;;  %18199 = vst [vmem:[#allocation32_spill] sm:$0xff] %v16351_v56  ;;  %v8170_v53 = vpop.f32.mrf.mxu1  ;;  %v8060_v15 = vadd.f32 %v18201_v25, %v18200_v26  ;;  %v18203_v7 = vld [vmem:[#allocation91_spill] sm:$0xff]  ;;  %v8811_v10 = vmul.f32 %v8747_v14, %v8747_v14  ;;  %v8064_v11 = vadd.f32 %v18204_v43, %v7951_v44  ;;  %18205 = vst [vmem:[#allocation119_spill] sm:$0xff] %v16359_v20 }
 0x4e7   : > { %18196 = vst [vmem:[#allocation59_spill] sm:$0xff] %v16347_v2  ;;  %v8751_v49 = vmax.f32 %v8687_v51, 0.0  ;;  %v8688_v41 = vmul.f32 %v8167_v60, %v16331_v34  ;;  %v8171_v57 = vadd.f32 %v8170_v53, %v8058_v31  ;;  %9562 = vmatmul.mubr.bf16.gmra.mxu0 %v9095_v36  ;;  %v8062_v40 = vadd.f32 %v18203_v7, %v18202_v61  ;;  %v18209_v43 = vld [vmem:[#allocation27_spill] sm:$0xff] }
 0x4e8   : > { %v8812_v13 = vmul.f32 %v8748_v3, %v8748_v3  ;;  %v8172_v18 = vpop.f32.mrf.mxu1  ;;  %v16362_v36 = vmul.f32 5.0, %v12510_v22  ;;  %12517 = vrcp.f32 %v6114_v19 }
 0x4e9   : > { %v9099_v16 = vpack.c.bf16 %v8751_v49, %v8747_v14  ;;  %v8752_v46 = vmax.f32 %v8688_v41, 0.0  ;;  %v8691_v51 = vmul.f32 %v8171_v57, %v16351_v56  ;;  %v8173_v31 = vadd.f32 %v8172_v18, %v8060_v15  ;;  %v18208_v41 = vld [vmem:[#allocation118_spill] sm:$0xff]  ;;  %v16369_v57 = vpop.f32.mrf.mxu0 }
 0x4ea   : > { %18206 = vst [vmem:[#allocation120_spill] sm:$0xff] %v16362_v36  ;;  %v8174_v12 = vpop.f32.mrf.mxu1  ;;  %v16364_v25 = vadd.f32 %v8812_v13, %v8811_v10  ;;  %v8815_v53 = vmul.f32 %v8751_v49, %v8751_v49  ;;  %v8068_v20 = vadd.f32 %v18209_v43, %v18208_v41  ;;  %18210 = vst [vmem:[#allocation133_spill] sm:$0xff] %v16369_v57  ;;  %v18215_v41 = vld [vmem:[#allocation55_spill] sm:$0xff] }
 0x4eb   : > { %v12512_v60 = vpop.eup %12511  ;;  %v8816_v26 = vmul.f32 %v8752_v46, %v8752_v46  ;;  %v8175_v61 = vadd.f32 %v8174_v12, %v8062_v40  ;;  %v9100_v7 = vpack.c.bf16 %v8752_v46, %v8748_v3  ;;  %v8755_v34 = vmax.f32 %v8691_v51, 0.0  ;;  %v18213_v51 = vld [vmem:[#allocation49_spill] sm:$0xff]  ;;  %v18216_v43 = vld [vmem:[#allocation95_spill] sm:$0xff]  ;;  %v16383_v57 = vpop.f32.mrf.mxu0 }
 0x4ec   : > { %18207 = vst [vmem:[#allocation25_spill] sm:$0xff] %v16364_v25  ;;  %v8692_v14 = vmul.f32 %v8173_v31, %v16351_v56  ;;  %v8176_v44 = vpop.f32.mrf.mxu1  ;;  %v16375_v18 = vmul.f32 5.0, %v12512_v60  ;;  %v18214_v31 = vld [vmem:[#allocation57_spill] sm:$0xff]  ;;  %18219 = vst [vmem:[#allocation67_spill] sm:$0xff] %v16383_v57  ;;  %v18224_v57 = vld [vmem:[#allocation99_spill] sm:$0xff] }
 0x4ed   : > { %v8695_v22 = vmul.f32 %v8175_v61, %v16362_v36  ;;  %v8177_v15 = vadd.f32 %v8176_v44, %v8064_v11  ;;  %9571 = vmatprep.mubr.bf16.mxu0 %v9100_v7  ;;  %v16372_v13 = vadd.f32 %v8816_v26, %v8815_v53  ;;  %v12514_v19 = vpop.eup %12513  ;;  %v7961_v12 = vadd.f32 %v18214_v31, %v18213_v51  ;;  %v18217_v26 = vld [vmem:[#allocation47_spill] sm:$0xff]  ;;  %v18218_v44 = vld [vmem:[#allocation28_spill] sm:$0xff]  ;;  %v16394_v37 = vpop.f32.mrf.mxu0 }
 0x4ee   : > { %v8756_v49 = vmax.f32 %v8692_v14, 0.0  ;;  %v8180_v10 = vpop.f32.mrf.mxu1  ;;  %18212 = vst [vmem:[#allocation24_spill] sm:$0xff] %v16375_v18  ;;  %v8070_v61 = vadd.f32 %v18216_v43, %v18215_v41  ;;  %v8819_v11 = vmul.f32 %v8755_v34, %v8755_v34  ;;  %v8072_v14 = vadd.f32 %v18218_v44, %v18217_v26  ;;  %18225 = vst [vmem:[#allocation78_spill] sm:$0xff] %v16394_v37 }
 0x4ef   : > { %18211 = vst [vmem:[#allocation31_spill] sm:$0xff] %v16372_v13  ;;  %v8759_v40 = vmax.f32 %v8695_v22, 0.0  ;;  %v8696_v3 = vmul.f32 %v8177_v15, %v16362_v36  ;;  %v8181_v46 = vadd.f32 %v8180_v10, %v8068_v20  ;;  %9572 = vmatmul.mubr.bf16.gmra.mxu0 %v9099_v16  ;;  %v18220_v20 = vld [vmem:[#allocation19_spill] sm:$0xff]  ;;  %v16387_v36 = vmul.f32 5.0, %v12514_v19 }
 0x4f0   : > { %v8820_v7 = vmul.f32 %v8756_v49, %v8756_v49  ;;  %v8182_v53 = vpop.f32.mrf.mxu1  ;;  %v8074_v16 = vadd.f32 %v18220_v20, %v7961_v12  ;;  %v18229_v20 = vld [vmem:[#allocation38_spill] sm:$0xff] }
 0x4f1   : > { %v9103_v22 = vpack.c.bf16 %v8759_v40, %v8755_v34  ;;  %v8760_v15 = vmax.f32 %v8696_v3, 0.0  ;;  %v8699_v60 = vmul.f32 %v8181_v46, %v16375_v18  ;;  %v8183_v10 = vadd.f32 %v8182_v53, %v8070_v61  ;;  %18221 = vst [vmem:[#allocation68_spill] sm:$0xff] %v16387_v36  ;;  %v18223_v3 = vld [vmem:[#allocation45_spill] sm:$0xff] }
 0x4f2   : > { %v8184_v51 = vpop.f32.mrf.mxu1  ;;  %v16389_v31 = vadd.f32 %v8820_v7, %v8819_v11  ;;  %v8823_v41 = vmul.f32 %v8759_v40, %v8759_v40  ;;  %v12516_v25 = vpop.eup %12515  ;;  %v8078_v46 = vadd.f32 %v18224_v57, %v18223_v3 }
 0x4f3   : > { %v8824_v43 = vmul.f32 %v8760_v15, %v8760_v15  ;;  %v8185_v13 = vadd.f32 %v8184_v51, %v8072_v14  ;;  %v9104_v56 = vpack.c.bf16 %v8760_v15, %v8756_v49  ;;  %v8763_v26 = vmax.f32 %v8699_v60, 0.0  ;;  %v18228_v60 = vld [vmem:[#allocation61_spill] sm:$0xff] }
 0x4f4   : > { %18222 = vst [vmem:[#allocation76_spill] sm:$0xff] %v16389_v31  ;;  %v8700_v44 = vmul.f32 %v8183_v10, %v16375_v18  ;;  %v8186_v34 = vpop.f32.mrf.mxu1  ;;  %v16400_v14 = vmul.f32 5.0, %v12516_v25  ;;  %v7971_v57 = vadd.f32 %v16119_v28, %v18228_v60  ;;  %v18230_v10 = vld [vmem:[#allocation54_spill] sm:$0xff] }
 0x4f5   : > { %v8703_v19 = vmul.f32 %v8185_v13, %v16387_v36  ;;  %v8187_v12 = vadd.f32 %v8186_v34, %v8074_v16  ;;  %9581 = vmatprep.mubr.bf16.mxu0 %v9104_v56  ;;  %v16397_v61 = vadd.f32 %v8824_v43, %v8823_v41  ;;  %v12518_v7 = vpop.eup %12517  ;;  %v8080_v13 = vadd.f32 %v18230_v10, %v18229_v20  ;;  %v18231_v41 = vld [vmem:[#allocation37_spill] sm:$0xff] }
 0x4f6   : > { %v8764_v40 = vmax.f32 %v8700_v44, 0.0  ;;  %v8190_v11 = vpop.f32.mrf.mxu1  ;;  %18227 = vst [vmem:[#allocation134_spill] sm:$0xff] %v16400_v14  ;;  %v8827_v16 = vmul.f32 %v8763_v26, %v8763_v26  ;;  %v8082_v43 = vadd.f32 %v15997_v23, %v18231_v41  ;;  %v16408_v44 = vpop.f32.mrf.mxu0 }
 0x4f7   : > { %18226 = vst [vmem:[#allocation71_spill] sm:$0xff] %v16397_v61  ;;  %v8767_v49 = vmax.f32 %v8703_v19, 0.0  ;;  %v8704_v53 = vmul.f32 %v8187_v12, %v16387_v36  ;;  %v8191_v15 = vadd.f32 %v8190_v11, %v8078_v46  ;;  %9582 = vmatmul.mubr.bf16.gmra.mxu0 %v9103_v22  ;;  %18232 = vst [vmem:[#allocation51_spill] sm:$0xff] %v16408_v44  ;;  %v16412_v19 = vmul.f32 5.0, %v12518_v7 }
 0x4f8   : > { %v8828_v56 = vmul.f32 %v8764_v40, %v8764_v40  ;;  %v8192_v51 = vpop.f32.mrf.mxu1  ;;  %v8084_v22 = vadd.f32 %v16004_v63, %v7971_v57 }
 0x4f9   : > { %v9107_v34 = vpack.c.bf16 %v8767_v49, %v8763_v26  ;;  %v8768_v3 = vmax.f32 %v8704_v53, 0.0  ;;  %v8707_v25 = vmul.f32 %v8191_v15, %v16400_v14  ;;  %v8193_v46 = vadd.f32 %v8192_v51, %v8080_v13  ;;  %18233 = vst [vmem:[#allocation60_spill] sm:$0xff] %v16412_v19  ;;  %v16417_v26 = vpop.f32.mrf.mxu0 }
 0x4fa   : > { %v8194_v28 = vpop.f32.mrf.mxu1  ;;  %v16414_v12 = vadd.f32 %v8828_v56, %v8827_v16  ;;  %v8831_v11 = vmul.f32 %v8767_v49, %v8767_v49 }
 0x4fb   : > { %v8832_v60 = vmul.f32 %v8768_v3, %v8768_v3  ;;  %v8195_v20 = vadd.f32 %v8194_v28, %v8082_v43  ;;  %v9108_v10 = vpack.c.bf16 %v8768_v3, %v8764_v40  ;;  %v8771_v36 = vmax.f32 %v8707_v25, 0.0  ;;  %v8461_v51 = vpop.f32.mrf.mxu0 }
 0x4fc   : > { %18234 = vst [vmem:[#allocation21_spill] sm:$0xff] %v16414_v12  ;;  %v8708_v23 = vmul.f32 %v8193_v46, %v16400_v14  ;;  %v8196_v41 = vpop.f32.mrf.mxu1 }
 0x4fd   : > { %v8711_v53 = vmul.f32 %v8195_v20, %v16412_v19  ;;  %v8197_v15 = vadd.f32 %v8196_v41, %v8084_v22  ;;  %9591 = vmatprep.mubr.bf16.mxu0 %v9108_v10  ;;  %v16420_v63 = vadd.f32 %v8832_v60, %v8831_v11  ;;  %v8835_v16 = vmul.f32 %v8771_v36, %v8771_v36  ;;  %v8463_v60 = vpop.f32.mrf.mxu0 }
 0x4fe   : > { %v8772_v7 = vmax.f32 %v8708_v23, 0.0  ;;  %v8346_v57 = vpop.f32.mrf.mxu1 }
 0x4ff   : > { %18235 = vst [vmem:[#allocation135_spill] sm:$0xff] %v16420_v63  ;;  %v8775_v13 = vmax.f32 %v8711_v53, 0.0  ;;  %v8712_v49 = vmul.f32 %v8197_v15, %v16412_v19  ;;  %9592 = vmatmul.mubr.bf16.gmra.mxu0 %v9107_v34  ;;  %v8465_v41 = vpop.f32.mrf.mxu0 }
 0x500   : > { %v8836_v40 = vmul.f32 %v8772_v7, %v8772_v7  ;;  %v8348_v56 = vpop.f32.mrf.mxu1 }
 0x501   : > { %v9111_v43 = vpack.c.bf16 %v8775_v13, %v8771_v36  ;;  %v8776_v3 = vmax.f32 %v8712_v49, 0.0  ;;  %v8839_v28 = vmul.f32 %v8775_v13, %v8775_v13  ;;  %v8469_v36 = vpop.f32.mrf.mxu0 }
 0x502   : > { %v8350_v25 = vpop.f32.mrf.mxu1  ;;  %v16423_v46 = vadd.f32 %v8836_v40, %v8835_v16 }
 0x503   : > { %v8840_v22 = vmul.f32 %v8776_v3, %v8776_v3  ;;  %v9112_v20 = vpack.c.bf16 %v8776_v3, %v8772_v7  ;;  %v16433_v13 = vpop.f32.mrf.mxu0 }
 0x504   : > { %18236 = vst [vmem:[#allocation41_spill] sm:$0xff] %v16423_v46  ;;  %v8352_v11 = vpop.f32.mrf.mxu1 }
 0x505   : > { %9601 = vmatprep.mubr.bf16.mxu0 %v9112_v20  ;;  %v16425_v10 = vadd.f32 %v8840_v22, %v8839_v28  ;;  %v16439_v3 = vpop.f32.mrf.mxu0 }
 0x506   : > { %v8356_v23 = vpop.f32.mrf.mxu1 }
 0x507   : > { %18237 = vst [vmem:[#allocation121_spill] sm:$0xff] %v16425_v10  ;;  %9602 = vmatmul.mubr.bf16.gmra.mxu0 %v9111_v43  ;;  %v16445_v22 = vpop.f32.mrf.mxu0 }
 0x508   : > { %v8358_v34 = vpop.f32.mrf.mxu1 }
 0x509   : > { %v16451_v46 = vpop.f32.mrf.mxu0 }
 0x50a   : > { %v8360_v53 = vpop.f32.mrf.mxu1 }
 0x50b   : > { %v16457_v14 = vpop.f32.mrf.mxu0 }
 0x50c   : > { %v16427_v15 = vpop.f32.mrf.mxu1 }
 0x50d   : > { %v16463_v37 = vpop.f32.mrf.mxu0 }
 0x50e   : > { %v16429_v49 = vpop.f32.mrf.mxu1 }
 0x50f   : > { %v16469_v31 = vpop.f32.mrf.mxu0 }
 0x510   : > { %v16431_v16 = vpop.f32.mrf.mxu1 }
 0x511   : > { %v16475_v8 = vpop.f32.mrf.mxu0 }
 0x512   : > { %v16435_v7 = vpop.f32.mrf.mxu1 }
 0x514   : > { %v16437_v40 = vpop.f32.mrf.mxu1 }
 0x516   : > { %v16441_v28 = vpop.f32.mrf.mxu1 }
 0x518   : > { %v16443_v43 = vpop.f32.mrf.mxu1 }
 0x51a   : > { %v16447_v20 = vpop.f32.mrf.mxu1 }
 0x51c   : > { %v16449_v10 = vpop.f32.mrf.mxu1 }
 0x51e   : > { %v16453_v19 = vpop.f32.mrf.mxu1 }
 0x520   : > { %v16455_v63 = vpop.f32.mrf.mxu1 }
 0x521   : > { %18238 = vst [vmem:[#allocation53_spill] sm:$0xff] %v16455_v63 }
 0x522   : > { %v16459_v12 = vpop.f32.mrf.mxu1 }
 0x523   : > { %18239 = vst [vmem:[#allocation22_spill] sm:$0xff] %v16459_v12  ;;  %v16481_v12 = vpop.f32.mrf.mxu0 }
 0x524   : > { %v16461_v44 = vpop.f32.mrf.mxu1  ;;  %18247 = vst [vmem:[#allocation40_spill] sm:$0xff] %v16481_v12 }
 0x525   : > { %18240 = vst [vmem:[#allocation70_spill] sm:$0xff] %v16461_v44 }
 0x526   : > { %v16465_v61 = vpop.f32.mrf.mxu1 }
 0x527   : > { %18241 = vst [vmem:[#allocation29_spill] sm:$0xff] %v16465_v61  ;;  %v16487_v61 = vpop.f32.mrf.mxu0 }
 0x528   : > { %v16467_v18 = vpop.f32.mrf.mxu1  ;;  %18250 = vst [vmem:[#allocation50_spill] sm:$0xff] %v16487_v61 }
 0x529   : > { %18242 = vst [vmem:[#allocation26_spill] sm:$0xff] %v16467_v18 }
 0x52a   : > { %v16471_v2 = vpop.f32.mrf.mxu1 }
 0x52b   : > { %18243 = vst [vmem:[#allocation56_spill] sm:$0xff] %v16471_v2  ;;  %v16494_v2 = vpop.f32.mrf.mxu0 }
 0x52c   : > { %v16473_v6 = vpop.f32.mrf.mxu1  ;;  %18253 = vst [vmem:[#allocation127_spill] sm:$0xff] %v16494_v2 }
 0x52d   : > { %18244 = vst [vmem:[#allocation34_spill] sm:$0xff] %v16473_v6  ;;  %v8347_v6 = vadd.f32 %v8346_v57, %v16012_v32  ;;  %v16502_v9 = vpop.f32.mrf.mxu0  ;;  %v8357_v32 = vadd.f32 %v8356_v23, %v16091_v55 }
 0x52e   : > { %v16477_v17 = vpop.f32.mrf.mxu1  ;;  %18256 = vst [vmem:[#allocation123_spill] sm:$0xff] %v16502_v9 }
 0x52f   : > { %18245 = vst [vmem:[#allocation20_spill] sm:$0xff] %v16477_v17  ;;  %v16507_v2 = vpop.f32.mrf.mxu0 }
 0x530   : > { %v16479_v30 = vpop.f32.mrf.mxu1 }
 0x531   : > { %18246 = vst [vmem:[#allocation126_spill] sm:$0xff] %v16479_v30  ;;  %v8349_v30 = vadd.f32 %v8348_v56, %v16028_v5  ;;  %v16513_v55 = vpop.f32.mrf.mxu0 }
 0x532   : > { %v16483_v44 = vpop.f32.mrf.mxu1 }
 0x533   : > { %18248 = vst [vmem:[#allocation104_spill] sm:$0xff] %v16483_v44  ;;  %v8351_v44 = vadd.f32 %v8350_v25, %v16044_v0  ;;  %v8462_v12 = vadd.f32 %v8461_v51, %v8349_v30  ;;  %v8470_v30 = vadd.f32 %v8469_v36, %v8357_v32 }
 0x534   : > { %v16485_v35 = vpop.f32.mrf.mxu1 }
 0x535   : > { %18249 = vst [vmem:[#allocation112_spill] sm:$0xff] %v16485_v35  ;;  %v8460_v35 = vadd.f32 %v16417_v26, %v8347_v6  ;;  %v8359_v26 = vadd.f32 %v8358_v34, %v16109_v1  ;;  %v16523_v34 = vpop.f32.mrf.mxu0 }
 0x536   : > { %v16489_v18 = vpop.f32.mrf.mxu1 }
 0x537   : > { %18251 = vst [vmem:[#allocation77_spill] sm:$0xff] %v16489_v18  ;;  %v8353_v18 = vadd.f32 %v8352_v11, %v16071_v62  ;;  %v8361_v62 = vadd.f32 %v8360_v53, %v16127_v58  ;;  %v8367_v58 = vadd.f32 %v16429_v49, %v16155_v54 }
 0x538   : > { %v16491_v50 = vpop.f32.mrf.mxu1 }
 0x539   : > { %18252 = vst [vmem:[#allocation111_spill] sm:$0xff] %v16491_v50  ;;  %v8466_v6 = vadd.f32 %v8465_v41, %v8353_v18  ;;  %v8474_v53 = vadd.f32 %v16439_v3, %v8361_v62  ;;  %v18258_v62 = vld [vmem:[#allocation98_spill] sm:$0xff] }
 0x53a   : > { %v16496_v63 = vpop.f32.mrf.mxu1 }
 0x53b   : > { %18254 = vst [vmem:[#allocation75_spill] sm:$0xff] %v16496_v63 }
 0x53c   : > { %v16499_v17 = vpop.f32.mrf.mxu1 }
 0x53d   : > { %18255 = vst [vmem:[#allocation81_spill] sm:$0xff] %v16499_v17  ;;  %v8464_v17 = vadd.f32 %v8463_v60, %v8351_v44  ;;  %v8363_v44 = vadd.f32 %v16427_v15, %v16139_v45  ;;  %v18257_v15 = vld [vmem:[#allocation103_spill] sm:$0xff] }
 0x53e   : > { %v8572_v61 = vpop.f32.mrf.mxu1 }
 0x53f   : > { %v8573_v50 = vadd.f32 %v8572_v61, %v8460_v35  ;;  %v8476_v54 = vadd.f32 %v16445_v22, %v8363_v44 }
 0x540   : > { %v8574_v57 = vpop.f32.mrf.mxu1 }
 0x541   : > { %v8653_v5 = vmul.f32 %v8573_v50, %v16148_v52  ;;  %v8575_v56 = vadd.f32 %v8574_v57, %v8462_v12 }
 0x542   : > { %v8576_v63 = vpop.f32.mrf.mxu1 }
 0x543   : > { %v8717_v0 = vmax.f32 %v8653_v5, 0.0  ;;  %v8654_v25 = vmul.f32 %v8575_v56, %v16148_v52  ;;  %v8577_v9 = vadd.f32 %v8576_v63, %v8464_v17  ;;  %v8472_v63 = vadd.f32 %v16433_v13, %v8359_v26 }
 0x544   : > { %v8578_v35 = vpop.f32.mrf.mxu1  ;;  %v8480_v26 = vadd.f32 %v16451_v46, %v8367_v58 }
 0x545   : > { %v8781_v61 = vmul.f32 %v8717_v0, %v8717_v0  ;;  %v8718_v51 = vmax.f32 %v8654_v25, 0.0  ;;  %v8657_v50 = vmul.f32 %v8577_v9, %v16159_v33  ;;  %v8579_v12 = vadd.f32 %v8578_v35, %v8466_v6  ;;  %v16535_v35 = vpop.f32.mrf.mxu0 }
 0x546   : > { %v8582_v11 = vpop.f32.mrf.mxu1 }
 0x547   : > { %v8721_v52 = vmax.f32 %v8657_v50, 0.0  ;;  %v8658_v17 = vmul.f32 %v8579_v12, %v16159_v33  ;;  %v8583_v18 = vadd.f32 %v8582_v11, %v8470_v30  ;;  %v8782_v1 = vmul.f32 %v8718_v51, %v8718_v51  ;;  %v18260_v11 = vld [vmem:[#allocation44_spill] sm:$0xff]  ;;  %v16545_v58 = vpop.f32.mrf.mxu0 }
 0x548   : > { %v8584_v60 = vpop.f32.mrf.mxu1  ;;  %v8844_v23 = vadd.f32 %v16231_v47, %v8781_v61  ;;  %v8369_v33 = vadd.f32 %v16431_v16, %v18257_v15  ;;  %v8371_v16 = vadd.f32 %v16435_v7, %v18258_v62 }
 0x549   : > { %v8785_v9 = vmul.f32 %v8721_v52, %v8721_v52  ;;  %v8722_v41 = vmax.f32 %v8658_v17, 0.0  ;;  %v8661_v45 = vmul.f32 %v8583_v18, %v16172_v27  ;;  %v8585_v36 = vadd.f32 %v8584_v60, %v8472_v63 }
 0x54a   : > { %v8586_v32 = vpop.f32.mrf.mxu1  ;;  %v8845_v57 = vadd.f32 %v8844_v23, %v8782_v1  ;;  %v9085_v56 = vpack.c.bf16 %v8721_v52, %v8717_v0  ;;  %v8377_v52 = vadd.f32 %v16441_v28, %v18260_v11  ;;  %v8482_v17 = vadd.f32 %v16457_v14, %v8369_v33 }
 0x54b   : > { %v8725_v49 = vmax.f32 %v8661_v45, 0.0  ;;  %v8587_v13 = vadd.f32 %v8586_v32, %v8474_v53  ;;  %v9086_v5 = vpack.c.bf16 %v8722_v41, %v8718_v51  ;;  %v8786_v47 = vmul.f32 %v8722_v41, %v8722_v41  ;;  %v18259_v51 = vld [vmem:[#allocation102_spill] sm:$0xff] }
 0x54c   : > { %v8662_v25 = vmul.f32 %v8585_v36, %v16172_v27  ;;  %8846 = vadd.xlane.f32.xlu0 %v8845_v57  ;;  %v8588_v6 = vpop.f32.mrf.mxu1  ;;  %v8849_v3 = vadd.f32 %v16243_v38, %v8785_v9  ;;  %v8373_v0 = vadd.f32 %v16437_v40, %v18259_v51  ;;  %v8484_v23 = vadd.f32 %v16463_v37, %v8371_v16 }
 0x54d   : > { %v8789_v30 = vmul.f32 %v8725_v49, %v8725_v49  ;;  %v8665_v22 = vmul.f32 %v8587_v13, %v16184_v21  ;;  %v8589_v61 = vadd.f32 %v8588_v6, %v8476_v54  ;;  %9644 = vmatprep.mubr.bf16.mxu1 %v9086_v5  ;;  %v8490_v54 = vadd.f32 %v16475_v8, %v8377_v52  ;;  %v16557_v13 = vpop.f32.mrf.mxu0 }
 0x54e   : > { %v8726_v27 = vmax.f32 %v8662_v25, 0.0  ;;  %v8592_v50 = vpop.f32.mrf.mxu1  ;;  %9645 = vmatmul.mubr.bf16.vlgmr.msra.gmra.mxu1 %v9085_v56  ;;  %v8850_v12 = vadd.f32 %v8849_v3, %v8786_v47  ;;  %v8486_v28 = vadd.f32 %v16469_v31, %v8373_v0  ;;  %v18263_v3 = vld [vmem:[#allocation40_spill] sm:$0xff]  ;;  %v18265_v0 = vld [vmem:[#allocation50_spill] sm:$0xff] }
 0x54f   : > { %v8729_v46 = vmax.f32 %v8665_v22, 0.0  ;;  %v8666_v38 = vmul.f32 %v8589_v61, %v16184_v21  ;;  %v8593_v44 = vadd.f32 %v8592_v50, %v8480_v26  ;;  %v8854_v7 = vadd.f32 %v16248_v29, %v8789_v30  ;;  %v18261_v21 = vld [vmem:[#allocation124_spill] sm:$0xff]  ;;  %v16567_v22 = vpop.f32.mrf.mxu0  ;;  %v18264_v61 = vld [vmem:[#allocation66_spill] sm:$0xff]  ;;  %v18267_v50 = vld [vmem:[#allocation53_spill] sm:$0xff] }
 0x550   : > { %8851 = vadd.xlane.f32.xlu1 %v8850_v12  ;;  %v8594_v18 = vpop.f32.mrf.mxu1  ;;  %v8790_v1 = vmul.f32 %v8726_v27, %v8726_v27  ;;  %v8379_v9 = vadd.f32 %v16443_v43, %v18261_v21  ;;  %v8381_v43 = vadd.f32 %v16447_v20, %v16220_v4  ;;  %v18262_v20 = vld [vmem:[#allocation62_spill] sm:$0xff] }
 0x551   : > { %v8793_v40 = vmul.f32 %v8729_v46, %v8729_v46  ;;  %v8730_v63 = vmax.f32 %v8666_v38, 0.0  ;;  %v8669_v60 = vmul.f32 %v8593_v44, %v16196_v48  ;;  %v8595_v29 = vadd.f32 %v8594_v18, %v8482_v17 }
 0x552   : > { %v8596_v41 = vpop.f32.mrf.mxu1  ;;  %v8855_v45 = vadd.f32 %v8854_v7, %v8790_v1  ;;  %v9089_v36 = vpack.c.bf16 %v8729_v46, %v8725_v49  ;;  %v8383_v49 = vadd.f32 %v16449_v10, %v16229_v42  ;;  %v8387_v26 = vadd.f32 %v16453_v19, %v18262_v20  ;;  %v18268_v19 = vld [vmem:[#allocation127_spill] sm:$0xff] }
 0x553   : > { %v8733_v53 = vmax.f32 %v8669_v60, 0.0  ;;  %v8597_v14 = vadd.f32 %v8596_v41, %v8484_v23  ;;  %v9090_v15 = vpack.c.bf16 %v8730_v63, %v8726_v27  ;;  %v8794_v33 = vmul.f32 %v8730_v63, %v8730_v63  ;;  %v18269_v63 = vld [vmem:[#allocation123_spill] sm:$0xff]  ;;  %v18272_v41 = vld [vmem:[#allocation22_spill] sm:$0xff] }
 0x554   : > { %v8670_v32 = vmul.f32 %v8595_v29, %v16196_v48  ;;  %8856 = vadd.xlane.f32.xlu0 %v8855_v45  ;;  %v8598_v57 = vpop.f32.mrf.mxu1  ;;  %v8859_v37 = vadd.f32 %v16280_v59, %v8793_v40  ;;  %v8492_v62 = vadd.f32 %v18263_v3, %v8379_v9  ;;  %v8494_v27 = vadd.f32 %v18265_v0, %v8381_v43  ;;  %v18270_v23 = vld [vmem:[#allocation131_spill] sm:$0xff]  ;;  %v16577_v9 = vpop.f32.mrf.mxu0  ;;  %v18279_v3 = vld [vmem:[#allocation30_spill] sm:$0xff] }
 0x555   : > { %v8797_v5 = vmul.f32 %v8733_v53, %v8733_v53  ;;  %v8673_v31 = vmul.f32 %v8597_v14, %v16216_v24  ;;  %v8599_v47 = vadd.f32 %v8598_v57, %v8486_v28  ;;  %9654 = vmatprep.mubr.bf16.mxu1 %v9090_v15  ;;  %v8496_v44 = vadd.f32 %v18268_v19, %v8383_v49  ;;  %v18271_v29 = vld [vmem:[#allocation39_spill] sm:$0xff]  ;;  %v18273_v14 = vld [vmem:[#allocation52_spill] sm:$0xff] }
 0x556   : > { %v8734_v48 = vmax.f32 %v8670_v32, 0.0  ;;  %v8602_v56 = vpop.f32.mrf.mxu1  ;;  %9655 = vmatmul.mubr.bf16.gmra.mxu1 %v9089_v36  ;;  %v8860_v25 = vadd.f32 %v8859_v37, %v8794_v33  ;;  %v8500_v60 = vadd.f32 %v18269_v63, %v8387_v26  ;;  %v8391_v45 = vadd.f32 %v18272_v41, %v18271_v29  ;;  %v18274_v36 = vld [vmem:[#allocation109_spill] sm:$0xff] }
 0x557   : > { %v8737_v8 = vmax.f32 %v8673_v31, 0.0  ;;  %v8674_v59 = vmul.f32 %v8599_v47, %v16216_v24  ;;  %v8603_v6 = vadd.f32 %v8602_v56, %v8490_v54  ;;  %v8864_v4 = vadd.f32 %v16293_v39, %v8797_v5  ;;  %v18266_v24 = vld [vmem:[#allocation129_spill] sm:$0xff] }
 0x558   : > { %8861 = vadd.xlane.f32.xlu1 %v8860_v25  ;;  %v8604_v16 = vpop.f32.mrf.mxu1  ;;  %v8798_v30 = vmul.f32 %v8734_v48, %v8734_v48  ;;  %v8389_v12 = vadd.f32 %v18267_v50, %v18266_v24  ;;  %v18276_v47 = vld [vmem:[#allocation65_spill] sm:$0xff] }
 0x559   : > { %v8801_v42 = vmul.f32 %v8737_v8, %v8737_v8  ;;  %v8738_v10 = vmax.f32 %v8674_v59, 0.0  ;;  %v8677_v51 = vmul.f32 %v8603_v6, %v18264_v61  ;;  %v8605_v39 = vadd.f32 %v8604_v16, %v8492_v62  ;;  %v18278_v56 = vld [vmem:[#allocation29_spill] sm:$0xff] }
 0x55a   : > { %v8606_v46 = vpop.f32.mrf.mxu1  ;;  %v8865_v38 = vadd.f32 %v8864_v4, %v8798_v30  ;;  %v9093_v18 = vpack.c.bf16 %v8737_v8, %v8733_v53  ;;  %v18275_v53 = vld [vmem:[#allocation70_spill] sm:$0xff]  ;;  %v8502_v8 = vadd.f32 %v16507_v2, %v8389_v12  ;;  %v16589_v4 = vpop.f32.mrf.mxu0  ;;  %v8504_v16 = vadd.f32 %v16513_v55, %v8391_v45  ;;  %v18282_v55 = vld [vmem:[#allocation59_spill] sm:$0xff] }
 0x55b   : > { %v8741_v7 = vmax.f32 %v8677_v51, 0.0  ;;  %v8607_v11 = vadd.f32 %v8606_v46, %v8494_v27  ;;  %v9094_v52 = vpack.c.bf16 %v8738_v10, %v8734_v48  ;;  %v8802_v17 = vmul.f32 %v8738_v10, %v8738_v10  ;;  %v18277_v48 = vld [vmem:[#allocation125_spill] sm:$0xff]  ;;  %v18280_v30 = vld [vmem:[#allocation110_spill] sm:$0xff] }
 0x55c   : > { %v8678_v1 = vmul.f32 %v8605_v39, %v18264_v61  ;;  %8866 = vadd.xlane.f32.xlu0 %v8865_v38  ;;  %v8608_v40 = vpop.f32.mrf.mxu1  ;;  %v8869_v21 = vadd.f32 %v18270_v23, %v8801_v42  ;;  %v8393_v32 = vadd.f32 %v18275_v53, %v18274_v36  ;;  %v8397_v25 = vadd.f32 %v18278_v56, %v18277_v48  ;;  %v18281_v42 = vld [vmem:[#allocation26_spill] sm:$0xff]  ;;  %v18290_v36 = vld [vmem:[#allocation20_spill] sm:$0xff]  ;;  %v18292_v48 = vld [vmem:[#allocation69_spill] sm:$0xff] }
 0x55d   : > { %v8805_v28 = vmul.f32 %v8741_v7, %v8741_v7  ;;  %v8681_v15 = vmul.f32 %v8607_v11, %v18273_v14  ;;  %v8609_v33 = vadd.f32 %v8608_v40, %v8496_v44  ;;  %9664 = vmatprep.mubr.bf16.mxu1 %v9094_v52  ;;  %v8399_v10 = vadd.f32 %v18281_v42, %v18280_v30  ;;  %v16599_v11 = vpop.f32.mrf.mxu0  ;;  %v18283_v52 = vld [vmem:[#allocation58_spill] sm:$0xff] }
 0x55e   : > { %v8742_v57 = vmax.f32 %v8678_v1, 0.0  ;;  %v8612_v54 = vpop.f32.mrf.mxu1  ;;  %9665 = vmatmul.mubr.bf16.gmra.mxu1 %v9093_v18  ;;  %v8870_v37 = vadd.f32 %v8869_v21, %v8802_v17  ;;  %v8506_v27 = vadd.f32 %v16523_v34, %v8393_v32  ;;  %v8510_v19 = vadd.f32 %v16535_v35, %v8397_v25  ;;  %v18284_v17 = vld [vmem:[#allocation56_spill] sm:$0xff]  ;;  %v18293_v56 = vld [vmem:[#allocation126_spill] sm:$0xff] }
 0x55f   : > { %v8745_v43 = vmax.f32 %v8681_v15, 0.0  ;;  %v8682_v5 = vmul.f32 %v8609_v33, %v18273_v14  ;;  %v8613_v31 = vadd.f32 %v8612_v54, %v8500_v60  ;;  %v8874_v49 = vadd.f32 %v18276_v47, %v8805_v28  ;;  %v18285_v34 = vld [vmem:[#allocation72_spill] sm:$0xff]  ;;  %v18286_v60 = vld [vmem:[#allocation23_spill] sm:$0xff]  ;;  %v18288_v14 = vld [vmem:[#allocation25_spill] sm:$0xff] }
 0x560   : > { %8871 = vadd.xlane.f32.xlu1 %v8870_v37  ;;  %v8614_v59 = vpop.f32.mrf.mxu1  ;;  %v8806_v6 = vmul.f32 %v8742_v57, %v8742_v57  ;;  %v8401_v18 = vadd.f32 %v18284_v17, %v18283_v52  ;;  %v18289_v33 = vld [vmem:[#allocation115_spill] sm:$0xff]  ;;  %v8512_v32 = vadd.f32 %v16545_v58, %v8399_v10  ;;  %v8525_v37 = vpop.f32.mrf.mxu0  ;;  %v8409_v25 = vadd.f32 %v18293_v56, %v18292_v48 }
 0x561   : > { %v8809_v20 = vmul.f32 %v8745_v43, %v8745_v43  ;;  %v8746_v26 = vmax.f32 %v8682_v5, 0.0  ;;  %v8685_v62 = vmul.f32 %v8613_v31, %v18279_v3  ;;  %v8615_v61 = vadd.f32 %v8614_v59, %v8502_v8  ;;  %v18291_v31 = vld [vmem:[#allocation32_spill] sm:$0xff]  ;;  %v18294_v10 = vld [vmem:[#allocation31_spill] sm:$0xff] }
 0x562   : > { %v8616_v51 = vpop.f32.mrf.mxu1  ;;  %v8875_v0 = vadd.f32 %v8874_v49, %v8806_v6  ;;  %v9097_v39 = vpack.c.bf16 %v8745_v43, %v8741_v7  ;;  %v18287_v7 = vld [vmem:[#allocation34_spill] sm:$0xff]  ;;  %v8407_v53 = vadd.f32 %v18290_v36, %v18289_v33  ;;  %v8514_v49 = vadd.f32 %v16557_v13, %v8401_v18  ;;  %v18304_v33 = vld [vmem:[#allocation67_spill] sm:$0xff] }
 0x563   : > { %v8749_v24 = vmax.f32 %v8685_v62, 0.0  ;;  %v8617_v2 = vadd.f32 %v8616_v51, %v8504_v16  ;;  %v9098_v50 = vpack.c.bf16 %v8746_v26, %v8742_v57  ;;  %v8810_v12 = vmul.f32 %v8746_v26, %v8746_v26  ;;  %v12367_v51 = vld [vmem:[#allocation10 + $0x78] sm:$0xff]   ;;  %v18305_v36 = vld [vmem:[#allocation111_spill] sm:$0xff] }
 0x564   : > { %v8686_v46 = vmul.f32 %v8615_v61, %v18279_v3  ;;  %8876 = vadd.xlane.f32.xlu0 %v8875_v0  ;;  %v8618_v38 = vpop.f32.mrf.mxu1  ;;  %v8879_v44 = vadd.f32 %v18282_v55, %v8809_v20  ;;  %v8403_v23 = vadd.f32 %v18287_v7, %v18286_v60  ;;  %v8520_v13 = vadd.f32 %v16577_v9, %v8407_v53  ;;  %v12368_v0 = vld [vmem:[#allocation10 + $0x38] sm:$0xff]   ;;  %v18302_v60 = vld [vmem:[#allocation77_spill] sm:$0xff] }
 0x565   : > { %v8813_v1 = vmul.f32 %v8749_v24, %v8749_v24  ;;  %v8689_v40 = vmul.f32 %v8617_v2, %v18285_v34  ;;  %v8619_v63 = vadd.f32 %v8618_v38, %v8506_v27  ;;  %9674 = vmatprep.mubr.bf16.mxu1 %v9098_v50  ;;  %v8529_v27 = vpop.f32.mrf.mxu0  ;;  %v18295_v2 = vld [vmem:[#allocation74_spill] sm:$0xff]  ;;  %v18296_v50 = vld [vmem:[#allocation104_spill] sm:$0xff]  ;;  %v18298_v38 = vld [vmem:[#allocation119_spill] sm:$0xff]  ;;  %11662 = vmatprep.subr.bf16.mxu0 %v12367_v51 }
 0x566   : > { %v8750_v21 = vmax.f32 %v8686_v46, 0.0  ;;  %v8622_v29 = vpop.f32.mrf.mxu1  ;;  %9675 = vmatmul.mubr.bf16.gmra.mxu1 %v9097_v39  ;;  %v8880_v41 = vadd.f32 %v8879_v44, %v8810_v12  ;;  %v8516_v20 = vadd.f32 %v16567_v22, %v8403_v23  ;;  %v8411_v22 = vadd.f32 %v18296_v50, %v18295_v2  ;;  %v18297_v39 = vld [vmem:[#allocation120_spill] sm:$0xff]  ;;  %11663 = vmatpush3.bf16.msra.mxu0 %v12368_v0 }
 0x567   : > { %v8753_v35 = vmax.f32 %v8689_v40, 0.0  ;;  %v8690_v45 = vmul.f32 %v8619_v63, %v18285_v34  ;;  %v8623_v28 = vadd.f32 %v8622_v29, %v8510_v19  ;;  %v8884_v15 = vadd.f32 %v18288_v14, %v8813_v1  ;;  %v18299_v19 = vld [vmem:[#allocation112_spill] sm:$0xff]  ;;  %v18301_v63 = vld [vmem:[#allocation133_spill] sm:$0xff] }
 0x568   : > { %8881 = vadd.xlane.f32.xlu1 %v8880_v41  ;;  %v8624_v57 = vpop.f32.mrf.mxu1  ;;  %v8814_v54 = vmul.f32 %v8750_v21, %v8750_v21  ;;  %v8413_v55 = vadd.f32 %v18299_v19, %v18298_v38  ;;  %v18300_v34 = vld [vmem:[#allocation76_spill] sm:$0xff]  ;;  %v8417_v7 = vadd.f32 %v18302_v60, %v18301_v63  ;;  %v8522_v23 = vadd.f32 %v16589_v4, %v8409_v25  ;;  %v8531_v41 = vpop.f32.mrf.mxu0 }
 0x569   : > { %v8817_v43 = vmul.f32 %v8753_v35, %v8753_v35  ;;  %v8754_v5 = vmax.f32 %v8690_v45, 0.0  ;;  %v8693_v47 = vmul.f32 %v8623_v28, %v18291_v31  ;;  %v8625_v8 = vadd.f32 %v8624_v57, %v8512_v32  ;;  %v18303_v28 = vld [vmem:[#allocation24_spill] sm:$0xff] }
 0x56a   : > { %v8626_v59 = vpop.f32.mrf.mxu1  ;;  %v8885_v6 = vadd.f32 %v8884_v15, %v8814_v54  ;;  %v9101_v16 = vpack.c.bf16 %v8753_v35, %v8749_v24  ;;  %v8524_v15 = vadd.f32 %v16599_v11, %v8411_v22  ;;  %v8419_v53 = vadd.f32 %v18305_v36, %v18304_v33  ;;  %v18312_v22 = vld [vmem:[#allocation21_spill] sm:$0xff] }
 0x56b   : > { %v16616_v26 = vmax.f32 %v8693_v47, 0.0  ;;  %v8627_v58 = vadd.f32 %v8626_v59, %v8514_v49  ;;  %v9102_v3 = vpack.c.bf16 %v8754_v5, %v8750_v21  ;;  %v8818_v62 = vmul.f32 %v8754_v5, %v8754_v5  ;;  %v12369_v59 = vld [vmem:[#allocation10 + $0x70] sm:$0xff]  }
 0x56c   : > { %v8694_v30 = vmul.f32 %v8625_v8, %v18291_v31  ;;  %8886 = vadd.xlane.f32.xlu0 %v8885_v6  ;;  %v8628_v42 = vpop.f32.mrf.mxu1  ;;  %v8889_v61 = vadd.f32 %v18294_v10, %v8817_v43  ;;  %v8526_v43 = vadd.f32 %v8525_v37, %v8413_v55  ;;  %v8530_v25 = vadd.f32 %v8529_v27, %v8417_v7  ;;  %v18306_v8 = vld [vmem:[#allocation71_spill] sm:$0xff]  ;;  %v12370_v6 = vld [vmem:[#allocation10 + $0x30] sm:$0xff]  }
 0x56d   : > { %v8821_v12 = vmul.f32 %v16616_v26, %v16616_v26  ;;  %v8697_v46 = vmul.f32 %v8627_v58, %v18297_v39  ;;  %v8629_v24 = vadd.f32 %v8628_v42, %v8516_v20  ;;  %9684 = vmatprep.mubr.bf16.mxu1 %v9102_v3  ;;  %v8533_v20 = vpop.f32.mrf.mxu0  ;;  %v18307_v58 = vld [vmem:[#allocation78_spill] sm:$0xff]  ;;  %v18308_v3 = vld [vmem:[#allocation75_spill] sm:$0xff]  ;;  %11664 = vmatprep.subr.bf16.mxu0 %v12369_v59 }
 0x56e   : > { %v8758_v44 = vmax.f32 %v8694_v30, 0.0  ;;  %v8632_v9 = vpop.f32.mrf.mxu1  ;;  %9685 = vmatmul.mubr.bf16.gmra.mxu1 %v9101_v16  ;;  %v8890_v52 = vadd.f32 %v8889_v61, %v8818_v62  ;;  %v8421_v62 = vadd.f32 %v18308_v3, %v18307_v58  ;;  %v18309_v16 = vld [vmem:[#allocation68_spill] sm:$0xff]  ;;  %11665 = vmatpush3.bf16.msra.mxu0 %v12370_v6  ;;  %v12373_v59 = vld [vmem:[#allocation10 + $0x60] sm:$0xff]   ;;  %v12375_v58 = vld [vmem:[#allocation10 + $0x58] sm:$0xff]  }
 0x56f   : > { %v8761_v17 = vmax.f32 %v8697_v46, 0.0  ;;  %v8698_v18 = vmul.f32 %v8629_v24, %v18297_v39  ;;  %v8633_v1 = vadd.f32 %v8632_v9, %v8520_v13  ;;  %v8894_v40 = vadd.f32 %v18300_v34, %v8821_v12  ;;  %v18310_v13 = vld [vmem:[#allocation51_spill] sm:$0xff]  ;;  %v8535_v38 = vpop.f32.mrf.mxu0  ;;  %v12376_v3 = vld [vmem:[#allocation10 + $0x18] sm:$0xff]  }
 0x570   : > { %8891 = vadd.xlane.f32.xlu1 %v8890_v52  ;;  %v8634_v21 = vpop.f32.mrf.mxu1  ;;  %v8822_v29 = vmul.f32 %v8758_v44, %v8758_v44  ;;  %v8532_v39 = vadd.f32 %v8531_v41, %v8419_v53  ;;  %v8534_v52 = vadd.f32 %v8533_v20, %v8421_v62  ;;  %v18314_v41 = vld [vmem:[#allocation135_spill] sm:$0xff]  ;;  %v12377_v62 = vld [vmem:[#allocation10 + $0x50] sm:$0xff]  }
 0x571   : > { %v8825_v35 = vmul.f32 %v8761_v17, %v8761_v17  ;;  %v8762_v45 = vmax.f32 %v8698_v18, 0.0  ;;  %v8701_v14 = vmul.f32 %v8633_v1, %v18303_v28  ;;  %v8635_v32 = vadd.f32 %v8634_v21, %v8522_v23  ;;  %v12374_v6 = vld [vmem:[#allocation10 + $0x20] sm:$0xff]  }
 0x572   : > { %v8636_v57 = vpop.f32.mrf.mxu1  ;;  %v8895_v54 = vadd.f32 %v8894_v40, %v8822_v29  ;;  %v9105_v49 = vpack.c.bf16 %v8761_v17, %v16616_v26  ;;  %v18311_v26 = vld [vmem:[#allocation81_spill] sm:$0xff] }
 0x573   : > { %v8765_v5 = vmax.f32 %v8701_v14, 0.0  ;;  %v8637_v31 = vadd.f32 %v8636_v57, %v8524_v15  ;;  %v9106_v47 = vpack.c.bf16 %v8762_v45, %v8758_v44  ;;  %v8826_v4 = vmul.f32 %v8762_v45, %v8762_v45  ;;  %v18313_v44 = vld [vmem:[#allocation134_spill] sm:$0xff]  ;;  %v12371_v45 = vld [vmem:[#allocation10 + $0x68] sm:$0xff]  }
 0x574   : > { %v8702_v48 = vmul.f32 %v8635_v32, %v18303_v28  ;;  %8896 = vadd.xlane.f32.xlu0 %v8895_v54  ;;  %v8638_v56 = vpop.f32.mrf.mxu1  ;;  %v8899_v11 = vadd.f32 %v18306_v8, %v8825_v35  ;;  %v8423_v10 = vadd.f32 %v18311_v26, %v18310_v13  ;;  %v12372_v28 = vld [vmem:[#allocation10 + $0x28] sm:$0xff]   ;;  %11666 = vmatprep.subr.bf16.mxu0 %v12371_v45  ;;  %v12382_v13 = vld [vmem:[#allocation10] sm:$0xff]  }
 0x575   : > { %v8829_v37 = vmul.f32 %v8765_v5, %v8765_v5  ;;  %v8705_v30 = vmul.f32 %v8637_v31, %v18309_v16  ;;  %v8639_v42 = vadd.f32 %v8638_v56, %v8526_v43  ;;  %9694 = vmatprep.mubr.bf16.mxu1 %v9106_v47  ;;  %v18315_v15 = vld [vmem:[#allocation60_spill] sm:$0xff]  ;;  %v18316_v43 = vld [vmem:[#allocation41_spill] sm:$0xff]  ;;  %11667 = vmatpush3.bf16.msra.mxu0 %v12372_v28 }
 0x576   : > { %v8766_v61 = vmax.f32 %v8702_v48, 0.0  ;;  %v8642_v51 = vpop.f32.mrf.mxu1  ;;  %9695 = vmatmul.mubr.bf16.gmra.mxu1 %v9105_v49  ;;  %v8900_v0 = vadd.f32 %v8899_v11, %v8826_v4  ;;  %v8536_v34 = vadd.f32 %v8535_v38, %v8423_v10  ;;  %11668 = vmatprep.subr.bf16.mxu0 %v12373_v59 }
 0x577   : > { %v8769_v27 = vmax.f32 %v8705_v30, 0.0  ;;  %v8706_v2 = vmul.f32 %v8639_v42, %v18309_v16  ;;  %v8643_v50 = vadd.f32 %v8642_v51, %v8530_v25  ;;  %v8904_v12 = vadd.f32 %v18312_v22, %v8829_v37  ;;  %v18317_v25 = vld [vmem:[#allocation121_spill] sm:$0xff]  ;;  %v12379_v16 = vld [vmem:[#allocation10 + $0x48] sm:$0xff]   ;;  %v12381_v42 = vld [vmem:[#allocation10 + $0x40] sm:$0xff]  }
 0x578   : > { %8901 = vadd.xlane.f32.xlu1 %v8900_v0  ;;  %v8644_v46 = vpop.f32.mrf.mxu1  ;;  %v8830_v24 = vmul.f32 %v8766_v61, %v8766_v61  ;;  %v12378_v37 = vld [vmem:[#allocation10 + $0x10] sm:$0xff]   ;;  %v12380_v30 = vld [vmem:[#allocation10 + $0x8] sm:$0xff]  }
 0x579   : > { %v8833_v19 = vmul.f32 %v8769_v27, %v8769_v27  ;;  %v8770_v55 = vmax.f32 %v8706_v2, 0.0  ;;  %v8709_v9 = vmul.f32 %v8643_v50, %v18313_v44  ;;  %v8645_v17 = vadd.f32 %v8644_v46, %v8532_v39  ;;  %11669 = vmatpush3.bf16.msra.mxu0 %v12374_v6 }
 0x57a   : > { %v8646_v18 = vpop.f32.mrf.mxu1  ;;  %v8905_v1 = vadd.f32 %v8904_v12, %v8830_v24  ;;  %v9109_v23 = vpack.c.bf16 %v8769_v27, %v8765_v5  ;;  %11670 = vmatprep.subr.bf16.mxu0 %v12375_v58 }
 0x57b   : > { %v8773_v40 = vmax.f32 %v8709_v9, 0.0  ;;  %v8647_v63 = vadd.f32 %v8646_v18, %v8534_v52  ;;  %v9110_v60 = vpack.c.bf16 %v8770_v55, %v8766_v61  ;;  %v8834_v7 = vmul.f32 %v8770_v55, %v8770_v55 }
 0x57c   : > { %v8710_v21 = vmul.f32 %v8645_v17, %v18313_v44  ;;  %8906 = vadd.xlane.f32.xlu0 %v8905_v1  ;;  %v8648_v29 = vpop.f32.mrf.mxu1  ;;  %v8909_v35 = vadd.f32 %v18314_v41, %v8833_v19 }
 0x57d   : > { %v8837_v14 = vmul.f32 %v8773_v40, %v8773_v40  ;;  %v8713_v33 = vmul.f32 %v8647_v63, %v18315_v15  ;;  %v8649_v36 = vadd.f32 %v8648_v29, %v8536_v34  ;;  %9704 = vmatprep.mubr.bf16.mxu1 %v9110_v60  ;;  %11671 = vmatpush3.bf16.msra.mxu0 %v12376_v3 }
 0x57e   : > { %v8774_v53 = vmax.f32 %v8710_v21, 0.0  ;;  %9705 = vmatmul.mubr.bf16.gmra.mxu1 %v9109_v23  ;;  %v8910_v32 = vadd.f32 %v8909_v35, %v8834_v7  ;;  %11672 = vmatprep.subr.bf16.mxu0 %v12377_v62 }
 0x57f   : > { %v8777_v57 = vmax.f32 %v8713_v33, 0.0  ;;  %v8714_v54 = vmul.f32 %v8649_v36, %v18315_v15  ;;  %v8914_v5 = vadd.f32 %v18316_v43, %v8837_v14 }
 0x580   : > { %8911 = vadd.xlane.f32.xlu1 %v8910_v32  ;;  %v8838_v31 = vmul.f32 %v8774_v53, %v8774_v53 }
 0x581   : > { %v8841_v47 = vmul.f32 %v8777_v57, %v8777_v57  ;;  %v8778_v4 = vmax.f32 %v8714_v54, 0.0  ;;  %v9113_v11 = vpack.c.bf16 %v8777_v57, %v8773_v40  ;;  %11673 = vmatpush3.bf16.msra.mxu0 %v12378_v37 }
 0x582   : > { %v8915_v49 = vadd.f32 %v8914_v5, %v8838_v31  ;;  %11674 = vmatprep.subr.bf16.mxu0 %v12379_v16 }
 0x583   : > { %v9114_v48 = vpack.c.bf16 %v8778_v4, %v8774_v53  ;;  %v8842_v56 = vmul.f32 %v8778_v4, %v8778_v4  ;;  %v8919_v8 = vadd.f32 %v18317_v25, %v8841_v47 }
 0x584   : > { %8916 = vadd.xlane.f32.xlu0 %v8915_v49 }
 0x585   : > { %9714 = vmatprep.mubr.bf16.mxu1 %v9114_v48  ;;  %v8920_v20 = vadd.f32 %v8919_v8, %v8842_v56  ;;  %11675 = vmatpush3.bf16.msra.mxu0 %v12380_v30 }
 0x586   : > { %9715 = vmatmul.mubr.bf16.gmra.mxu1 %v9113_v11  ;;  %11676 = vmatprep.subr.bf16.mxu0 %v12381_v42 }
 0x587   : > { %8921 = vadd.xlane.f32.xlu1 %v8920_v20 }
 0x589   : > { %11677 = vmatpush3.bf16.msra.mxu0 %v12382_v13 }
 0x58f   : > { %v16654_v26 = vpop.f32.mrf.mxu0 }
 0x591   : > { %v16656_v10 = vpop.f32.mrf.mxu0 }
 0x593   : > { %v16658_v61 = vpop.f32.mrf.mxu0 }
 0x595   : > { %v16660_v51 = vpop.f32.mrf.mxu0 }
 0x597   : > { %v16662_v27 = vpop.f32.mrf.mxu0 }
 0x599   : > { %v16664_v22 = vpop.f32.mrf.mxu0 }
 0x59b   : > { %v16666_v39 = vpop.f32.mrf.mxu0 }
 0x59d   : > { %v16671_v24 = vpop.f32.mrf.mxu0 }
 0x59f   : > { %v16675_v55 = vpop.f32.mrf.mxu0 }
 0x5a1   : > { %v16680_v18 = vpop.f32.mrf.mxu0 }
 0x5a3   : > { %v16686_v21 = vpop.f32.mrf.mxu0 }
 0x5a5   : > { %v16689_v36 = vpop.f32.mrf.mxu0 }
 0x5a7   : > { %v16698_v48 = vpop.f32.mrf.mxu0 }
 0x5a9   : > { %v16705_v58 = vpop.f32.mrf.mxu0 }
 0x5d5   : > { %v8847_v0 = vpop.xlane.xlu0 %8846 }
 0x5d6   : > { %12519 = vrsqrt.f32 %v8847_v0  ;;  %vm8925_vm0 = vcmp.eq.f32.partialorder %v8847_v0, inf  ;;  %v8928_v7 = vand.u32 2147483648, %v8847_v0  ;;  %vm8927_vm2 = vcmp.eq.f32.partialorder %v8847_v0, 0.0 }
 0x5d9   : > { %v8852_v2 = vpop.xlane.xlu1 %8851 }
 0x5da   : > { %12521 = vrsqrt.f32 %v8852_v2  ;;  %vm8932_vm1 = vcmp.eq.f32.partialorder %v8852_v2, inf  ;;  %v8935_v35 = vand.u32 2147483648, %v8852_v2  ;;  %vm8934_vm4 = vcmp.eq.f32.partialorder %v8852_v2, 0.0 }
 0x5dd   : > { %v8857_v50 = vpop.xlane.xlu0 %8856 }
 0x5de   : > { %12523 = vrsqrt.f32 %v8857_v50  ;;  %vm8939_vm3 = vcmp.eq.f32.partialorder %v8857_v50, inf  ;;  %v8942_v14 = vand.u32 2147483648, %v8857_v50  ;;  %vm8941_vm6 = vcmp.eq.f32.partialorder %v8857_v50, 0.0 }
 0x5e1   : > { %v8862_v12 = vpop.xlane.xlu1 %8861 }
 0x5e2   : > { %12525 = vrsqrt.f32 %v8862_v12  ;;  %vm8946_vm5 = vcmp.eq.f32.partialorder %v8862_v12, inf  ;;  %v8949_v43 = vand.u32 2147483648, %v8862_v12  ;;  %vm8948_vm8 = vcmp.eq.f32.partialorder %v8862_v12, 0.0 }
 0x5e3   : > { %v12520_v19 = vpop.eup %12519 }
 0x5e4   : > { %v8924_v9 = vmul.f32 %v12520_v19, %v8847_v0 }
 0x5e5   : > { %v16668_v46 = vpop.xlane.xlu0 %8866 }
 0x5e6   : > { %12527 = vrsqrt.f32 %v16668_v46  ;;  %v8926_v60 = vsel %vm8925_vm0, %v8847_v0, %v8924_v9  ;;  %vm8953_vm7 = vcmp.eq.f32.partialorder %v16668_v46, inf  ;;  %v8956_v56 = vand.u32 2147483648, %v16668_v46  ;;  %v16715_v0 = vpop.f32.mrf.mxu0 }
 0x5e7   : > { %v12522_v44 = vpop.eup %12521  ;;  %v8929_v45 = vsel %vm8927_vm2, %v8928_v7, %v8926_v60  ;;  %vm8955_vm9 = vcmp.eq.f32.partialorder %v16668_v46, 0.0 }
 0x5e8   : > { %v8931_v1 = vmul.f32 %v12522_v44, %v8852_v2  ;;  %v9035_v32 = vadd.f32 1e-08, %v8929_v45  ;;  %v16726_v44 = vpop.f32.mrf.mxu0 }
 0x5e9   : > { %v16673_v38 = vpop.xlane.xlu1 %8871 }
 0x5ea   : > { %12529 = vrsqrt.f32 %v16673_v38  ;;  %v8933_v41 = vsel %vm8932_vm1, %v8852_v2, %v8931_v1  ;;  %vm8960_vm10 = vcmp.eq.f32.partialorder %v16673_v38, inf  ;;  %v8963_v37 = vand.u32 2147483648, %v16673_v38 }
 0x5eb   : > { %v12524_v17 = vpop.eup %12523  ;;  %v8936_v33 = vsel %vm8934_vm4, %v8935_v35, %v8933_v41  ;;  %vm8962_vm11 = vcmp.eq.f32.partialorder %v16673_v38, 0.0  ;;  %v16735_v41 = vpop.f32.mrf.mxu0 }
 0x5ec   : > { %v8938_v63 = vmul.f32 %v12524_v17, %v8857_v50  ;;  %v9036_v47 = vadd.f32 1e-08, %v8936_v33 }
 0x5ed   : > { %v16678_v52 = vpop.xlane.xlu0 %8876 }
 0x5ee   : > { %12531 = vrsqrt.f32 %v16678_v52  ;;  %v8940_v28 = vsel %vm8939_vm3, %v8857_v50, %v8938_v63  ;;  %vm8967_vm12 = vcmp.eq.f32.partialorder %v16678_v52, inf  ;;  %vm8969_vm14 = vcmp.eq.f32.partialorder %v16678_v52, 0.0 }
 0x5ef   : > { %v12526_v40 = vpop.eup %12525  ;;  %v8943_v5 = vsel %vm8941_vm6, %v8942_v14, %v8940_v28 }
 0x5f0   : > { %v8945_v29 = vmul.f32 %v12526_v40, %v8862_v12  ;;  %v9037_v8 = vadd.f32 1e-08, %v8943_v5 }
 0x5f1   : > { %v16682_v34 = vpop.xlane.xlu1 %8881 }
 0x5f2   : > { %12533 = vrsqrt.f32 %v16682_v34  ;;  %v8947_v57 = vsel %vm8946_vm5, %v8862_v12, %v8945_v29  ;;  %v8970_v12 = vand.u32 2147483648, %v16678_v52  ;;  %vm8974_vm13 = vcmp.eq.f32.partialorder %v16682_v34, inf }
 0x5f3   : > { %v12528_v23 = vpop.eup %12527  ;;  %v8950_v4 = vsel %vm8948_vm8, %v8949_v43, %v8947_v57  ;;  %v8977_v9 = vand.u32 2147483648, %v16682_v34  ;;  %vm8976_vm15 = vcmp.eq.f32.partialorder %v16682_v34, 0.0 }
 0x5f4   : > { %v8952_v15 = vmul.f32 %v12528_v23, %v16668_v46  ;;  %v9038_v59 = vadd.f32 1e-08, %v8950_v4 }
 0x5f5   : > { %v16691_v53 = vpop.xlane.xlu0 %8886 }
 0x5f6   : > { %12535 = vrsqrt.f32 %v16691_v53  ;;  %v8954_v49 = vsel %vm8953_vm7, %v16668_v46, %v8952_v15  ;;  %vm8981_vm0 = vcmp.eq.f32.partialorder %v16691_v53, inf  ;;  %v8984_v35 = vand.u32 2147483648, %v16691_v53 }
 0x5f7   : > { %v12530_v54 = vpop.eup %12529  ;;  %12537 = vrcp.f32 %v9035_v32  ;;  %v8957_v6 = vsel %vm8955_vm9, %v8956_v56, %v8954_v49  ;;  %vm8983_vm1 = vcmp.eq.f32.partialorder %v16691_v53, 0.0 }
 0x5f8   : > { %v8959_v25 = vmul.f32 %v12530_v54, %v16673_v38  ;;  %v9039_v30 = vadd.f32 1e-08, %v8957_v6 }
 0x5f9   : > { %v16694_v31 = vpop.xlane.xlu1 %8891 }
 0x5fa   : > { %12539 = vrsqrt.f32 %v16694_v31  ;;  %v8961_v62 = vsel %vm8960_vm10, %v16673_v38, %v8959_v25  ;;  %vm8988_vm2 = vcmp.eq.f32.partialorder %v16694_v31, inf  ;;  %v8991_v15 = vand.u32 2147483648, %v16694_v31  ;;  %v16752_v25 = vpop.f32.mrf.mxu0 }
 0x5fb   : > { %v12532_v11 = vpop.eup %12531  ;;  %12541 = vrcp.f32 %v9036_v47  ;;  %v8964_v13 = vsel %vm8962_vm11, %v8963_v37, %v8961_v62  ;;  %vm8990_vm3 = vcmp.eq.f32.partialorder %v16694_v31, 0.0 }
 0x5fc   : > { %12543 = vrcp.f32 %v9037_v8  ;;  %v8966_v16 = vmul.f32 %v12532_v11, %v16678_v52  ;;  %v9040_v46 = vadd.f32 1e-08, %v8964_v13 }
 0x5fd   : > { %v16707_v3 = vpop.xlane.xlu0 %8896  ;;  %12545 = vrcp.f32 %v9038_v59 }
 0x5fe   : > { %12547 = vrsqrt.f32 %v16707_v3  ;;  %v8968_v50 = vsel %vm8967_vm12, %v16678_v52, %v8966_v16  ;;  %vm8995_vm4 = vcmp.eq.f32.partialorder %v16707_v3, inf  ;;  %v8998_v47 = vand.u32 2147483648, %v16707_v3 }
 0x5ff   : > { %v12534_v20 = vpop.eup %12533  ;;  %12549 = vrcp.f32 %v9039_v30  ;;  %v8971_v1 = vsel %vm8969_vm14, %v8970_v12, %v8968_v50  ;;  %vm8997_vm5 = vcmp.eq.f32.partialorder %v16707_v3, 0.0 }
 0x600   : > { %v8973_v42 = vmul.f32 %v12534_v20, %v16682_v34  ;;  %v9041_v29 = vadd.f32 1e-08, %v8971_v1 }
 0x601   : > { %v16718_v2 = vpop.xlane.xlu1 %8901 }
 0x602   : > { %12551 = vrsqrt.f32 %v16718_v2  ;;  %v8975_v38 = vsel %vm8974_vm13, %v16682_v34, %v8973_v42  ;;  %v9005_v6 = vand.u32 2147483648, %v16718_v2  ;;  %vm9002_vm6 = vcmp.eq.f32.partialorder %v16718_v2, inf }
 0x603   : > { %v12536_v19 = vpop.eup %12535  ;;  %12553 = vrcp.f32 %v9040_v46  ;;  %v8978_v60 = vsel %vm8976_vm15, %v8977_v9, %v8975_v38  ;;  %v16770_v9 = vpop.f32.mrf.mxu0  ;;  %vm9004_vm8 = vcmp.eq.f32.partialorder %v16718_v2, 0.0 }
 0x604   : > { %v12538_v40 = vpop.eup %12537  ;;  %v8980_v23 = vmul.f32 %v12536_v19, %v16691_v53  ;;  %v9042_v57 = vadd.f32 1e-08, %v8978_v60 }
 0x605   : > { %v16729_v17 = vpop.xlane.xlu0 %8906  ;;  %v9067_v45 = vmul.f32 5.0, %v12538_v40 }
 0x606   : > { %12555 = vrsqrt.f32 %v16729_v17  ;;  %v8982_v49 = vsel %vm8981_vm0, %v16691_v53, %v8980_v23  ;;  %v9012_v12 = vand.u32 2147483648, %v16729_v17  ;;  %vm9009_vm7 = vcmp.eq.f32.partialorder %v16729_v17, inf }
 0x607   : > { %v12540_v63 = vpop.eup %12539  ;;  %12557 = vrcp.f32 %v9041_v29  ;;  %v8985_v50 = vsel %vm8983_vm1, %v8984_v35, %v8982_v49  ;;  %vm9011_vm9 = vcmp.eq.f32.partialorder %v16729_v17, 0.0 }
 0x608   : > { %v12542_v7 = vpop.eup %12541  ;;  %v8987_v14 = vmul.f32 %v12540_v63, %v16694_v31  ;;  %v9043_v29 = vadd.f32 1e-08, %v8985_v50 }
 0x609   : > { %v12544_v34 = vpop.eup %12543  ;;  %v16743_v33 = vpop.xlane.xlu1 %8911  ;;  %v9068_v5 = vmul.f32 5.0, %v12542_v7 }
 0x60a   : > { %12559 = vrsqrt.f32 %v16743_v33  ;;  %v9069_v59 = vmul.f32 5.0, %v12544_v34  ;;  %v8989_v37 = vsel %vm8988_vm2, %v16694_v31, %v8987_v14  ;;  %v9019_v35 = vand.u32 2147483648, %v16743_v33 }
 0x60b   : > { %12561 = vrcp.f32 %v9042_v57  ;;  %v8992_v40 = vsel %vm8990_vm3, %v8991_v15, %v8989_v37  ;;  %vm9016_vm10 = vcmp.eq.f32.partialorder %v16743_v33, inf  ;;  %vm9018_vm12 = vcmp.eq.f32.partialorder %v16743_v33, 0.0 }
 0x60e   : > { %v9646_v52 = vpop.f32.mrf.mxu1 }
 0x60f   : > { %v9647_v28 = vadd.f32 %v9646_v52, %v16654_v26  ;;  %v12546_v26 = vpop.eup %12545 }
 0x610   : > { %v9648_v32 = vpop.f32.mrf.mxu1  ;;  %v12548_v56 = vpop.eup %12547  ;;  %v9070_v38 = vmul.f32 5.0, %v12546_v26 }
 0x611   : > { %v9725_v54 = vmul.f32 %v9647_v28, %v9067_v45  ;;  %v9649_v43 = vadd.f32 %v9648_v32, %v16656_v10  ;;  %v16755_v10 = vpop.xlane.xlu0 %8916  ;;  %v12550_v16 = vpop.eup %12549  ;;  %v9044_v32 = vadd.f32 1e-08, %v8992_v40 }
 0x612   : > { %v9650_v4 = vpop.f32.mrf.mxu1  ;;  %12563 = vrsqrt.f32 %v16755_v10  ;;  %v12552_v19 = vpop.eup %12551  ;;  %v16777_v52 = vmul.f32 5.0, %v12550_v16  ;;  %vm9023_vm11 = vcmp.eq.f32.partialorder %v16755_v10, inf  ;;  %vm9025_vm13 = vcmp.eq.f32.partialorder %v16755_v10, 0.0 }
 0x613   : > { %v9726_v8 = vmul.f32 %v9649_v43, %v9067_v45  ;;  %v9651_v11 = vadd.f32 %v9650_v4, %v16658_v61  ;;  %v9757_v20 = vmax.f32 %v9725_v54, 0.0  ;;  %v8994_v61 = vmul.f32 %v12548_v56, %v16707_v3  ;;  %v16775_v63 = vpop.xlane.xlu1 %8921  ;;  %v12554_v31 = vpop.eup %12553 }
 0x614   : > { %v9652_v62 = vpop.f32.mrf.mxu1  ;;  %v9001_v34 = vmul.f32 %v12552_v19, %v16718_v2  ;;  %v12556_v54 = vpop.eup %12555  ;;  %12565 = vrsqrt.f32 %v16775_v63  ;;  %vm9030_vm14 = vcmp.eq.f32.partialorder %v16775_v63, inf  ;;  %vm9032_vm15 = vcmp.eq.f32.partialorder %v16775_v63, 0.0 }
 0x615   : > { %v9758_v30 = vmax.f32 %v9726_v8, 0.0  ;;  %v9727_v42 = vmul.f32 %v9651_v11, %v9068_v5  ;;  %v9653_v13 = vadd.f32 %v9652_v62, %v16660_v51  ;;  %v9789_v23 = vmul.f32 %v9757_v20, %v9757_v20 }
 0x616   : > { %v9656_v46 = vpop.f32.mrf.mxu1  ;;  %v8996_v57 = vsel %vm8995_vm4, %v16707_v3, %v8994_v61  ;;  %12567 = vrcp.f32 %v9043_v29 }
 0x617   : > { %v9728_v1 = vmul.f32 %v9653_v13, %v9068_v5  ;;  %v9657_v51 = vadd.f32 %v9656_v46, %v16662_v27  ;;  %v9790_v53 = vmul.f32 %v9758_v30, %v9758_v30  ;;  %v9759_v60 = vmax.f32 %v9727_v42, 0.0  ;;  %v12558_v13 = vpop.eup %12557 }
 0x618   : > { %v9658_v7 = vpop.f32.mrf.mxu1  ;;  %v8999_v42 = vsel %vm8997_vm5, %v8998_v47, %v8996_v57  ;;  %v9003_v46 = vsel %vm9002_vm6, %v16718_v2, %v9001_v34  ;;  %v12560_v19 = vpop.eup %12559  ;;  %12569 = vrcp.f32 %v9044_v32 }
 0x619   : > { %v9760_v45 = vmax.f32 %v9728_v1, 0.0  ;;  %v9729_v28 = vmul.f32 %v9657_v51, %v9069_v59  ;;  %v9659_v27 = vadd.f32 %v9658_v7, %v16664_v22  ;;  %v9821_v15 = vadd.f32 %v9790_v53, %v9789_v23  ;;  %v16789_v22 = vpop.f32.mrf.mxu0  ;;  %v12562_v3 = vpop.eup %12561 }
 0x61a   : > { %v9660_v14 = vpop.f32.mrf.mxu1  ;;  %v10029_v4 = vpack.c.bf16 %v9759_v60, %v9757_v20  ;;  %v9791_v8 = vmul.f32 %v9759_v60, %v9759_v60  ;;  %v9045_v7 = vadd.f32 1e-08, %v8999_v42  ;;  %v9015_v34 = vmul.f32 %v12560_v19, %v16743_v33 }
 0x61b   : > { %v9730_v43 = vmul.f32 %v9659_v27, %v9069_v59  ;;  %v9661_v5 = vadd.f32 %v9660_v14, %v16666_v39  ;;  %v10030_v26 = vpack.c.bf16 %v9760_v45, %v9758_v30  ;;  %v9761_v49 = vmax.f32 %v9729_v28, 0.0  ;;  %9822 = vadd.xlane.f32.xlu0 %v9821_v15  ;;  %v16804_v1 = vpop.f32.mrf.mxu0 }
 0x61c   : > { %v9662_v56 = vpop.f32.mrf.mxu1  ;;  %v9792_v11 = vmul.f32 %v9760_v45, %v9760_v45  ;;  %v9008_v59 = vmul.f32 %v12556_v54, %v16729_v17  ;;  %v9072_v30 = vmul.f32 5.0, %v12554_v31  ;;  %v9073_v45 = vmul.f32 5.0, %v12558_v13 }
 0x61d   : > { %v9762_v62 = vmax.f32 %v9730_v43, 0.0  ;;  %v9731_v37 = vmul.f32 %v9661_v5, %v9070_v38  ;;  %v9663_v16 = vadd.f32 %v9662_v56, %v16671_v24  ;;  %10205 = vmatprep.mubr.bf16.mxu0 %v10030_v26  ;;  %v9026_v24 = vand.u32 2147483648, %v16755_v10  ;;  %v16820_v32 = vpop.f32.mrf.mxu0 }
 0x61e   : > { %v9666_v39 = vpop.f32.mrf.mxu1  ;;  %10206 = vmatmul.mubr.bf16.vlgmr.msra.gmra.mxu0 %v10029_v4  ;;  %v9824_v20 = vadd.f32 %v9792_v11, %v9791_v8  ;;  %v9793_v40 = vmul.f32 %v9761_v49, %v9761_v49  ;;  %v9006_v28 = vsel %vm9004_vm8, %v9005_v6, %v9003_v46  ;;  %v9010_v27 = vsel %vm9009_vm7, %v16729_v17, %v9008_v59 }
 0x61f   : > { %v9732_v50 = vmul.f32 %v9663_v16, %v9070_v38  ;;  %v9667_v61 = vadd.f32 %v9666_v39, %v16675_v55  ;;  %v9763_v51 = vmax.f32 %v9731_v37, 0.0  ;;  %v9794_v60 = vmul.f32 %v9762_v62, %v9762_v62  ;;  %v12564_v31 = vpop.eup %12563  ;;  %v16832_v59 = vpop.f32.mrf.mxu0 }
 0x620   : > { %9825 = vadd.xlane.f32.xlu1 %v9824_v20  ;;  %v9668_v53 = vpop.f32.mrf.mxu1  ;;  %v9046_v56 = vadd.f32 1e-08, %v9006_v28  ;;  %v9022_v8 = vmul.f32 %v12564_v31, %v16755_v10  ;;  %12571 = vrcp.f32 %v9045_v7  ;;  %v9074_v42 = vmul.f32 5.0, %v12562_v3 }
 0x621   : > { %v9764_v47 = vmax.f32 %v9732_v50, 0.0  ;;  %v9733_v38 = vmul.f32 %v9667_v61, %v16777_v52  ;;  %v9669_v55 = vadd.f32 %v9668_v53, %v16680_v18  ;;  %v9827_v29 = vadd.f32 %v9794_v60, %v9793_v40  ;;  %v12566_v16 = vpop.eup %12565  ;;  %v16845_v3 = vpop.f32.mrf.mxu0 }
 0x622   : > { %v9670_v23 = vpop.f32.mrf.mxu1  ;;  %v10031_v57 = vpack.c.bf16 %v9763_v51, %v9761_v49  ;;  %v9795_v2 = vmul.f32 %v9763_v51, %v9763_v51  ;;  %v9013_v49 = vsel %vm9011_vm9, %v9012_v12, %v9010_v27  ;;  %12573 = vrcp.f32 %v9046_v56 }
 0x623   : > { %v9734_v18 = vmul.f32 %v9669_v55, %v16777_v52  ;;  %v9671_v14 = vadd.f32 %v9670_v23, %v16686_v21  ;;  %v10032_v15 = vpack.c.bf16 %v9764_v47, %v9762_v62  ;;  %v9765_v54 = vmax.f32 %v9733_v38, 0.0  ;;  %9828 = vadd.xlane.f32.xlu0 %v9827_v29 }
 0x624   : > { %v9672_v43 = vpop.f32.mrf.mxu1  ;;  %v9796_v6 = vmul.f32 %v9764_v47, %v9764_v47  ;;  %v9047_v46 = vadd.f32 1e-08, %v9013_v49  ;;  %v9024_v51 = vsel %vm9023_vm11, %v16755_v10, %v9022_v8  ;;  %v9029_v53 = vmul.f32 %v12566_v16, %v16775_v63 }
 0x625   : > { %v9766_v5 = vmax.f32 %v9734_v18, 0.0  ;;  %v9735_v26 = vmul.f32 %v9671_v14, %v9072_v30  ;;  %v9673_v4 = vadd.f32 %v9672_v43, %v16689_v36  ;;  %10213 = vmatprep.mubr.bf16.mxu0 %v10032_v15  ;;  %v9017_v36 = vsel %vm9016_vm10, %v16743_v33, %v9015_v34 }
 0x626   : > { %v9676_v52 = vpop.f32.mrf.mxu1  ;;  %10214 = vmatmul.mubr.bf16.gmra.mxu0 %v10031_v57  ;;  %v9830_v21 = vadd.f32 %v9796_v6, %v9795_v2  ;;  %v9797_v13 = vmul.f32 %v9765_v54, %v9765_v54  ;;  %v9020_v19 = vsel %vm9018_vm12, %v9019_v35, %v9017_v36  ;;  %12575 = vrcp.f32 %v9047_v46  ;;  %v16854_v57 = vpop.f32.mrf.mxu0 }
 0x627   : > { %v9736_v11 = vmul.f32 %v9673_v4, %v9072_v30  ;;  %v9677_v62 = vadd.f32 %v9676_v52, %v16698_v48  ;;  %v9798_v37 = vmul.f32 %v9766_v5, %v9766_v5  ;;  %v9767_v39 = vmax.f32 %v9735_v26, 0.0  ;;  %v12568_v48 = vpop.eup %12567 }
 0x628   : > { %9831 = vadd.xlane.f32.xlu1 %v9830_v21  ;;  %v9678_v20 = vpop.f32.mrf.mxu1  ;;  %v12570_v33 = vpop.eup %12569  ;;  %v9048_v31 = vadd.f32 1e-08, %v9020_v19  ;;  %v9027_v15 = vsel %vm9025_vm13, %v9026_v24, %v9024_v51  ;;  %v9031_v6 = vsel %vm9030_vm14, %v16775_v63, %v9029_v53 }
 0x629   : > { %v9768_v17 = vmax.f32 %v9736_v11, 0.0  ;;  %v9737_v12 = vmul.f32 %v9677_v62, %v9073_v45  ;;  %v9679_v30 = vadd.f32 %v9678_v20, %v16705_v58  ;;  %v9833_v61 = vadd.f32 %v9798_v37, %v9797_v13  ;;  %v16863_v62 = vpop.f32.mrf.mxu0 }
 0x62a   : > { %v9680_v50 = vpop.f32.mrf.mxu1  ;;  %v10033_v47 = vpack.c.bf16 %v9767_v39, %v9765_v54  ;;  %v9799_v7 = vmul.f32 %v9767_v39, %v9767_v39  ;;  %v9076_v10 = vmul.f32 5.0, %v12570_v33  ;;  %12577 = vrcp.f32 %v9048_v31 }
 0x62b   : > { %v9738_v40 = vmul.f32 %v9679_v30, %v9073_v45  ;;  %v9681_v60 = vadd.f32 %v9680_v50, %v16715_v0  ;;  %v10034_v58 = vpack.c.bf16 %v9768_v17, %v9766_v5  ;;  %v9769_v38 = vmax.f32 %v9737_v12, 0.0  ;;  %9834 = vadd.xlane.f32.xlu0 %v9833_v61  ;;  %v9597_v46 = vpop.f32.mrf.mxu0 }
 0x62c   : > { %v9682_v55 = vpop.f32.mrf.mxu1  ;;  %v9800_v23 = vmul.f32 %v9768_v17, %v9768_v17  ;;  %v9075_v45 = vmul.f32 5.0, %v12568_v48  ;;  %v9049_v56 = vadd.f32 1e-08, %v9027_v15 }
 0x62d   : > { %v9770_v35 = vmax.f32 %v9738_v40, 0.0  ;;  %v9739_v29 = vmul.f32 %v9681_v60, %v9074_v42  ;;  %v9683_v28 = vadd.f32 %v9682_v55, %v16726_v44  ;;  %10221 = vmatprep.mubr.bf16.mxu0 %v10034_v58  ;;  %v9033_v44 = vand.u32 2147483648, %v16775_v63  ;;  %v12572_v8 = vpop.eup %12571  ;;  %v9599_v33 = vpop.f32.mrf.mxu0 }
 0x62e   : > { %v9686_v27 = vpop.f32.mrf.mxu1  ;;  %10222 = vmatmul.mubr.bf16.gmra.mxu0 %v10033_v47  ;;  %v9836_v0 = vadd.f32 %v9800_v23, %v9799_v7  ;;  %v9801_v2 = vmul.f32 %v9769_v38, %v9769_v38  ;;  %v9077_v17 = vmul.f32 5.0, %v12572_v8  ;;  %12579 = vrcp.f32 %v9049_v56 }
 0x62f   : > { %v9740_v34 = vmul.f32 %v9683_v28, %v9074_v42  ;;  %v9687_v18 = vadd.f32 %v9686_v27, %v16735_v41  ;;  %v9802_v14 = vmul.f32 %v9770_v35, %v9770_v35  ;;  %v9771_v54 = vmax.f32 %v9739_v29, 0.0  ;;  %v12574_v13 = vpop.eup %12573 }
 0x630   : > { %9837 = vadd.xlane.f32.xlu1 %v9836_v0  ;;  %v9688_v43 = vpop.f32.mrf.mxu1  ;;  %v9034_v11 = vsel %vm9032_vm15, %v9033_v44, %v9031_v6  ;;  %v9078_v7 = vmul.f32 5.0, %v12574_v13 }
 0x631   : > { %v9772_v5 = vmax.f32 %v9740_v34, 0.0  ;;  %v9741_v41 = vmul.f32 %v9687_v18, %v9075_v45  ;;  %v9689_v26 = vadd.f32 %v9688_v43, %v16752_v25  ;;  %v9839_v4 = vadd.f32 %v9802_v14, %v9801_v2  ;;  %v9603_v43 = vpop.f32.mrf.mxu0 }
 0x632   : > { %v9690_v24 = vpop.f32.mrf.mxu1  ;;  %v10035_v37 = vpack.c.bf16 %v9771_v54, %v9769_v38  ;;  %v9803_v25 = vmul.f32 %v9771_v54, %v9771_v54  ;;  %v9050_v30 = vadd.f32 1e-08, %v9034_v11 }
 0x633   : > { %v9742_v52 = vmul.f32 %v9689_v26, %v9075_v45  ;;  %v9691_v21 = vadd.f32 %v9690_v24, %v16770_v9  ;;  %v10036_v49 = vpack.c.bf16 %v9772_v5, %v9770_v35  ;;  %v9773_v36 = vmax.f32 %v9741_v41, 0.0  ;;  %9840 = vadd.xlane.f32.xlu0 %v9839_v4  ;;  %v12576_v38 = vpop.eup %12575 }
 0x634   : > { %v9692_v16 = vpop.f32.mrf.mxu1  ;;  %v9804_v39 = vmul.f32 %v9772_v5, %v9772_v5  ;;  %12581 = vrcp.f32 %v9050_v30  ;;  %v9079_v44 = vmul.f32 5.0, %v12576_v38 }
 0x635   : > { %v9774_v63 = vmax.f32 %v9742_v52, 0.0  ;;  %v9743_v20 = vmul.f32 %v9691_v21, %v9076_v10  ;;  %v9693_v42 = vadd.f32 %v9692_v16, %v16789_v22  ;;  %10229 = vmatprep.mubr.bf16.mxu0 %v10036_v49  ;;  %v9805_v53 = vmul.f32 %v9773_v36, %v9773_v36  ;;  %v9605_v49 = vpop.f32.mrf.mxu0 }
 0x636   : > { %v9696_v12 = vpop.f32.mrf.mxu1  ;;  %10230 = vmatmul.mubr.bf16.gmra.mxu0 %v10035_v37  ;;  %v9842_v9 = vadd.f32 %v9804_v39, %v9803_v25 }
 0x637   : > { %v9744_v48 = vmul.f32 %v9693_v42, %v9076_v10  ;;  %v9697_v50 = vadd.f32 %v9696_v12, %v16804_v1  ;;  %v9806_v61 = vmul.f32 %v9774_v63, %v9774_v63  ;;  %v9775_v19 = vmax.f32 %v9743_v20, 0.0  ;;  %v12578_v14 = vpop.eup %12577  ;;  %v9607_v30 = vpop.f32.mrf.mxu0 }
 0x638   : > { %9843 = vadd.xlane.f32.xlu1 %v9842_v9  ;;  %v9698_v51 = vpop.f32.mrf.mxu1  ;;  %v9080_v56 = vmul.f32 5.0, %v12578_v14 }
 0x639   : > { %v9776_v40 = vmax.f32 %v9744_v48, 0.0  ;;  %v9745_v60 = vmul.f32 %v9697_v50, %v9077_v17  ;;  %v9699_v22 = vadd.f32 %v9698_v51, %v16820_v32  ;;  %v9845_v47 = vadd.f32 %v9806_v61, %v9805_v53 }
 0x63a   : > { %v9700_v58 = vpop.f32.mrf.mxu1  ;;  %v10037_v35 = vpack.c.bf16 %v9775_v19, %v9773_v36  ;;  %v9807_v45 = vmul.f32 %v9775_v19, %v9775_v19 }
 0x63b   : > { %v9746_v55 = vmul.f32 %v9699_v22, %v9077_v17  ;;  %v9701_v23 = vadd.f32 %v9700_v58, %v16832_v59  ;;  %v10038_v1 = vpack.c.bf16 %v9776_v40, %v9774_v63  ;;  %v9777_v29 = vmax.f32 %v9745_v60, 0.0  ;;  %9846 = vadd.xlane.f32.xlu0 %v9845_v47  ;;  %v12580_v21 = vpop.eup %12579 }
 0x63c   : > { %v9702_v28 = vpop.f32.mrf.mxu1  ;;  %v9808_v27 = vmul.f32 %v9776_v40, %v9776_v40  ;;  %v9081_v17 = vmul.f32 5.0, %v12580_v21 }
 0x63d   : > { %v9778_v0 = vmax.f32 %v9746_v55, 0.0  ;;  %v9747_v31 = vmul.f32 %v9701_v23, %v9078_v7  ;;  %v9703_v32 = vadd.f32 %v9702_v28, %v16845_v3  ;;  %10237 = vmatprep.mubr.bf16.mxu0 %v10038_v1  ;;  %v9809_v5 = vmul.f32 %v9777_v29, %v9777_v29  ;;  %v9609_v55 = vpop.f32.mrf.mxu0 }
 0x63e   : > { %v9706_v34 = vpop.f32.mrf.mxu1  ;;  %10238 = vmatmul.mubr.bf16.gmra.mxu0 %v10037_v35  ;;  %v9848_v18 = vadd.f32 %v9808_v27, %v9807_v45 }
 0x63f   : > { %v9748_v15 = vmul.f32 %v9703_v32, %v9078_v7  ;;  %v9707_v59 = vadd.f32 %v9706_v34, %v16854_v57  ;;  %v9810_v54 = vmul.f32 %v9778_v0, %v9778_v0  ;;  %v9779_v2 = vmax.f32 %v9747_v31, 0.0 }
 0x640   : > { %9849 = vadd.xlane.f32.xlu1 %v9848_v18  ;;  %v9708_v6 = vpop.f32.mrf.mxu1 }
 0x641   : > { %v9780_v41 = vmax.f32 %v9748_v15, 0.0  ;;  %v9749_v26 = vmul.f32 %v9707_v59, %v9079_v44  ;;  %v9709_v10 = vadd.f32 %v9708_v6, %v16863_v62  ;;  %v9851_v24 = vadd.f32 %v9810_v54, %v9809_v5  ;;  %v12582_v42 = vpop.eup %12581  ;;  %v12385_v6 = vld [vmem:[#allocation11 + $0x28] sm:$0xff]   ;;  %v12386_v5 = vld [vmem:[#allocation11 + $0x20] sm:$0xff]  }
 0x642   : > { %v9710_v3 = vpop.f32.mrf.mxu1  ;;  %v10039_v11 = vpack.c.bf16 %v9779_v2, %v9777_v29  ;;  %v9811_v36 = vmul.f32 %v9779_v2, %v9779_v2  ;;  %v9082_v53 = vmul.f32 5.0, %v12582_v42  ;;  %v12384_v2 = vld [vmem:[#allocation11 + $0x30] sm:$0xff]  }
 0x643   : > { %v9750_v4 = vmul.f32 %v9709_v10, %v9079_v44  ;;  %v9711_v8 = vadd.f32 %v9710_v3, %v9597_v46  ;;  %v10040_v52 = vpack.c.bf16 %v9780_v41, %v9778_v0  ;;  %v9781_v57 = vmax.f32 %v9749_v26, 0.0  ;;  %9852 = vadd.xlane.f32.xlu0 %v9851_v24  ;;  %v12388_v26 = vld [vmem:[#allocation11 + $0x10] sm:$0xff]   ;;  %v12389_v10 = vld [vmem:[#allocation11 + $0x8] sm:$0xff]   ;;  %v12390_v3 = vld [vmem:[#allocation11] sm:$0xff]  }
 0x644   : > { %v9712_v37 = vpop.f32.mrf.mxu1  ;;  %v9812_v16 = vmul.f32 %v9780_v41, %v9780_v41  ;;  %v12387_v41 = vld [vmem:[#allocation11 + $0x18] sm:$0xff]  }
 0x645   : > { %v9782_v25 = vmax.f32 %v9750_v4, 0.0  ;;  %v9751_v39 = vmul.f32 %v9711_v8, %v9080_v56  ;;  %v9713_v63 = vadd.f32 %v9712_v37, %v9599_v33  ;;  %10245 = vmatprep.mubr.bf16.mxu0 %v10040_v52  ;;  %v9813_v61 = vmul.f32 %v9781_v57, %v9781_v57 }
 0x646   : > { %v9716_v20 = vpop.f32.mrf.mxu1  ;;  %10246 = vmatmul.mubr.bf16.gmra.mxu0 %v10039_v11  ;;  %v9854_v62 = vadd.f32 %v9812_v16, %v9811_v36 }
 0x647   : > { %v9752_v13 = vmul.f32 %v9713_v63, %v9080_v56  ;;  %v9717_v12 = vadd.f32 %v9716_v20, %v9603_v43  ;;  %v9814_v9 = vmul.f32 %v9782_v25, %v9782_v25  ;;  %v9783_v48 = vmax.f32 %v9751_v39, 0.0  ;;  %v12383_v43 = vld [vmem:[#allocation11 + $0x38] sm:$0xff]  }
 0x648   : > { %9855 = vadd.xlane.f32.xlu1 %v9854_v62  ;;  %v9718_v50 = vpop.f32.mrf.mxu1  ;;  %11742 = vmatprep.subr.bf16.mxu1 %v12383_v43 }
 0x649   : > { %v9784_v46 = vmax.f32 %v9752_v13, 0.0  ;;  %v9753_v19 = vmul.f32 %v9717_v12, %v9081_v17  ;;  %v9719_v51 = vadd.f32 %v9718_v50, %v9605_v49  ;;  %v9857_v60 = vadd.f32 %v9814_v9, %v9813_v61  ;;  %11743 = vmatpush3.bf16.msra.mxu1 %v12383_v43 }
 0x64a   : > { %v9720_v40 = vpop.f32.mrf.mxu1  ;;  %v10041_v7 = vpack.c.bf16 %v9783_v48, %v9781_v57  ;;  %v9815_v1 = vmul.f32 %v9783_v48, %v9783_v48  ;;  %11744 = vmatprep.subr.bf16.mxu1 %v12384_v2 }
 0x64b   : > { %v9785_v22 = vmax.f32 %v9753_v19, 0.0  ;;  %v9754_v58 = vmul.f32 %v9719_v51, %v9081_v17  ;;  %v9721_v47 = vadd.f32 %v9720_v40, %v9607_v30  ;;  %v10042_v38 = vpack.c.bf16 %v9784_v46, %v9782_v25  ;;  %9858 = vadd.xlane.f32.xlu0 %v9857_v60 }
 0x64c   : > { %v9722_v23 = vpop.f32.mrf.mxu1  ;;  %v9816_v33 = vmul.f32 %v9784_v46, %v9784_v46 }
 0x64d   : > { %v9786_v35 = vmax.f32 %v9754_v58, 0.0  ;;  %v9755_v29 = vmul.f32 %v9721_v47, %v9082_v53  ;;  %v9723_v28 = vadd.f32 %v9722_v23, %v9609_v55  ;;  %10253 = vmatprep.mubr.bf16.mxu0 %v10042_v38  ;;  %v9817_v31 = vmul.f32 %v9785_v22, %v9785_v22  ;;  %11745 = vmatpush3.bf16.msra.mxu1 %v12384_v2 }
 0x64e   : > { %10254 = vmatmul.mubr.bf16.gmra.mxu0 %v10041_v7  ;;  %v9860_v45 = vadd.f32 %v9816_v33, %v9815_v1  ;;  %11746 = vmatprep.subr.bf16.mxu1 %v12385_v6 }
 0x64f   : > { %v9787_v27 = vmax.f32 %v9755_v29, 0.0  ;;  %v9756_v0 = vmul.f32 %v9723_v28, %v9082_v53  ;;  %v9818_v32 = vmul.f32 %v9786_v35, %v9786_v35 }
 0x650   : > { %9861 = vadd.xlane.f32.xlu1 %v9860_v45 }
 0x651   : > { %v9788_v34 = vmax.f32 %v9756_v0, 0.0  ;;  %v9863_v18 = vadd.f32 %v9818_v32, %v9817_v31  ;;  %v9819_v15 = vmul.f32 %v9787_v27, %v9787_v27  ;;  %v10043_v59 = vpack.c.bf16 %v9787_v27, %v9785_v22  ;;  %11747 = vmatpush3.bf16.msra.mxu1 %v12385_v6 }
 0x652   : > { %11748 = vmatprep.subr.bf16.mxu1 %v12386_v5 }
 0x653   : > { %9864 = vadd.xlane.f32.xlu0 %v9863_v18  ;;  %v10044_v14 = vpack.c.bf16 %v9788_v34, %v9786_v35  ;;  %v9820_v44 = vmul.f32 %v9788_v34, %v9788_v34 }
 0x655   : > { %10261 = vmatprep.mubr.bf16.mxu0 %v10044_v14  ;;  %v9866_v54 = vadd.f32 %v9820_v44, %v9819_v15  ;;  %11749 = vmatpush3.bf16.msra.mxu1 %v12386_v5 }
 0x656   : > { %10262 = vmatmul.mubr.bf16.gmra.mxu0 %v10043_v59  ;;  %11750 = vmatprep.subr.bf16.mxu1 %v12387_v41 }
 0x657   : > { %9867 = vadd.xlane.f32.xlu1 %v9866_v54 }
 0x659   : > { %11751 = vmatpush3.bf16.msra.mxu1 %v12387_v41 }
 0x65a   : > { %11752 = vmatprep.subr.bf16.mxu1 %v12388_v26 }
 0x65d   : > { %11753 = vmatpush3.bf16.msra.mxu1 %v12388_v26 }
 0x65e   : > { %11754 = vmatprep.subr.bf16.mxu1 %v12389_v10 }
 0x661   : > { %11755 = vmatpush3.bf16.msra.mxu1 %v12389_v10 }
 0x662   : > { %11756 = vmatprep.subr.bf16.mxu1 %v12390_v3 }
 0x665   : > { %11757 = vmatpush3.bf16.msra.mxu1 %v12390_v3 }
 0x6a4   : > { %v9823_v24 = vpop.xlane.xlu0 %9822 }
 0x6a5   : > { %12583 = vrsqrt.f32 %v9823_v24  ;;  %vm9871_vm0 = vcmp.eq.f32.partialorder %v9823_v24, inf  ;;  %v9874_v25 = vand.u32 2147483648, %v9823_v24  ;;  %vm9873_vm2 = vcmp.eq.f32.partialorder %v9823_v24, 0.0 }
 0x6a9   : > { %v9826_v4 = vpop.xlane.xlu1 %9825 }
 0x6aa   : > { %12585 = vrsqrt.f32 %v9826_v4  ;;  %vm9878_vm1 = vcmp.eq.f32.partialorder %v9826_v4, inf  ;;  %v9881_v42 = vand.u32 2147483648, %v9826_v4  ;;  %vm9880_vm3 = vcmp.eq.f32.partialorder %v9826_v4, 0.0 }
 0x6ac   : > { %v9829_v56 = vpop.xlane.xlu0 %9828 }
 0x6ad   : > { %12587 = vrsqrt.f32 %v9829_v56  ;;  %vm9885_vm4 = vcmp.eq.f32.partialorder %v9829_v56, inf  ;;  %v9888_v48 = vand.u32 2147483648, %v9829_v56  ;;  %vm9887_vm5 = vcmp.eq.f32.partialorder %v9829_v56, 0.0 }
 0x6b1   : > { %v9832_v8 = vpop.xlane.xlu1 %9831 }
 0x6b2   : > { %12589 = vrsqrt.f32 %v9832_v8  ;;  %v12584_v52 = vpop.eup %12583  ;;  %vm9892_vm6 = vcmp.eq.f32.partialorder %v9832_v8, inf  ;;  %v9895_v58 = vand.u32 2147483648, %v9832_v8  ;;  %vm9894_vm7 = vcmp.eq.f32.partialorder %v9832_v8, 0.0 }
 0x6b3   : > { %v9870_v11 = vmul.f32 %v12584_v52, %v9823_v24 }
 0x6b4   : > { %v9835_v21 = vpop.xlane.xlu0 %9834 }
 0x6b5   : > { %12591 = vrsqrt.f32 %v9835_v21  ;;  %v9872_v16 = vsel %vm9871_vm0, %v9823_v24, %v9870_v11  ;;  %vm9899_vm8 = vcmp.eq.f32.partialorder %v9835_v21, inf  ;;  %v9902_v33 = vand.u32 2147483648, %v9835_v21 }
 0x6b6   : > { %v9875_v20 = vsel %vm9873_vm2, %v9874_v25, %v9872_v16  ;;  %vm9901_vm10 = vcmp.eq.f32.partialorder %v9835_v21, 0.0 }
 0x6b7   : > { %v12586_v49 = vpop.eup %12585  ;;  %v9981_v12 = vadd.f32 1e-08, %v9875_v20 }
 0x6b8   : > { %v9877_v37 = vmul.f32 %v12586_v49, %v9826_v4 }
 0x6b9   : > { %v16872_v57 = vpop.xlane.xlu1 %9837 }
 0x6ba   : > { %12593 = vrsqrt.f32 %v16872_v57  ;;  %v12588_v36 = vpop.eup %12587  ;;  %v9879_v62 = vsel %vm9878_vm1, %v9826_v4, %v9877_v37  ;;  %vm9906_vm9 = vcmp.eq.f32.partialorder %v16872_v57, inf  ;;  %v9909_v27 = vand.u32 2147483648, %v16872_v57 }
 0x6bb   : > { %v9884_v63 = vmul.f32 %v12588_v36, %v9829_v56  ;;  %v9882_v9 = vsel %vm9880_vm3, %v9881_v42, %v9879_v62  ;;  %vm9908_vm11 = vcmp.eq.f32.partialorder %v16872_v57, 0.0 }
 0x6bc   : > { %v16875_v39 = vpop.xlane.xlu0 %9840  ;;  %v9982_v19 = vadd.f32 1e-08, %v9882_v9 }
 0x6bd   : > { %12595 = vrsqrt.f32 %v16875_v39  ;;  %v9886_v30 = vsel %vm9885_vm4, %v9829_v56, %v9884_v63  ;;  %vm9913_vm12 = vcmp.eq.f32.partialorder %v16875_v39, inf  ;;  %v9916_v54 = vand.u32 2147483648, %v16875_v39 }
 0x6be   : > { %v9889_v51 = vsel %vm9887_vm5, %v9888_v48, %v9886_v30  ;;  %vm9915_vm13 = vcmp.eq.f32.partialorder %v16875_v39, 0.0 }
 0x6bf   : > { %v12590_v17 = vpop.eup %12589  ;;  %v9983_v47 = vadd.f32 1e-08, %v9889_v51 }
 0x6c0   : > { %v9891_v50 = vmul.f32 %v12590_v17, %v9832_v8 }
 0x6c1   : > { %v16878_v13 = vpop.xlane.xlu1 %9843 }
 0x6c2   : > { %12597 = vrsqrt.f32 %v16878_v13  ;;  %v12592_v46 = vpop.eup %12591  ;;  %v9893_v22 = vsel %vm9892_vm6, %v9832_v8, %v9891_v50  ;;  %vm9920_vm14 = vcmp.eq.f32.partialorder %v16878_v13, inf  ;;  %v9923_v8 = vand.u32 2147483648, %v16878_v13 }
 0x6c3   : > { %12599 = vrcp.f32 %v9981_v12  ;;  %v9898_v40 = vmul.f32 %v12592_v46, %v9835_v21  ;;  %v9896_v55 = vsel %vm9894_vm7, %v9895_v58, %v9893_v22  ;;  %vm9922_vm0 = vcmp.eq.f32.partialorder %v16878_v13, 0.0 }
 0x6c4   : > { %v16881_v61 = vpop.xlane.xlu0 %9846  ;;  %v9984_v35 = vadd.f32 1e-08, %v9896_v55 }
 0x6c5   : > { %12601 = vrsqrt.f32 %v16881_v61  ;;  %v9900_v23 = vsel %vm9899_vm8, %v9835_v21, %v9898_v40  ;;  %vm9927_vm15 = vcmp.eq.f32.partialorder %v16881_v61, inf  ;;  %v9930_v42 = vand.u32 2147483648, %v16881_v61 }
 0x6c6   : > { %12603 = vrcp.f32 %v9982_v19  ;;  %v9903_v29 = vsel %vm9901_vm10, %v9902_v33, %v9900_v23  ;;  %vm9929_vm2 = vcmp.eq.f32.partialorder %v16881_v61, 0.0 }
 0x6c7   : > { %v12594_v53 = vpop.eup %12593  ;;  %v9985_v32 = vadd.f32 1e-08, %v9903_v29 }
 0x6c8   : > { %v9905_v38 = vmul.f32 %v12594_v53, %v16872_v57 }
 0x6c9   : > { %v16884_v60 = vpop.xlane.xlu1 %9849 }
 0x6ca   : > { %12605 = vrsqrt.f32 %v16884_v60  ;;  %v12596_v1 = vpop.eup %12595  ;;  %v9907_v28 = vsel %vm9906_vm9, %v16872_v57, %v9905_v38  ;;  %vm9934_vm1 = vcmp.eq.f32.partialorder %v16884_v60, inf  ;;  %v9937_v53 = vand.u32 2147483648, %v16884_v60 }
 0x6cb   : > { %12607 = vrcp.f32 %v9983_v47  ;;  %v9912_v0 = vmul.f32 %v12596_v1, %v16875_v39  ;;  %v9910_v34 = vsel %vm9908_vm11, %v9909_v27, %v9907_v28  ;;  %vm9936_vm4 = vcmp.eq.f32.partialorder %v16884_v60, 0.0 }
 0x6cc   : > { %v16888_v7 = vpop.xlane.xlu0 %9852  ;;  %v9986_v6 = vadd.f32 1e-08, %v9910_v34 }
 0x6cd   : > { %12609 = vrsqrt.f32 %v16888_v7  ;;  %v9914_v59 = vsel %vm9913_vm12, %v16875_v39, %v9912_v0  ;;  %vm9941_vm3 = vcmp.eq.f32.partialorder %v16888_v7, inf  ;;  %vm9943_vm6 = vcmp.eq.f32.partialorder %v16888_v7, 0.0 }
 0x6ce   : > { %12611 = vrcp.f32 %v9984_v35  ;;  %v9917_v24 = vsel %vm9915_vm13, %v9916_v54, %v9914_v59 }
 0x6cf   : > { %v12598_v45 = vpop.eup %12597  ;;  %v9987_v16 = vadd.f32 1e-08, %v9917_v24 }
 0x6d0   : > { %v12600_v18 = vpop.eup %12599  ;;  %v9919_v14 = vmul.f32 %v12598_v45, %v16878_v13 }
 0x6d1   : > { %v16895_v31 = vpop.xlane.xlu1 %9855  ;;  %v10013_v41 = vmul.f32 5.0, %v12600_v18  ;;  %v9944_v18 = vand.u32 2147483648, %v16888_v7 }
 0x6d2   : > { %12613 = vrsqrt.f32 %v16895_v31  ;;  %v12602_v44 = vpop.eup %12601  ;;  %v9921_v4 = vsel %vm9920_vm14, %v16878_v13, %v9919_v14  ;;  %vm9948_vm5 = vcmp.eq.f32.partialorder %v16895_v31, inf  ;;  %vm9950_vm7 = vcmp.eq.f32.partialorder %v16895_v31, 0.0 }
 0x6d3   : > { %v12604_v5 = vpop.eup %12603  ;;  %12615 = vrcp.f32 %v9985_v32  ;;  %v9926_v10 = vmul.f32 %v12602_v44, %v16881_v61  ;;  %v9924_v25 = vsel %vm9922_vm0, %v9923_v8, %v9921_v4 }
 0x6d4   : > { %v16903_v43 = vpop.xlane.xlu0 %9858  ;;  %v10014_v49 = vmul.f32 5.0, %v12604_v5  ;;  %v9988_v48 = vadd.f32 1e-08, %v9924_v25 }
 0x6d5   : > { %12617 = vrsqrt.f32 %v16903_v43  ;;  %v9928_v20 = vsel %vm9927_vm15, %v16881_v61, %v9926_v10  ;;  %vm9955_vm8 = vcmp.eq.f32.partialorder %v16903_v43, inf  ;;  %vm9957_vm10 = vcmp.eq.f32.partialorder %v16903_v43, 0.0 }
 0x6d6   : > { %12619 = vrcp.f32 %v9986_v6  ;;  %v9931_v19 = vsel %vm9929_vm2, %v9930_v42, %v9928_v20 }
 0x6d7   : > { %v12606_v56 = vpop.eup %12605  ;;  %v9989_v33 = vadd.f32 1e-08, %v9931_v19 }
 0x6d8   : > { %v12608_v57 = vpop.eup %12607  ;;  %v9933_v39 = vmul.f32 %v12606_v56, %v16884_v60 }
 0x6d9   : > { %v16911_v52 = vpop.xlane.xlu1 %9861  ;;  %v10015_v9 = vmul.f32 5.0, %v12608_v57 }
 0x6da   : > { %12621 = vrsqrt.f32 %v16911_v52  ;;  %v12610_v62 = vpop.eup %12609  ;;  %v9935_v58 = vsel %vm9934_vm1, %v16884_v60, %v9933_v39  ;;  %vm9962_vm9 = vcmp.eq.f32.partialorder %v16911_v52, inf  ;;  %vm9964_vm11 = vcmp.eq.f32.partialorder %v16911_v52, 0.0 }
 0x6db   : > { %12623 = vrcp.f32 %v9987_v16  ;;  %v12612_v51 = vpop.eup %12611  ;;  %v9940_v40 = vmul.f32 %v12610_v62, %v16888_v7  ;;  %v9938_v45 = vsel %vm9936_vm4, %v9937_v53, %v9935_v58 }
 0x6dc   : > { %v16920_v13 = vpop.xlane.xlu0 %9864  ;;  %v10016_v29 = vmul.f32 5.0, %v12612_v51  ;;  %v9990_v59 = vadd.f32 1e-08, %v9938_v45 }
 0x6dd   : > { %12625 = vrsqrt.f32 %v16920_v13  ;;  %v9942_v34 = vsel %vm9941_vm3, %v16888_v7, %v9940_v40  ;;  %vm9969_vm12 = vcmp.eq.f32.partialorder %v16920_v13, inf  ;;  %vm9971_vm13 = vcmp.eq.f32.partialorder %v16920_v13, 0.0 }
 0x6de   : > { %v11678_v15 = vpop.f32.mrf.mxu0  ;;  %12627 = vrcp.f32 %v9988_v48 }
 0x6df   : > { %v12614_v47 = vpop.eup %12613 }
 0x6e0   : > { %v11679_v2 = vpop.f32.mrf.mxu0  ;;  %v16928_v61 = vpop.xlane.xlu1 %9867  ;;  %v9947_v0 = vmul.f32 %v12614_v47, %v16895_v31 }
 0x6e1   : > { %v11680_v26 = vadd.f32 %v11679_v2, %v11678_v15  ;;  %v12616_v27 = vpop.eup %12615  ;;  %12629 = vrsqrt.f32 %v16928_v61  ;;  %vm9976_vm14 = vcmp.eq.f32.partialorder %v16928_v61, inf  ;;  %vm9978_vm15 = vcmp.eq.f32.partialorder %v16928_v61, 0.0 }
 0x6e2   : > { %v11681_v3 = vpop.f32.mrf.mxu0  ;;  %v12618_v44 = vpop.eup %12617  ;;  %12631 = vrcp.f32 %v9989_v33  ;;  %v10017_v6 = vmul.f32 5.0, %v12616_v27  ;;  %v9949_v10 = vsel %vm9948_vm5, %v16895_v31, %v9947_v0 }
 0x6e3   : > { %v10270_v21 = vmul.f32 %v11680_v26, %v10013_v41  ;;  %v12620_v54 = vpop.eup %12619  ;;  %v9945_v41 = vsel %vm9943_vm6, %v9944_v18, %v9942_v34  ;;  %v9954_v24 = vmul.f32 %v12618_v44, %v16903_v43  ;;  %12633 = vrcp.f32 %v9990_v59 }
 0x6e4   : > { %v11682_v11 = vpop.f32.mrf.mxu0  ;;  %v9991_v7 = vadd.f32 1e-08, %v9945_v41  ;;  %v10018_v57 = vmul.f32 5.0, %v12620_v54  ;;  %v9972_v34 = vand.u32 2147483648, %v16920_v13 }
 0x6e5   : > { %v10286_v37 = vmax.f32 %v10270_v21, 0.0  ;;  %v11683_v36 = vadd.f32 %v11682_v11, %v11681_v3  ;;  %v9951_v21 = vand.u32 2147483648, %v16895_v31  ;;  %v9956_v62 = vsel %vm9955_vm8, %v16903_v43, %v9954_v24 }
 0x6e6   : > { %v11684_v63 = vpop.f32.mrf.mxu0  ;;  %12635 = vrcp.f32 %v9991_v7 }
 0x6e7   : > { %v10271_v17 = vmul.f32 %v11683_v36, %v10014_v49  ;;  %v10302_v12 = vmul.f32 %v10286_v37, %v10286_v37  ;;  %v12622_v3 = vpop.eup %12621  ;;  %v9952_v39 = vsel %vm9950_vm7, %v9951_v21, %v9949_v10 }
 0x6e8   : > { %v11685_v30 = vpop.f32.mrf.mxu0  ;;  %v12624_v36 = vpop.eup %12623  ;;  %v9961_v16 = vmul.f32 %v12622_v3, %v16911_v52 }
 0x6e9   : > { %v10287_v50 = vmax.f32 %v10271_v17, 0.0  ;;  %v11686_v46 = vadd.f32 %v11685_v30, %v11684_v63  ;;  %10318 = vadd.xlane.f32.xlu0 %v10302_v12  ;;  %v9958_v17 = vand.u32 2147483648, %v16903_v43  ;;  %v10019_v30 = vmul.f32 5.0, %v12624_v36 }
 0x6ea   : > { %v11687_v22 = vpop.f32.mrf.mxu0  ;;  %v12626_v42 = vpop.eup %12625  ;;  %v9963_v51 = vsel %vm9962_vm9, %v16911_v52, %v9961_v16 }
 0x6eb   : > { %v10272_v38 = vmul.f32 %v11686_v46, %v10015_v9  ;;  %v10510_v55 = vpack.c.bf16 %v10287_v50, %v10286_v37  ;;  %v10303_v23 = vmul.f32 %v10287_v50, %v10287_v50  ;;  %v12628_v31 = vpop.eup %12627  ;;  %v9992_v50 = vadd.f32 1e-08, %v9952_v39 }
 0x6ec   : > { %v11688_v1 = vpop.f32.mrf.mxu0  ;;  %v9959_v19 = vsel %vm9957_vm10, %v9958_v17, %v9956_v62  ;;  %v9968_v53 = vmul.f32 %v12626_v42, %v16920_v13 }
 0x6ed   : > { %v10288_v35 = vmax.f32 %v10272_v38, 0.0  ;;  %v11689_v28 = vadd.f32 %v11688_v1, %v11687_v22  ;;  %11758 = vmatprep.mubr.bf16.mxu1 %v10510_v55  ;;  %10320 = vadd.xlane.f32.xlu1 %v10303_v23  ;;  %v9965_v38 = vand.u32 2147483648, %v16911_v52  ;;  %v10020_v55 = vmul.f32 5.0, %v12628_v31 }
 0x6ee   : > { %v11690_v32 = vpop.f32.mrf.mxu0  ;;  %v12630_v47 = vpop.eup %12629  ;;  %12637 = vrcp.f32 %v9992_v50 }
 0x6ef   : > { %v10273_v14 = vmul.f32 %v11689_v28, %v10016_v29  ;;  %v10304_v15 = vmul.f32 %v10288_v35, %v10288_v35  ;;  %v12632_v23 = vpop.eup %12631  ;;  %v9966_v28 = vsel %vm9964_vm11, %v9965_v38, %v9963_v51  ;;  %v9975_v45 = vmul.f32 %v12630_v47, %v16928_v61 }
 0x6f0   : > { %v11691_v60 = vpop.f32.mrf.mxu0  ;;  %v10021_v52 = vmul.f32 5.0, %v12632_v23 }
 0x6f1   : > { %v10289_v2 = vmax.f32 %v10273_v14, 0.0  ;;  %v11692_v5 = vadd.f32 %v11691_v60, %v11690_v32  ;;  %10322 = vadd.xlane.f32.xlu0 %v10304_v15  ;;  %v9970_v32 = vsel %vm9969_vm12, %v16920_v13, %v9968_v53  ;;  %v12634_v14 = vpop.eup %12633  ;;  %v9994_v60 = vadd.f32 1e-08, %v9966_v28 }
 0x6f2   : > { %v11693_v26 = vpop.f32.mrf.mxu0  ;;  %v9973_v54 = vsel %vm9971_vm13, %v9972_v34, %v9970_v32  ;;  %v9977_v41 = vsel %vm9976_vm14, %v16928_v61, %v9975_v45  ;;  %v10022_v10 = vmul.f32 5.0, %v12634_v14 }
 0x6f3   : > { %v10511_v4 = vpack.c.bf16 %v10289_v2, %v10288_v35  ;;  %v10274_v56 = vmul.f32 %v11692_v5, %v10017_v6  ;;  %v10305_v8 = vmul.f32 %v10289_v2, %v10289_v2  ;;  %v9993_v35 = vadd.f32 1e-08, %v9959_v19  ;;  %v12636_v13 = vpop.eup %12635 }
 0x6f4   : > { %v11694_v49 = vpop.f32.mrf.mxu0 }
 0x6f5   : > { %v10290_v11 = vmax.f32 %v10274_v56, 0.0  ;;  %v11695_v37 = vadd.f32 %v11694_v49, %v11693_v26  ;;  %11759 = vmatmul.mubr.bf16.vlgmr.msra.gmra.mxu1 %v10511_v4  ;;  %10324 = vadd.xlane.f32.xlu1 %v10305_v8  ;;  %12639 = vrcp.f32 %v9993_v35  ;;  %v9979_v26 = vand.u32 2147483648, %v16928_v61 }
 0x6f6   : > { %v11696_v25 = vpop.f32.mrf.mxu0  ;;  %12641 = vrcp.f32 %v9994_v60  ;;  %v9995_v56 = vadd.f32 1e-08, %v9973_v54 }
 0x6f7   : > { %v10275_v63 = vmul.f32 %v11695_v37, %v10018_v57  ;;  %v10306_v20 = vmul.f32 %v10290_v11, %v10290_v11  ;;  %v9980_v21 = vsel %vm9978_vm15, %v9979_v26, %v9977_v41 }
 0x6f8   : > { %v11697_v12 = vpop.f32.mrf.mxu0  ;;  %12643 = vrcp.f32 %v9995_v56  ;;  %v9996_v16 = vadd.f32 1e-08, %v9980_v21 }
 0x6f9   : > { %v10291_v9 = vmax.f32 %v10275_v63, 0.0  ;;  %v11698_v48 = vadd.f32 %v11697_v12, %v11696_v25  ;;  %10326 = vadd.xlane.f32.xlu0 %v10306_v20 }
 0x6fa   : > { %v11699_v46 = vpop.f32.mrf.mxu0  ;;  %12645 = vrcp.f32 %v9996_v16 }
 0x6fb   : > { %v10276_v40 = vmul.f32 %v11698_v48, %v10019_v30  ;;  %v10512_v22 = vpack.c.bf16 %v10291_v9, %v10290_v11  ;;  %v10307_v58 = vmul.f32 %v10291_v9, %v10291_v9  ;;  %v10023_v11 = vmul.f32 5.0, %v12636_v13  ;;  %v12638_v25 = vpop.eup %12637 }
 0x6fc   : > { %v11700_v43 = vpop.f32.mrf.mxu0  ;;  %v10024_v17 = vmul.f32 5.0, %v12638_v25 }
 0x6fd   : > { %v10292_v1 = vmax.f32 %v10276_v40, 0.0  ;;  %v11701_v33 = vadd.f32 %v11700_v43, %v11699_v46  ;;  %11762 = vmatprep.mubr.bf16.mxu1 %v10512_v22  ;;  %10328 = vadd.xlane.f32.xlu1 %v10307_v58 }
 0x6fe   : > { %v11702_v29 = vpop.f32.mrf.mxu0 }
 0x6ff   : > { %v10277_v27 = vmul.f32 %v11701_v33, %v10020_v55  ;;  %v10308_v0 = vmul.f32 %v10292_v1, %v10292_v1 }
 0x700   : > { %v11703_v18 = vpop.f32.mrf.mxu0 }
 0x701   : > { %v10293_v15 = vmax.f32 %v10277_v27, 0.0  ;;  %v11704_v44 = vadd.f32 %v11703_v18, %v11702_v29  ;;  %10330 = vadd.xlane.f32.xlu0 %v10308_v0 }
 0x702   : > { %v11705_v59 = vpop.f32.mrf.mxu0  ;;  %v12640_v31 = vpop.eup %12639 }
 0x703   : > { %v10513_v2 = vpack.c.bf16 %v10293_v15, %v10292_v1  ;;  %v10278_v6 = vmul.f32 %v11704_v44, %v10021_v52  ;;  %v10309_v5 = vmul.f32 %v10293_v15, %v10293_v15  ;;  %v10025_v19 = vmul.f32 5.0, %v12640_v31  ;;  %v12642_v53 = vpop.eup %12641 }
 0x704   : > { %v11706_v3 = vpop.f32.mrf.mxu0  ;;  %v10026_v43 = vmul.f32 5.0, %v12642_v53 }
 0x705   : > { %v10294_v24 = vmax.f32 %v10278_v6, 0.0  ;;  %v11707_v4 = vadd.f32 %v11706_v3, %v11705_v59  ;;  %11763 = vmatmul.mubr.bf16.gmra.mxu1 %v10513_v2  ;;  %10332 = vadd.xlane.f32.xlu1 %v10309_v5  ;;  %v12644_v1 = vpop.eup %12643 }
 0x706   : > { %v11708_v8 = vpop.f32.mrf.mxu0  ;;  %v10027_v27 = vmul.f32 5.0, %v12644_v1 }
 0x707   : > { %v10279_v49 = vmul.f32 %v11707_v4, %v10022_v10  ;;  %v10310_v7 = vmul.f32 %v10294_v24, %v10294_v24  ;;  %v12646_v32 = vpop.eup %12645 }
 0x708   : > { %v11709_v57 = vpop.f32.mrf.mxu0  ;;  %v10028_v60 = vmul.f32 5.0, %v12646_v32 }
 0x709   : > { %v10295_v37 = vmax.f32 %v10279_v49, 0.0  ;;  %v11710_v36 = vadd.f32 %v11709_v57, %v11708_v8  ;;  %10334 = vadd.xlane.f32.xlu0 %v10310_v7 }
 0x70a   : > { %v11711_v61 = vpop.f32.mrf.mxu0 }
 0x70b   : > { %v10280_v39 = vmul.f32 %v11710_v36, %v10023_v11  ;;  %v10514_v63 = vpack.c.bf16 %v10295_v37, %v10294_v24  ;;  %v10311_v20 = vmul.f32 %v10295_v37, %v10295_v37 }
 0x70c   : > { %v11712_v62 = vpop.f32.mrf.mxu0 }
 0x70d   : > { %v10296_v42 = vmax.f32 %v10280_v39, 0.0  ;;  %v11713_v12 = vadd.f32 %v11712_v62, %v11711_v61  ;;  %11766 = vmatprep.mubr.bf16.mxu1 %v10514_v63  ;;  %10336 = vadd.xlane.f32.xlu1 %v10311_v20 }
 0x70e   : > { %v11714_v9 = vpop.f32.mrf.mxu0 }
 0x70f   : > { %v10281_v30 = vmul.f32 %v11713_v12, %v10024_v17  ;;  %v10312_v48 = vmul.f32 %v10296_v42, %v10296_v42 }
 0x710   : > { %v11715_v50 = vpop.f32.mrf.mxu0 }
 0x711   : > { %v10297_v46 = vmax.f32 %v10281_v30, 0.0  ;;  %v11716_v51 = vadd.f32 %v11715_v50, %v11714_v9  ;;  %10338 = vadd.xlane.f32.xlu0 %v10312_v48 }
 0x712   : > { %v11717_v40 = vpop.f32.mrf.mxu0 }
 0x713   : > { %v10515_v22 = vpack.c.bf16 %v10297_v46, %v10296_v42  ;;  %v10282_v58 = vmul.f32 %v11716_v51, %v10025_v19  ;;  %v10313_v47 = vmul.f32 %v10297_v46, %v10297_v46 }
 0x714   : > { %v11718_v38 = vpop.f32.mrf.mxu0 }
 0x715   : > { %v10298_v55 = vmax.f32 %v10282_v58, 0.0  ;;  %v11719_v23 = vadd.f32 %v11718_v38, %v11717_v40  ;;  %11767 = vmatmul.mubr.bf16.gmra.mxu1 %v10515_v22  ;;  %10340 = vadd.xlane.f32.xlu1 %v10313_v47 }
 0x716   : > { %v11720_v33 = vpop.f32.mrf.mxu0 }
 0x717   : > { %v10283_v35 = vmul.f32 %v11719_v23, %v10026_v43  ;;  %v10314_v29 = vmul.f32 %v10298_v55, %v10298_v55 }
 0x718   : > { %v11721_v28 = vpop.f32.mrf.mxu0 }
 0x719   : > { %v10299_v45 = vmax.f32 %v10283_v35, 0.0  ;;  %v11722_v0 = vadd.f32 %v11721_v28, %v11720_v33  ;;  %10342 = vadd.xlane.f32.xlu0 %v10314_v29 }
 0x71a   : > { %v11723_v34 = vpop.f32.mrf.mxu0 }
 0x71b   : > { %v10284_v52 = vmul.f32 %v11722_v0, %v10027_v27  ;;  %v10516_v18 = vpack.c.bf16 %v10299_v45, %v10298_v55  ;;  %v10315_v14 = vmul.f32 %v10299_v45, %v10299_v45 }
 0x71c   : > { %v11724_v15 = vpop.f32.mrf.mxu0 }
 0x71d   : > { %v10300_v44 = vmax.f32 %v10284_v52, 0.0  ;;  %v11725_v59 = vadd.f32 %v11724_v15, %v11723_v34  ;;  %11770 = vmatprep.mubr.bf16.mxu1 %v10516_v18  ;;  %10344 = vadd.xlane.f32.xlu1 %v10315_v14 }
 0x71f   : > { %v10285_v54 = vmul.f32 %v11725_v59, %v10028_v60  ;;  %v10316_v2 = vmul.f32 %v10300_v44, %v10300_v44 }
 0x721   : > { %v10301_v6 = vmax.f32 %v10285_v54, 0.0  ;;  %10346 = vadd.xlane.f32.xlu0 %v10316_v2 }
 0x723   : > { %v10517_v5 = vpack.c.bf16 %v10301_v6, %v10300_v44  ;;  %v10317_v41 = vmul.f32 %v10301_v6, %v10301_v6 }
 0x725   : > { %11771 = vmatmul.mubr.bf16.gmra.mxu1 %v10517_v5  ;;  %10348 = vadd.xlane.f32.xlu1 %v10317_v41 }
 0x772   : > { %v10319_v26 = vpop.xlane.xlu0 %10318 }
 0x773   : > { %vm10352_vm1 = vcmp.eq.f32.partialorder %v10319_v26, inf  ;;  %v10355_v63 = vand.u32 2147483648, %v10319_v26  ;;  %vm10354_vm3 = vcmp.eq.f32.partialorder %v10319_v26, 0.0 }
 0x776   : > { %v10321_v10 = vpop.xlane.xlu1 %10320 }
 0x777   : > { %vm10359_vm5 = vcmp.eq.f32.partialorder %v10321_v10, inf  ;;  %v10362_v30 = vand.u32 2147483648, %v10321_v10  ;;  %vm10361_vm7 = vcmp.eq.f32.partialorder %v10321_v10, 0.0 }
 0x77a   : > { %v10323_v3 = vpop.xlane.xlu0 %10322 }
 0x77b   : > { %12647 = vrsqrt.f32 %v10323_v3  ;;  %vm10366_vm0 = vcmp.eq.f32.partialorder %v10323_v3, inf  ;;  %v10369_v61 = vand.u32 2147483648, %v10323_v3  ;;  %vm10368_vm2 = vcmp.eq.f32.partialorder %v10323_v3, 0.0 }
 0x77c   : > { %12649 = vrsqrt.f32 %v10319_v26 }
 0x77e   : > { %v10325_v13 = vpop.xlane.xlu1 %10324 }
 0x77f   : > { %12651 = vrsqrt.f32 %v10325_v13  ;;  %vm10373_vm4 = vcmp.eq.f32.partialorder %v10325_v13, inf  ;;  %v10376_v12 = vand.u32 2147483648, %v10325_v13  ;;  %vm10375_vm6 = vcmp.eq.f32.partialorder %v10325_v13, 0.0 }
 0x780   : > { %12653 = vrsqrt.f32 %v10321_v10 }
 0x782   : > { %v16960_v24 = vpop.xlane.xlu0 %10326 }
 0x783   : > { %vm10380_vm9 = vcmp.eq.f32.partialorder %v16960_v24, inf  ;;  %v10383_v45 = vand.u32 2147483648, %v16960_v24  ;;  %vm10382_vm11 = vcmp.eq.f32.partialorder %v16960_v24, 0.0 }
 0x786   : > { %v16962_v56 = vpop.xlane.xlu1 %10328 }
 0x787   : > { %vm10387_vm13 = vcmp.eq.f32.partialorder %v16962_v56, inf  ;;  %v10390_v15 = vand.u32 2147483648, %v16962_v56  ;;  %vm10389_vm15 = vcmp.eq.f32.partialorder %v16962_v56, 0.0 }
 0x788   : > { %v12648_v4 = vpop.eup %12647 }
 0x789   : > { %v12650_v21 = vpop.eup %12649  ;;  %v10365_v49 = vmul.f32 %v12648_v4, %v10323_v3 }
 0x78a   : > { %v16964_v8 = vpop.xlane.xlu0 %10330  ;;  %v10351_v11 = vmul.f32 %v12650_v21, %v10319_v26 }
 0x78b   : > { %12655 = vrsqrt.f32 %v16964_v8  ;;  %v10367_v16 = vsel %vm10366_vm0, %v10323_v3, %v10365_v49  ;;  %vm10394_vm8 = vcmp.eq.f32.partialorder %v16964_v8, inf  ;;  %v10397_v29 = vand.u32 2147483648, %v16964_v8 }
 0x78c   : > { %v12652_v7 = vpop.eup %12651  ;;  %12657 = vrsqrt.f32 %v16960_v24  ;;  %v10353_v39 = vsel %vm10352_vm1, %v10319_v26, %v10351_v11  ;;  %v10370_v20 = vsel %vm10368_vm2, %v10369_v61, %v10367_v16  ;;  %vm10396_vm10 = vcmp.eq.f32.partialorder %v16964_v8, 0.0 }
 0x78d   : > { %v12654_v37 = vpop.eup %12653  ;;  %v10372_v36 = vmul.f32 %v12652_v7, %v10325_v13  ;;  %v10356_v62 = vsel %vm10354_vm3, %v10355_v63, %v10353_v39  ;;  %v10464_v9 = vadd.f32 1e-08, %v10370_v20 }
 0x78e   : > { %v16968_v57 = vpop.xlane.xlu1 %10332  ;;  %v10358_v25 = vmul.f32 %v12654_v37, %v10321_v10  ;;  %v10462_v48 = vadd.f32 1e-08, %v10356_v62 }
 0x78f   : > { %12659 = vrsqrt.f32 %v16968_v57  ;;  %v10374_v42 = vsel %vm10373_vm4, %v10325_v13, %v10372_v36  ;;  %vm10401_vm12 = vcmp.eq.f32.partialorder %v16968_v57, inf  ;;  %v10404_v52 = vand.u32 2147483648, %v16968_v57 }
 0x790   : > { %12661 = vrsqrt.f32 %v16962_v56  ;;  %v10360_v31 = vsel %vm10359_vm5, %v10321_v10, %v10358_v25  ;;  %v10377_v50 = vsel %vm10375_vm6, %v10376_v12, %v10374_v42  ;;  %vm10403_vm14 = vcmp.eq.f32.partialorder %v16968_v57, 0.0 }
 0x791   : > { %v10363_v46 = vsel %vm10361_vm7, %v10362_v30, %v10360_v31  ;;  %12663 = vrcp.f32 %v10464_v9  ;;  %v10465_v22 = vadd.f32 1e-08, %v10377_v50 }
 0x792   : > { %v16972_v17 = vpop.xlane.xlu0 %10334  ;;  %12665 = vrcp.f32 %v10462_v48  ;;  %v10463_v58 = vadd.f32 1e-08, %v10363_v46 }
 0x793   : > { %vm10408_vm2 = vcmp.eq.f32.partialorder %v16972_v17, inf  ;;  %v10411_v50 = vand.u32 2147483648, %v16972_v17  ;;  %vm10410_vm4 = vcmp.eq.f32.partialorder %v16972_v17, 0.0 }
 0x796   : > { %v16974_v51 = vpop.xlane.xlu1 %10336 }
 0x797   : > { %vm10415_vm5 = vcmp.eq.f32.partialorder %v16974_v51, inf  ;;  %vm10417_vm7 = vcmp.eq.f32.partialorder %v16974_v51, 0.0 }
 0x798   : > { %v12656_v19 = vpop.eup %12655 }
 0x799   : > { %v12658_v40 = vpop.eup %12657  ;;  %v10393_v47 = vmul.f32 %v12656_v19, %v16964_v8 }
 0x79a   : > { %v16976_v53 = vpop.xlane.xlu0 %10338  ;;  %v10379_v55 = vmul.f32 %v12658_v40, %v16960_v24 }
 0x79b   : > { %12667 = vrsqrt.f32 %v16976_v53  ;;  %v10395_v33 = vsel %vm10394_vm8, %v16964_v8, %v10393_v47  ;;  %vm10422_vm0 = vcmp.eq.f32.partialorder %v16976_v53, inf  ;;  %vm10424_vm1 = vcmp.eq.f32.partialorder %v16976_v53, 0.0 }
 0x79c   : > { %v12660_v38 = vpop.eup %12659  ;;  %12669 = vrsqrt.f32 %v16972_v17  ;;  %v10381_v28 = vsel %vm10380_vm9, %v16960_v24, %v10379_v55  ;;  %v10398_v27 = vsel %vm10396_vm10, %v10397_v29, %v10395_v33  ;;  %v10425_v12 = vand.u32 2147483648, %v16976_v53 }
 0x79d   : > { %v12662_v23 = vpop.eup %12661  ;;  %12671 = vrcp.f32 %v10465_v22  ;;  %v10400_v1 = vmul.f32 %v12660_v38, %v16968_v57  ;;  %v10384_v0 = vsel %vm10382_vm11, %v10383_v45, %v10381_v28  ;;  %v10468_v14 = vadd.f32 1e-08, %v10398_v27 }
 0x79e   : > { %v16982_v43 = vpop.xlane.xlu1 %10340  ;;  %12673 = vrcp.f32 %v10463_v58  ;;  %v10386_v35 = vmul.f32 %v12662_v23, %v16962_v56  ;;  %v12664_v44 = vpop.eup %12663  ;;  %v10466_v60 = vadd.f32 1e-08, %v10384_v0  ;;  %v10418_v38 = vand.u32 2147483648, %v16974_v51 }
 0x79f   : > { %12675 = vrsqrt.f32 %v16982_v43  ;;  %v10402_v32 = vsel %vm10401_vm12, %v16968_v57, %v10400_v1  ;;  %v12666_v54 = vpop.eup %12665  ;;  %v10496_v10 = vmul.f32 5.0, %v12664_v44  ;;  %vm10429_vm3 = vcmp.eq.f32.partialorder %v16982_v43, inf }
 0x7a0   : > { %12677 = vrsqrt.f32 %v16974_v51  ;;  %v10388_v18 = vsel %vm10387_vm13, %v16962_v56, %v10386_v35  ;;  %v10405_v59 = vsel %vm10403_vm14, %v10404_v52, %v10402_v32  ;;  %v10494_v49 = vmul.f32 5.0, %v12666_v54 }
 0x7a1   : > { %v10391_v2 = vsel %vm10389_vm15, %v10390_v15, %v10388_v18  ;;  %12679 = vrcp.f32 %v10468_v14  ;;  %v10469_v3 = vadd.f32 1e-08, %v10405_v59  ;;  %vm10431_vm6 = vcmp.eq.f32.partialorder %v16982_v43, 0.0 }
 0x7a2   : > { %v16999_v34 = vpop.xlane.xlu0 %10342  ;;  %12681 = vrcp.f32 %v10466_v60  ;;  %v10467_v4 = vadd.f32 1e-08, %v10391_v2 }
 0x7a3   : > { %vm10436_vm9 = vcmp.eq.f32.partialorder %v16999_v34, inf  ;;  %vm10438_vm12 = vcmp.eq.f32.partialorder %v16999_v34, 0.0 }
 0x7a6   : > { %v17007_v5 = vpop.xlane.xlu1 %10344 }
 0x7a7   : > { %vm10443_vm13 = vcmp.eq.f32.partialorder %v17007_v5, inf  ;;  %vm10445_vm15 = vcmp.eq.f32.partialorder %v17007_v5, 0.0 }
 0x7a8   : > { %v12668_v6 = vpop.eup %12667 }
 0x7a9   : > { %v12670_v26 = vpop.eup %12669  ;;  %v10421_v21 = vmul.f32 %v12668_v6, %v16976_v53 }
 0x7aa   : > { %v17009_v41 = vpop.xlane.xlu0 %10346  ;;  %v12672_v13 = vpop.eup %12671  ;;  %v10407_v37 = vmul.f32 %v12670_v26, %v16972_v17 }
 0x7ab   : > { %v12674_v8 = vpop.eup %12673  ;;  %12683 = vrsqrt.f32 %v17009_v41  ;;  %v10497_v16 = vmul.f32 5.0, %v12672_v13  ;;  %v10423_v62 = vsel %vm10422_vm0, %v16976_v53, %v10421_v21  ;;  %v10432_v53 = vand.u32 2147483648, %v16982_v43 }
 0x7ac   : > { %v12676_v7 = vpop.eup %12675  ;;  %12685 = vrsqrt.f32 %v16999_v34  ;;  %v10495_v39 = vmul.f32 5.0, %v12674_v8  ;;  %v10409_v30 = vsel %vm10408_vm2, %v16972_v17, %v10407_v37  ;;  %v10426_v48 = vsel %vm10424_vm1, %v10425_v12, %v10423_v62 }
 0x7ad   : > { %12687 = vrcp.f32 %v10469_v3  ;;  %v12678_v25 = vpop.eup %12677  ;;  %v10428_v63 = vmul.f32 %v12676_v7, %v16982_v43  ;;  %v10412_v19 = vsel %vm10410_vm4, %v10411_v50, %v10409_v30  ;;  %v10472_v40 = vadd.f32 1e-08, %v10426_v48 }
 0x7ae   : > { %v17014_v11 = vpop.xlane.xlu1 %10348  ;;  %12689 = vrcp.f32 %v10467_v4  ;;  %v10414_v31 = vmul.f32 %v12678_v25, %v16974_v51  ;;  %v12680_v58 = vpop.eup %12679  ;;  %v10470_v23 = vadd.f32 1e-08, %v10412_v19  ;;  %vm10450_vm8 = vcmp.eq.f32.partialorder %v17009_v41, inf }
 0x7af   : > { %12691 = vrsqrt.f32 %v17014_v11  ;;  %v10430_v46 = vsel %vm10429_vm3, %v16982_v43, %v10428_v63  ;;  %v12682_v55 = vpop.eup %12681  ;;  %v10500_v35 = vmul.f32 5.0, %v12680_v58  ;;  %vm10452_vm10 = vcmp.eq.f32.partialorder %v17009_v41, 0.0 }
 0x7b0   : > { %12693 = vrsqrt.f32 %v17007_v5  ;;  %v10416_v22 = vsel %vm10415_vm5, %v16974_v51, %v10414_v31  ;;  %v10433_v47 = vsel %vm10431_vm6, %v10432_v53, %v10430_v46  ;;  %v10498_v43 = vmul.f32 5.0, %v12682_v55 }
 0x7b1   : > { %v10419_v1 = vsel %vm10417_vm7, %v10418_v38, %v10416_v22  ;;  %12695 = vrcp.f32 %v10472_v40  ;;  %v10473_v29 = vadd.f32 1e-08, %v10433_v47  ;;  %vm10457_vm11 = vcmp.eq.f32.partialorder %v17014_v11, inf }
 0x7b2   : > { %12697 = vrcp.f32 %v10470_v23  ;;  %v10471_v52 = vadd.f32 1e-08, %v10419_v1  ;;  %v10439_v21 = vand.u32 2147483648, %v16999_v34  ;;  %vm10459_vm14 = vcmp.eq.f32.partialorder %v17014_v11, 0.0 }
 0x7b3   : > { %12699 = vrcp.f32 %v10473_v29 }
 0x7b4   : > { %12701 = vrcp.f32 %v10471_v52 }
 0x7b5   : > { %v11760_v24 = vpop.f32.mrf.mxu1 }
 0x7b6   : > { %v10681_v56 = vmul.f32 %v11760_v24, %v10496_v10  ;;  %v10453_v10 = vand.u32 2147483648, %v17009_v41 }
 0x7b7   : > { %v10616_v57 = vpop.f32.mrf.mxu1 }
 0x7b8   : > { %10697 = vst [vmem:[%s17017_s11 + $0x10] sm:$0xff] %v10681_v56  ;;  %v10679_v36 = vmul.f32 %v10616_v57, %v10494_v49  ;;  %v12684_v17 = vpop.eup %12683  ;;  %v10460_v49 = vand.u32 2147483648, %v17014_v11 }
 0x7b9   : > { %v11761_v61 = vpop.f32.mrf.mxu1  ;;  %v12686_v33 = vpop.eup %12685  ;;  %v10449_v0 = vmul.f32 %v12684_v17, %v17009_v41 }
 0x7ba   : > { %10695 = vst [vmem:[%s17017_s11] sm:$0xff] %v10679_v36  ;;  %v10682_v20 = vmul.f32 %v11761_v61, %v10497_v16  ;;  %v12688_v28 = vpop.eup %12687  ;;  %v10435_v51 = vmul.f32 %v12686_v33, %v16999_v34  ;;  %v10446_v16 = vand.u32 2147483648, %v17007_v5 }
 0x7bb   : > { %v10619_v42 = vpop.f32.mrf.mxu1  ;;  %v12690_v27 = vpop.eup %12689  ;;  %v10501_v44 = vmul.f32 5.0, %v12688_v28  ;;  %v10451_v2 = vsel %vm10450_vm8, %v17009_v41, %v10449_v0 }
 0x7bc   : > { %10698 = vst [vmem:[%s17017_s11 + $0x18] sm:$0xff] %v10682_v20  ;;  %v10680_v9 = vmul.f32 %v10619_v42, %v10495_v39  ;;  %v12692_v18 = vpop.eup %12691  ;;  %v10499_v54 = vmul.f32 5.0, %v12690_v27  ;;  %v10437_v4 = vsel %vm10436_vm9, %v16999_v34, %v10435_v51  ;;  %v10454_v8 = vsel %vm10452_vm10, %v10453_v10, %v10451_v2 }
 0x7bd   : > { %v12694_v60 = vpop.eup %12693  ;;  %v10456_v6 = vmul.f32 %v12692_v18, %v17014_v11  ;;  %v10440_v7 = vsel %vm10438_vm12, %v10439_v21, %v10437_v4  ;;  %v10476_v41 = vadd.f32 1e-08, %v10454_v8 }
 0x7be   : > { %10696 = vst [vmem:[%s17017_s11 + $0x8] sm:$0xff] %v10680_v9  ;;  %v10442_v13 = vmul.f32 %v12694_v60, %v17007_v5  ;;  %v12696_v37 = vpop.eup %12695  ;;  %v10474_v25 = vadd.f32 1e-08, %v10440_v7 }
 0x7bf   : > { %v10458_v56 = vsel %vm10457_vm11, %v17014_v11, %v10456_v6  ;;  %v12698_v61 = vpop.eup %12697  ;;  %v10504_v39 = vmul.f32 5.0, %v12696_v37  ;;  %12703 = vrcp.f32 %v10476_v41 }
 0x7c0   : > { %v10444_v57 = vsel %vm10443_vm13, %v17007_v5, %v10442_v13  ;;  %v10461_v36 = vsel %vm10459_vm14, %v10460_v49, %v10458_v56  ;;  %v12700_v20 = vpop.eup %12699  ;;  %v10502_v42 = vmul.f32 5.0, %v12698_v61  ;;  %12705 = vrcp.f32 %v10474_v25 }
 0x7c1   : > { %v10447_v34 = vsel %vm10445_vm15, %v10446_v16, %v10444_v57  ;;  %v10477_v63 = vadd.f32 1e-08, %v10461_v36  ;;  %v12702_v31 = vpop.eup %12701  ;;  %v10505_v48 = vmul.f32 5.0, %v12700_v20 }
 0x7c2   : > { %v10475_v12 = vadd.f32 1e-08, %v10447_v34  ;;  %v10503_v46 = vmul.f32 5.0, %v12702_v31 }
 0x7c3   : > { %12707 = vrcp.f32 %v10477_v63 }
 0x7c4   : > { %12709 = vrcp.f32 %v10475_v12 }
 0x7c5   : > { %v11764_v45 = vpop.f32.mrf.mxu1 }
 0x7c6   : > { %v10685_v32 = vmul.f32 %v11764_v45, %v10500_v35 }
 0x7c7   : > { %v10632_v14 = vpop.f32.mrf.mxu1 }
 0x7c8   : > { %10701 = vst [vmem:[%s17017_s11 + $0x30] sm:$0xff] %v10685_v32  ;;  %v10683_v15 = vmul.f32 %v10632_v14, %v10498_v43 }
 0x7c9   : > { %v11765_v59 = vpop.f32.mrf.mxu1 }
 0x7ca   : > { %10699 = vst [vmem:[%s17017_s11 + $0x20] sm:$0xff] %v10683_v15  ;;  %v10686_v26 = vmul.f32 %v11765_v59, %v10501_v44 }
 0x7cb   : > { %v10635_v3 = vpop.f32.mrf.mxu1 }
 0x7cc   : > { %10702 = vst [vmem:[%s17017_s11 + $0x38] sm:$0xff] %v10686_v26  ;;  %v10684_v24 = vmul.f32 %v10635_v3, %v10499_v54  ;;  %v12704_v40 = vpop.eup %12703 }
 0x7cd   : > { %v12706_v22 = vpop.eup %12705  ;;  %v10508_v58 = vmul.f32 5.0, %v12704_v40 }
 0x7ce   : > { %10700 = vst [vmem:[%s17017_s11 + $0x28] sm:$0xff] %v10684_v24  ;;  %v10506_v23 = vmul.f32 5.0, %v12706_v22 }
 0x7d0   : > { %v12708_v47 = vpop.eup %12707 }
 0x7d1   : > { %v12710_v17 = vpop.eup %12709  ;;  %v10509_v35 = vmul.f32 5.0, %v12708_v47 }
 0x7d2   : > { %v10507_v45 = vmul.f32 5.0, %v12710_v17 }
 0x7d5   : > { %v11768_v62 = vpop.f32.mrf.mxu1 }
 0x7d6   : > { %v10689_v11 = vmul.f32 %v11768_v62, %v10504_v39 }
 0x7d7   : > { %v10648_v9 = vpop.f32.mrf.mxu1 }
 0x7d8   : > { %10705 = vst [vmem:[%s17017_s11 + $0x50] sm:$0xff] %v10689_v11  ;;  %v10687_v30 = vmul.f32 %v10648_v9, %v10502_v42 }
 0x7d9   : > { %v11769_v5 = vpop.f32.mrf.mxu1 }
 0x7da   : > { %10703 = vst [vmem:[%s17017_s11 + $0x40] sm:$0xff] %v10687_v30  ;;  %v10690_v50 = vmul.f32 %v11769_v5, %v10505_v48 }
 0x7db   : > { %v10651_v19 = vpop.f32.mrf.mxu1 }
 0x7dc   : > { %10706 = vst [vmem:[%s17017_s11 + $0x58] sm:$0xff] %v10690_v50  ;;  %v10688_v53 = vmul.f32 %v10651_v19, %v10503_v46 }
 0x7de   : > { %10704 = vst [vmem:[%s17017_s11 + $0x48] sm:$0xff] %v10688_v53 }
 0x7e5   : > { %v11772_v38 = vpop.f32.mrf.mxu1 }
 0x7e6   : > { %v10693_v55 = vmul.f32 %v11772_v38, %v10508_v58 }
 0x7e7   : > { %v10664_v1 = vpop.f32.mrf.mxu1 }
 0x7e8   : > { %10709 = vst [vmem:[%s17017_s11 + $0x70] sm:$0xff] %v10693_v55  ;;  %v10691_v33 = vmul.f32 %v10664_v1, %v10506_v23 }
 0x7e9   : > { %v11773_v29 = vpop.f32.mrf.mxu1 }
 0x7ea   : > { %10707 = vst [vmem:[%s17017_s11 + $0x60] sm:$0xff] %v10691_v33  ;;  %v10694_v28 = vmul.f32 %v11773_v29, %v10509_v35 }
 0x7eb   : > { %v10667_v43 = vpop.f32.mrf.mxu1 }
 0x7ec   : > { %10710 = vst [vmem:[%s17017_s11 + $0x78] sm:$0xff] %v10694_v28  ;;  %v10692_v27 = vmul.f32 %v10667_v43, %v10507_v45 }
 0x7ee   : > { %10708 = vst [vmem:[%s17017_s11 + $0x68] sm:$0xff] %v10692_v27 }
 0x7ef   : > { %12882 = shalt.err (!%p12879_p3)
}
 0x7f0   : > { %s12883_s9 = scalar_lea.hbm %s17078_s14, 2048  ;;  %s12887_s28 = scalar_lea.hbm %s17131_s6, 4096 }
 0x7f1   : > { %p12884_p4 = scmp.ne.s32.totalorder %s17078_s14, %s12883_s9  ;;  %p12888_p2 = scmp.lt.s32.totalorder %s17078_s14, %s17131_s6 }
 0x7f2   : > { %p12889_p5 = scmp.lt.s32.totalorder %s12887_s28, %s12883_s9 }
 0x7f3   : > { %p12885_p12 = pnand %p12884_p4, %p18318_p11 }
 0x7f4   : > { %p12890_p8 = por %p12889_p5, %p12888_p2 }
 0x7f5   : > { %p12886_p6 = pneg %p12885_p12 }
 0x7f7   : > { %p12891_p10 = pnand %p12890_p8, %p12886_p6 }
 0x7f9   : > { %12894 = shalt.err (!%p12891_p10)
}
 0x7fa   : > { %s12965_s20 = smov 128   ;;  %s12966_s25 = smov 8  }
 0x7fb   : > { %11799 = dma.vmem_to_hbm [thread:$0]  (%p18318_p11), %s17080_s18, 2048, %s17078_s14, %s10712_s27, %s12965_s20, %s12965_s20, %s12966_s25  }
 0x7fc PF: > { %s10740_s19 = sand.u32 1, %s12933_s21   ;;  %p18319_p13 = scmp.ne.s32.totalorder %s17439_s13, 0 }
 0x7fd   : > { %p18320_p0 = scmp.ge.s32.totalorder %s12945_s24, 2  ;;  %s10741_s26 = scalar_lea.sflag [#allocation4], %s10740_s19 }
 0x7ff   : > { %p11822_p7 = pnand %p18320_p0, %p18319_p13 }
 0x801   : > { %p11823_p9 = pneg %p11822_p7 }
 0x803   : > { %12928 = dma.done.wait (%p11823_p9), %s10741_s26, 2048  }
 0x804   : > { %12930 = vsyncadd (%p11823_p9), %s10741_s26, 4294965248  ;;  %p22_p1 = scmp.ge.s32.totalorder %s13094_s7, 4   ;;  %s18321_s21 = smov %s12937_s22 }
 0x805   : > { %s18322_s22 = smov %s12941_s23  ;;  %s18323_s23 = smov %s13106_s8 }
 0x806   : > { %s18324_s24 = smov %s13094_s7  ;;  %24 = sbr.rel (!%p22_p1) target bundleno = 8 (0x8), region = 109 }
 0x80b   :  { %10746 = vsyncpa [#allocation3], 1 }
 0x80c   :  { %10748 = vsyncpa [#allocation3 + $0x1], 1 }
 0x80d   :  { %10749 = vsyncpa [#allocation6], 1 }
 0x80e   :  { %10750 = vsyncpa [#allocation9], 1 }
 0x80f   :  { %10751 = vsyncpa [#allocation12], 1 }
 0x810   :  { %10752 = vsyncpa [#allocation4], 1 }
 0x811   :  { %10754 = vsyncpa [#allocation4 + $0x1], 1 }

</bundles_post_ra>
